<compile_context>
chip_gen: v7x
topology: tpu7x:2x2x1
jax: 0.10.0
libtpu: 0.0.40
codegen_flags: <defaults>
</compile_context>

<pallas_src>
import math

import jax
import jax.numpy as jnp
from jax.experimental import pallas as pl
from jax.experimental.pallas import tpu as pltpu

# ----------------------------- configuration (small, consistent with module) --
MODEL_CHANNELS = 64     # model_channels (512 in the original)
NUM_LAYERS = 2          # num_layers (8 in the original)
IN_CHANNELS = 16        # in_channels (100 in the original)
OUT_CHANNELS = 32       # out_channels (200 in the original)
NUM_HEADS = 4           # num_heads (16 in the original)
HEAD_DIM = MODEL_CHANNELS // NUM_HEADS
NUM_GROUPS = 32         # normalization() == GroupNorm(32, C)
GN_EPS = 1e-5
N_BATCH = 2
SEQ = 16

NUM_RES = 3 + NUM_LAYERS + 3      # cti(3) + DiffusionLayers + res tail(3)
NUM_ATT = 3 + NUM_LAYERS          # cti(3) + DiffusionLayers


# ----------------------------- the fused Pallas kernel ------------------------
def _diffusion_tts_kernel(
        # per-batch activations / modulation
        x_ref, cond_ref, mod_ref,
        # stacked ResBlock params
        rb_vec_ref, rb_w1_ref, rb_w2_ref,
        # stacked AttentionBlock params
        at_vec_ref, at_wqkv_ref, at_bqkv_ref, at_wproj_ref, at_bias_ref,
        # stem / head params
        inp_w_ref, integ_w_ref, out_w_ref, misc_vec_ref, out_b_ref,
        # constants
        gmat_ref,
        # output
        o_ref):
    gmat = gmat_ref[...]                       # (C, C), group mask / (group_size * T)

    def silu(h):
        return h * jax.nn.sigmoid(h)

    def group_norm(h, gamma, beta):
        # reduce over T first (lane reduction), then ONE tiny (C,C)x(C,2) group matmul
        sx = jnp.sum(h, axis=1, keepdims=True)                  # (C, 1)
        sx2 = jnp.sum(h * h, axis=1, keepdims=True)             # (C, 1)
        mom = jnp.dot(gmat, jnp.concatenate([sx, sx2], axis=1),
                      preferred_element_type=jnp.float32)       # (C, 2)
        mean = mom[:, 0:1]
        var = mom[:, 1:2] - mean * mean
        return (h - mean) * jax.lax.rsqrt(var + GN_EPS) * gamma + beta

    def conv1x1(h, w_bf16, b):
        return jnp.dot(w_bf16, h.astype(jnp.bfloat16),
                       preferred_element_type=jnp.float32) + b

    def conv3(h, w_im2col_bf16, b):
        # +-1 time shifts via pltpu.roll (XLU) + boundary mask; im2col operand built in bf16.
        tlen = h.shape[1]
        tpos = jax.lax.broadcasted_iota(jnp.int32, h.shape, 1)
        hprev = jnp.where(tpos == 0, 0.0, pltpu.roll(h, 1, axis=1))         # h[:, t-1]
        hnext = jnp.where(tpos == tlen - 1, 0.0,
                          pltpu.roll(h, tlen - 1, axis=1))                  # h[:, t+1]
        him = jnp.concatenate([hprev.astype(jnp.bfloat16),
                               h.astype(jnp.bfloat16),
                               hnext.astype(jnp.bfloat16)], axis=0)         # (3Cin, T) bf16
        return jnp.dot(w_im2col_bf16, him, preferred_element_type=jnp.float32) + b

    def resblock(h, r):
        v = rb_vec_ref[r]                                      # (C, 6)
        m = mod_ref[r]                                         # (C, 2): [scale, shift]
        y = silu(group_norm(h, v[:, 0:1], v[:, 1:2]))
        y = conv1x1(y, rb_w1_ref[r], v[:, 2:3])
        y = group_norm(y, v[:, 3:4], v[:, 4:5])
        y = y * (1.0 + m[:, 0:1]) + m[:, 1:2]
        y = silu(y)
        y = conv3(y, rb_w2_ref[r], v[:, 5:6])
        return y + h

    def attention(h, a):
        d = HEAD_DIM
        tlen = h.shape[1]
        v = at_vec_ref[a]                                      # (C, 3)
        hn = group_norm(h, v[:, 0:1], v[:, 1:2])
        # q rows of at_wqkv / at_bqkv are pre-scaled by 1/sqrt(d) at pack time.
        qkv = conv1x1(hn, at_wqkv_ref[a], at_bqkv_ref[a]).astype(jnp.bfloat16)  # (3C, T)
        # head-major channel layout [h0:(q,k,v), h1:(q,k,v), ...] (QKVAttentionLegacy)
        qkv = qkv.reshape(NUM_HEADS, 3, d, tlen)               # tile-aligned reshape
        q, k, vv = qkv[:, 0], qkv[:, 1], qkv[:, 2]             # each (H, d, T)
        # batched over heads: (H, d, T) x (H, d, T) -> (H, Tq, Tk)
        s = jax.lax.dot_general(q, k, (((1,), (1,)), ((0,), (0,))),
                                preferred_element_type=jnp.float32)
        s = s + at_bias_ref[a].astype(jnp.float32)
        s = s - jnp.max(s, axis=-1, keepdims=True)
        e = jnp.exp(s)
        p = e * pl.reciprocal(jnp.sum(e, axis=-1, keepdims=True), approx=True)
        # (H, d, Tk) x (H, Tq, Tk) -> (H, d, Tq)
        ao = jax.lax.dot_general(vv, p.astype(jnp.bfloat16),
                                 (((2,), (2,)), ((0,), (0,))),
                                 preferred_element_type=jnp.float32)
        hh = ao.reshape(MODEL_CHANNELS, tlen)                  # head merge (free reshape)
        return conv1x1(hh, at_wproj_ref[a], v[:, 2:3]) + h

    def diff_layer(r, act):
        return attention(resblock(act, r), r)

    mv = misc_vec_ref[...]                                     # (C, 4)

    # conditioning_timestep_integrator: 3 DiffusionLayers on code_emb
    code = jax.lax.fori_loop(0, 3, diff_layer, cond_ref[0])

    # inp_block -> concat(channels) -> integrating_conv
    h = conv3(x_ref[0], inp_w_ref[...], mv[:, 0:1])
    h = jnp.concatenate([h, code], axis=0)
    h = conv1x1(h, integ_w_ref[...], mv[:, 1:2])

    # main DiffusionLayers + trailing ResBlocks (homogeneous -> fori_loop, dynamic layer index)
    h = jax.lax.fori_loop(3, 3 + NUM_LAYERS, diff_layer, h)
    h = jax.lax.fori_loop(3 + NUM_LAYERS, NUM_RES, lambda r, act: resblock(act, r), h)

    # out head: GroupNorm -> SiLU -> Conv1d(k=3)
    h = silu(group_norm(h, mv[:, 2:3], mv[:, 3:4]))
    o_ref[0] = conv3(h, out_w_ref[...], out_b_ref[...])


# ----------------------------- glue helpers -----------------------------------
def timestep_embedding(timesteps, dim, max_period=10000.0):
    half = dim // 2
    freqs = jnp.exp(-math.log(max_period) * jnp.arange(half, dtype=jnp.float32) / half)
    args = timesteps.astype(jnp.float32)[:, None] * freqs[None]
    return jnp.concatenate([jnp.cos(args), jnp.sin(args)], axis=-1)


def rel_pos_bias(emb_table, t, head_dim, num_buckets=32, max_distance=64):
    """RelativePositionBias (causal=False), already multiplied by sqrt(head_dim)."""
    q_pos = jnp.arange(t)
    k_pos = jnp.arange(t)
    n = -(k_pos[None, :] - q_pos[:, None])
    nb = num_buckets // 2
    ret = (n < 0).astype(jnp.int32) * nb
    n = jnp.abs(n)
    max_exact = nb // 2
    is_small = n < max_exact
    val_if_large = max_exact + (
        jnp.log(jnp.maximum(n, 1).astype(jnp.float32) / max_exact)
        / math.log(max_distance / max_exact) * (nb - max_exact)).astype(jnp.int32)
    val_if_large = jnp.minimum(val_if_large, nb - 1)
    bucket = ret + jnp.where(is_small, n, val_if_large)               # (t, t)
    values = emb_table[bucket]                                        # (t, t, H)
    return jnp.transpose(values, (2, 0, 1)) * (head_dim ** 0.5)       # (H, t, t)


def build_group_matrix(c, num_groups, t):
    gs = c // num_groups
    idx = jnp.arange(c) // gs
    return (idx[:, None] == idx[None, :]).astype(jnp.float32) / (gs * t)


# ----------------------------- forward (one pallas_call) ----------------------
def diffusion_tts_forward(pp, x, timesteps, precomputed_aligned_embeddings):
    n, cin, t = x.shape
    c = MODEL_CHANNELS
    r_cnt = pp['rb_vec'].shape[0]
    a_cnt = pp['at_vec'].shape[0]

    # --- plain-JAX glue (tiny) ---------------------------------------------
    temb = timestep_embedding(timesteps, c)
    h1 = temb @ pp['time1_w'].T + pp['time1_b']
    time_emb = jax.nn.silu(h1) @ pp['time2_w'].T + pp['time2_b']       # (N, C)

    se = jax.nn.silu(time_emb)
    eo = jnp.einsum('nc,rdc->nrd', se, pp['emb_w']) + pp['emb_b'][None]  # (N, R, 2C)
    mod = jnp.stack([eo[:, :, :c], eo[:, :, c:]], axis=-1)             # (N, R, C, 2)

    at_bias = jnp.stack([rel_pos_bias(pp['at_rel'][a], t, HEAD_DIM)
                         for a in range(a_cnt)], axis=0).astype(jnp.bfloat16)  # (A, H, T, T)

    gmat = build_group_matrix(c, NUM_GROUPS, t)

    out = pl.pallas_call(
        _diffusion_tts_kernel,
        out_shape=jax.ShapeDtypeStruct((n, OUT_CHANNELS, t), jnp.float32),
        grid=(n,),
        in_specs=[
            pl.BlockSpec((1, cin, t), lambda b: (b, 0, 0)),             # x
            pl.BlockSpec((1, c, t), lambda b: (b, 0, 0)),               # code_emb
            pl.BlockSpec((None, r_cnt, c, 2), lambda b: (b, 0, 0, 0)),  # per-res scale/shift
            pl.BlockSpec((r_cnt, c, 6), lambda b: (0, 0, 0)),           # rb_vec
            pl.BlockSpec((r_cnt, c, c), lambda b: (0, 0, 0)),           # rb_w1 (bf16)
            pl.BlockSpec((r_cnt, c, 3 * c), lambda b: (0, 0, 0)),       # rb_w2 (bf16)
            pl.BlockSpec((a_cnt, c, 3), lambda b: (0, 0, 0)),           # at_vec
            pl.BlockSpec((a_cnt, 3 * c, c), lambda b: (0, 0, 0)),       # at_wqkv (bf16)
            pl.BlockSpec((a_cnt, 3 * c, 1), lambda b: (0, 0, 0)),       # at_bqkv
            pl.BlockSpec((a_cnt, c, c), lambda b: (0, 0, 0)),           # at_wproj (bf16)
            pl.BlockSpec((a_cnt, NUM_HEADS, t, t), lambda b: (0, 0, 0, 0)),  # at_bias (bf16)
            pl.BlockSpec((c, 3 * cin), lambda b: (0, 0)),               # inp_w (bf16)
            pl.BlockSpec((c, 2 * c), lambda b: (0, 0)),                 # integ_w (bf16)
            pl.BlockSpec((OUT_CHANNELS, 3 * c), lambda b: (0, 0)),      # out_w (bf16)
            pl.BlockSpec((c, 4), lambda b: (0, 0)),                     # misc_vec
            pl.BlockSpec((OUT_CHANNELS, 1), lambda b: (0, 0)),          # out_b
            pl.BlockSpec((c, c), lambda b: (0, 0)),                     # gmat
        ],
        out_specs=pl.BlockSpec((1, OUT_CHANNELS, t), lambda b: (b, 0, 0)),
        compiler_params=pltpu.CompilerParams(
            dimension_semantics=("parallel",),
            # TODO(synk): at full scale raise to ~96-110MiB on v5e/v6e and keep <56MiB on v7x,
            # with Buffered(1)/per-layer streaming for the big weight slabs (see header).
            vmem_limit_bytes=32 * 1024 * 1024),
    )(x, precomputed_aligned_embeddings, mod,
      pp['rb_vec'], pp['rb_w1'], pp['rb_w2'],
      pp['at_vec'], pp['at_wqkv'], pp['at_bqkv'], pp['at_wproj'], at_bias,
      pp['inp_w'], pp['integ_w'], pp['out_w'], pp['misc_vec'], pp['out_b'],
      gmat)

    # extraneous_addition * 0 (keeps unconditioned_embedding "used", as in the module)
    return out + 0.0 * jnp.mean(pp['uncond_emb'])


# ----------------------------- deterministic parameter init -------------------
def init_gn(key, c):
    kg, kb = jax.random.split(key)
    return {'g': 1.0 + 0.05 * jax.random.normal(kg, (c, 1), jnp.float32),
            'b': 0.05 * jax.random.normal(kb, (c, 1), jnp.float32)}


def init_conv1x1(key, cout, cin):
    kw, kb = jax.random.split(key)
    return {'w': 0.05 * jax.random.normal(kw, (cout, cin), jnp.float32),
            'b': 0.05 * jax.random.normal(kb, (cout, 1), jnp.float32)}


def init_conv3(key, cout, cin):
    kw, kb = jax.random.split(key)
    return {'w': 0.05 * jax.random.normal(kw, (3, cout, cin), jnp.float32),
            'b': 0.05 * jax.random.normal(kb, (cout, 1), jnp.float32)}


def init_linear(key, cout, cin):
    kw, kb = jax.random.split(key)
    return {'w': 0.05 * jax.random.normal(kw, (cout, cin), jnp.float32),
            'b': 0.05 * jax.random.normal(kb, (1, cout), jnp.float32)}


def init_resblock(key, c):
    k = jax.random.split(key, 5)
    return {'gn1': init_gn(k[0], c),
            'conv1': init_conv1x1(k[1], c, c),
            'emb': init_linear(k[2], 2 * c, c),
            'gn2': init_gn(k[3], c),
            'conv2': init_conv3(k[4], c, c)}


def init_attn(key, c, h):
    k = jax.random.split(key, 4)
    return {'gn': init_gn(k[0], c),
            'qkv': init_conv1x1(k[1], 3 * c, c),
            'proj': init_conv1x1(k[2], c, c),      # zero_module in original; synthetic init here
            'rel': 0.02 * jax.random.normal(k[3], (32, h), jnp.float32)}


def init_diff_layer(key, c, h):
    k1, k2 = jax.random.split(key)
    return {'res': init_resblock(k1, c), 'attn': init_attn(k2, c, h)}


def init_params(key):
    c, h = MODEL_CHANNELS, NUM_HEADS
    keys = jax.random.split(key, 10)
    return {
        'inp': init_conv3(keys[0], c, IN_CHANNELS),
        'time1': init_linear(keys[1], c, c),
        'time2': init_linear(keys[2], c, c),
        'cti': [init_diff_layer(k, c, h) for k in jax.random.split(keys[3], 3)],
        'integ': init_conv1x1(keys[4], c, 2 * c),
        'layers': [init_diff_layer(k, c, h) for k in jax.random.split(keys[5], NUM_LAYERS)],
        'res_tail': [init_resblock(k, c) for k in jax.random.split(keys[6], 3)],
        'out_gn': init_gn(keys[7], c),
        'out_conv': init_conv3(keys[8], OUT_CHANNELS, c),
        'uncond_emb': jax.random.normal(keys[9], (1, c, 1), jnp.float32),
    }


# ----------------------------- weight packing (done once, outside jit) --------
def pack_params(params):
    res_list = ([lp['res'] for lp in params['cti']]
                + [lp['res'] for lp in params['layers']]
                + list(params['res_tail']))
    attn_list = ([lp['attn'] for lp in params['cti']]
                 + [lp['attn'] for lp in params['layers']])

    def im2col3(w):   # (3, Cout, Cin) tap-major -> (Cout, 3*Cin), taps = [t-1, t, t+1]
        return jnp.concatenate([w[0], w[1], w[2]], axis=1)

    rb_vec = jnp.stack([jnp.concatenate(
        [r['gn1']['g'], r['gn1']['b'], r['conv1']['b'],
         r['gn2']['g'], r['gn2']['b'], r['conv2']['b']], axis=1)
        for r in res_list], axis=0)                                       # (R, C, 6)
    rb_w1 = jnp.stack([r['conv1']['w'] for r in res_list]).astype(jnp.bfloat16)
    rb_w2 = jnp.stack([im2col3(r['conv2']['w']) for r in res_list]).astype(jnp.bfloat16)

    at_vec = jnp.stack([jnp.concatenate(
        [a['gn']['g'], a['gn']['b'], a['proj']['b']], axis=1)
        for a in attn_list], axis=0)                                      # (A, C, 3)

    # Fold the 1/sqrt(head_dim) softmax scale into the q rows of the qkv projection
    # (head-major layout: rows [h*3d, h*3d+d) are the q rows of head h).  Exact for d=16.
    row = jnp.arange(3 * MODEL_CHANNELS)
    q_rows = (row % (3 * HEAD_DIM)) < HEAD_DIM
    rs = jnp.where(q_rows, 1.0 / math.sqrt(HEAD_DIM), 1.0)[None, :, None]
    at_wqkv = (jnp.stack([a['qkv']['w'] for a in attn_list]) * rs).astype(jnp.bfloat16)
    at_bqkv = jnp.stack([a['qkv']['b'] for a in attn_list]) * rs          # (A, 3C, 1) f32
    at_wproj = jnp.stack([a['proj']['w'] for a in attn_list]).astype(jnp.bfloat16)
    at_rel = jnp.stack([a['rel'] for a in attn_list])                     # (A, 32, H)

    emb_w = jnp.stack([r['emb']['w'] for r in res_list])                  # (R, 2C, C)
    emb_b = jnp.stack([r['emb']['b'][0] for r in res_list])               # (R, 2C)

    misc_vec = jnp.concatenate([params['inp']['b'], params['integ']['b'],
                                params['out_gn']['g'], params['out_gn']['b']], axis=1)  # (C, 4)

    return dict(
        rb_vec=rb_vec, rb_w1=rb_w1, rb_w2=rb_w2,
        at_vec=at_vec, at_wqkv=at_wqkv, at_bqkv=at_bqkv, at_wproj=at_wproj,
        at_rel=at_rel, emb_w=emb_w, emb_b=emb_b,
        inp_w=im2col3(params['inp']['w']).astype(jnp.bfloat16),
        integ_w=params['integ']['w'].astype(jnp.bfloat16),
        out_w=im2col3(params['out_conv']['w']).astype(jnp.bfloat16),
        out_b=params['out_conv']['b'],
        misc_vec=misc_vec,
        time1_w=params['time1']['w'], time1_b=params['time1']['b'],
        time2_w=params['time2']['w'], time2_b=params['time2']['b'],
        uncond_emb=params['uncond_emb'],
    )


# ----------------------------- main --------------------------------------------
if __name__ == "__main__":
    root = jax.random.PRNGKey(0)
    kp, kx, kc = jax.random.split(root, 3)

    params = init_params(kp)
    packed = pack_params(params)

    x = jax.random.normal(kx, (N_BATCH, IN_CHANNELS, SEQ), jnp.float32)
    timesteps = jnp.array([3.0, 117.0], jnp.float32)
    precomputed_aligned_embeddings = jax.random.normal(
        kc, (N_BATCH, MODEL_CHANNELS, SEQ), jnp.float32)

    fwd = jax.jit(diffusion_tts_forward)
    out = jax.block_until_ready(fwd(packed, x, timesteps, precomputed_aligned_embeddings))

    assert out.shape == (N_BATCH, OUT_CHANNELS, SEQ), out.shape
    assert bool(jnp.all(jnp.isfinite(out)))
    print("KERNEL_OK")
</pallas_src>

<mosaic_0001>
module attributes {stable_mosaic.version = 11 : i64} {
  func.func @_diffusion_tts_kernel(%arg0: i32, %arg1: memref<1x16x16xf32, #tpu.memory_space<vmem>>, %arg2: memref<1x64x16xf32, #tpu.memory_space<vmem>>, %arg3: memref<1x8x64x2xf32, #tpu.memory_space<vmem>>, %arg4: memref<8x64x6xf32, #tpu.memory_space<vmem>>, %arg5: memref<8x64x64xbf16, #tpu.memory_space<vmem>>, %arg6: memref<8x64x192xbf16, #tpu.memory_space<vmem>>, %arg7: memref<5x64x3xf32, #tpu.memory_space<vmem>>, %arg8: memref<5x192x64xbf16, #tpu.memory_space<vmem>>, %arg9: memref<5x192x1xf32, #tpu.memory_space<vmem>>, %arg10: memref<5x64x64xbf16, #tpu.memory_space<vmem>>, %arg11: memref<5x4x16x16xbf16, #tpu.memory_space<vmem>>, %arg12: memref<64x48xbf16, #tpu.memory_space<vmem>>, %arg13: memref<64x128xbf16, #tpu.memory_space<vmem>>, %arg14: memref<32x192xbf16, #tpu.memory_space<vmem>>, %arg15: memref<64x4xf32, #tpu.memory_space<vmem>>, %arg16: memref<32x1xf32, #tpu.memory_space<vmem>>, %arg17: memref<64x64xf32, #tpu.memory_space<vmem>>, %arg18: memref<1x32x16xf32, #tpu.memory_space<vmem>>) attributes {dimension_semantics = [#tpu.dimension_semantics<parallel>], iteration_bounds = array<i64: 2>, scalar_prefetch = 0 : i64, scratch_operands = 0 : i64, tpu.core_type = #tpu.core_type<tc>, window_params = [{transform_indices = @transform_0, window_bounds = array<i64: 1, 16, 16>}, {transform_indices = @transform_1, window_bounds = array<i64: 1, 64, 16>}, {transform_indices = @transform_2, window_bounds = array<i64: 1, 8, 64, 2>}, {pipeline_mode = #tpu.pipeline_mode<synchronous>, transform_indices = @transform_3, window_bounds = array<i64: 8, 64, 6>}, {pipeline_mode = #tpu.pipeline_mode<synchronous>, transform_indices = @transform_4, window_bounds = array<i64: 8, 64, 64>}, {pipeline_mode = #tpu.pipeline_mode<synchronous>, transform_indices = @transform_5, window_bounds = array<i64: 8, 64, 192>}, {pipeline_mode = #tpu.pipeline_mode<synchronous>, transform_indices = @transform_6, window_bounds = array<i64: 5, 64, 3>}, {pipeline_mode = #tpu.pipeline_mode<synchronous>, transform_indices = @transform_7, window_bounds = array<i64: 5, 192, 64>}, {pipeline_mode = #tpu.pipeline_mode<synchronous>, transform_indices = @transform_8, window_bounds = array<i64: 5, 192, 1>}, {pipeline_mode = #tpu.pipeline_mode<synchronous>, transform_indices = @transform_9, window_bounds = array<i64: 5, 64, 64>}, {pipeline_mode = #tpu.pipeline_mode<synchronous>, transform_indices = @transform_10, window_bounds = array<i64: 5, 4, 16, 16>}, {pipeline_mode = #tpu.pipeline_mode<synchronous>, transform_indices = @transform_11, window_bounds = array<i64: 64, 48>}, {pipeline_mode = #tpu.pipeline_mode<synchronous>, transform_indices = @transform_12, window_bounds = array<i64: 64, 128>}, {pipeline_mode = #tpu.pipeline_mode<synchronous>, transform_indices = @transform_13, window_bounds = array<i64: 32, 192>}, {pipeline_mode = #tpu.pipeline_mode<synchronous>, transform_indices = @transform_14, window_bounds = array<i64: 64, 4>}, {pipeline_mode = #tpu.pipeline_mode<synchronous>, transform_indices = @transform_15, window_bounds = array<i64: 32, 1>}, {pipeline_mode = #tpu.pipeline_mode<synchronous>, transform_indices = @transform_16, window_bounds = array<i64: 64, 64>}, {transform_indices = @transform_17, window_bounds = array<i64: 1, 32, 16>}]} {
    %c0 = arith.constant 0 : index
    %c0_0 = arith.constant 0 : index
    %0 = vector.load %arg17[%c0, %c0_0] : memref<64x64xf32, #tpu.memory_space<vmem>>, vector<64x64xf32>
    %c0_1 = arith.constant 0 : index
    %c0_2 = arith.constant 0 : index
    %1 = vector.load %arg15[%c0_1, %c0_2] : memref<64x4xf32, #tpu.memory_space<vmem>>, vector<64x4xf32>
    %c0_3 = arith.constant 0 : index
    %c0_4 = arith.constant 0 : index
    %c0_5 = arith.constant 0 : index
    %2 = vector.load %arg2[%c0_3, %c0_4, %c0_5] : memref<1x64x16xf32, #tpu.memory_space<vmem>>, vector<1x64x16xf32>
    %3 = vector.shape_cast %2 : vector<1x64x16xf32> to vector<64x16xf32>
    %c0_i32 = arith.constant 0 : i32
    %c3_i32 = arith.constant 3 : i32
    %4 = arith.addi %c0_i32, %c3_i32 : i32
    %c1_i32 = arith.constant 1 : i32
    %5 = scf.for %arg19 = %c0_i32 to %4 step %c1_i32 iter_args(%arg20 = %3) -> (vector<64x16xf32>)  : i32 {
      %92 = arith.index_cast %arg19 : i32 to index
      %c0_45 = arith.constant 0 : index
      %c0_46 = arith.constant 0 : index
      %93 = vector.load %arg4[%92, %c0_45, %c0_46] : memref<8x64x6xf32, #tpu.memory_space<vmem>>, vector<1x64x6xf32>
      %94 = vector.shape_cast %93 : vector<1x64x6xf32> to vector<64x6xf32>
      %c0_47 = arith.constant 0 : index
      %95 = arith.index_cast %arg19 : i32 to index
      %c0_48 = arith.constant 0 : index
      %c0_49 = arith.constant 0 : index
      %96 = vector.load %arg3[%c0_47, %95, %c0_48, %c0_49] : memref<1x8x64x2xf32, #tpu.memory_space<vmem>>, vector<1x1x64x2xf32>
      %97 = vector.shape_cast %96 : vector<1x1x64x2xf32> to vector<64x2xf32>
      %98 = vector.extract_strided_slice %94 {offsets = [0, 0], sizes = [64, 1], strides = [1, 1]} : vector<64x6xf32> to vector<64x1xf32>
      %99 = vector.extract_strided_slice %94 {offsets = [0, 1], sizes = [64, 1], strides = [1, 1]} : vector<64x6xf32> to vector<64x1xf32>
      %cst_50 = arith.constant dense<0.000000e+00> : vector<64xf32>
      %100 = vector.multi_reduction <add>, %arg20, %cst_50 [1] : vector<64x16xf32> to vector<64xf32>
      %101 = vector.shape_cast %100 : vector<64xf32> to vector<64x1xf32>
      %102 = arith.mulf %arg20, %arg20 : vector<64x16xf32>
      %cst_51 = arith.constant dense<0.000000e+00> : vector<64xf32>
      %103 = vector.multi_reduction <add>, %102, %cst_51 [1] : vector<64x16xf32> to vector<64xf32>
      %104 = vector.shape_cast %103 : vector<64xf32> to vector<64x1xf32>
      %105 = tpu.concatenate %101, %104 in 1 : vector<64x1xf32>, vector<64x1xf32> -> vector<64x2xf32>
      %cst_52 = arith.constant dense<0.000000e+00> : vector<64x2xf32>
      %106 = tpu.matmul %0, %105, %cst_52 {dimension_numbers = #tpu.dot_dimension_numbers<[1], [0], [0], [1], [0, 0, 1, 1], [], []>} : vector<64x64xf32>, vector<64x2xf32>, vector<64x2xf32> -> vector<64x2xf32>
      %107 = vector.extract_strided_slice %106 {offsets = [0, 0], sizes = [64, 1], strides = [1, 1]} : vector<64x2xf32> to vector<64x1xf32>
      %108 = vector.extract_strided_slice %106 {offsets = [0, 1], sizes = [64, 1], strides = [1, 1]} : vector<64x2xf32> to vector<64x1xf32>
      %109 = arith.mulf %107, %107 : vector<64x1xf32>
      %110 = arith.subf %108, %109 : vector<64x1xf32>
      %111 = vector.broadcast %107 : vector<64x1xf32> to vector<64x16xf32>
      %112 = arith.subf %arg20, %111 : vector<64x16xf32>
      %cst_53 = arith.constant 9.99999974E-6 : f32
      %113 = vector.broadcast %cst_53 : f32 to vector<64x1xf32>
      %114 = arith.addf %110, %113 : vector<64x1xf32>
      %115 = math.rsqrt %114 : vector<64x1xf32>
      %116 = vector.broadcast %115 : vector<64x1xf32> to vector<64x16xf32>
      %117 = arith.mulf %112, %116 : vector<64x16xf32>
      %118 = vector.broadcast %98 : vector<64x1xf32> to vector<64x16xf32>
      %119 = arith.mulf %117, %118 : vector<64x16xf32>
      %120 = vector.broadcast %99 : vector<64x1xf32> to vector<64x16xf32>
      %121 = arith.addf %119, %120 : vector<64x16xf32>
      %122 = arith.negf %121 : vector<64x16xf32>
      %123 = math.exp %122 : vector<64x16xf32>
      %cst_54 = arith.constant 1.000000e+00 : f32
      %124 = vector.broadcast %cst_54 : f32 to vector<64x16xf32>
      %125 = arith.addf %124, %123 : vector<64x16xf32>
      %126 = arith.divf %124, %125 : vector<64x16xf32>
      %127 = arith.mulf %121, %126 : vector<64x16xf32>
      %128 = arith.index_cast %arg19 : i32 to index
      %c0_55 = arith.constant 0 : index
      %c0_56 = arith.constant 0 : index
      %129 = vector.load %arg5[%128, %c0_55, %c0_56] : memref<8x64x64xbf16, #tpu.memory_space<vmem>>, vector<1x64x64xbf16>
      %130 = vector.shape_cast %129 : vector<1x64x64xbf16> to vector<64x64xbf16>
      %131 = vector.extract_strided_slice %94 {offsets = [0, 2], sizes = [64, 1], strides = [1, 1]} : vector<64x6xf32> to vector<64x1xf32>
      %132 = arith.truncf %127 : vector<64x16xf32> to vector<64x16xbf16>
      %cst_57 = arith.constant dense<0.000000e+00> : vector<64x16xf32>
      %133 = tpu.matmul %130, %132, %cst_57 {dimension_numbers = #tpu.dot_dimension_numbers<[1], [0], [0], [1], [0, 0, 1, 1], [], []>} : vector<64x64xbf16>, vector<64x16xbf16>, vector<64x16xf32> -> vector<64x16xf32>
      %134 = vector.broadcast %131 : vector<64x1xf32> to vector<64x16xf32>
      %135 = arith.addf %133, %134 : vector<64x16xf32>
      %136 = vector.extract_strided_slice %94 {offsets = [0, 3], sizes = [64, 1], strides = [1, 1]} : vector<64x6xf32> to vector<64x1xf32>
      %137 = vector.extract_strided_slice %94 {offsets = [0, 4], sizes = [64, 1], strides = [1, 1]} : vector<64x6xf32> to vector<64x1xf32>
      %cst_58 = arith.constant dense<0.000000e+00> : vector<64xf32>
      %138 = vector.multi_reduction <add>, %135, %cst_58 [1] : vector<64x16xf32> to vector<64xf32>
      %139 = vector.shape_cast %138 : vector<64xf32> to vector<64x1xf32>
      %140 = arith.mulf %135, %135 : vector<64x16xf32>
      %cst_59 = arith.constant dense<0.000000e+00> : vector<64xf32>
      %141 = vector.multi_reduction <add>, %140, %cst_59 [1] : vector<64x16xf32> to vector<64xf32>
      %142 = vector.shape_cast %141 : vector<64xf32> to vector<64x1xf32>
      %143 = tpu.concatenate %139, %142 in 1 : vector<64x1xf32>, vector<64x1xf32> -> vector<64x2xf32>
      %cst_60 = arith.constant dense<0.000000e+00> : vector<64x2xf32>
      %144 = tpu.matmul %0, %143, %cst_60 {dimension_numbers = #tpu.dot_dimension_numbers<[1], [0], [0], [1], [0, 0, 1, 1], [], []>} : vector<64x64xf32>, vector<64x2xf32>, vector<64x2xf32> -> vector<64x2xf32>
      %145 = vector.extract_strided_slice %144 {offsets = [0, 0], sizes = [64, 1], strides = [1, 1]} : vector<64x2xf32> to vector<64x1xf32>
      %146 = vector.extract_strided_slice %144 {offsets = [0, 1], sizes = [64, 1], strides = [1, 1]} : vector<64x2xf32> to vector<64x1xf32>
      %147 = arith.mulf %145, %145 : vector<64x1xf32>
      %148 = arith.subf %146, %147 : vector<64x1xf32>
      %149 = vector.broadcast %145 : vector<64x1xf32> to vector<64x16xf32>
      %150 = arith.subf %135, %149 : vector<64x16xf32>
      %cst_61 = arith.constant 9.99999974E-6 : f32
      %151 = vector.broadcast %cst_61 : f32 to vector<64x1xf32>
      %152 = arith.addf %148, %151 : vector<64x1xf32>
      %153 = math.rsqrt %152 : vector<64x1xf32>
      %154 = vector.broadcast %153 : vector<64x1xf32> to vector<64x16xf32>
      %155 = arith.mulf %150, %154 : vector<64x16xf32>
      %156 = vector.broadcast %136 : vector<64x1xf32> to vector<64x16xf32>
      %157 = arith.mulf %155, %156 : vector<64x16xf32>
      %158 = vector.broadcast %137 : vector<64x1xf32> to vector<64x16xf32>
      %159 = arith.addf %157, %158 : vector<64x16xf32>
      %160 = vector.extract_strided_slice %97 {offsets = [0, 0], sizes = [64, 1], strides = [1, 1]} : vector<64x2xf32> to vector<64x1xf32>
      %cst_62 = arith.constant 1.000000e+00 : f32
      %161 = vector.broadcast %cst_62 : f32 to vector<64x1xf32>
      %162 = arith.addf %161, %160 : vector<64x1xf32>
      %163 = vector.broadcast %162 : vector<64x1xf32> to vector<64x16xf32>
      %164 = arith.mulf %159, %163 : vector<64x16xf32>
      %165 = vector.extract_strided_slice %97 {offsets = [0, 1], sizes = [64, 1], strides = [1, 1]} : vector<64x2xf32> to vector<64x1xf32>
      %166 = vector.broadcast %165 : vector<64x1xf32> to vector<64x16xf32>
      %167 = arith.addf %164, %166 : vector<64x16xf32>
      %168 = arith.negf %167 : vector<64x16xf32>
      %169 = math.exp %168 : vector<64x16xf32>
      %cst_63 = arith.constant 1.000000e+00 : f32
      %170 = vector.broadcast %cst_63 : f32 to vector<64x16xf32>
      %171 = arith.addf %170, %169 : vector<64x16xf32>
      %172 = arith.divf %170, %171 : vector<64x16xf32>
      %173 = arith.mulf %167, %172 : vector<64x16xf32>
      %174 = arith.index_cast %arg19 : i32 to index
      %c0_64 = arith.constant 0 : index
      %c0_65 = arith.constant 0 : index
      %175 = vector.load %arg6[%174, %c0_64, %c0_65] : memref<8x64x192xbf16, #tpu.memory_space<vmem>>, vector<1x64x192xbf16>
      %176 = vector.shape_cast %175 : vector<1x64x192xbf16> to vector<64x192xbf16>
      %177 = vector.extract_strided_slice %94 {offsets = [0, 5], sizes = [64, 1], strides = [1, 1]} : vector<64x6xf32> to vector<64x1xf32>
      %178 = tpu.iota {dimensions = array<i32: 1>} : vector<64x16xi32>
      %c0_i32_66 = arith.constant 0 : i32
      %179 = vector.broadcast %c0_i32_66 : i32 to vector<64x16xi32>
      %180 = arith.cmpi eq, %178, %179 : vector<64x16xi32>
      %c1_i32_67 = arith.constant 1 : i32
      %181 = tpu.dynamic_rotate %173 by %c1_i32_67 dim 1 : vector<64x16xf32>, i32 -> vector<64x16xf32>
      %cst_68 = arith.constant 0.000000e+00 : f32
      %182 = vector.broadcast %cst_68 : f32 to vector<64x16xf32>
      %183 = arith.select %180, %182, %181 : vector<64x16xi1>, vector<64x16xf32>
      %c15_i32_69 = arith.constant 15 : i32
      %184 = vector.broadcast %c15_i32_69 : i32 to vector<64x16xi32>
      %185 = arith.cmpi eq, %178, %184 : vector<64x16xi32>
      %c15_i32_70 = arith.constant 15 : i32
      %186 = tpu.dynamic_rotate %173 by %c15_i32_70 dim 1 : vector<64x16xf32>, i32 -> vector<64x16xf32>
      %cst_71 = arith.constant 0.000000e+00 : f32
      %187 = vector.broadcast %cst_71 : f32 to vector<64x16xf32>
      %188 = arith.select %185, %187, %186 : vector<64x16xi1>, vector<64x16xf32>
      %189 = arith.truncf %183 : vector<64x16xf32> to vector<64x16xbf16>
      %190 = arith.truncf %173 : vector<64x16xf32> to vector<64x16xbf16>
      %191 = arith.truncf %188 : vector<64x16xf32> to vector<64x16xbf16>
      %192 = tpu.concatenate %189, %190, %191 in 0 : vector<64x16xbf16>, vector<64x16xbf16>, vector<64x16xbf16> -> vector<192x16xbf16>
      %cst_72 = arith.constant dense<0.000000e+00> : vector<64x16xf32>
      %193 = tpu.matmul %176, %192, %cst_72 {dimension_numbers = #tpu.dot_dimension_numbers<[1], [0], [0], [1], [0, 0, 1, 1], [], []>} : vector<64x192xbf16>, vector<192x16xbf16>, vector<64x16xf32> -> vector<64x16xf32>
      %194 = vector.broadcast %177 : vector<64x1xf32> to vector<64x16xf32>
      %195 = arith.addf %193, %194 : vector<64x16xf32>
      %196 = arith.addf %195, %arg20 : vector<64x16xf32>
      %197 = arith.index_cast %arg19 : i32 to index
      %c0_73 = arith.constant 0 : index
      %c0_74 = arith.constant 0 : index
      %198 = vector.load %arg7[%197, %c0_73, %c0_74] : memref<5x64x3xf32, #tpu.memory_space<vmem>>, vector<1x64x3xf32>
      %199 = vector.shape_cast %198 : vector<1x64x3xf32> to vector<64x3xf32>
      %200 = vector.extract_strided_slice %199 {offsets = [0, 0], sizes = [64, 1], strides = [1, 1]} : vector<64x3xf32> to vector<64x1xf32>
      %201 = vector.extract_strided_slice %199 {offsets = [0, 1], sizes = [64, 1], strides = [1, 1]} : vector<64x3xf32> to vector<64x1xf32>
      %cst_75 = arith.constant dense<0.000000e+00> : vector<64xf32>
      %202 = vector.multi_reduction <add>, %196, %cst_75 [1] : vector<64x16xf32> to vector<64xf32>
      %203 = vector.shape_cast %202 : vector<64xf32> to vector<64x1xf32>
      %204 = arith.mulf %196, %196 : vector<64x16xf32>
      %cst_76 = arith.constant dense<0.000000e+00> : vector<64xf32>
      %205 = vector.multi_reduction <add>, %204, %cst_76 [1] : vector<64x16xf32> to vector<64xf32>
      %206 = vector.shape_cast %205 : vector<64xf32> to vector<64x1xf32>
      %207 = tpu.concatenate %203, %206 in 1 : vector<64x1xf32>, vector<64x1xf32> -> vector<64x2xf32>
      %cst_77 = arith.constant dense<0.000000e+00> : vector<64x2xf32>
      %208 = tpu.matmul %0, %207, %cst_77 {dimension_numbers = #tpu.dot_dimension_numbers<[1], [0], [0], [1], [0, 0, 1, 1], [], []>} : vector<64x64xf32>, vector<64x2xf32>, vector<64x2xf32> -> vector<64x2xf32>
      %209 = vector.extract_strided_slice %208 {offsets = [0, 0], sizes = [64, 1], strides = [1, 1]} : vector<64x2xf32> to vector<64x1xf32>
      %210 = vector.extract_strided_slice %208 {offsets = [0, 1], sizes = [64, 1], strides = [1, 1]} : vector<64x2xf32> to vector<64x1xf32>
      %211 = arith.mulf %209, %209 : vector<64x1xf32>
      %212 = arith.subf %210, %211 : vector<64x1xf32>
      %213 = vector.broadcast %209 : vector<64x1xf32> to vector<64x16xf32>
      %214 = arith.subf %196, %213 : vector<64x16xf32>
      %cst_78 = arith.constant 9.99999974E-6 : f32
      %215 = vector.broadcast %cst_78 : f32 to vector<64x1xf32>
      %216 = arith.addf %212, %215 : vector<64x1xf32>
      %217 = math.rsqrt %216 : vector<64x1xf32>
      %218 = vector.broadcast %217 : vector<64x1xf32> to vector<64x16xf32>
      %219 = arith.mulf %214, %218 : vector<64x16xf32>
      %220 = vector.broadcast %200 : vector<64x1xf32> to vector<64x16xf32>
      %221 = arith.mulf %219, %220 : vector<64x16xf32>
      %222 = vector.broadcast %201 : vector<64x1xf32> to vector<64x16xf32>
      %223 = arith.addf %221, %222 : vector<64x16xf32>
      %224 = arith.index_cast %arg19 : i32 to index
      %c0_79 = arith.constant 0 : index
      %c0_80 = arith.constant 0 : index
      %225 = vector.load %arg8[%224, %c0_79, %c0_80] : memref<5x192x64xbf16, #tpu.memory_space<vmem>>, vector<1x192x64xbf16>
      %226 = vector.shape_cast %225 : vector<1x192x64xbf16> to vector<192x64xbf16>
      %227 = arith.index_cast %arg19 : i32 to index
      %c0_81 = arith.constant 0 : index
      %c0_82 = arith.constant 0 : index
      %228 = vector.load %arg9[%227, %c0_81, %c0_82] : memref<5x192x1xf32, #tpu.memory_space<vmem>>, vector<1x192x1xf32>
      %229 = vector.shape_cast %228 : vector<1x192x1xf32> to vector<192x1xf32>
      %230 = arith.truncf %223 : vector<64x16xf32> to vector<64x16xbf16>
      %cst_83 = arith.constant dense<0.000000e+00> : vector<192x16xf32>
      %231 = tpu.matmul %226, %230, %cst_83 {dimension_numbers = #tpu.dot_dimension_numbers<[1], [0], [0], [1], [0, 0, 1, 1], [], []>} : vector<192x64xbf16>, vector<64x16xbf16>, vector<192x16xf32> -> vector<192x16xf32>
      %232 = vector.broadcast %229 : vector<192x1xf32> to vector<192x16xf32>
      %233 = arith.addf %231, %232 : vector<192x16xf32>
      %234 = arith.truncf %233 : vector<192x16xf32> to vector<192x16xbf16>
      %235 = vector.shape_cast %234 : vector<192x16xbf16> to vector<4x3x16x16xbf16>
      %236 = vector.extract_strided_slice %235 {offsets = [0, 0, 0, 0], sizes = [4, 1, 16, 16], strides = [1, 1, 1, 1]} : vector<4x3x16x16xbf16> to vector<4x1x16x16xbf16>
      %237 = vector.shape_cast %236 : vector<4x1x16x16xbf16> to vector<4x16x16xbf16>
      %238 = vector.extract_strided_slice %235 {offsets = [0, 1, 0, 0], sizes = [4, 1, 16, 16], strides = [1, 1, 1, 1]} : vector<4x3x16x16xbf16> to vector<4x1x16x16xbf16>
      %239 = vector.shape_cast %238 : vector<4x1x16x16xbf16> to vector<4x16x16xbf16>
      %240 = vector.extract_strided_slice %235 {offsets = [0, 2, 0, 0], sizes = [4, 1, 16, 16], strides = [1, 1, 1, 1]} : vector<4x3x16x16xbf16> to vector<4x1x16x16xbf16>
      %241 = vector.shape_cast %240 : vector<4x1x16x16xbf16> to vector<4x16x16xbf16>
      %cst_84 = arith.constant dense<0.000000e+00> : vector<4x16x16xf32>
      %242 = tpu.matmul %237, %239, %cst_84 {dimension_numbers = #tpu.dot_dimension_numbers<[1], [1], [2], [2], [0, 0, 0, 2, 1, 2], [0], [0]>} : vector<4x16x16xbf16>, vector<4x16x16xbf16>, vector<4x16x16xf32> -> vector<4x16x16xf32>
      %243 = arith.index_cast %arg19 : i32 to index
      %c0_85 = arith.constant 0 : index
      %c0_86 = arith.constant 0 : index
      %c0_87 = arith.constant 0 : index
      %244 = vector.load %arg11[%243, %c0_85, %c0_86, %c0_87] : memref<5x4x16x16xbf16, #tpu.memory_space<vmem>>, vector<1x4x16x16xbf16>
      %245 = vector.shape_cast %244 : vector<1x4x16x16xbf16> to vector<4x16x16xbf16>
      %246 = arith.extf %245 : vector<4x16x16xbf16> to vector<4x16x16xf32>
      %247 = arith.addf %242, %246 : vector<4x16x16xf32>
      %cst_88 = arith.constant dense<0xFF800000> : vector<4x16xf32>
      %248 = vector.multi_reduction <maximumf>, %247, %cst_88 [2] : vector<4x16x16xf32> to vector<4x16xf32>
      %249 = vector.shape_cast %248 : vector<4x16xf32> to vector<4x16x1xf32>
      %250 = vector.broadcast %249 : vector<4x16x1xf32> to vector<4x16x16xf32>
      %251 = arith.subf %247, %250 : vector<4x16x16xf32>
      %252 = math.exp %251 : vector<4x16x16xf32>
      %cst_89 = arith.constant dense<0.000000e+00> : vector<4x16xf32>
      %253 = vector.multi_reduction <add>, %252, %cst_89 [2] : vector<4x16x16xf32> to vector<4x16xf32>
      %254 = vector.shape_cast %253 : vector<4x16xf32> to vector<4x16x1xf32>
      %255 = tpu.reciprocal %254 {approx = true} : vector<4x16x1xf32> -> vector<4x16x1xf32>
      %256 = vector.broadcast %255 : vector<4x16x1xf32> to vector<4x16x16xf32>
      %257 = arith.mulf %252, %256 : vector<4x16x16xf32>
      %258 = arith.truncf %257 : vector<4x16x16xf32> to vector<4x16x16xbf16>
      %cst_90 = arith.constant dense<0.000000e+00> : vector<4x16x16xf32>
      %259 = tpu.matmul %241, %258, %cst_90 {dimension_numbers = #tpu.dot_dimension_numbers<[2], [2], [1], [1], [0, 0, 0, 1, 1, 1], [0], [0]>} : vector<4x16x16xbf16>, vector<4x16x16xbf16>, vector<4x16x16xf32> -> vector<4x16x16xf32>
      %260 = vector.shape_cast %259 : vector<4x16x16xf32> to vector<64x16xf32>
      %261 = arith.index_cast %arg19 : i32 to index
      %c0_91 = arith.constant 0 : index
      %c0_92 = arith.constant 0 : index
      %262 = vector.load %arg10[%261, %c0_91, %c0_92] : memref<5x64x64xbf16, #tpu.memory_space<vmem>>, vector<1x64x64xbf16>
      %263 = vector.shape_cast %262 : vector<1x64x64xbf16> to vector<64x64xbf16>
      %264 = vector.extract_strided_slice %199 {offsets = [0, 2], sizes = [64, 1], strides = [1, 1]} : vector<64x3xf32> to vector<64x1xf32>
      %265 = arith.truncf %260 : vector<64x16xf32> to vector<64x16xbf16>
      %cst_93 = arith.constant dense<0.000000e+00> : vector<64x16xf32>
      %266 = tpu.matmul %263, %265, %cst_93 {dimension_numbers = #tpu.dot_dimension_numbers<[1], [0], [0], [1], [0, 0, 1, 1], [], []>} : vector<64x64xbf16>, vector<64x16xbf16>, vector<64x16xf32> -> vector<64x16xf32>
      %267 = vector.broadcast %264 : vector<64x1xf32> to vector<64x16xf32>
      %268 = arith.addf %266, %267 : vector<64x16xf32>
      %269 = arith.addf %268, %196 : vector<64x16xf32>
      scf.yield %269 : vector<64x16xf32>
    }
    %c3_i32_6 = arith.constant 3 : i32
    %c0_7 = arith.constant 0 : index
    %c0_8 = arith.constant 0 : index
    %c0_9 = arith.constant 0 : index
    %6 = vector.load %arg1[%c0_7, %c0_8, %c0_9] : memref<1x16x16xf32, #tpu.memory_space<vmem>>, vector<1x16x16xf32>
    %7 = vector.shape_cast %6 : vector<1x16x16xf32> to vector<16x16xf32>
    %c0_10 = arith.constant 0 : index
    %c0_11 = arith.constant 0 : index
    %8 = vector.load %arg12[%c0_10, %c0_11] : memref<64x48xbf16, #tpu.memory_space<vmem>>, vector<64x48xbf16>
    %9 = vector.extract_strided_slice %1 {offsets = [0, 0], sizes = [64, 1], strides = [1, 1]} : vector<64x4xf32> to vector<64x1xf32>
    %10 = tpu.iota {dimensions = array<i32: 1>} : vector<16x16xi32>
    %c0_i32_12 = arith.constant 0 : i32
    %11 = vector.broadcast %c0_i32_12 : i32 to vector<16x16xi32>
    %12 = arith.cmpi eq, %10, %11 : vector<16x16xi32>
    %c1_i32_13 = arith.constant 1 : i32
    %13 = tpu.dynamic_rotate %7 by %c1_i32_13 dim 1 : vector<16x16xf32>, i32 -> vector<16x16xf32>
    %cst = arith.constant 0.000000e+00 : f32
    %14 = vector.broadcast %cst : f32 to vector<16x16xf32>
    %15 = arith.select %12, %14, %13 : vector<16x16xi1>, vector<16x16xf32>
    %c15_i32 = arith.constant 15 : i32
    %16 = vector.broadcast %c15_i32 : i32 to vector<16x16xi32>
    %17 = arith.cmpi eq, %10, %16 : vector<16x16xi32>
    %c15_i32_14 = arith.constant 15 : i32
    %18 = tpu.dynamic_rotate %7 by %c15_i32_14 dim 1 : vector<16x16xf32>, i32 -> vector<16x16xf32>
    %cst_15 = arith.constant 0.000000e+00 : f32
    %19 = vector.broadcast %cst_15 : f32 to vector<16x16xf32>
    %20 = arith.select %17, %19, %18 : vector<16x16xi1>, vector<16x16xf32>
    %21 = arith.truncf %15 : vector<16x16xf32> to vector<16x16xbf16>
    %22 = arith.truncf %7 : vector<16x16xf32> to vector<16x16xbf16>
    %23 = arith.truncf %20 : vector<16x16xf32> to vector<16x16xbf16>
    %24 = tpu.concatenate %21, %22, %23 in 0 : vector<16x16xbf16>, vector<16x16xbf16>, vector<16x16xbf16> -> vector<48x16xbf16>
    %cst_16 = arith.constant dense<0.000000e+00> : vector<64x16xf32>
    %25 = tpu.matmul %8, %24, %cst_16 {dimension_numbers = #tpu.dot_dimension_numbers<[1], [0], [0], [1], [0, 0, 1, 1], [], []>} : vector<64x48xbf16>, vector<48x16xbf16>, vector<64x16xf32> -> vector<64x16xf32>
    %26 = vector.broadcast %9 : vector<64x1xf32> to vector<64x16xf32>
    %27 = arith.addf %25, %26 : vector<64x16xf32>
    %28 = tpu.concatenate %27, %5 in 0 : vector<64x16xf32>, vector<64x16xf32> -> vector<128x16xf32>
    %c0_17 = arith.constant 0 : index
    %c0_18 = arith.constant 0 : index
    %29 = vector.load %arg13[%c0_17, %c0_18] : memref<64x128xbf16, #tpu.memory_space<vmem>>, vector<64x128xbf16>
    %30 = vector.extract_strided_slice %1 {offsets = [0, 1], sizes = [64, 1], strides = [1, 1]} : vector<64x4xf32> to vector<64x1xf32>
    %31 = arith.truncf %28 : vector<128x16xf32> to vector<128x16xbf16>
    %cst_19 = arith.constant dense<0.000000e+00> : vector<64x16xf32>
    %32 = tpu.matmul %29, %31, %cst_19 {dimension_numbers = #tpu.dot_dimension_numbers<[1], [0], [0], [1], [0, 0, 1, 1], [], []>} : vector<64x128xbf16>, vector<128x16xbf16>, vector<64x16xf32> -> vector<64x16xf32>
    %33 = vector.broadcast %30 : vector<64x1xf32> to vector<64x16xf32>
    %34 = arith.addf %32, %33 : vector<64x16xf32>
    %c3_i32_20 = arith.constant 3 : i32
    %c2_i32 = arith.constant 2 : i32
    %35 = arith.addi %c3_i32_20, %c2_i32 : i32
    %c1_i32_21 = arith.constant 1 : i32
    %36 = scf.for %arg19 = %c3_i32_20 to %35 step %c1_i32_21 iter_args(%arg20 = %34) -> (vector<64x16xf32>)  : i32 {
      %92 = arith.index_cast %arg19 : i32 to index
      %c0_45 = arith.constant 0 : index
      %c0_46 = arith.constant 0 : index
      %93 = vector.load %arg4[%92, %c0_45, %c0_46] : memref<8x64x6xf32, #tpu.memory_space<vmem>>, vector<1x64x6xf32>
      %94 = vector.shape_cast %93 : vector<1x64x6xf32> to vector<64x6xf32>
      %c0_47 = arith.constant 0 : index
      %95 = arith.index_cast %arg19 : i32 to index
      %c0_48 = arith.constant 0 : index
      %c0_49 = arith.constant 0 : index
      %96 = vector.load %arg3[%c0_47, %95, %c0_48, %c0_49] : memref<1x8x64x2xf32, #tpu.memory_space<vmem>>, vector<1x1x64x2xf32>
      %97 = vector.shape_cast %96 : vector<1x1x64x2xf32> to vector<64x2xf32>
      %98 = vector.extract_strided_slice %94 {offsets = [0, 0], sizes = [64, 1], strides = [1, 1]} : vector<64x6xf32> to vector<64x1xf32>
      %99 = vector.extract_strided_slice %94 {offsets = [0, 1], sizes = [64, 1], strides = [1, 1]} : vector<64x6xf32> to vector<64x1xf32>
      %cst_50 = arith.constant dense<0.000000e+00> : vector<64xf32>
      %100 = vector.multi_reduction <add>, %arg20, %cst_50 [1] : vector<64x16xf32> to vector<64xf32>
      %101 = vector.shape_cast %100 : vector<64xf32> to vector<64x1xf32>
      %102 = arith.mulf %arg20, %arg20 : vector<64x16xf32>
      %cst_51 = arith.constant dense<0.000000e+00> : vector<64xf32>
      %103 = vector.multi_reduction <add>, %102, %cst_51 [1] : vector<64x16xf32> to vector<64xf32>
      %104 = vector.shape_cast %103 : vector<64xf32> to vector<64x1xf32>
      %105 = tpu.concatenate %101, %104 in 1 : vector<64x1xf32>, vector<64x1xf32> -> vector<64x2xf32>
      %cst_52 = arith.constant dense<0.000000e+00> : vector<64x2xf32>
      %106 = tpu.matmul %0, %105, %cst_52 {dimension_numbers = #tpu.dot_dimension_numbers<[1], [0], [0], [1], [0, 0, 1, 1], [], []>} : vector<64x64xf32>, vector<64x2xf32>, vector<64x2xf32> -> vector<64x2xf32>
      %107 = vector.extract_strided_slice %106 {offsets = [0, 0], sizes = [64, 1], strides = [1, 1]} : vector<64x2xf32> to vector<64x1xf32>
      %108 = vector.extract_strided_slice %106 {offsets = [0, 1], sizes = [64, 1], strides = [1, 1]} : vector<64x2xf32> to vector<64x1xf32>
      %109 = arith.mulf %107, %107 : vector<64x1xf32>
      %110 = arith.subf %108, %109 : vector<64x1xf32>
      %111 = vector.broadcast %107 : vector<64x1xf32> to vector<64x16xf32>
      %112 = arith.subf %arg20, %111 : vector<64x16xf32>
      %cst_53 = arith.constant 9.99999974E-6 : f32
      %113 = vector.broadcast %cst_53 : f32 to vector<64x1xf32>
      %114 = arith.addf %110, %113 : vector<64x1xf32>
      %115 = math.rsqrt %114 : vector<64x1xf32>
      %116 = vector.broadcast %115 : vector<64x1xf32> to vector<64x16xf32>
      %117 = arith.mulf %112, %116 : vector<64x16xf32>
      %118 = vector.broadcast %98 : vector<64x1xf32> to vector<64x16xf32>
      %119 = arith.mulf %117, %118 : vector<64x16xf32>
      %120 = vector.broadcast %99 : vector<64x1xf32> to vector<64x16xf32>
      %121 = arith.addf %119, %120 : vector<64x16xf32>
      %122 = arith.negf %121 : vector<64x16xf32>
      %123 = math.exp %122 : vector<64x16xf32>
      %cst_54 = arith.constant 1.000000e+00 : f32
      %124 = vector.broadcast %cst_54 : f32 to vector<64x16xf32>
      %125 = arith.addf %124, %123 : vector<64x16xf32>
      %126 = arith.divf %124, %125 : vector<64x16xf32>
      %127 = arith.mulf %121, %126 : vector<64x16xf32>
      %128 = arith.index_cast %arg19 : i32 to index
      %c0_55 = arith.constant 0 : index
      %c0_56 = arith.constant 0 : index
      %129 = vector.load %arg5[%128, %c0_55, %c0_56] : memref<8x64x64xbf16, #tpu.memory_space<vmem>>, vector<1x64x64xbf16>
      %130 = vector.shape_cast %129 : vector<1x64x64xbf16> to vector<64x64xbf16>
      %131 = vector.extract_strided_slice %94 {offsets = [0, 2], sizes = [64, 1], strides = [1, 1]} : vector<64x6xf32> to vector<64x1xf32>
      %132 = arith.truncf %127 : vector<64x16xf32> to vector<64x16xbf16>
      %cst_57 = arith.constant dense<0.000000e+00> : vector<64x16xf32>
      %133 = tpu.matmul %130, %132, %cst_57 {dimension_numbers = #tpu.dot_dimension_numbers<[1], [0], [0], [1], [0, 0, 1, 1], [], []>} : vector<64x64xbf16>, vector<64x16xbf16>, vector<64x16xf32> -> vector<64x16xf32>
      %134 = vector.broadcast %131 : vector<64x1xf32> to vector<64x16xf32>
      %135 = arith.addf %133, %134 : vector<64x16xf32>
      %136 = vector.extract_strided_slice %94 {offsets = [0, 3], sizes = [64, 1], strides = [1, 1]} : vector<64x6xf32> to vector<64x1xf32>
      %137 = vector.extract_strided_slice %94 {offsets = [0, 4], sizes = [64, 1], strides = [1, 1]} : vector<64x6xf32> to vector<64x1xf32>
      %cst_58 = arith.constant dense<0.000000e+00> : vector<64xf32>
      %138 = vector.multi_reduction <add>, %135, %cst_58 [1] : vector<64x16xf32> to vector<64xf32>
      %139 = vector.shape_cast %138 : vector<64xf32> to vector<64x1xf32>
      %140 = arith.mulf %135, %135 : vector<64x16xf32>
      %cst_59 = arith.constant dense<0.000000e+00> : vector<64xf32>
      %141 = vector.multi_reduction <add>, %140, %cst_59 [1] : vector<64x16xf32> to vector<64xf32>
      %142 = vector.shape_cast %141 : vector<64xf32> to vector<64x1xf32>
      %143 = tpu.concatenate %139, %142 in 1 : vector<64x1xf32>, vector<64x1xf32> -> vector<64x2xf32>
      %cst_60 = arith.constant dense<0.000000e+00> : vector<64x2xf32>
      %144 = tpu.matmul %0, %143, %cst_60 {dimension_numbers = #tpu.dot_dimension_numbers<[1], [0], [0], [1], [0, 0, 1, 1], [], []>} : vector<64x64xf32>, vector<64x2xf32>, vector<64x2xf32> -> vector<64x2xf32>
      %145 = vector.extract_strided_slice %144 {offsets = [0, 0], sizes = [64, 1], strides = [1, 1]} : vector<64x2xf32> to vector<64x1xf32>
      %146 = vector.extract_strided_slice %144 {offsets = [0, 1], sizes = [64, 1], strides = [1, 1]} : vector<64x2xf32> to vector<64x1xf32>
      %147 = arith.mulf %145, %145 : vector<64x1xf32>
      %148 = arith.subf %146, %147 : vector<64x1xf32>
      %149 = vector.broadcast %145 : vector<64x1xf32> to vector<64x16xf32>
      %150 = arith.subf %135, %149 : vector<64x16xf32>
      %cst_61 = arith.constant 9.99999974E-6 : f32
      %151 = vector.broadcast %cst_61 : f32 to vector<64x1xf32>
      %152 = arith.addf %148, %151 : vector<64x1xf32>
      %153 = math.rsqrt %152 : vector<64x1xf32>
      %154 = vector.broadcast %153 : vector<64x1xf32> to vector<64x16xf32>
      %155 = arith.mulf %150, %154 : vector<64x16xf32>
      %156 = vector.broadcast %136 : vector<64x1xf32> to vector<64x16xf32>
      %157 = arith.mulf %155, %156 : vector<64x16xf32>
      %158 = vector.broadcast %137 : vector<64x1xf32> to vector<64x16xf32>
      %159 = arith.addf %157, %158 : vector<64x16xf32>
      %160 = vector.extract_strided_slice %97 {offsets = [0, 0], sizes = [64, 1], strides = [1, 1]} : vector<64x2xf32> to vector<64x1xf32>
      %cst_62 = arith.constant 1.000000e+00 : f32
      %161 = vector.broadcast %cst_62 : f32 to vector<64x1xf32>
      %162 = arith.addf %161, %160 : vector<64x1xf32>
      %163 = vector.broadcast %162 : vector<64x1xf32> to vector<64x16xf32>
      %164 = arith.mulf %159, %163 : vector<64x16xf32>
      %165 = vector.extract_strided_slice %97 {offsets = [0, 1], sizes = [64, 1], strides = [1, 1]} : vector<64x2xf32> to vector<64x1xf32>
      %166 = vector.broadcast %165 : vector<64x1xf32> to vector<64x16xf32>
      %167 = arith.addf %164, %166 : vector<64x16xf32>
      %168 = arith.negf %167 : vector<64x16xf32>
      %169 = math.exp %168 : vector<64x16xf32>
      %cst_63 = arith.constant 1.000000e+00 : f32
      %170 = vector.broadcast %cst_63 : f32 to vector<64x16xf32>
      %171 = arith.addf %170, %169 : vector<64x16xf32>
      %172 = arith.divf %170, %171 : vector<64x16xf32>
      %173 = arith.mulf %167, %172 : vector<64x16xf32>
      %174 = arith.index_cast %arg19 : i32 to index
      %c0_64 = arith.constant 0 : index
      %c0_65 = arith.constant 0 : index
      %175 = vector.load %arg6[%174, %c0_64, %c0_65] : memref<8x64x192xbf16, #tpu.memory_space<vmem>>, vector<1x64x192xbf16>
      %176 = vector.shape_cast %175 : vector<1x64x192xbf16> to vector<64x192xbf16>
      %177 = vector.extract_strided_slice %94 {offsets = [0, 5], sizes = [64, 1], strides = [1, 1]} : vector<64x6xf32> to vector<64x1xf32>
      %178 = tpu.iota {dimensions = array<i32: 1>} : vector<64x16xi32>
      %c0_i32_66 = arith.constant 0 : i32
      %179 = vector.broadcast %c0_i32_66 : i32 to vector<64x16xi32>
      %180 = arith.cmpi eq, %178, %179 : vector<64x16xi32>
      %c1_i32_67 = arith.constant 1 : i32
      %181 = tpu.dynamic_rotate %173 by %c1_i32_67 dim 1 : vector<64x16xf32>, i32 -> vector<64x16xf32>
      %cst_68 = arith.constant 0.000000e+00 : f32
      %182 = vector.broadcast %cst_68 : f32 to vector<64x16xf32>
      %183 = arith.select %180, %182, %181 : vector<64x16xi1>, vector<64x16xf32>
      %c15_i32_69 = arith.constant 15 : i32
      %184 = vector.broadcast %c15_i32_69 : i32 to vector<64x16xi32>
      %185 = arith.cmpi eq, %178, %184 : vector<64x16xi32>
      %c15_i32_70 = arith.constant 15 : i32
      %186 = tpu.dynamic_rotate %173 by %c15_i32_70 dim 1 : vector<64x16xf32>, i32 -> vector<64x16xf32>
      %cst_71 = arith.constant 0.000000e+00 : f32
      %187 = vector.broadcast %cst_71 : f32 to vector<64x16xf32>
      %188 = arith.select %185, %187, %186 : vector<64x16xi1>, vector<64x16xf32>
      %189 = arith.truncf %183 : vector<64x16xf32> to vector<64x16xbf16>
      %190 = arith.truncf %173 : vector<64x16xf32> to vector<64x16xbf16>
      %191 = arith.truncf %188 : vector<64x16xf32> to vector<64x16xbf16>
      %192 = tpu.concatenate %189, %190, %191 in 0 : vector<64x16xbf16>, vector<64x16xbf16>, vector<64x16xbf16> -> vector<192x16xbf16>
      %cst_72 = arith.constant dense<0.000000e+00> : vector<64x16xf32>
      %193 = tpu.matmul %176, %192, %cst_72 {dimension_numbers = #tpu.dot_dimension_numbers<[1], [0], [0], [1], [0, 0, 1, 1], [], []>} : vector<64x192xbf16>, vector<192x16xbf16>, vector<64x16xf32> -> vector<64x16xf32>
      %194 = vector.broadcast %177 : vector<64x1xf32> to vector<64x16xf32>
      %195 = arith.addf %193, %194 : vector<64x16xf32>
      %196 = arith.addf %195, %arg20 : vector<64x16xf32>
      %197 = arith.index_cast %arg19 : i32 to index
      %c0_73 = arith.constant 0 : index
      %c0_74 = arith.constant 0 : index
      %198 = vector.load %arg7[%197, %c0_73, %c0_74] : memref<5x64x3xf32, #tpu.memory_space<vmem>>, vector<1x64x3xf32>
      %199 = vector.shape_cast %198 : vector<1x64x3xf32> to vector<64x3xf32>
      %200 = vector.extract_strided_slice %199 {offsets = [0, 0], sizes = [64, 1], strides = [1, 1]} : vector<64x3xf32> to vector<64x1xf32>
      %201 = vector.extract_strided_slice %199 {offsets = [0, 1], sizes = [64, 1], strides = [1, 1]} : vector<64x3xf32> to vector<64x1xf32>
      %cst_75 = arith.constant dense<0.000000e+00> : vector<64xf32>
      %202 = vector.multi_reduction <add>, %196, %cst_75 [1] : vector<64x16xf32> to vector<64xf32>
      %203 = vector.shape_cast %202 : vector<64xf32> to vector<64x1xf32>
      %204 = arith.mulf %196, %196 : vector<64x16xf32>
      %cst_76 = arith.constant dense<0.000000e+00> : vector<64xf32>
      %205 = vector.multi_reduction <add>, %204, %cst_76 [1] : vector<64x16xf32> to vector<64xf32>
      %206 = vector.shape_cast %205 : vector<64xf32> to vector<64x1xf32>
      %207 = tpu.concatenate %203, %206 in 1 : vector<64x1xf32>, vector<64x1xf32> -> vector<64x2xf32>
      %cst_77 = arith.constant dense<0.000000e+00> : vector<64x2xf32>
      %208 = tpu.matmul %0, %207, %cst_77 {dimension_numbers = #tpu.dot_dimension_numbers<[1], [0], [0], [1], [0, 0, 1, 1], [], []>} : vector<64x64xf32>, vector<64x2xf32>, vector<64x2xf32> -> vector<64x2xf32>
      %209 = vector.extract_strided_slice %208 {offsets = [0, 0], sizes = [64, 1], strides = [1, 1]} : vector<64x2xf32> to vector<64x1xf32>
      %210 = vector.extract_strided_slice %208 {offsets = [0, 1], sizes = [64, 1], strides = [1, 1]} : vector<64x2xf32> to vector<64x1xf32>
      %211 = arith.mulf %209, %209 : vector<64x1xf32>
      %212 = arith.subf %210, %211 : vector<64x1xf32>
      %213 = vector.broadcast %209 : vector<64x1xf32> to vector<64x16xf32>
      %214 = arith.subf %196, %213 : vector<64x16xf32>
      %cst_78 = arith.constant 9.99999974E-6 : f32
      %215 = vector.broadcast %cst_78 : f32 to vector<64x1xf32>
      %216 = arith.addf %212, %215 : vector<64x1xf32>
      %217 = math.rsqrt %216 : vector<64x1xf32>
      %218 = vector.broadcast %217 : vector<64x1xf32> to vector<64x16xf32>
      %219 = arith.mulf %214, %218 : vector<64x16xf32>
      %220 = vector.broadcast %200 : vector<64x1xf32> to vector<64x16xf32>
      %221 = arith.mulf %219, %220 : vector<64x16xf32>
      %222 = vector.broadcast %201 : vector<64x1xf32> to vector<64x16xf32>
      %223 = arith.addf %221, %222 : vector<64x16xf32>
      %224 = arith.index_cast %arg19 : i32 to index
      %c0_79 = arith.constant 0 : index
      %c0_80 = arith.constant 0 : index
      %225 = vector.load %arg8[%224, %c0_79, %c0_80] : memref<5x192x64xbf16, #tpu.memory_space<vmem>>, vector<1x192x64xbf16>
      %226 = vector.shape_cast %225 : vector<1x192x64xbf16> to vector<192x64xbf16>
      %227 = arith.index_cast %arg19 : i32 to index
      %c0_81 = arith.constant 0 : index
      %c0_82 = arith.constant 0 : index
      %228 = vector.load %arg9[%227, %c0_81, %c0_82] : memref<5x192x1xf32, #tpu.memory_space<vmem>>, vector<1x192x1xf32>
      %229 = vector.shape_cast %228 : vector<1x192x1xf32> to vector<192x1xf32>
      %230 = arith.truncf %223 : vector<64x16xf32> to vector<64x16xbf16>
      %cst_83 = arith.constant dense<0.000000e+00> : vector<192x16xf32>
      %231 = tpu.matmul %226, %230, %cst_83 {dimension_numbers = #tpu.dot_dimension_numbers<[1], [0], [0], [1], [0, 0, 1, 1], [], []>} : vector<192x64xbf16>, vector<64x16xbf16>, vector<192x16xf32> -> vector<192x16xf32>
      %232 = vector.broadcast %229 : vector<192x1xf32> to vector<192x16xf32>
      %233 = arith.addf %231, %232 : vector<192x16xf32>
      %234 = arith.truncf %233 : vector<192x16xf32> to vector<192x16xbf16>
      %235 = vector.shape_cast %234 : vector<192x16xbf16> to vector<4x3x16x16xbf16>
      %236 = vector.extract_strided_slice %235 {offsets = [0, 0, 0, 0], sizes = [4, 1, 16, 16], strides = [1, 1, 1, 1]} : vector<4x3x16x16xbf16> to vector<4x1x16x16xbf16>
      %237 = vector.shape_cast %236 : vector<4x1x16x16xbf16> to vector<4x16x16xbf16>
      %238 = vector.extract_strided_slice %235 {offsets = [0, 1, 0, 0], sizes = [4, 1, 16, 16], strides = [1, 1, 1, 1]} : vector<4x3x16x16xbf16> to vector<4x1x16x16xbf16>
      %239 = vector.shape_cast %238 : vector<4x1x16x16xbf16> to vector<4x16x16xbf16>
      %240 = vector.extract_strided_slice %235 {offsets = [0, 2, 0, 0], sizes = [4, 1, 16, 16], strides = [1, 1, 1, 1]} : vector<4x3x16x16xbf16> to vector<4x1x16x16xbf16>
      %241 = vector.shape_cast %240 : vector<4x1x16x16xbf16> to vector<4x16x16xbf16>
      %cst_84 = arith.constant dense<0.000000e+00> : vector<4x16x16xf32>
      %242 = tpu.matmul %237, %239, %cst_84 {dimension_numbers = #tpu.dot_dimension_numbers<[1], [1], [2], [2], [0, 0, 0, 2, 1, 2], [0], [0]>} : vector<4x16x16xbf16>, vector<4x16x16xbf16>, vector<4x16x16xf32> -> vector<4x16x16xf32>
      %243 = arith.index_cast %arg19 : i32 to index
      %c0_85 = arith.constant 0 : index
      %c0_86 = arith.constant 0 : index
      %c0_87 = arith.constant 0 : index
      %244 = vector.load %arg11[%243, %c0_85, %c0_86, %c0_87] : memref<5x4x16x16xbf16, #tpu.memory_space<vmem>>, vector<1x4x16x16xbf16>
      %245 = vector.shape_cast %244 : vector<1x4x16x16xbf16> to vector<4x16x16xbf16>
      %246 = arith.extf %245 : vector<4x16x16xbf16> to vector<4x16x16xf32>
      %247 = arith.addf %242, %246 : vector<4x16x16xf32>
      %cst_88 = arith.constant dense<0xFF800000> : vector<4x16xf32>
      %248 = vector.multi_reduction <maximumf>, %247, %cst_88 [2] : vector<4x16x16xf32> to vector<4x16xf32>
      %249 = vector.shape_cast %248 : vector<4x16xf32> to vector<4x16x1xf32>
      %250 = vector.broadcast %249 : vector<4x16x1xf32> to vector<4x16x16xf32>
      %251 = arith.subf %247, %250 : vector<4x16x16xf32>
      %252 = math.exp %251 : vector<4x16x16xf32>
      %cst_89 = arith.constant dense<0.000000e+00> : vector<4x16xf32>
      %253 = vector.multi_reduction <add>, %252, %cst_89 [2] : vector<4x16x16xf32> to vector<4x16xf32>
      %254 = vector.shape_cast %253 : vector<4x16xf32> to vector<4x16x1xf32>
      %255 = tpu.reciprocal %254 {approx = true} : vector<4x16x1xf32> -> vector<4x16x1xf32>
      %256 = vector.broadcast %255 : vector<4x16x1xf32> to vector<4x16x16xf32>
      %257 = arith.mulf %252, %256 : vector<4x16x16xf32>
      %258 = arith.truncf %257 : vector<4x16x16xf32> to vector<4x16x16xbf16>
      %cst_90 = arith.constant dense<0.000000e+00> : vector<4x16x16xf32>
      %259 = tpu.matmul %241, %258, %cst_90 {dimension_numbers = #tpu.dot_dimension_numbers<[2], [2], [1], [1], [0, 0, 0, 1, 1, 1], [0], [0]>} : vector<4x16x16xbf16>, vector<4x16x16xbf16>, vector<4x16x16xf32> -> vector<4x16x16xf32>
      %260 = vector.shape_cast %259 : vector<4x16x16xf32> to vector<64x16xf32>
      %261 = arith.index_cast %arg19 : i32 to index
      %c0_91 = arith.constant 0 : index
      %c0_92 = arith.constant 0 : index
      %262 = vector.load %arg10[%261, %c0_91, %c0_92] : memref<5x64x64xbf16, #tpu.memory_space<vmem>>, vector<1x64x64xbf16>
      %263 = vector.shape_cast %262 : vector<1x64x64xbf16> to vector<64x64xbf16>
      %264 = vector.extract_strided_slice %199 {offsets = [0, 2], sizes = [64, 1], strides = [1, 1]} : vector<64x3xf32> to vector<64x1xf32>
      %265 = arith.truncf %260 : vector<64x16xf32> to vector<64x16xbf16>
      %cst_93 = arith.constant dense<0.000000e+00> : vector<64x16xf32>
      %266 = tpu.matmul %263, %265, %cst_93 {dimension_numbers = #tpu.dot_dimension_numbers<[1], [0], [0], [1], [0, 0, 1, 1], [], []>} : vector<64x64xbf16>, vector<64x16xbf16>, vector<64x16xf32> -> vector<64x16xf32>
      %267 = vector.broadcast %264 : vector<64x1xf32> to vector<64x16xf32>
      %268 = arith.addf %266, %267 : vector<64x16xf32>
      %269 = arith.addf %268, %196 : vector<64x16xf32>
      scf.yield %269 : vector<64x16xf32>
    }
    %c2_i32_22 = arith.constant 2 : i32
    %c5_i32 = arith.constant 5 : i32
    %c3_i32_23 = arith.constant 3 : i32
    %37 = arith.addi %c5_i32, %c3_i32_23 : i32
    %c1_i32_24 = arith.constant 1 : i32
    %38 = scf.for %arg19 = %c5_i32 to %37 step %c1_i32_24 iter_args(%arg20 = %36) -> (vector<64x16xf32>)  : i32 {
      %92 = arith.index_cast %arg19 : i32 to index
      %c0_45 = arith.constant 0 : index
      %c0_46 = arith.constant 0 : index
      %93 = vector.load %arg4[%92, %c0_45, %c0_46] : memref<8x64x6xf32, #tpu.memory_space<vmem>>, vector<1x64x6xf32>
      %94 = vector.shape_cast %93 : vector<1x64x6xf32> to vector<64x6xf32>
      %c0_47 = arith.constant 0 : index
      %95 = arith.index_cast %arg19 : i32 to index
      %c0_48 = arith.constant 0 : index
      %c0_49 = arith.constant 0 : index
      %96 = vector.load %arg3[%c0_47, %95, %c0_48, %c0_49] : memref<1x8x64x2xf32, #tpu.memory_space<vmem>>, vector<1x1x64x2xf32>
      %97 = vector.shape_cast %96 : vector<1x1x64x2xf32> to vector<64x2xf32>
      %98 = vector.extract_strided_slice %94 {offsets = [0, 0], sizes = [64, 1], strides = [1, 1]} : vector<64x6xf32> to vector<64x1xf32>
      %99 = vector.extract_strided_slice %94 {offsets = [0, 1], sizes = [64, 1], strides = [1, 1]} : vector<64x6xf32> to vector<64x1xf32>
      %cst_50 = arith.constant dense<0.000000e+00> : vector<64xf32>
      %100 = vector.multi_reduction <add>, %arg20, %cst_50 [1] : vector<64x16xf32> to vector<64xf32>
      %101 = vector.shape_cast %100 : vector<64xf32> to vector<64x1xf32>
      %102 = arith.mulf %arg20, %arg20 : vector<64x16xf32>
      %cst_51 = arith.constant dense<0.000000e+00> : vector<64xf32>
      %103 = vector.multi_reduction <add>, %102, %cst_51 [1] : vector<64x16xf32> to vector<64xf32>
      %104 = vector.shape_cast %103 : vector<64xf32> to vector<64x1xf32>
      %105 = tpu.concatenate %101, %104 in 1 : vector<64x1xf32>, vector<64x1xf32> -> vector<64x2xf32>
      %cst_52 = arith.constant dense<0.000000e+00> : vector<64x2xf32>
      %106 = tpu.matmul %0, %105, %cst_52 {dimension_numbers = #tpu.dot_dimension_numbers<[1], [0], [0], [1], [0, 0, 1, 1], [], []>} : vector<64x64xf32>, vector<64x2xf32>, vector<64x2xf32> -> vector<64x2xf32>
      %107 = vector.extract_strided_slice %106 {offsets = [0, 0], sizes = [64, 1], strides = [1, 1]} : vector<64x2xf32> to vector<64x1xf32>
      %108 = vector.extract_strided_slice %106 {offsets = [0, 1], sizes = [64, 1], strides = [1, 1]} : vector<64x2xf32> to vector<64x1xf32>
      %109 = arith.mulf %107, %107 : vector<64x1xf32>
      %110 = arith.subf %108, %109 : vector<64x1xf32>
      %111 = vector.broadcast %107 : vector<64x1xf32> to vector<64x16xf32>
      %112 = arith.subf %arg20, %111 : vector<64x16xf32>
      %cst_53 = arith.constant 9.99999974E-6 : f32
      %113 = vector.broadcast %cst_53 : f32 to vector<64x1xf32>
      %114 = arith.addf %110, %113 : vector<64x1xf32>
      %115 = math.rsqrt %114 : vector<64x1xf32>
      %116 = vector.broadcast %115 : vector<64x1xf32> to vector<64x16xf32>
      %117 = arith.mulf %112, %116 : vector<64x16xf32>
      %118 = vector.broadcast %98 : vector<64x1xf32> to vector<64x16xf32>
      %119 = arith.mulf %117, %118 : vector<64x16xf32>
      %120 = vector.broadcast %99 : vector<64x1xf32> to vector<64x16xf32>
      %121 = arith.addf %119, %120 : vector<64x16xf32>
      %122 = arith.negf %121 : vector<64x16xf32>
      %123 = math.exp %122 : vector<64x16xf32>
      %cst_54 = arith.constant 1.000000e+00 : f32
      %124 = vector.broadcast %cst_54 : f32 to vector<64x16xf32>
      %125 = arith.addf %124, %123 : vector<64x16xf32>
      %126 = arith.divf %124, %125 : vector<64x16xf32>
      %127 = arith.mulf %121, %126 : vector<64x16xf32>
      %128 = arith.index_cast %arg19 : i32 to index
      %c0_55 = arith.constant 0 : index
      %c0_56 = arith.constant 0 : index
      %129 = vector.load %arg5[%128, %c0_55, %c0_56] : memref<8x64x64xbf16, #tpu.memory_space<vmem>>, vector<1x64x64xbf16>
      %130 = vector.shape_cast %129 : vector<1x64x64xbf16> to vector<64x64xbf16>
      %131 = vector.extract_strided_slice %94 {offsets = [0, 2], sizes = [64, 1], strides = [1, 1]} : vector<64x6xf32> to vector<64x1xf32>
      %132 = arith.truncf %127 : vector<64x16xf32> to vector<64x16xbf16>
      %cst_57 = arith.constant dense<0.000000e+00> : vector<64x16xf32>
      %133 = tpu.matmul %130, %132, %cst_57 {dimension_numbers = #tpu.dot_dimension_numbers<[1], [0], [0], [1], [0, 0, 1, 1], [], []>} : vector<64x64xbf16>, vector<64x16xbf16>, vector<64x16xf32> -> vector<64x16xf32>
      %134 = vector.broadcast %131 : vector<64x1xf32> to vector<64x16xf32>
      %135 = arith.addf %133, %134 : vector<64x16xf32>
      %136 = vector.extract_strided_slice %94 {offsets = [0, 3], sizes = [64, 1], strides = [1, 1]} : vector<64x6xf32> to vector<64x1xf32>
      %137 = vector.extract_strided_slice %94 {offsets = [0, 4], sizes = [64, 1], strides = [1, 1]} : vector<64x6xf32> to vector<64x1xf32>
      %cst_58 = arith.constant dense<0.000000e+00> : vector<64xf32>
      %138 = vector.multi_reduction <add>, %135, %cst_58 [1] : vector<64x16xf32> to vector<64xf32>
      %139 = vector.shape_cast %138 : vector<64xf32> to vector<64x1xf32>
      %140 = arith.mulf %135, %135 : vector<64x16xf32>
      %cst_59 = arith.constant dense<0.000000e+00> : vector<64xf32>
      %141 = vector.multi_reduction <add>, %140, %cst_59 [1] : vector<64x16xf32> to vector<64xf32>
      %142 = vector.shape_cast %141 : vector<64xf32> to vector<64x1xf32>
      %143 = tpu.concatenate %139, %142 in 1 : vector<64x1xf32>, vector<64x1xf32> -> vector<64x2xf32>
      %cst_60 = arith.constant dense<0.000000e+00> : vector<64x2xf32>
      %144 = tpu.matmul %0, %143, %cst_60 {dimension_numbers = #tpu.dot_dimension_numbers<[1], [0], [0], [1], [0, 0, 1, 1], [], []>} : vector<64x64xf32>, vector<64x2xf32>, vector<64x2xf32> -> vector<64x2xf32>
      %145 = vector.extract_strided_slice %144 {offsets = [0, 0], sizes = [64, 1], strides = [1, 1]} : vector<64x2xf32> to vector<64x1xf32>
      %146 = vector.extract_strided_slice %144 {offsets = [0, 1], sizes = [64, 1], strides = [1, 1]} : vector<64x2xf32> to vector<64x1xf32>
      %147 = arith.mulf %145, %145 : vector<64x1xf32>
      %148 = arith.subf %146, %147 : vector<64x1xf32>
      %149 = vector.broadcast %145 : vector<64x1xf32> to vector<64x16xf32>
      %150 = arith.subf %135, %149 : vector<64x16xf32>
      %cst_61 = arith.constant 9.99999974E-6 : f32
      %151 = vector.broadcast %cst_61 : f32 to vector<64x1xf32>
      %152 = arith.addf %148, %151 : vector<64x1xf32>
      %153 = math.rsqrt %152 : vector<64x1xf32>
      %154 = vector.broadcast %153 : vector<64x1xf32> to vector<64x16xf32>
      %155 = arith.mulf %150, %154 : vector<64x16xf32>
      %156 = vector.broadcast %136 : vector<64x1xf32> to vector<64x16xf32>
      %157 = arith.mulf %155, %156 : vector<64x16xf32>
      %158 = vector.broadcast %137 : vector<64x1xf32> to vector<64x16xf32>
      %159 = arith.addf %157, %158 : vector<64x16xf32>
      %160 = vector.extract_strided_slice %97 {offsets = [0, 0], sizes = [64, 1], strides = [1, 1]} : vector<64x2xf32> to vector<64x1xf32>
      %cst_62 = arith.constant 1.000000e+00 : f32
      %161 = vector.broadcast %cst_62 : f32 to vector<64x1xf32>
      %162 = arith.addf %161, %160 : vector<64x1xf32>
      %163 = vector.broadcast %162 : vector<64x1xf32> to vector<64x16xf32>
      %164 = arith.mulf %159, %163 : vector<64x16xf32>
      %165 = vector.extract_strided_slice %97 {offsets = [0, 1], sizes = [64, 1], strides = [1, 1]} : vector<64x2xf32> to vector<64x1xf32>
      %166 = vector.broadcast %165 : vector<64x1xf32> to vector<64x16xf32>
      %167 = arith.addf %164, %166 : vector<64x16xf32>
      %168 = arith.negf %167 : vector<64x16xf32>
      %169 = math.exp %168 : vector<64x16xf32>
      %cst_63 = arith.constant 1.000000e+00 : f32
      %170 = vector.broadcast %cst_63 : f32 to vector<64x16xf32>
      %171 = arith.addf %170, %169 : vector<64x16xf32>
      %172 = arith.divf %170, %171 : vector<64x16xf32>
      %173 = arith.mulf %167, %172 : vector<64x16xf32>
      %174 = arith.index_cast %arg19 : i32 to index
      %c0_64 = arith.constant 0 : index
      %c0_65 = arith.constant 0 : index
      %175 = vector.load %arg6[%174, %c0_64, %c0_65] : memref<8x64x192xbf16, #tpu.memory_space<vmem>>, vector<1x64x192xbf16>
      %176 = vector.shape_cast %175 : vector<1x64x192xbf16> to vector<64x192xbf16>
      %177 = vector.extract_strided_slice %94 {offsets = [0, 5], sizes = [64, 1], strides = [1, 1]} : vector<64x6xf32> to vector<64x1xf32>
      %178 = tpu.iota {dimensions = array<i32: 1>} : vector<64x16xi32>
      %c0_i32_66 = arith.constant 0 : i32
      %179 = vector.broadcast %c0_i32_66 : i32 to vector<64x16xi32>
      %180 = arith.cmpi eq, %178, %179 : vector<64x16xi32>
      %c1_i32_67 = arith.constant 1 : i32
      %181 = tpu.dynamic_rotate %173 by %c1_i32_67 dim 1 : vector<64x16xf32>, i32 -> vector<64x16xf32>
      %cst_68 = arith.constant 0.000000e+00 : f32
      %182 = vector.broadcast %cst_68 : f32 to vector<64x16xf32>
      %183 = arith.select %180, %182, %181 : vector<64x16xi1>, vector<64x16xf32>
      %c15_i32_69 = arith.constant 15 : i32
      %184 = vector.broadcast %c15_i32_69 : i32 to vector<64x16xi32>
      %185 = arith.cmpi eq, %178, %184 : vector<64x16xi32>
      %c15_i32_70 = arith.constant 15 : i32
      %186 = tpu.dynamic_rotate %173 by %c15_i32_70 dim 1 : vector<64x16xf32>, i32 -> vector<64x16xf32>
      %cst_71 = arith.constant 0.000000e+00 : f32
      %187 = vector.broadcast %cst_71 : f32 to vector<64x16xf32>
      %188 = arith.select %185, %187, %186 : vector<64x16xi1>, vector<64x16xf32>
      %189 = arith.truncf %183 : vector<64x16xf32> to vector<64x16xbf16>
      %190 = arith.truncf %173 : vector<64x16xf32> to vector<64x16xbf16>
      %191 = arith.truncf %188 : vector<64x16xf32> to vector<64x16xbf16>
      %192 = tpu.concatenate %189, %190, %191 in 0 : vector<64x16xbf16>, vector<64x16xbf16>, vector<64x16xbf16> -> vector<192x16xbf16>
      %cst_72 = arith.constant dense<0.000000e+00> : vector<64x16xf32>
      %193 = tpu.matmul %176, %192, %cst_72 {dimension_numbers = #tpu.dot_dimension_numbers<[1], [0], [0], [1], [0, 0, 1, 1], [], []>} : vector<64x192xbf16>, vector<192x16xbf16>, vector<64x16xf32> -> vector<64x16xf32>
      %194 = vector.broadcast %177 : vector<64x1xf32> to vector<64x16xf32>
      %195 = arith.addf %193, %194 : vector<64x16xf32>
      %196 = arith.addf %195, %arg20 : vector<64x16xf32>
      scf.yield %196 : vector<64x16xf32>
    }
    %c3_i32_25 = arith.constant 3 : i32
    %39 = vector.extract_strided_slice %1 {offsets = [0, 2], sizes = [64, 1], strides = [1, 1]} : vector<64x4xf32> to vector<64x1xf32>
    %40 = vector.extract_strided_slice %1 {offsets = [0, 3], sizes = [64, 1], strides = [1, 1]} : vector<64x4xf32> to vector<64x1xf32>
    %cst_26 = arith.constant dense<0.000000e+00> : vector<64xf32>
    %41 = vector.multi_reduction <add>, %38, %cst_26 [1] : vector<64x16xf32> to vector<64xf32>
    %42 = vector.shape_cast %41 : vector<64xf32> to vector<64x1xf32>
    %43 = arith.mulf %38, %38 : vector<64x16xf32>
    %cst_27 = arith.constant dense<0.000000e+00> : vector<64xf32>
    %44 = vector.multi_reduction <add>, %43, %cst_27 [1] : vector<64x16xf32> to vector<64xf32>
    %45 = vector.shape_cast %44 : vector<64xf32> to vector<64x1xf32>
    %46 = tpu.concatenate %42, %45 in 1 : vector<64x1xf32>, vector<64x1xf32> -> vector<64x2xf32>
    %cst_28 = arith.constant dense<0.000000e+00> : vector<64x2xf32>
    %47 = tpu.matmul %0, %46, %cst_28 {dimension_numbers = #tpu.dot_dimension_numbers<[1], [0], [0], [1], [0, 0, 1, 1], [], []>} : vector<64x64xf32>, vector<64x2xf32>, vector<64x2xf32> -> vector<64x2xf32>
    %48 = vector.extract_strided_slice %47 {offsets = [0, 0], sizes = [64, 1], strides = [1, 1]} : vector<64x2xf32> to vector<64x1xf32>
    %49 = vector.extract_strided_slice %47 {offsets = [0, 1], sizes = [64, 1], strides = [1, 1]} : vector<64x2xf32> to vector<64x1xf32>
    %50 = arith.mulf %48, %48 : vector<64x1xf32>
    %51 = arith.subf %49, %50 : vector<64x1xf32>
    %52 = vector.broadcast %48 : vector<64x1xf32> to vector<64x16xf32>
    %53 = arith.subf %38, %52 : vector<64x16xf32>
    %cst_29 = arith.constant 9.99999974E-6 : f32
    %54 = vector.broadcast %cst_29 : f32 to vector<64x1xf32>
    %55 = arith.addf %51, %54 : vector<64x1xf32>
    %56 = math.rsqrt %55 : vector<64x1xf32>
    %57 = vector.broadcast %56 : vector<64x1xf32> to vector<64x16xf32>
    %58 = arith.mulf %53, %57 : vector<64x16xf32>
    %59 = vector.broadcast %39 : vector<64x1xf32> to vector<64x16xf32>
    %60 = arith.mulf %58, %59 : vector<64x16xf32>
    %61 = vector.broadcast %40 : vector<64x1xf32> to vector<64x16xf32>
    %62 = arith.addf %60, %61 : vector<64x16xf32>
    %63 = arith.negf %62 : vector<64x16xf32>
    %64 = math.exp %63 : vector<64x16xf32>
    %cst_30 = arith.constant 1.000000e+00 : f32
    %65 = vector.broadcast %cst_30 : f32 to vector<64x16xf32>
    %66 = arith.addf %65, %64 : vector<64x16xf32>
    %67 = arith.divf %65, %66 : vector<64x16xf32>
    %68 = arith.mulf %62, %67 : vector<64x16xf32>
    %c0_31 = arith.constant 0 : index
    %c0_32 = arith.constant 0 : index
    %69 = vector.load %arg14[%c0_31, %c0_32] : memref<32x192xbf16, #tpu.memory_space<vmem>>, vector<32x192xbf16>
    %c0_33 = arith.constant 0 : index
    %c0_34 = arith.constant 0 : index
    %70 = vector.load %arg16[%c0_33, %c0_34] : memref<32x1xf32, #tpu.memory_space<vmem>>, vector<32x1xf32>
    %71 = tpu.iota {dimensions = array<i32: 1>} : vector<64x16xi32>
    %c0_i32_35 = arith.constant 0 : i32
    %72 = vector.broadcast %c0_i32_35 : i32 to vector<64x16xi32>
    %73 = arith.cmpi eq, %71, %72 : vector<64x16xi32>
    %c1_i32_36 = arith.constant 1 : i32
    %74 = tpu.dynamic_rotate %68 by %c1_i32_36 dim 1 : vector<64x16xf32>, i32 -> vector<64x16xf32>
    %cst_37 = arith.constant 0.000000e+00 : f32
    %75 = vector.broadcast %cst_37 : f32 to vector<64x16xf32>
    %76 = arith.select %73, %75, %74 : vector<64x16xi1>, vector<64x16xf32>
    %c15_i32_38 = arith.constant 15 : i32
    %77 = vector.broadcast %c15_i32_38 : i32 to vector<64x16xi32>
    %78 = arith.cmpi eq, %71, %77 : vector<64x16xi32>
    %c15_i32_39 = arith.constant 15 : i32
    %79 = tpu.dynamic_rotate %68 by %c15_i32_39 dim 1 : vector<64x16xf32>, i32 -> vector<64x16xf32>
    %cst_40 = arith.constant 0.000000e+00 : f32
    %80 = vector.broadcast %cst_40 : f32 to vector<64x16xf32>
    %81 = arith.select %78, %80, %79 : vector<64x16xi1>, vector<64x16xf32>
    %82 = arith.truncf %76 : vector<64x16xf32> to vector<64x16xbf16>
    %83 = arith.truncf %68 : vector<64x16xf32> to vector<64x16xbf16>
    %84 = arith.truncf %81 : vector<64x16xf32> to vector<64x16xbf16>
    %85 = tpu.concatenate %82, %83, %84 in 0 : vector<64x16xbf16>, vector<64x16xbf16>, vector<64x16xbf16> -> vector<192x16xbf16>
    %cst_41 = arith.constant dense<0.000000e+00> : vector<32x16xf32>
    %86 = tpu.matmul %69, %85, %cst_41 {dimension_numbers = #tpu.dot_dimension_numbers<[1], [0], [0], [1], [0, 0, 1, 1], [], []>} : vector<32x192xbf16>, vector<192x16xbf16>, vector<32x16xf32> -> vector<32x16xf32>
    %87 = vector.broadcast %70 : vector<32x1xf32> to vector<32x16xf32>
    %88 = arith.addf %86, %87 : vector<32x16xf32>
    %c0_42 = arith.constant 0 : index
    %c0_43 = arith.constant 0 : index
    %c0_44 = arith.constant 0 : index
    %89 = vector.load %arg18[%c0_42, %c0_43, %c0_44] : memref<1x32x16xf32, #tpu.memory_space<vmem>>, vector<1x32x16xf32>
    %90 = vector.shape_cast %89 : vector<1x32x16xf32> to vector<32x16xf32>
    %91 = vector.shape_cast %88 : vector<32x16xf32> to vector<1x32x16xf32>
    tpu.vector_store %arg18[%c0_42, %c0_43, %c0_44], %91 {strides = array<i32>} : memref<1x32x16xf32, #tpu.memory_space<vmem>>, vector<1x32x16xf32>,
    return
  }
  func.func @transform_0(%arg0: i32) -> (i32, i32, i32) {
    %c0_i32 = arith.constant 0 : i32
    %c0_i32_0 = arith.constant 0 : i32
    %c0_i32_1 = arith.constant 0 : i32
    return %arg0, %c0_i32, %c0_i32_0 : i32, i32, i32
  }
  func.func @transform_1(%arg0: i32) -> (i32, i32, i32) {
    %c0_i32 = arith.constant 0 : i32
    %c0_i32_0 = arith.constant 0 : i32
    %c0_i32_1 = arith.constant 0 : i32
    return %arg0, %c0_i32, %c0_i32_0 : i32, i32, i32
  }
  func.func @transform_2(%arg0: i32) -> (i32, i32, i32, i32) {
    %c0_i32 = arith.constant 0 : i32
    %c0_i32_0 = arith.constant 0 : i32
    %c0_i32_1 = arith.constant 0 : i32
    %c0_i32_2 = arith.constant 0 : i32
    return %arg0, %c0_i32, %c0_i32_0, %c0_i32_1 : i32, i32, i32, i32
  }
  func.func @transform_3(%arg0: i32) -> (i32, i32, i32) {
    %c0_i32 = arith.constant 0 : i32
    %c0_i32_0 = arith.constant 0 : i32
    %c0_i32_1 = arith.constant 0 : i32
    %c0_i32_2 = arith.constant 0 : i32
    return %c0_i32, %c0_i32_0, %c0_i32_1 : i32, i32, i32
  }
  func.func @transform_4(%arg0: i32) -> (i32, i32, i32) {
    %c0_i32 = arith.constant 0 : i32
    %c0_i32_0 = arith.constant 0 : i32
    %c0_i32_1 = arith.constant 0 : i32
    %c0_i32_2 = arith.constant 0 : i32
    return %c0_i32, %c0_i32_0, %c0_i32_1 : i32, i32, i32
  }
  func.func @transform_5(%arg0: i32) -> (i32, i32, i32) {
    %c0_i32 = arith.constant 0 : i32
    %c0_i32_0 = arith.constant 0 : i32
    %c0_i32_1 = arith.constant 0 : i32
    %c0_i32_2 = arith.constant 0 : i32
    return %c0_i32, %c0_i32_0, %c0_i32_1 : i32, i32, i32
  }
  func.func @transform_6(%arg0: i32) -> (i32, i32, i32) {
    %c0_i32 = arith.constant 0 : i32
    %c0_i32_0 = arith.constant 0 : i32
    %c0_i32_1 = arith.constant 0 : i32
    %c0_i32_2 = arith.constant 0 : i32
    return %c0_i32, %c0_i32_0, %c0_i32_1 : i32, i32, i32
  }
  func.func @transform_7(%arg0: i32) -> (i32, i32, i32) {
    %c0_i32 = arith.constant 0 : i32
    %c0_i32_0 = arith.constant 0 : i32
    %c0_i32_1 = arith.constant 0 : i32
    %c0_i32_2 = arith.constant 0 : i32
    return %c0_i32, %c0_i32_0, %c0_i32_1 : i32, i32, i32
  }
  func.func @transform_8(%arg0: i32) -> (i32, i32, i32) {
    %c0_i32 = arith.constant 0 : i32
    %c0_i32_0 = arith.constant 0 : i32
    %c0_i32_1 = arith.constant 0 : i32
    %c0_i32_2 = arith.constant 0 : i32
    return %c0_i32, %c0_i32_0, %c0_i32_1 : i32, i32, i32
  }
  func.func @transform_9(%arg0: i32) -> (i32, i32, i32) {
    %c0_i32 = arith.constant 0 : i32
    %c0_i32_0 = arith.constant 0 : i32
    %c0_i32_1 = arith.constant 0 : i32
    %c0_i32_2 = arith.constant 0 : i32
    return %c0_i32, %c0_i32_0, %c0_i32_1 : i32, i32, i32
  }
  func.func @transform_10(%arg0: i32) -> (i32, i32, i32, i32) {
    %c0_i32 = arith.constant 0 : i32
    %c0_i32_0 = arith.constant 0 : i32
    %c0_i32_1 = arith.constant 0 : i32
    %c0_i32_2 = arith.constant 0 : i32
    %c0_i32_3 = arith.constant 0 : i32
    return %c0_i32, %c0_i32_0, %c0_i32_1, %c0_i32_2 : i32, i32, i32, i32
  }
  func.func @transform_11(%arg0: i32) -> (i32, i32) {
    %c0_i32 = arith.constant 0 : i32
    %c0_i32_0 = arith.constant 0 : i32
    %c0_i32_1 = arith.constant 0 : i32
    return %c0_i32, %c0_i32_0 : i32, i32
  }
  func.func @transform_12(%arg0: i32) -> (i32, i32) {
    %c0_i32 = arith.constant 0 : i32
    %c0_i32_0 = arith.constant 0 : i32
    %c0_i32_1 = arith.constant 0 : i32
    return %c0_i32, %c0_i32_0 : i32, i32
  }
  func.func @transform_13(%arg0: i32) -> (i32, i32) {
    %c0_i32 = arith.constant 0 : i32
    %c0_i32_0 = arith.constant 0 : i32
    %c0_i32_1 = arith.constant 0 : i32
    return %c0_i32, %c0_i32_0 : i32, i32
  }
  func.func @transform_14(%arg0: i32) -> (i32, i32) {
    %c0_i32 = arith.constant 0 : i32
    %c0_i32_0 = arith.constant 0 : i32
    %c0_i32_1 = arith.constant 0 : i32
    return %c0_i32, %c0_i32_0 : i32, i32
  }
  func.func @transform_15(%arg0: i32) -> (i32, i32) {
    %c0_i32 = arith.constant 0 : i32
    %c0_i32_0 = arith.constant 0 : i32
    %c0_i32_1 = arith.constant 0 : i32
    return %c0_i32, %c0_i32_0 : i32, i32
  }
  func.func @transform_16(%arg0: i32) -> (i32, i32) {
    %c0_i32 = arith.constant 0 : i32
    %c0_i32_0 = arith.constant 0 : i32
    %c0_i32_1 = arith.constant 0 : i32
    return %c0_i32, %c0_i32_0 : i32, i32
  }
  func.func @transform_17(%arg0: i32) -> (i32, i32, i32) {
    %c0_i32 = arith.constant 0 : i32
    %c0_i32_0 = arith.constant 0 : i32
    %c0_i32_1 = arith.constant 0 : i32
    return %arg0, %c0_i32, %c0_i32_0 : i32, i32, i32
  }
}

</mosaic_0001>

<bundles_post_ra>
// kernel: diffusion_tts_forward.1
= control target key start
LH: loop header
LB: loop body
LE: loop exit
PB: predicated region body
PF: predicated region fallthrough
CT: control target
= control target key end

     0   :  { %s12731_s24 = smov 0   ;;  %s16229_s0 = inlined_call_operand.vmem [shape: f32[2,16,16], index: 0, kind: input, shape index: {}]   ;;  %s16230_s1 = inlined_call_operand.vmem [shape: f32[2,64,16], index: 1, kind: input, shape index: {}]   ;;  %s16231_s2 = inlined_call_operand.vmem [shape: f32[2,8,64,2], index: 2, kind: input, shape index: {}]   ;;  %s16232_s3 = inlined_call_operand.vmem [shape: f32[8,64,6], index: 3, kind: input, shape index: {}]   ;;  %s16233_s4 = inlined_call_operand.vmem [shape: bf16[8,64,64], index: 4, kind: input, shape index: {}]   ;;  %s16234_s5 = inlined_call_operand.vmem [shape: bf16[8,64,192], index: 5, kind: input, shape index: {}]   ;;  %s16235_s6 = inlined_call_operand.vmem [shape: f32[5,64,3], index: 6, kind: input, shape index: {}]   ;;  %s16236_s7 = inlined_call_operand.vmem [shape: bf16[5,192,64], index: 7, kind: input, shape index: {}]   ;;  %s16237_s8 = inlined_call_operand.vmem [shape: f32[5,192,1], index: 8, kind: input, shape index: {}]   ;;  %s16238_s9 = inlined_call_operand.vmem [shape: bf16[5,64,64], index: 9, kind: input, shape index: {}]   ;;  %s16239_s10 = inlined_call_operand.vmem [shape: bf16[5,4,16,16], index: 10, kind: input, shape index: {}]   ;;  %s16240_s11 = inlined_call_operand.vmem [shape: bf16[64,48], index: 11, kind: input, shape index: {}]   ;;  %s16241_s12 = inlined_call_operand.vmem [shape: bf16[64,128], index: 12, kind: input, shape index: {}]   ;;  %s16242_s13 = inlined_call_operand.vmem [shape: bf16[32,192], index: 13, kind: input, shape index: {}]   ;;  %s16243_s14 = inlined_call_operand.vmem [shape: f32[64,4], index: 14, kind: input, shape index: {}]   ;;  %s16244_s15 = inlined_call_operand.vmem [shape: f32[32,1], index: 15, kind: input, shape index: {}]   ;;  %s16245_s16 = inlined_call_operand.vmem [shape: f32[64,64], index: 16, kind: input, shape index: {}]   ;;  %s16246_s17 = inlined_call_operand.vmem [shape: f32[2,32,16], index: 17, kind: output, shape index: {}]  }
   0x1   :  { %16317 = sst [smem:[#allocation19_spill]] %s16229_s0 }
   0x2   :  { %16318 = sst [smem:[#allocation20_spill]] %s16230_s1 }
   0x3   :  { %16319 = sst [smem:[#allocation21_spill]] %s16244_s15 }
   0x4   :  { %16320 = sst [smem:[#allocation22_spill]] %s16245_s16 }
   0x5 LB: > { %16321 = sst [smem:[#allocation2_spill]] %s12489_s24  ;;  %s9565_s25 = sadd.s32 4294967295, %s12489_s24   ;;  %s12489_s24 = sphi %s12731_s24, %s27_s24  }
   0x6   : > { %p9569_p0 = scmp.ge.s32.totalorder %s12489_s24, 1  ;;  %p507_p1 = scmp.lt.s32.totalorder %s12489_s24, 3 }
   0x8   : > { %p508_p2 = pnand %p9569_p0, %p507_p1 }
   0xa   : > { %511 = sbr.rel (%p508_p2) target bundleno = 13207 (0x3397), region = 88 }
  0x11   : > { %p569_p3 = scmp.lt.s32.totalorder %s9565_s25, 1  ;;  %s16322_s16 = sld [smem:[#allocation22_spill]]  ;;  %v12782_v8 = vld [vmem:[%s16243_s14] sm:$0xff]  ;;  %v12787_v9 = vld [vmem:[%s16243_s14 + $0x8] sm:$0xff]  ;;  %v12792_v10 = vld [vmem:[%s16243_s14 + $0x10] sm:$0xff] }
  0x12   : > { %16331 = vst [vmem:[#allocation11_spill] sm:$0xff] %v12782_v8  ;;  %16332 = vst [vmem:[#allocation12_spill] sm:$0xff] %v12787_v9  ;;  %v12797_v11 = vld [vmem:[%s16243_s14 + $0x18] sm:$0xff]  ;;  %v12802_v12 = vld [vmem:[%s16243_s14 + $0x20] sm:$0xff]  ;;  %s16338_s1 = sld [smem:[#allocation19_spill]]  ;;  %s16339_s26 = sld [smem:[#allocation20_spill]] }
  0x13   : > { %s16460_s25 = smov (!%p569_p3, %s9565_s25), 1  ;;  %16333 = vst [vmem:[#allocation13_spill] sm:$0xff] %v12792_v10  ;;  %16334 = vst [vmem:[#allocation14_spill] sm:$0xff] %v12797_v11  ;;  %v12807_v13 = vld [vmem:[%s16243_s14 + $0x28] sm:$0xff]  ;;  %v12812_v14 = vld [vmem:[%s16243_s14 + $0x30] sm:$0xff]  ;;  %s12853_s15 = smov 0  }
  0x14   : > { %s10057_s22 = sshll.u32 %s16460_s25, 4  ;;  %s10058_s23 = sshll.u32 %s16460_s25, 6  ;;  %16335 = vst [vmem:[#allocation15_spill] sm:$0xff] %v12802_v12  ;;  %16336 = vst [vmem:[#allocation16_spill] sm:$0xff] %v12807_v13  ;;  %v12825_v15 = vld [vmem:[%s16243_s14 + $0x38] sm:$0xff] }
  0x15   : > { %16337 = vst [vmem:[#allocation17_spill] sm:$0xff] %v12812_v14  ;;  %16340 = vst [vmem:[#allocation18_spill] sm:$0xff] %v12825_v15  ;;  %s10059_s28 = sshll.u32 %s16460_s25, 9  ;;  %s10060_s29 = sshll.u32 %s16460_s25, 5 }
  0x16   : > { %s12830_s18 = scalar_lea.vmem %s16231_s2, %s10059_s28 }
  0x17   : > { %v12742_v0 = vld [vmem:[%s16322_s16] sm:$0xff]  ;;  %v12747_v1 = vld [vmem:[%s16322_s16 + $0x8] sm:$0xff]  ;;  %v12752_v2 = vld [vmem:[%s16322_s16 + $0x10] sm:$0xff] }
  0x18   : > { %16323 = vst [vmem:[#allocation3_spill] sm:$0xff] %v12742_v0  ;;  %16324 = vst [vmem:[#allocation4_spill] sm:$0xff] %v12747_v1  ;;  %v12757_v3 = vld [vmem:[%s16322_s16 + $0x18] sm:$0xff]  ;;  %v12762_v4 = vld [vmem:[%s16322_s16 + $0x20] sm:$0xff]  ;;  %s12817_s20 = scalar_lea.vmem %s16338_s1, %s10057_s22  ;;  %s578_s27 = scalar_lea.vmem %s16339_s26, %s10058_s23 }
  0x19   : > { %16325 = vst [vmem:[#allocation5_spill] sm:$0xff] %v12752_v2  ;;  %16326 = vst [vmem:[#allocation6_spill] sm:$0xff] %v12757_v3  ;;  %v12767_v5 = vld [vmem:[%s16322_s16 + $0x28] sm:$0xff]  ;;  %v12772_v6 = vld [vmem:[%s16322_s16 + $0x30] sm:$0xff] }
  0x1a   : > { %16327 = vst [vmem:[#allocation7_spill] sm:$0xff] %v12762_v4  ;;  %16328 = vst [vmem:[#allocation8_spill] sm:$0xff] %v12767_v5  ;;  %v12777_v7 = vld [vmem:[%s16322_s16 + $0x38] sm:$0xff]  ;;  %v606_v16 = vld [vmem:[%s578_s27] sm:$0xff]   ;;  %s12835_s16 = scalar_lea.vmem %s16246_s17, %s10060_s29 }
  0x1b   : > { %16329 = vst [vmem:[#allocation9_spill] sm:$0xff] %v12772_v6  ;;  %16330 = vst [vmem:[#allocation10_spill] sm:$0xff] %v12777_v7  ;;  %v607_v17 = vld [vmem:[%s578_s27 + $0x8] sm:$0xff]   ;;  %v608_v18 = vld [vmem:[%s578_s27 + $0x10] sm:$0xff]  }
  0x1c   : > { %v609_v19 = vld [vmem:[%s578_s27 + $0x18] sm:$0xff]   ;;  %v610_v20 = vld [vmem:[%s578_s27 + $0x20] sm:$0xff]   ;;  %v611_v21 = vld [vmem:[%s578_s27 + $0x28] sm:$0xff]  }
  0x1d   : > { %v612_v22 = vld [vmem:[%s578_s27 + $0x30] sm:$0xff]   ;;  %v613_v23 = vld [vmem:[%s578_s27 + $0x38] sm:$0xff]  }
  0x1e LB: >> { %vm647_vm0 = vcmask 130048   ;;  %v672_v25 = vmul.f32 %v12521_v16, %v12521_v16  ;;  %v673_v26 = vmul.f32 %v12517_v17, %v12517_v17  ;;  %v674_v31 = vmul.f32 %v12513_v18, %v12513_v18  ;;  %s10063_s24 = smul.u32 96, %s12525_s15  ;;  %s12600_s21 = smov 1   ;;  %v12517_v17 = vphi %v607_v17, %v16376_v17   ;;  %v12513_v18 = vphi %v608_v18, %v16375_v18   ;;  %v12509_v19 = vphi %v609_v19, %v16374_v19   ;;  %v12505_v20 = vphi %v610_v20, %v16373_v20   ;;  %v12501_v21 = vphi %v611_v21, %v16372_v21   ;;  %v12497_v22 = vphi %v612_v22, %v16371_v22   ;;  %v12493_v23 = vphi %v613_v23, %v16370_v23   ;;  %s12525_s15 = sphi %s12853_s15, %s619_s15   ;;  %v12521_v16 = vphi %v606_v16, %v16377_v16  }
  0x1f   : >> { %v16347_v0 = vld [vmem:[#allocation3_spill] sm:$0xff]  ;;  %v648_v24 = vsel %vm647_vm0, %v12521_v16, 0.0  ;;  %v651_v28 = vsel %vm647_vm0, %v12517_v17, 0.0  ;;  %v654_v30 = vsel %vm647_vm0, %v12513_v18, 0.0  ;;  %v657_v32 = vsel %vm647_vm0, %v12509_v19, 0.0  ;;  %s12995_s26 = sshll.u32 %s12525_s15, 6 }
  0x20   : >> { %v16341_v2 = vld [vmem:[#allocation5_spill] sm:$0xff]  ;;  %v16342_v3 = vld [vmem:[#allocation6_spill] sm:$0xff]  ;;  %649 = vadd.xlane.f32.xlu0 %v648_v24  ;;  %v680_v27 = vsel %vm647_vm0, %v672_v25, 0.0  ;;  %v683_v29 = vsel %vm647_vm0, %v673_v26, 0.0  ;;  %v675_v33 = vmul.f32 %v12509_v19, %v12509_v19  ;;  %v686_v34 = vsel %vm647_vm0, %v674_v31, 0.0  ;;  %s12954_s1 = scalar_lea.vmem %s16236_s7, %s10063_s24  ;;  %s13002_s29 = scalar_lea.vmem %s16232_s3, %s12995_s26 }
  0x21   : >> { %v16343_v4 = vld [vmem:[#allocation7_spill] sm:$0xff]  ;;  %v16344_v5 = vld [vmem:[#allocation8_spill] sm:$0xff]  ;;  %681 = vadd.xlane.f32.xlu1 %v680_v27  ;;  %v660_v36 = vsel %vm647_vm0, %v12505_v20, 0.0  ;;  %v676_v37 = vmul.f32 %v12505_v20, %v12505_v20  ;;  %v663_v38 = vsel %vm647_vm0, %v12501_v21, 0.0  ;;  %v677_v39 = vmul.f32 %v12501_v21, %v12501_v21  ;;  %s13070_s0 = sshll.u32 %s12525_s15, 5  ;;  %s13232_s24 = scalar_lea.vmem %s12830_s18, %s12995_s26 }
  0x22   : >> { %v16345_v6 = vld [vmem:[#allocation9_spill] sm:$0xff]  ;;  %v16346_v7 = vld [vmem:[#allocation10_spill] sm:$0xff]  ;;  %v689_v35 = vsel %vm647_vm0, %v675_v33, 0.0  ;;  %v666_v42 = vsel %vm647_vm0, %v12497_v22, 0.0  ;;  %v678_v43 = vmul.f32 %v12497_v22, %v12497_v22  ;;  %v669_v44 = vsel %vm647_vm0, %v12493_v23, 0.0  ;;  %s13076_s19 = scalar_lea.vmem %s16233_s4, %s13070_s0  ;;  %s12605_s25 = smov 16  }
  0x23   : >> { %v692_v40 = vsel %vm647_vm0, %v676_v37, 0.0  ;;  %v695_v41 = vsel %vm647_vm0, %v677_v39, 0.0  ;;  %v679_v45 = vmul.f32 %v12493_v23, %v12493_v23  ;;  %vm713_vm1 = vcmask 523264   ;;  %s12606_s23 = smov 113   ;;  %s12607_s27 = smov 127  }
  0x24   : >> { %652 = vadd.xlane.f32.xlu0 %v651_v28  ;;  %v698_v46 = vsel %vm647_vm0, %v678_v43, 0.0  ;;  %10396 = vmatprep.mubr.msk.f32.mxu1 %vm713_vm1, %v16347_v0  ;;  %vm704_vm2 = vcmask 7168   ;;  %vm1874_vm3 = vcmask 1047680   ;;  %s13459_s22 = scalar_lea.vmem %s16234_s5, %s12995_s26  ;;  %vm12610_vm8 = vmmov 0   ;;  %s13820_s28 = scalar_lea.vmem %s16239_s10, %s13070_s0 }
  0x25   : >> { %684 = vadd.xlane.f32.xlu1 %v683_v29  ;;  %v701_v47 = vsel %vm647_vm0, %v679_v45, 0.0  ;;  %10440 = vmatprep.mubr.msk.f32.mxu0 %vm713_vm1, %v16347_v0 }
  0x28   : >> { %655 = vadd.xlane.f32.xlu0 %v654_v30 }
  0x29   : >> { %658 = vadd.xlane.f32.xlu1 %v657_v32 }
  0x2c   : >> { %687 = vadd.xlane.f32.xlu0 %v686_v34 }
  0x2d   : >> { %690 = vadd.xlane.f32.xlu1 %v689_v35 }
  0x30   : >> { %661 = vadd.xlane.f32.xlu0 %v660_v36  ;;  %v16253_v36 = vmov 0  }
  0x31   : >> { %664 = vadd.xlane.f32.xlu1 %v663_v38  ;;  %11320 = vset.pattern.permute.xlu0 %v16253_v36 }
  0x32   : >> { %11321 = vset.pattern.permute.xlu1 %v16253_v36 }
  0x34   : >> { %693 = vadd.xlane.f32.xlu0 %v692_v40 }
  0x35   : >> { %696 = vadd.xlane.f32.xlu1 %v695_v41 }
  0x38   : >> { %667 = vadd.xlane.f32.xlu0 %v666_v42 }
  0x39   : >> { %670 = vadd.xlane.f32.xlu1 %v669_v44 }
  0x3c   : >> { %699 = vadd.xlane.f32.xlu0 %v698_v46 }
  0x3d   : >> { %702 = vadd.xlane.f32.xlu1 %v701_v47 }
  0xad   : >> { %v650_v48 = vpop.xlane.xlu0 %649 }
  0xae   : >> { %v682_v49 = vpop.xlane.xlu1 %681 }
  0xaf   : >> { %v705_v52 = vsel %vm704_vm2, %v650_v48, %v682_v49 }
  0xb1   : >> { %v653_v50 = vpop.xlane.xlu0 %652 }
  0xb2   : >> { %v685_v51 = vpop.xlane.xlu1 %684 }
  0xb3   : >> { %v706_v53 = vsel %vm704_vm2, %v653_v50, %v685_v51 }
  0xb4   : >> { %v10910_v55 = vpack.c.bf16 %v706_v53, %v705_v52  ;;  %v13007_v53 = vld [vmem:[%s13002_s29] sm:$0xff] }
  0xb5   : >> { %v656_v54 = vpop.xlane.xlu0 %655 }
  0xb6   : >> { %10911 = vmatprep.subr.bf16.mxu1 %v10910_v55  ;;  %v659_v56 = vpop.xlane.xlu1 %658 }
  0xb7   : >> { %10913 = vmatpush3.bf16.msra.mxu1 %v10910_v55  ;;  %v13019_v55 = vld [vmem:[%s13002_s29 + $0x8] sm:$0xff] }
  0xb9   : >> { %v688_v57 = vpop.xlane.xlu0 %687 }
  0xba   : >> { %v691_v58 = vpop.xlane.xlu1 %690  ;;  %v707_v59 = vsel %vm704_vm2, %v656_v54, %v688_v57  ;;  %v13014_v54 = vld [vmem:[%s13002_s29 + $0x18] sm:$0xff]  ;;  %v16251_v57 = vmov 1  }
  0xbb   : >> { %v708_v60 = vsel %vm704_vm2, %v659_v56, %v691_v58  ;;  %v13024_v56 = vld [vmem:[%s13002_s29 + $0x28] sm:$0xff]  ;;  %v13030_v58 = vld [vmem:[%s13002_s29 + $0x30] sm:$0xff] }
  0xbc   : >> { %v10914_v61 = vpack.c.bf16 %v708_v60, %v707_v59  ;;  %v13038_v59 = vld [vmem:[%s13002_s29 + $0x10] sm:$0xff]  ;;  %v13047_v60 = vld [vmem:[%s13002_s29 + $0x20] sm:$0xff] }
  0xbd   : >> { %v662_v62 = vpop.xlane.xlu0 %661 }
  0xbe   : >> { %10915 = vmatprep.subr.bf16.mxu1 %v10914_v61  ;;  %v665_v63 = vpop.xlane.xlu1 %664 }
  0xbf   : >> { %10917 = vmatpush3.bf16.msra.mxu1 %v10914_v61  ;;  %v13054_v61 = vld [vmem:[%s13002_s29 + $0x38] sm:$0xff] }
  0xc1   : >> { %v694_v24 = vpop.xlane.xlu0 %693 }
  0xc2   : >> { %v697_v25 = vpop.xlane.xlu1 %696  ;;  %v709_v26 = vsel %vm704_vm2, %v662_v62, %v694_v24 }
  0xc3   : >> { %v710_v27 = vsel %vm704_vm2, %v665_v63, %v697_v25 }
  0xc4   : >> { %v10918_v28 = vpack.c.bf16 %v710_v27, %v709_v26 }
  0xc5   : >> { %v668_v29 = vpop.xlane.xlu0 %667 }
  0xc6   : >> { %10919 = vmatprep.subr.bf16.mxu1 %v10918_v28  ;;  %v671_v30 = vpop.xlane.xlu1 %670 }
  0xc7   : >> { %10921 = vmatpush3.bf16.msra.mxu1 %v10918_v28 }
  0xc9   : >> { %v700_v31 = vpop.xlane.xlu0 %699 }
  0xca   : >> { %v703_v32 = vpop.xlane.xlu1 %702  ;;  %v711_v33 = vsel %vm704_vm2, %v668_v29, %v700_v31 }
  0xcb   : >> { %v712_v34 = vsel %vm704_vm2, %v671_v30, %v703_v32 }
  0xcc   : >> { %v10922_v35 = vpack.c.bf16 %v712_v34, %v711_v33 }
  0xce   : >> { %10923 = vmatprep.subr.bf16.mxu1 %v10922_v35 }
  0xcf   : >> { %10925 = vmatpush3.bf16.msra.mxu1 %v10922_v35 }
  0xd2   : >> { %10397 = vmatmul.mubr.msk.f32.vlgmr.msra.gmra.mrb[0].mxu1 %vm713_vm1, %v12747_v1 }
  0xd3   : >> { %10399 = vmatprep.mubr.msk.f32.mxu1 %vm713_vm1, %v16341_v2 }
  0xd6   : >> { %10400 = vmatmul.mubr.msk.f32.gmra.mrb[2].mxu1 %vm713_vm1, %v16342_v3 }
  0xd7   : >> { %10402 = vmatprep.mubr.msk.f32.mxu1 %vm713_vm1, %v16343_v4 }
  0xda   : >> { %10403 = vmatmul.mubr.msk.f32.gmra.mrb[4].mxu1 %vm713_vm1, %v16344_v5 }
  0xdb   : >> { %10405 = vmatprep.mubr.msk.f32.mxu1 %vm713_vm1, %v16345_v6 }
  0xde   : >> { %10406 = vmatmul.mubr.msk.f32.gmra.mrb[6].mxu1 %vm713_vm1, %v16346_v7 }
 0x1a5   : >> { %v12956_v37 = vpop.f32.mrb[0].mxu1 }
 0x1a6   : >> { %v844_v38 = vmul.f32 %v12956_v37, %v12956_v37  ;;  %v12960_v39 = vpop.f32.mrb[1].mxu1 }
 0x1a7   : >> { %v843_v40 = vmul.f32 %v12960_v39, %v12960_v39 }
 0x1a8   : >> { %861 = vrot.lane.b32.xlu1 %v844_v38, %s12600_s21 }
 0x1a9   : >> { %859 = vrot.lane.b32.xlu0 %v843_v40, %s12600_s21  ;;  %v12966_v41 = vpop.f32.mrb[2].mxu1 }
 0x1aa   : >> { %v846_v42 = vmul.f32 %v12966_v41, %v12966_v41  ;;  %v12970_v43 = vpop.f32.mrb[3].mxu1 }
 0x1ab   : >> { %v845_v45 = vmul.f32 %v12970_v43, %v12970_v43 }
 0x1ac   : >> { %865 = vrot.lane.b32.xlu1 %v846_v42, %s12600_s21 }
 0x1ad   : >> { %v12973_v44 = vpop.f32.mrb[4].mxu1 }
 0x1ae   : >> { %v12977_v46 = vpop.f32.mrb[5].mxu1  ;;  %v848_v48 = vmul.f32 %v12973_v44, %v12973_v44 }
 0x1af   : >> { %v847_v47 = vmul.f32 %v12977_v46, %v12977_v46 }
 0x1b0   : >> { %863 = vrot.lane.b32.xlu1 %v845_v45, %s12600_s21 }
 0x1b1   : >> { %867 = vrot.lane.b32.xlu0 %v847_v47, %s12600_s21  ;;  %v12985_v49 = vpop.f32.mrb[6].mxu1 }
 0x1b2   : >> { %v12987_v50 = vpop.f32.mrb[7].mxu1  ;;  %v850_v52 = vmul.f32 %v12985_v49, %v12985_v49 }
 0x1b3   : >> { %v849_v51 = vmul.f32 %v12987_v50, %v12987_v50 }
 0x1b4   : >> { %869 = vrot.lane.b32.xlu1 %v848_v48, %s12600_s21 }
 0x1b5   : >> { %871 = vrot.lane.b32.xlu0 %v849_v51, %s12600_s21 }
 0x1b8   : >> { %873 = vrot.lane.b32.xlu1 %v850_v52, %s12600_s21 }
 0x1b9   : >> { %893 = vperm.xlu0 %11320, %v12960_v39  }
 0x1bc   : >> { %898 = vperm.xlu1 %11321, %v12956_v37  }
 0x1bd   : >> { %1005 = vperm.xlu0 %11320, %v13007_v53  }
 0x1c0   : >> { %903 = vperm.xlu1 %11321, %v12970_v43  }
 0x1c1   : >> { %913 = vperm.xlu0 %11320, %v12977_v46  }
 0x1c4   : >> { %908 = vperm.xlu1 %11321, %v12966_v41  }
 0x1c5   : >> { %1020 = vperm.xlu0 %11320, %v13014_v54  }
 0x1c8   : >> { %1010 = vperm.xlu1 %11321, %v13019_v55  }
 0x1c9   : >> { %923 = vperm.xlu0 %11320, %v12987_v50  }
 0x1cc   : >> { %11322 = vset.pattern.permute.xlu1 %v16251_v57 }
 0x1cd   : >> { %1052 = vperm.xlu1 %11322, %v13007_v53   ;;  %1030 = vperm.xlu0 %11320, %v13024_v56  }
 0x1d1   : >> { %1056 = vperm.xlu1 %11322, %v13019_v55   ;;  %1035 = vperm.xlu0 %11320, %v13030_v58  }
 0x1d5   : >> { %11323 = vset.pattern.permute.xlu1 %v16253_v36  ;;  %11328 = vset.pattern.permute.xlu0 %v16251_v57 }
 0x1d6   : >> { %918 = vperm.xlu1 %11323, %v12973_v44  }
 0x1da   : >> { %1015 = vperm.xlu1 %11323, %v13038_v59  }
 0x1de   : >> { %11324 = vset.pattern.permute.xlu1 %v16251_v57 }
 0x1df   : >> { %1060 = vperm.xlu1 %11324, %v13038_v59  }
 0x1e3   : >> { %1064 = vperm.xlu1 %11324, %v13014_v54  }
 0x1e7   : >> { %11325 = vset.pattern.permute.xlu1 %v16253_v36 }
 0x1e8   : >> { %928 = vperm.xlu1 %11325, %v12985_v49  }
 0x1ec   : >> { %1025 = vperm.xlu1 %11325, %v13047_v60  }
 0x1f0   : >> { %11326 = vset.pattern.permute.xlu1 %v16251_v57 }
 0x1f1   : >> { %1068 = vperm.xlu1 %11326, %v13047_v60  }
 0x1f5   : >> { %1072 = vperm.xlu1 %11326, %v13024_v56  }
 0x1f9   : >> { %11327 = vset.pattern.permute.xlu1 %v16253_v36 }
 0x1fa   : >> { %1040 = vperm.xlu1 %11327, %v13054_v61  }
 0x1fe   : >> { %11329 = vset.pattern.permute.xlu1 %v16251_v57 }
 0x21a   : >> { %v862_v62 = vpop.permute.xlu1 %861 }
 0x21b   : >> { %v884_v63 = vsub.f32 %v12956_v37, %v862_v62  ;;  %v860_v24 = vpop.permute.xlu0 %859 }
 0x21c   : >> { %v883_v25 = vsub.f32 %v12960_v39, %v860_v24 }
 0x21d   : >> { %v940_v26 = vadd.f32 1e-05, %v884_v63 }
 0x21e   : >> { %v939_v27 = vadd.f32 1e-05, %v883_v25  ;;  %v866_v28 = vpop.permute.xlu1 %865 }
 0x21f   : >> { %11484 = vrsqrt.f32 %v940_v26  ;;  %v886_v29 = vsub.f32 %v12966_v41, %v866_v28  ;;  %v11452_v26 = vld [vmem:[%s13076_s19] sm:$0xff]  }
 0x220   : >> { %11486 = vrsqrt.f32 %v939_v27  ;;  %10416 = vmatprep.mubr.msk.bf16.mxu1 %vm713_vm1, %v11452_v26 }
 0x221   : >> { %v942_v30 = vadd.f32 1e-05, %v886_v29 }
 0x222   : >> { %v864_v31 = vpop.permute.xlu1 %863 }
 0x223   : >> { %11488 = vrsqrt.f32 %v942_v30  ;;  %v885_v32 = vsub.f32 %v12970_v43, %v864_v31  ;;  %v868_v33 = vpop.permute.xlu0 %867  ;;  %v16249_v30 = vmov 2  }
 0x224   : >> { %v887_v34 = vsub.f32 %v12977_v46, %v868_v33 }
 0x225   : >> { %v941_v35 = vadd.f32 1e-05, %v885_v32 }
 0x226   : >> { %v943_v37 = vadd.f32 1e-05, %v887_v34  ;;  %v870_v38 = vpop.permute.xlu1 %869 }
 0x227   : >> { %11490 = vrsqrt.f32 %v941_v35  ;;  %v888_v39 = vsub.f32 %v12973_v44, %v870_v38  ;;  %v872_v40 = vpop.permute.xlu0 %871 }
 0x228   : >> { %v889_v42 = vsub.f32 %v12987_v50, %v872_v40  ;;  %11492 = vrsqrt.f32 %v943_v37 }
 0x229   : >> { %v11485_v45 = vpop.eup %11484  ;;  %v944_v41 = vadd.f32 1e-05, %v888_v39 }
 0x22a   : >> { %v11487_v47 = vpop.eup %11486  ;;  %v945_v48 = vadd.f32 1e-05, %v889_v42  ;;  %v874_v51 = vpop.permute.xlu1 %873  ;;  %962 = vperm.xlu0 %11328, %v11485_v45  }
 0x22b   : >> { %11494 = vrsqrt.f32 %v944_v41  ;;  %v890_v43 = vsub.f32 %v12985_v49, %v874_v51  ;;  %957 = vperm.xlu1 %11329, %v11487_v47  }
 0x22c   : >> { %11496 = vrsqrt.f32 %v945_v48 }
 0x22d   : >> { %v11489_v46 = vpop.eup %11488  ;;  %v946_v52 = vadd.f32 1e-05, %v890_v43 }
 0x22e   : >> { %972 = vperm.xlu0 %11328, %v11489_v46  }
 0x22f   : >> { %11498 = vrsqrt.f32 %v946_v52 }
 0x231   : >> { %v11491_v44 = vpop.eup %11490 }
 0x232   : >> { %967 = vperm.xlu1 %11329, %v11491_v44   ;;  %v11493_v50 = vpop.eup %11492 }
 0x235   : >> { %v11495_v62 = vpop.eup %11494 }
 0x236   : >> { %977 = vperm.xlu1 %11329, %v11493_v50   ;;  %982 = vperm.xlu0 %11328, %v11495_v62   ;;  %v11497_v63 = vpop.eup %11496 }
 0x238   : >> { %v894_v34 = vpop.permute.xlu0 %893 }
 0x239   : >> { %v11499_v24 = vpop.eup %11498  ;;  %v931_v44 = vsub.f32 %v12521_v16, %v894_v34 }
 0x23a   : >> { %992 = vperm.xlu0 %11328, %v11499_v24   ;;  %987 = vperm.xlu1 %11329, %v11497_v63  }
 0x23b   : >> { %v899_v49 = vpop.permute.xlu1 %898 }
 0x23c   : >> { %v1006_v37 = vpop.permute.xlu0 %1005  ;;  %v932_v52 = vsub.f32 %v12517_v17, %v899_v49 }
 0x23e   : >> { %1080 = vperm.xlu0 %11328, %v13054_v61   ;;  %1076 = vperm.xlu1 %11329, %v13030_v58  }
 0x23f   : >> { %v904_v25 = vpop.permute.xlu1 %903 }
 0x240   : >> { %v914_v39 = vpop.permute.xlu0 %913  ;;  %v933_v13 = vsub.f32 %v12513_v18, %v904_v25 }
 0x242   : >> { %11330 = vset.pattern.permute.xlu1 %v16249_v30  ;;  %11331 = vset.pattern.permute.xlu0 %v16249_v30 }
 0x243   : >> { %v909_v27 = vpop.permute.xlu1 %908  ;;  %1163 = vperm.xlu1 %11330, %v13007_v53   ;;  %1171 = vperm.xlu0 %11331, %v13038_v59  }
 0x244   : >> { %v1021_v45 = vpop.permute.xlu0 %1020  ;;  %v934_v26 = vsub.f32 %v12509_v19, %v909_v27 }
 0x247   : >> { %v1011_v28 = vpop.permute.xlu1 %1010  ;;  %1167 = vperm.xlu1 %11330, %v13019_v55   ;;  %1183 = vperm.xlu0 %11331, %v13024_v56  }
 0x248   : >> { %v924_v47 = vpop.permute.xlu0 %923 }
 0x24b   : >> { %1175 = vperm.xlu1 %11330, %v13014_v54   ;;  %1191 = vperm.xlu0 %11331, %v13054_v61  }
 0x24c   : >> { %v1053_v29 = vpop.permute.xlu1 %1052  ;;  %v1031_v48 = vpop.permute.xlu0 %1030 }
 0x24f   : >> { %1179 = vperm.xlu1 %11330, %v13047_v60  }
 0x250   : >> { %v1057_v31 = vpop.permute.xlu1 %1056  ;;  %v1036_v46 = vpop.permute.xlu0 %1035 }
 0x253   : >> { %1187 = vperm.xlu1 %11330, %v13030_v58  }
 0x255   : >> { %v919_v32 = vpop.permute.xlu1 %918 }
 0x257   : >> { %11332 = vset.pattern.permute.xlu1 %v16253_v36 }
 0x259   : >> { %v1016_v33 = vpop.permute.xlu1 %1015 }
 0x25e   : >> { %v1061_v35 = vpop.permute.xlu1 %1060 }
 0x262   : >> { %v1065_v38 = vpop.permute.xlu1 %1064 }
 0x267   : >> { %v929_v40 = vpop.permute.xlu1 %928 }
 0x26b   : >> { %v1026_v42 = vpop.permute.xlu1 %1025 }
 0x270   : >> { %v1069_v41 = vpop.permute.xlu1 %1068 }
 0x274   : >> { %v1073_v51 = vpop.permute.xlu1 %1072 }
 0x279   : >> { %v1041_v43 = vpop.permute.xlu1 %1040 }
 0x2a9   : >> { %v963_v50 = vpop.permute.xlu0 %962 }
 0x2aa   : >> { %v996_v62 = vmul.f32 %v963_v50, %v932_v52  ;;  %v958_v63 = vpop.permute.xlu1 %957 }
 0x2ab   : >> { %v995_v24 = vmul.f32 %v958_v63, %v931_v44 }
 0x2ac   : >> { %v1044_v30 = vmul.f32 %v1011_v28, %v996_v62  ;;  %v935_v28 = vsub.f32 %v12505_v20, %v914_v39 }
 0x2ad   : >> { %v1043_v57 = vmul.f32 %v1006_v37, %v995_v24  ;;  %v973_v36 = vpop.permute.xlu0 %972 }
 0x2ae   : >> { %v13094_v14 = vadd.f32 %v1057_v31, %v1044_v30  ;;  %v998_v15 = vmul.f32 %v973_v36, %v934_v26  ;;  %v936_v30 = vsub.f32 %v12501_v21, %v919_v32 }
 0x2af   : >> { %v13096_v12 = vadd.f32 %v1053_v29, %v1043_v57 }
 0x2b0   : >> { %v9588_v49 = vmul.f32 -1.442695, %v13094_v14  ;;  %v1046_v10 = vmul.f32 %v1021_v45, %v998_v15  ;;  %v937_v45 = vsub.f32 %v12497_v22, %v924_v47 }
 0x2b1   : >> { %v9587_v34 = vmul.f32 -1.442695, %v13096_v12  ;;  %v968_v52 = vpop.permute.xlu1 %967 }
 0x2b2   : >> { %11500 = vpow2.f32 %v9588_v49  ;;  %v13101_v44 = vadd.f32 %v1065_v38, %v1046_v10  ;;  %v997_v27 = vmul.f32 %v968_v52, %v933_v13  ;;  %v938_v13 = vsub.f32 %v12493_v23, %v929_v40 }
 0x2b3   : >> { %11502 = vpow2.f32 %v9587_v34 }
 0x2b4   : >> { %v9590_v36 = vmul.f32 -1.442695, %v13101_v44  ;;  %v1045_v57 = vmul.f32 %v1016_v33, %v997_v27 }
 0x2b5   : >> { %v978_v29 = vpop.permute.xlu1 %977  ;;  %v983_v25 = vpop.permute.xlu0 %982 }
 0x2b6   : >> { %11504 = vpow2.f32 %v9590_v36  ;;  %v1085_v31 = vadd.f32 %v1061_v35, %v1045_v57  ;;  %v999_v15 = vmul.f32 %v978_v29, %v935_v28  ;;  %v1000_v37 = vmul.f32 %v983_v25, %v936_v30 }
 0x2b8   : >> { %v9589_v50 = vmul.f32 -1.442695, %v1085_v31  ;;  %v1047_v10 = vmul.f32 %v1026_v42, %v999_v15  ;;  %v1048_v38 = vmul.f32 %v1031_v48, %v1000_v37 }
 0x2b9   : >> { %v988_v62 = vpop.permute.xlu1 %987  ;;  %v993_v39 = vpop.permute.xlu0 %992 }
 0x2ba   : >> { %11506 = vpow2.f32 %v9589_v50  ;;  %v1087_v32 = vadd.f32 %v1069_v41, %v1047_v10  ;;  %v1088_v63 = vadd.f32 %v1073_v51, %v1048_v38  ;;  %v1001_v24 = vmul.f32 %v988_v62, %v937_v45 }
 0x2bb   : >> { %v1002_v33 = vmul.f32 %v993_v39, %v938_v13 }
 0x2bc   : >> { %v11501_v26 = vpop.eup %11500  ;;  %v9591_v49 = vmul.f32 -1.442695, %v1087_v32  ;;  %v1049_v34 = vmul.f32 %v1036_v46, %v1001_v24  ;;  %v9592_v27 = vmul.f32 -1.442695, %v1088_v63 }
 0x2bd   : >> { %v11503_v35 = vpop.eup %11502  ;;  %v1116_v52 = vadd.f32 1.0, %v11501_v26  ;;  %v1077_v28 = vpop.permute.xlu1 %1076  ;;  %v1050_v47 = vmul.f32 %v1041_v43, %v1002_v33 }
 0x2be   : >> { %v1081_v30 = vpop.permute.xlu0 %1080  ;;  %v1115_v42 = vadd.f32 1.0, %v11503_v35  ;;  %11508 = vpow2.f32 %v9591_v49  ;;  %v1089_v48 = vadd.f32 %v1077_v28, %v1049_v34 }
 0x2bf   : >> { %11510 = vrcp.f32 %v1116_v52  ;;  %v1090_v40 = vadd.f32 %v1081_v30, %v1050_v47 }
 0x2c0   : >> { %v11505_v36 = vpop.eup %11504  ;;  %11512 = vrcp.f32 %v1115_v42  ;;  %v9593_v41 = vmul.f32 -1.442695, %v1089_v48 }
 0x2c1   : >> { %v1118_v51 = vadd.f32 1.0, %v11505_v36  ;;  %11514 = vpow2.f32 %v9592_v27  ;;  %v9594_v57 = vmul.f32 -1.442695, %v1090_v40 }
 0x2c2   : >> { %11516 = vpow2.f32 %v9593_v41 }
 0x2c3   : >> { %11518 = vpow2.f32 %v9594_v57  ;;  %v16348_v57 = vmov 0  }
 0x2c4   : >> { %v11507_v29 = vpop.eup %11506  ;;  %11520 = vrcp.f32 %v1118_v51  ;;  %v11454_v51 = vld [vmem:[%s13076_s19 + $0x10] sm:$0xff]  }
 0x2c5   : >> { %v1117_v46 = vadd.f32 1.0, %v11507_v29 }
 0x2c7   : >> { %11522 = vrcp.f32 %v1117_v46 }
 0x2c8   : >> { %v11509_v25 = vpop.eup %11508 }
 0x2c9   : >> { %v11511_v43 = vpop.eup %11510  ;;  %v1119_v15 = vadd.f32 1.0, %v11509_v25 }
 0x2ca   : >> { %v11513_v37 = vpop.eup %11512  ;;  %v1140_v45 = vmul.f32 %v11511_v43, %v13094_v14 }
 0x2cb   : >> { %v11515_v50 = vpop.eup %11514  ;;  %11524 = vrcp.f32 %v1119_v15  ;;  %v1139_v10 = vmul.f32 %v11513_v37, %v13096_v12 }
 0x2cc   : >> { %v11517_v38 = vpop.eup %11516  ;;  %v1120_v13 = vadd.f32 1.0, %v11515_v50 }
 0x2cd   : >> { %v1121_v62 = vadd.f32 1.0, %v11517_v38  ;;  %v1158_v39 = vpack.c.bf16 %v1140_v45, %v1139_v10  ;;  %v11519_v24 = vpop.eup %11518 }
 0x2ce   : >> { %11526 = vrcp.f32 %v1120_v13  ;;  %v11521_v33 = vpop.eup %11520  ;;  %v1122_v26 = vadd.f32 1.0, %v11519_v24 }
 0x2cf   : >> { %11528 = vrcp.f32 %v1121_v62  ;;  %10408 = vmatprep.subr.bf16.mxu1 %v1158_v39  ;;  %v1142_v14 = vmul.f32 %v11521_v33, %v13101_v44  ;;  %v11453_v44 = vld [vmem:[%s13076_s19 + $0x8] sm:$0xff]  }
 0x2d0   : >> { %10409 = vmatpush3.bf16.msra.mxu1 %v1158_v39  ;;  %11530 = vrcp.f32 %v1122_v26 }
 0x2d1   : >> { %v11523_v49 = vpop.eup %11522 }
 0x2d2   : >> { %v1141_v34 = vmul.f32 %v11523_v49, %v1085_v31 }
 0x2d4   : >> { %v1159_v35 = vpack.c.bf16 %v1142_v14, %v1141_v34 }
 0x2d5   : >> { %v11525_v52 = vpop.eup %11524 }
 0x2d6   : >> { %10410 = vmatprep.subr.bf16.mxu1 %v1159_v35  ;;  %v1143_v12 = vmul.f32 %v11525_v52, %v1087_v32  ;;  %v11455_v32 = vld [vmem:[%s13076_s19 + $0x18] sm:$0xff]  }
 0x2d7   : >> { %10411 = vmatpush3.bf16.msra.mxu1 %v1159_v35 }
 0x2d8   : >> { %v11527_v27 = vpop.eup %11526 }
 0x2d9   : >> { %v11529_v28 = vpop.eup %11528  ;;  %v1144_v47 = vmul.f32 %v11527_v27, %v1088_v63  ;;  %v1164_v63 = vpop.permute.xlu1 %1163 }
 0x2da   : >> { %v1145_v30 = vmul.f32 %v11529_v28, %v1089_v48  ;;  %v11531_v42 = vpop.eup %11530 }
 0x2db   : >> { %v1160_v36 = vpack.c.bf16 %v1144_v47, %v1143_v12  ;;  %v1146_v41 = vmul.f32 %v11531_v42, %v1090_v40  ;;  %v1172_v40 = vpop.permute.xlu0 %1171 }
 0x2dd   : >> { %10412 = vmatprep.subr.bf16.mxu1 %v1160_v36  ;;  %v1161_v31 = vpack.c.bf16 %v1146_v41, %v1145_v30  ;;  %v1168_v48 = vpop.permute.xlu1 %1167 }
 0x2de   : >> { %10413 = vmatpush3.bf16.msra.mxu1 %v1160_v36 }
 0x2df   : >> { %10414 = vmatprep.subr.bf16.mxu1 %v1161_v31  ;;  %v1184_v28 = vpop.permute.xlu0 %1183 }
 0x2e1   : >> { %v1176_v29 = vpop.permute.xlu1 %1175 }
 0x2e2   : >> { %10415 = vmatpush3.bf16.msra.mxu1 %v1161_v31 }
 0x2e3   : >> { %2088 = vmatprep.subr.bf16.mxu1 %v16348_v57 }
 0x2e5   : >> { %10417 = vmatmul.mubr.msk.bf16.vlgmr.msra.gmra.mrb[8].mxu1 %vm713_vm1, %v11453_v44  ;;  %v1180_v38 = vpop.permute.xlu1 %1179  ;;  %v1192_v44 = vpop.permute.xlu0 %1191 }
 0x2e6   : >> { %10420 = vmatprep.mubr.msk.bf16.mxu1 %vm713_vm1, %v11454_v51 }
 0x2e9   : >> { %v1188_v14 = vpop.permute.xlu1 %1187 }
 0x2ed   : >> { %10421 = vmatmul.mubr.msk.bf16.gmra.mrb[12].mxu1 %vm713_vm1, %v11455_v32 }
 0x3b8   : >> { %v10418_v46 = vpop.f32.mrb[8].mxu1 }
 0x3b9   : >> { %v13118_v25 = vadd.f32 %v10418_v46, %v1172_v40  ;;  %v1260_v43 = vpop.f32.mrb[9].mxu1 }
 0x3ba   : >> { %v10419_v15 = vpop.f32.mrb[10].mxu1  ;;  %v13120_v37 = vadd.f32 %v1260_v43, %v1164_v63 }
 0x3bb   : >> { %v13122_v45 = vadd.f32 %v10419_v15, %v1176_v29  ;;  %v1263_v50 = vpop.f32.mrb[11].mxu1  ;;  %v1297_v10 = vsel %vm647_vm0, %v13118_v25, 0.0  ;;  %v1317_v24 = vmul.f32 %v13118_v25, %v13118_v25 }
 0x3bc   : >> { %1298 = vadd.xlane.f32.xlu1 %v1297_v10  ;;  %v13126_v13 = vadd.f32 %v1263_v50, %v1168_v48  ;;  %v1291_v39 = vsel %vm647_vm0, %v13120_v37, 0.0  ;;  %v1315_v34 = vmul.f32 %v13120_v37, %v13120_v37 }
 0x3bd   : >> { %v1300_v62 = vsel %vm647_vm0, %v13122_v45, 0.0  ;;  %v1329_v27 = vsel %vm647_vm0, %v1317_v24, 0.0  ;;  %v1318_v30 = vmul.f32 %v13122_v45, %v13122_v45 }
 0x3be   : >> { %1301 = vadd.xlane.f32.xlu0 %v1300_v62  ;;  %v1294_v49 = vsel %vm647_vm0, %v13126_v13, 0.0  ;;  %v1323_v47 = vsel %vm647_vm0, %v1315_v34, 0.0  ;;  %v1316_v31 = vmul.f32 %v13126_v13, %v13126_v13 }
 0x3bf   : >> { %v1332_v41 = vsel %vm647_vm0, %v1318_v30, 0.0 }
 0x3c0   : >> { %v10422_v33 = vpop.f32.mrb[12].mxu1  ;;  %1292 = vadd.xlane.f32.xlu1 %v1291_v39  ;;  %v1326_v48 = vsel %vm647_vm0, %v1316_v31, 0.0 }
 0x3c1   : >> { %v1276_v26 = vpop.f32.mrb[13].mxu1  ;;  %v13138_v52 = vadd.f32 %v10422_v33, %v1188_v14 }
 0x3c2   : >> { %v10423_v35 = vpop.f32.mrb[14].mxu1  ;;  %1295 = vadd.xlane.f32.xlu0 %v1294_v49  ;;  %v13144_v42 = vadd.f32 %v1276_v26, %v1180_v38 }
 0x3c3   : >> { %v1279_v12 = vpop.f32.mrb[15].mxu1  ;;  %v1309_v36 = vsel %vm647_vm0, %v13138_v52, 0.0  ;;  %v13155_v63 = vadd.f32 %v10423_v35, %v1192_v44  ;;  %v1321_v40 = vmul.f32 %v13138_v52, %v13138_v52 }
 0x3c4   : >> { %1330 = vadd.xlane.f32.xlu1 %v1329_v27  ;;  %v1303_v51 = vsel %vm647_vm0, %v13144_v42, 0.0  ;;  %v1319_v32 = vmul.f32 %v13144_v42, %v13144_v42  ;;  %v13161_v46 = vadd.f32 %v1279_v12, %v1184_v28 }
 0x3c5   : >> { %v1312_v43 = vsel %vm647_vm0, %v13155_v63, 0.0  ;;  %v1341_v15 = vsel %vm647_vm0, %v1321_v40, 0.0  ;;  %v1322_v62 = vmul.f32 %v13155_v63, %v13155_v63 }
 0x3c6   : >> { %1324 = vadd.xlane.f32.xlu0 %v1323_v47  ;;  %v1335_v29 = vsel %vm647_vm0, %v1319_v32, 0.0  ;;  %v1306_v50 = vsel %vm647_vm0, %v13161_v46, 0.0  ;;  %v1320_v10 = vmul.f32 %v13161_v46, %v13161_v46 }
 0x3c7   : >> { %v1344_v39 = vsel %vm647_vm0, %v1322_v62, 0.0 }
 0x3c8   : >> { %1310 = vadd.xlane.f32.xlu1 %v1309_v36  ;;  %v1338_v38 = vsel %vm647_vm0, %v1320_v10, 0.0 }
 0x3ca   : >> { %1333 = vadd.xlane.f32.xlu0 %v1332_v41 }
 0x3cc   : >> { %1304 = vadd.xlane.f32.xlu1 %v1303_v51 }
 0x3ce   : >> { %1327 = vadd.xlane.f32.xlu0 %v1326_v48 }
 0x3d0   : >> { %1336 = vadd.xlane.f32.xlu1 %v1335_v29 }
 0x3d2   : >> { %1313 = vadd.xlane.f32.xlu0 %v1312_v43 }
 0x3d4   : >> { %1342 = vadd.xlane.f32.xlu1 %v1341_v15 }
 0x3d6   : >> { %1307 = vadd.xlane.f32.xlu0 %v1306_v50 }
 0x3da   : >> { %1339 = vadd.xlane.f32.xlu0 %v1338_v38 }
 0x3de   : >> { %1345 = vadd.xlane.f32.xlu0 %v1344_v39 }
 0x449   : >> { %v1299_v24 = vpop.xlane.xlu1 %1298 }
 0x44b   : >> { %v1302_v33 = vpop.xlane.xlu0 %1301 }
 0x44d   : >> { %v1293_v26 = vpop.xlane.xlu1 %1292 }
 0x44f   : >> { %v1296_v49 = vpop.xlane.xlu0 %1295 }
 0x451   : >> { %v1331_v34 = vpop.xlane.xlu1 %1330 }
 0x452   : >> { %v1349_v31 = vsel %vm704_vm2, %v1299_v24, %v1331_v34  ;;  %v12603_v24 = vmov 4  }
 0x453   : >> { %v1325_v14 = vpop.xlane.xlu0 %1324  ;;  %11339 = vset.pattern.permute.xlu0 %v12603_v24 }
 0x454   : >> { %v1347_v28 = vsel %vm704_vm2, %v1293_v26, %v1325_v14 }
 0x455   : >> { %v1311_v35 = vpop.xlane.xlu1 %1310 }
 0x457   : >> { %v1334_v12 = vpop.xlane.xlu0 %1333 }
 0x458   : >> { %v1350_v47 = vsel %vm704_vm2, %v1302_v33, %v1334_v12 }
 0x459   : >> { %v1305_v36 = vpop.xlane.xlu1 %1304  ;;  %v10930_v44 = vpack.c.bf16 %v1350_v47, %v1349_v31 }
 0x45b   : >> { %v1328_v27 = vpop.xlane.xlu0 %1327 }
 0x45c   : >> { %v1348_v30 = vsel %vm704_vm2, %v1296_v49, %v1328_v27 }
 0x45d   : >> { %v10926_v41 = vpack.c.bf16 %v1348_v30, %v1347_v28  ;;  %v1337_v32 = vpop.xlane.xlu1 %1336 }
 0x45e   : >> { %v1351_v40 = vsel %vm704_vm2, %v1305_v36, %v1337_v32 }
 0x45f   : >> { %10927 = vmatprep.subr.bf16.mxu0 %v10926_v41  ;;  %v1314_v51 = vpop.xlane.xlu0 %1313 }
 0x460   : >> { %10929 = vmatpush3.bf16.msra.mxu0 %v10926_v41  ;;  %v639_v41 = vld [vmem:[%s13232_s24] sm:$0xff] }
 0x461   : >> { %10931 = vmatprep.subr.bf16.mxu0 %v10930_v44  ;;  %v1343_v15 = vpop.xlane.xlu1 %1342  ;;  %v1700_v31 = vadd.f32 1.0, %v639_v41 }
 0x462   : >> { %v1353_v38 = vsel %vm704_vm2, %v1311_v35, %v1343_v15  ;;  %v12604_v35 = vmov 3  }
 0x463   : >> { %v1308_v48 = vpop.xlane.xlu0 %1307 }
 0x464   : >> { %10933 = vmatpush3.bf16.msra.mxu0 %v10930_v44  ;;  %v640_v44 = vld [vmem:[%s13232_s24 + $0x8] sm:$0xff] }
 0x467   : >> { %v1340_v29 = vpop.xlane.xlu0 %1339 }
 0x468   : >> { %v1352_v43 = vsel %vm704_vm2, %v1308_v48, %v1340_v29  ;;  %v16349_v48 = vmov 1  }
 0x469   : >> { %v10934_v50 = vpack.c.bf16 %v1352_v43, %v1351_v40  ;;  %v643_v40 = vld [vmem:[%s13232_s24 + $0x20] sm:$0xff]  ;;  %v641_v43 = vld [vmem:[%s13232_s24 + $0x10] sm:$0xff] }
 0x46a   : >> { %v1702_v15 = vadd.f32 1.0, %v641_v43 }
 0x46b   : >> { %10935 = vmatprep.subr.bf16.mxu0 %v10934_v50  ;;  %v1346_v10 = vpop.xlane.xlu0 %1345 }
 0x46c   : >> { %v1354_v62 = vsel %vm704_vm2, %v1314_v51, %v1346_v10  ;;  %10937 = vmatpush3.bf16.msra.mxu0 %v10934_v50  ;;  %v1701_v51 = vadd.f32 1.0, %v640_v44  ;;  %v642_v50 = vld [vmem:[%s13232_s24 + $0x18] sm:$0xff] }
 0x46d   : >> { %v10938_v39 = vpack.c.bf16 %v1354_v62, %v1353_v38  ;;  %v1703_v10 = vadd.f32 1.0, %v642_v50  ;;  %v1704_v38 = vadd.f32 1.0, %v643_v40 }
 0x46f   : >> { %10939 = vmatprep.subr.bf16.mxu0 %v10938_v39 }
 0x470   : >> { %10941 = vmatpush3.bf16.msra.mxu0 %v10938_v39 }
 0x473   : >> { %10441 = vmatmul.mubr.msk.f32.vlgmr.msra.gmra.mrb[0].mxu0 %vm713_vm1, %v12747_v1 }
 0x474   : >> { %10443 = vmatprep.mubr.msk.f32.mxu0 %vm713_vm1, %v16341_v2 }
 0x477   : >> { %10444 = vmatmul.mubr.msk.f32.gmra.mrb[2].mxu0 %vm713_vm1, %v16342_v3 }
 0x478   : >> { %10446 = vmatprep.mubr.msk.f32.mxu0 %vm713_vm1, %v16343_v4 }
 0x47b   : >> { %10447 = vmatmul.mubr.msk.f32.gmra.mrb[4].mxu0 %vm713_vm1, %v16344_v5 }
 0x47c   : >> { %10449 = vmatprep.mubr.msk.f32.mxu0 %vm713_vm1, %v16345_v6 }
 0x47f   : >> { %10450 = vmatmul.mubr.msk.f32.gmra.mrb[6].mxu0 %vm713_vm1, %v16346_v7 }
 0x480   : >> { %10468 = vmatprep.mubr.msk.f32.mxu0 %vm713_vm1, %v16347_v0 }
 0x546   : >> { %v13199_v33 = vpop.f32.mrb[0].mxu0 }
 0x547   : >> { %v1461_v26 = vmul.f32 %v13199_v33, %v13199_v33  ;;  %v13203_v49 = vpop.f32.mrb[1].mxu0 }
 0x548   : >> { %1510 = vperm.xlu1 %11332, %v13203_v49  }
 0x549   : >> { %1478 = vrot.lane.b32.xlu0 %v1461_v26, %s12600_s21  ;;  %v645_v26 = vld [vmem:[%s13232_s24 + $0x30] sm:$0xff] }
 0x54a   : >> { %v13207_v34 = vpop.f32.mrb[2].mxu0 }
 0x54b   : >> { %v13209_v14 = vpop.f32.mrb[3].mxu0 }
 0x54c   : >> { %11333 = vset.pattern.permute.xlu1 %v12604_v35 }
 0x54d   : >> { %1625 = vperm.xlu1 %11333, %v13019_v55  }
 0x54e   : >> { %v13213_v12 = vpop.f32.mrb[4].mxu0 }
 0x54f   : >> { %v1465_v27 = vmul.f32 %v13213_v12, %v13213_v12  ;;  %v13217_v28 = vpop.f32.mrb[5].mxu0 }
 0x551   : >> { %11334 = vset.pattern.permute.xlu1 %v12603_v24  ;;  %1486 = vrot.lane.b32.xlu0 %v1465_v27, %s12600_s21  ;;  %v1706_v27 = vadd.f32 1.0, %v645_v26 }
 0x552   : >> { %1661 = vperm.xlu1 %11334, %v13007_v53   ;;  %v13222_v47 = vpop.f32.mrb[6].mxu0 }
 0x553   : >> { %v1467_v30 = vmul.f32 %v13222_v47, %v13222_v47  ;;  %v13226_v36 = vpop.f32.mrb[7].mxu0 }
 0x554   : >> { %v1466_v29 = vmul.f32 %v13226_v36, %v13226_v36 }
 0x555   : >> { %1490 = vrot.lane.b32.xlu0 %v1467_v30, %s12600_s21 }
 0x556   : >> { %1665 = vperm.xlu1 %11334, %v13019_v55   ;;  %v1460_v55 = vmul.f32 %v13203_v49, %v13203_v49 }
 0x559   : >> { %1673 = vperm.xlu0 %11339, %v13014_v54  }
 0x55a   : >> { %11335 = vset.pattern.permute.xlu1 %v12604_v35 }
 0x55b   : >> { %1629 = vperm.xlu1 %11335, %v13038_v59  }
 0x55d   : >> { %1681 = vperm.xlu0 %11339, %v13024_v56  }
 0x55f   : >> { %11336 = vset.pattern.permute.xlu1 %v16348_v57 }
 0x560   : >> { %1710 = vperm.xlu1 %11336, %v1700_v31  }
 0x561   : >> { %11345 = vset.pattern.permute.xlu0 %v12604_v35 }
 0x562   : >> { %1621 = vperm.xlu0 %11345, %v13007_v53   ;;  %v1463_v53 = vmul.f32 %v13207_v34, %v13207_v34 }
 0x564   : >> { %1715 = vperm.xlu1 %11336, %v1701_v51  }
 0x566   : >> { %1633 = vperm.xlu0 %11345, %v13014_v54   ;;  %v1462_v54 = vmul.f32 %v13209_v14, %v13209_v14 }
 0x568   : >> { %11337 = vset.pattern.permute.xlu1 %v12603_v24 }
 0x569   : >> { %1669 = vperm.xlu1 %11337, %v13038_v59   ;;  %v1464_v59 = vmul.f32 %v13217_v28, %v13217_v28 }
 0x56a   : >> { %1641 = vperm.xlu0 %11345, %v13024_v56   ;;  %v644_v56 = vld [vmem:[%s13232_s24 + $0x28] sm:$0xff] }
 0x56b   : >> { %v1705_v32 = vadd.f32 1.0, %v644_v56 }
 0x56d   : >> { %1476 = vrot.lane.b32.xlu1 %v1460_v55, %s12600_s21 }
 0x56e   : >> { %1645 = vperm.xlu0 %11345, %v13030_v58   ;;  %11338 = vset.pattern.permute.xlu1 %v16348_v57 }
 0x571   : >> { %1525 = vperm.xlu1 %11338, %v13207_v34  }
 0x572   : >> { %11347 = vset.pattern.permute.xlu0 %v16348_v57 }
 0x573   : >> { %1515 = vperm.xlu0 %11347, %v13199_v33  }
 0x575   : >> { %1482 = vrot.lane.b32.xlu1 %v1463_v53, %s12600_s21 }
 0x577   : >> { %1520 = vperm.xlu0 %11347, %v13209_v14  }
 0x579   : >> { %1480 = vrot.lane.b32.xlu1 %v1462_v54, %s12600_s21 }
 0x57b   : >> { %1530 = vperm.xlu0 %11347, %v13217_v28  }
 0x57d   : >> { %1535 = vperm.xlu1 %11338, %v13213_v12  }
 0x57f   : >> { %1540 = vperm.xlu0 %11347, %v13226_v36  }
 0x581   : >> { %1484 = vrot.lane.b32.xlu1 %v1464_v59, %s12600_s21 }
 0x582   : >> { %11340 = vset.pattern.permute.xlu1 %v16349_v48 }
 0x583   : >> { %1735 = vperm.xlu0 %11347, %v1705_v32  }
 0x585   : >> { %1758 = vperm.xlu1 %11340, %v639_v41  }
 0x587   : >> { %11351 = vset.pattern.permute.xlu0 %v16349_v48 }
 0x588   : >> { %1778 = vperm.xlu0 %11351, %v643_v40  }
 0x589   : >> { %1488 = vrot.lane.b32.xlu1 %v1466_v29, %s12600_s21 }
 0x58d   : >> { %1763 = vperm.xlu1 %11340, %v640_v44  }
 0x591   : >> { %11341 = vset.pattern.permute.xlu1 %v16348_v57 }
 0x592   : >> { %1545 = vperm.xlu1 %11341, %v13222_v47  }
 0x596   : >> { %11342 = vset.pattern.permute.xlu1 %v12604_v35 }
 0x597   : >> { %1637 = vperm.xlu1 %11342, %v13047_v60  }
 0x59b   : >> { %11343 = vset.pattern.permute.xlu1 %v16348_v57 }
 0x59c   : >> { %1720 = vperm.xlu1 %11343, %v1702_v15  }
 0x5a0   : >> { %1725 = vperm.xlu1 %11343, %v1703_v10  }
 0x5a4   : >> { %11344 = vset.pattern.permute.xlu1 %v12603_v24 }
 0x5a5   : >> { %1677 = vperm.xlu1 %11344, %v13047_v60  }
 0x5a9   : >> { %11346 = vset.pattern.permute.xlu1 %v16349_v48 }
 0x5aa   : >> { %1768 = vperm.xlu1 %11346, %v641_v43  }
 0x5ae   : >> { %1773 = vperm.xlu1 %11346, %v642_v50  }
 0x5b2   : >> { %11348 = vset.pattern.permute.xlu1 %v12604_v35 }
 0x5b3   : >> { %1649 = vperm.xlu1 %11348, %v13054_v61  }
 0x5b7   : >> { %11349 = vset.pattern.permute.xlu1 %v16348_v57 }
 0x5b8   : >> { %1730 = vperm.xlu1 %11349, %v1704_v38  }
 0x5bb   : >> { %v1479_v62 = vpop.permute.xlu0 %1478 }
 0x5bc   : >> { %11350 = vset.pattern.permute.xlu1 %v12603_v24  ;;  %v1501_v39 = vsub.f32 %v13199_v33, %v1479_v62 }
 0x5bd   : >> { %1685 = vperm.xlu1 %11350, %v13030_v58  }
 0x5be   : >> { %v1557_v60 = vadd.f32 1e-05, %v1501_v39 }
 0x5c0   : >> { %11532 = vrsqrt.f32 %v1557_v60 }
 0x5c1   : >> { %1689 = vperm.xlu1 %11350, %v13054_v61  }
 0x5c5   : >> { %11352 = vset.pattern.permute.xlu1 %v16349_v48 }
 0x5c6   : >> { %1783 = vperm.xlu1 %11352, %v644_v56   ;;  %v1487_v56 = vpop.permute.xlu0 %1486 }
 0x5c7   : >> { %v13294_v35 = vpop.permute.xlu1 %1510  ;;  %v1505_v43 = vsub.f32 %v13213_v12, %v1487_v56 }
 0x5c8   : >> { %v1548_v5 = vsub.f32 %v13120_v37, %v13294_v35 }
 0x5c9   : >> { %v1561_v39 = vadd.f32 1e-05, %v1505_v43 }
 0x5ca   : >> { %11353 = vset.pattern.permute.xlu1 %v16348_v57  ;;  %v11533_v24 = vpop.eup %11532  ;;  %v1491_v15 = vpop.permute.xlu0 %1490 }
 0x5cb   : >> { %1740 = vperm.xlu1 %11353, %v1706_v27  }
 0x5cc   : >> { %v13297_v30 = vpop.permute.xlu1 %1625 }
 0x5cf   : >> { %11354 = vset.pattern.permute.xlu1 %v16349_v48 }
 0x5d0   : >> { %1579 = vperm.xlu1 %11354, %v11533_v24  }
 0x5d1   : >> { %v13300_v58 = vpop.permute.xlu1 %1661 }
 0x5d5   : >> { %v13302_v61 = vpop.permute.xlu1 %1665 }
 0x5da   : >> { %v13304_v33 = vpop.permute.xlu1 %1629 }
 0x5df   : >> { %v13306_v41 = vpop.permute.xlu1 %1710 }
 0x5e3   : >> { %v13308_v31 = vpop.permute.xlu1 %1715 }
 0x5e8   : >> { %v13310_v44 = vpop.permute.xlu1 %1669 }
 0x5ec   : >> { %v1477_v51 = vpop.permute.xlu1 %1476 }
 0x5ed   : >> { %v1500_v55 = vsub.f32 %v13203_v49, %v1477_v51  ;;  %v1507_v49 = vsub.f32 %v13222_v47, %v1491_v15 }
 0x5ef   : >> { %v1556_v53 = vadd.f32 1e-05, %v1500_v55  ;;  %v1563_v60 = vadd.f32 1e-05, %v1507_v49 }
 0x5f0   : >> { %v13313_v54 = vpop.permute.xlu1 %1525 }
 0x5f1   : >> { %11534 = vrsqrt.f32 %v1556_v53 }
 0x5f4   : >> { %v1483_v59 = vpop.permute.xlu1 %1482 }
 0x5f5   : >> { %v1503_v32 = vsub.f32 %v13207_v34, %v1483_v59 }
 0x5f7   : >> { %v1559_v29 = vadd.f32 1e-05, %v1503_v32 }
 0x5f8   : >> { %v1481_v40 = vpop.permute.xlu1 %1480 }
 0x5f9   : >> { %11536 = vrsqrt.f32 %v1559_v29  ;;  %v1502_v50 = vsub.f32 %v13209_v14, %v1481_v40  ;;  %v646_v29 = vld [vmem:[%s13232_s24 + $0x38] sm:$0xff]  ;;  %s13657_s24 = scalar_lea.vmem %s16235_s6, %s12995_s26 }
 0x5fa   : >> { %v1707_v43 = vadd.f32 1.0, %v646_v29 }
 0x5fb   : >> { %v11535_v10 = vpop.eup %11534  ;;  %v1558_v38 = vadd.f32 1e-05, %v1502_v50 }
 0x5fc   : >> { %v13319_v62 = vpop.permute.xlu1 %1535  ;;  %1574 = vperm.xlu1 %11354, %v11535_v10  }
 0x5fd   : >> { %11538 = vrsqrt.f32 %v1558_v38 }
 0x5fe   : >> { %11540 = vrsqrt.f32 %v1561_v39 }
 0x5ff   : >> { %11542 = vrsqrt.f32 %v1563_v60 }
 0x600   : >> { %v1485_v27 = vpop.permute.xlu1 %1484 }
 0x601   : >> { %v1504_v34 = vsub.f32 %v13217_v28, %v1485_v27 }
 0x603   : >> { %v11537_v24 = vpop.eup %11536  ;;  %v1560_v12 = vadd.f32 1e-05, %v1504_v34 }
 0x604   : >> { %v13322_v51 = vpop.permute.xlu1 %1758  ;;  %1589 = vperm.xlu0 %11351, %v11537_v24  }
 0x605   : >> { %11544 = vrsqrt.f32 %v1560_v12 }
 0x607   : >> { %v11539_v14 = vpop.eup %11538 }
 0x608   : >> { %1584 = vperm.xlu1 %11354, %v11539_v14   ;;  %v1489_v47 = vpop.permute.xlu1 %1488  ;;  %v11541_v53 = vpop.eup %11540 }
 0x609   : >> { %v1506_v55 = vsub.f32 %v13226_v36, %v1489_v47  ;;  %v11543_v59 = vpop.eup %11542 }
 0x60b   : >> { %v1562_v56 = vadd.f32 1e-05, %v1506_v55 }
 0x60c   : >> { %1599 = vperm.xlu1 %11354, %v11541_v53   ;;  %v1764_v28 = vpop.permute.xlu1 %1763 }
 0x60d   : >> { %11546 = vrsqrt.f32 %v1562_v56 }
 0x60f   : >> { %v11545_v32 = vpop.eup %11544 }
 0x610   : >> { %1594 = vperm.xlu0 %11351, %v11545_v32   ;;  %1609 = vperm.xlu1 %11354, %v11543_v59  }
 0x611   : >> { %v13326_v15 = vpop.permute.xlu1 %1545 }
 0x614   : >> { %1788 = vperm.xlu1 %11354, %v645_v26   ;;  %v1674_v26 = vpop.permute.xlu0 %1673 }
 0x616   : >> { %v13329_v36 = vpop.permute.xlu1 %1637 }
 0x617   : >> { %v11547_v40 = vpop.eup %11546 }
 0x618   : >> { %1793 = vperm.xlu1 %11354, %v646_v29   ;;  %1604 = vperm.xlu0 %11351, %v11547_v40   ;;  %v1682_v27 = vpop.permute.xlu0 %1681 }
 0x61b   : >> { %v1721_v50 = vpop.permute.xlu1 %1720 }
 0x61c   : >> { %11355 = vset.pattern.permute.xlu0 %v16348_v57  ;;  %v1622_v24 = vpop.permute.xlu0 %1621 }
 0x61d   : >> { %1745 = vperm.xlu0 %11355, %v1707_v43  }
 0x61f   : >> { %v1726_v10 = vpop.permute.xlu1 %1725 }
 0x620   : >> { %v1634_v14 = vpop.permute.xlu0 %1633 }
 0x624   : >> { %v13331_v38 = vpop.permute.xlu1 %1677  ;;  %v1642_v55 = vpop.permute.xlu0 %1641 }
 0x628   : >> { %v13343_v56 = vpop.permute.xlu0 %1645 }
 0x629   : >> { %v1769_v49 = vpop.permute.xlu1 %1768 }
 0x62c   : >> { %v1516_v32 = vpop.permute.xlu0 %1515 }
 0x62d   : >> { %v1774_v39 = vpop.permute.xlu1 %1773  ;;  %v1549_v40 = vsub.f32 %v13126_v13, %v1516_v32 }
 0x630   : >> { %v1521_v43 = vpop.permute.xlu0 %1520 }
 0x631   : >> { %v1550_v37 = vsub.f32 %v13118_v25, %v1521_v43 }
 0x632   : >> { %v13333_v60 = vpop.permute.xlu1 %1649 }
 0x634   : >> { %v1531_v9 = vpop.permute.xlu0 %1530 }
 0x637   : >> { %v13335_v34 = vpop.permute.xlu1 %1730 }
 0x638   : >> { %v13350_v48 = vpop.permute.xlu0 %1540 }
 0x63c   : >> { %v13337_v12 = vpop.permute.xlu1 %1685  ;;  %v1736_v6 = vpop.permute.xlu0 %1735 }
 0x640   : >> { %v13339_v47 = vpop.permute.xlu1 %1689  ;;  %v1779_v13 = vpop.permute.xlu0 %1778 }
 0x645   : >> { %v13341_v53 = vpop.permute.xlu1 %1783 }
 0x64a   : >> { %v13345_v59 = vpop.permute.xlu1 %1740 }
 0x64f   : >> { %v1580_v29 = vpop.permute.xlu1 %1579 }
 0x650   : >> { %v1613_v0 = vmul.f32 %v1580_v29, %v1549_v40  ;;  %v1552_v40 = vsub.f32 %v13144_v42, %v1531_v9 }
 0x652   : >> { %v1653_v11 = vmul.f32 %v13297_v30, %v1613_v0 }
 0x654   : >> { %v1693_v8 = vadd.f32 %v13302_v61, %v1653_v11  ;;  %v1551_v11 = vsub.f32 %v13122_v45, %v13313_v54  ;;  %v1553_v45 = vsub.f32 %v13161_v46, %v13319_v62 }
 0x656   : >> { %v1749_v7 = vmul.f32 %v13308_v31, %v1693_v8 }
 0x658   : >> { %v13355_v4 = vadd.f32 %v1764_v28, %v1749_v7 }
 0x65a   : >> { %v9614_v32 = vmul.f32 -1.442695, %v13355_v4 }
 0x65c   : >> { %11548 = vpow2.f32 %v9614_v32 }
 0x666   : >> { %v11549_v28 = vpop.eup %11548 }
 0x667   : >> { %v1829_v32 = vadd.f32 1.0, %v11549_v28 }
 0x67b   : >> { %v1575_v3 = vpop.permute.xlu1 %1574 }
 0x67c   : >> { %v1612_v2 = vmul.f32 %v1575_v3, %v1548_v5 }
 0x67e   : >> { %v1652_v29 = vmul.f32 %v1622_v24, %v1612_v2 }
 0x680   : >> { %v1692_v0 = vadd.f32 %v13300_v58, %v1652_v29 }
 0x682   : >> { %v1748_v8 = vmul.f32 %v13306_v41, %v1692_v0 }
 0x683   : >> { %v1590_v30 = vpop.permute.xlu0 %1589 }
 0x684   : >> { %v13363_v61 = vadd.f32 %v13322_v51, %v1748_v8  ;;  %v1615_v7 = vmul.f32 %v1590_v30, %v1551_v11 }
 0x686   : >> { %v9613_v3 = vmul.f32 -1.442695, %v13363_v61  ;;  %v1655_v5 = vmul.f32 %v1634_v14, %v1615_v7 }
 0x687   : >> { %v1585_v35 = vpop.permute.xlu1 %1584 }
 0x688   : >> { %11550 = vpow2.f32 %v9613_v3  ;;  %v1695_v2 = vadd.f32 %v1674_v26, %v1655_v5  ;;  %v1614_v58 = vmul.f32 %v1585_v35, %v1550_v37 }
 0x68a   : >> { %v1751_v31 = vmul.f32 %v1726_v10, %v1695_v2  ;;  %v1654_v41 = vmul.f32 %v13304_v33, %v1614_v58 }
 0x68b   : >> { %v1600_v54 = vpop.permute.xlu1 %1599 }
 0x68c   : >> { %v13370_v51 = vadd.f32 %v1774_v39, %v1751_v31  ;;  %v1694_v24 = vadd.f32 %v13310_v44, %v1654_v41  ;;  %v1617_v25 = vmul.f32 %v1600_v54, %v1553_v45  ;;  %v1555_v39 = vsub.f32 %v13155_v63, %v13326_v15 }
 0x68e   : >> { %v9616_v14 = vmul.f32 -1.442695, %v13370_v51  ;;  %v1750_v43 = vmul.f32 %v1721_v50, %v1694_v24  ;;  %v1657_v26 = vmul.f32 %v1642_v55, %v1617_v25 }
 0x68f   : >> { %v1595_v29 = vpop.permute.xlu0 %1594  ;;  %v1610_v33 = vpop.permute.xlu1 %1609 }
 0x690   : >> { %11552 = vpow2.f32 %v9616_v14  ;;  %v1798_v46 = vadd.f32 %v1769_v49, %v1750_v43  ;;  %v1697_v62 = vadd.f32 %v1682_v27, %v1657_v26  ;;  %v1616_v10 = vmul.f32 %v1595_v29, %v1552_v40 }
 0x691   : >> { %11554 = vrcp.f32 %v1829_v32  ;;  %v1619_v42 = vmul.f32 %v1610_v33, %v1555_v39  ;;  %v1554_v49 = vsub.f32 %v13138_v52, %v13350_v48 }
 0x692   : >> { %v11551_v0 = vpop.eup %11550  ;;  %v9615_v11 = vmul.f32 -1.442695, %v1798_v46  ;;  %v1753_v44 = vmul.f32 %v1736_v6, %v1697_v62  ;;  %v1656_v8 = vmul.f32 %v13329_v36, %v1616_v10 }
 0x693   : >> { %v1828_v9 = vadd.f32 1.0, %v11551_v0  ;;  %v1659_v15 = vmul.f32 %v13333_v60, %v1619_v42  ;;  %v1789_v30 = vpop.permute.xlu1 %1788 }
 0x694   : >> { %11556 = vpow2.f32 %v9615_v11  ;;  %v1801_v50 = vadd.f32 %v13341_v53, %v1753_v44  ;;  %v1696_v55 = vadd.f32 %v13331_v38, %v1656_v8 }
 0x695   : >> { %11558 = vrcp.f32 %v1828_v9  ;;  %v1699_v38 = vadd.f32 %v13339_v47, %v1659_v15 }
 0x696   : >> { %v9618_v27 = vmul.f32 -1.442695, %v1801_v50  ;;  %v1752_v63 = vmul.f32 %v13335_v34, %v1696_v55 }
 0x697   : >> { %v1605_v6 = vpop.permute.xlu0 %1604  ;;  %v1794_v58 = vpop.permute.xlu1 %1793 }
 0x698   : >> { %11560 = vpow2.f32 %v9618_v27  ;;  %v1800_v36 = vadd.f32 %v1779_v13, %v1752_v63  ;;  %v1618_v7 = vmul.f32 %v1605_v6, %v1554_v49 }
 0x69a   : >> { %v11553_v37 = vpop.eup %11552  ;;  %v9617_v3 = vmul.f32 -1.442695, %v1800_v36  ;;  %v1658_v53 = vmul.f32 %v13343_v56, %v1618_v7 }
 0x69b   : >> { %v1831_v5 = vadd.f32 1.0, %v11553_v37  ;;  %v11555_v35 = vpop.eup %11554 }
 0x69c   : >> { %11562 = vpow2.f32 %v9617_v3  ;;  %v1698_v52 = vadd.f32 %v13337_v12, %v1658_v53  ;;  %v1746_v48 = vpop.permute.xlu0 %1745  ;;  %v13389_v41 = vmul.f32 %v11555_v35, %v13355_v4 }
 0x69d   : >> { %v1755_v34 = vmul.f32 %v1746_v48, %v1699_v38  ;;  %11564 = vrcp.f32 %v1831_v5 }
 0x69e   : >> { %v11557_v2 = vpop.eup %11556  ;;  %v1754_v60 = vmul.f32 %v13345_v59, %v1698_v52 }
 0x69f   : >> { %v11559_v13 = vpop.eup %11558  ;;  %v1830_v45 = vadd.f32 1.0, %v11557_v2  ;;  %v1803_v31 = vadd.f32 %v1794_v58, %v1755_v34 }
 0x6a0   : >> { %v13392_v56 = vmul.f32 %v11559_v13, %v13363_v61  ;;  %v1802_v47 = vadd.f32 %v1789_v30, %v1754_v60 }
 0x6a1   : >> { %11566 = vrcp.f32 %v1830_v45  ;;  %v9620_v12 = vmul.f32 -1.442695, %v1803_v31 }
 0x6a2   : >> { %v11561_v54 = vpop.eup %11560  ;;  %v9619_v28 = vmul.f32 -1.442695, %v1802_v47  ;;  %v11356_v24 = vpack.i.bf16 %v13389_v41, %v13392_v56 }
 0x6a3   : >> { %v1833_v59 = vadd.f32 1.0, %v11561_v54  ;;  %11568 = vpow2.f32 %v9620_v12 }
 0x6a4   : >> { %11570 = vpow2.f32 %v9619_v28  ;;  %11357 = vrot.lane.b32.xlu0 %v11356_v24, %s12605_s25 }
 0x6a5   : >> { %11572 = vrcp.f32 %v1833_v59 }
 0x6a6   : >> { %v11563_v25 = vpop.eup %11562 }
 0x6a7   : >> { %v1832_v4 = vadd.f32 1.0, %v11563_v25  ;;  %v11565_v40 = vpop.eup %11564 }
 0x6a8   : >> { %v13398_v14 = vmul.f32 %v11565_v40, %v13370_v51 }
 0x6a9   : >> { %11574 = vrcp.f32 %v1832_v4 }
 0x6ab   : >> { %v11567_v61 = vpop.eup %11566 }
 0x6ac   : >> { %v13400_v43 = vmul.f32 %v11567_v61, %v1798_v46 }
 0x6ad   : >> { %v11569_v26 = vpop.eup %11568 }
 0x6ae   : >> { %v11571_v32 = vpop.eup %11570  ;;  %v1835_v29 = vadd.f32 1.0, %v11569_v26  ;;  %v11361_v62 = vpack.i.bf16 %v13398_v14, %v13400_v43 }
 0x6af   : >> { %v1834_v10 = vadd.f32 1.0, %v11571_v32  ;;  %v11573_v33 = vpop.eup %11572 }
 0x6b0   : >> { %11576 = vrcp.f32 %v1835_v29  ;;  %11362 = vrot.lane.b32.xlu1 %v11361_v62, %s12605_s25  ;;  %v13405_v0 = vmul.f32 %v11573_v33, %v1801_v50 }
 0x6b1   : >> { %11578 = vrcp.f32 %v1834_v10 }
 0x6b3   : >> { %v11575_v39 = vpop.eup %11574 }
 0x6b4   : >> { %v13407_v11 = vmul.f32 %v11575_v39, %v1800_v36 }
 0x6b6   : >> { %v11366_v51 = vpack.i.bf16 %v13405_v0, %v13407_v11 }
 0x6b8   : >> { %11367 = vrot.lane.b32.xlu0 %v11366_v51, %s12605_s25 }
 0x6ba   : >> { %v11577_v46 = vpop.eup %11576 }
 0x6bb   : >> { %v11579_v44 = vpop.eup %11578  ;;  %v13412_v8 = vmul.f32 %v11577_v46, %v1803_v31 }
 0x6bc   : >> { %v13414_v9 = vmul.f32 %v11579_v44, %v1802_v47 }
 0x6be   : >> { %v11371_v42 = vpack.i.bf16 %v13412_v8, %v13414_v9 }
 0x6c0   : >> { %11372 = vrot.lane.b32.xlu1 %v11371_v42, %s12605_s25 }
 0x716   : >> { %v11358_v50 = vpop.permute.xlu0 %11357 }
 0x717   : >> { %v11360_v55 = vunpack.i.h.bf16 %v11358_v50  ;;  %v11359_v49 = vunpack.i.l.bf16 %v11358_v50 }
 0x719   : >> { %v1880_v27 = vsel %vm1874_vm3, %v11360_v55, %v13389_v41  ;;  %v1877_v63 = vsel %vm1874_vm3, %v11359_v49, %v13392_v56  ;;  %v11458_v49 = vld [vmem:[%s13459_s22 + $0x4] ss:$8 sps:$4 sm:$0xff]  }
 0x71a   : >> { %v11376_v15 = vpack.i.bf16 %v1880_v27, %v1877_v63  ;;  %9671 = vmatprep.mubr.msk.bf16.mxu1 %vm713_vm1, %v11458_v49  ;;  %v12608_v27 = vmov 5   ;;  %v11628_v63 = vld [vmem:[%s13002_s29 + $0x8] sm:$0xff] }
 0x71b   : >> { %11437 = vset.pattern.permute.xlu1 %v12608_v27  ;;  %11436 = vset.pattern.permute.xlu0 %v12608_v27  ;;  %v11464_v49 = vld [vmem:[%s13459_s22 + $0x20] ss:$8 sps:$4 sm:$0xff]   ;;  %v11465_v27 = vld [vmem:[%s13459_s22 + $0x34] ss:$8 sps:$4 sm:$0xff]  }
 0x71c   : >> { %11377 = vrot.lane.b32.xlu0 %v11376_v15, %s12605_s25  ;;  %v11629_v15 = vld [vmem:[%s13002_s29] sm:$0xff] }
 0x722   : >> { %v11363_v6 = vpop.permute.xlu1 %11362 }
 0x723   : >> { %v11365_v36 = vunpack.i.h.bf16 %v11363_v6  ;;  %v11364_v30 = vunpack.i.l.bf16 %v11363_v6  ;;  %v11630_v6 = vld [vmem:[%s13002_s29 + $0x10] sm:$0xff] }
 0x725   : >> { %v1886_v7 = vsel %vm1874_vm3, %v11365_v36, %v13398_v14  ;;  %v1883_v37 = vsel %vm1874_vm3, %v11364_v30, %v13400_v43  ;;  %v11631_v36 = vld [vmem:[%s13002_s29 + $0x18] sm:$0xff]  ;;  %v11632_v30 = vld [vmem:[%s13002_s29 + $0x20] sm:$0xff] }
 0x726   : >> { %v11381_v3 = vpack.i.bf16 %v1886_v7, %v1883_v37  ;;  %v11633_v7 = vld [vmem:[%s13002_s29 + $0x28] sm:$0xff]  ;;  %v11634_v37 = vld [vmem:[%s13002_s29 + $0x30] sm:$0xff] }
 0x728   : >> { %11382 = vrot.lane.b32.xlu1 %v11381_v3, %s12605_s25  ;;  %v11635_v3 = vld [vmem:[%s13002_s29 + $0x38] sm:$0xff]  ;;  %s13939_s29 = scalar_lea.vmem %s16238_s9, %s13070_s0 }
 0x72a   : >> { %v11368_v53 = vpop.permute.xlu0 %11367 }
 0x72b   : >> { %v11370_v5 = vunpack.i.h.bf16 %v11368_v53  ;;  %v11369_v38 = vunpack.i.l.bf16 %v11368_v53  ;;  %v1871_v53 = vlaneseq }
 0x72d   : >> { %v1892_v52 = vsel %vm1874_vm3, %v11370_v5, %v13405_v0  ;;  %v1889_v48 = vsel %vm1874_vm3, %v11369_v38, %v13407_v11  ;;  %v1872_v5 = vand.u32 127, %v1871_v53 }
 0x72e   : >> { %v11386_v35 = vpack.i.bf16 %v1892_v52, %v1889_v48 }
 0x72f   : >> { %vm10111_vm4 = vcmp.ne.s32.totalorder %v1872_v5, 0  ;;  %vm10112_vm6 = vcmp.ne.s32.totalorder %v1872_v5, 15 }
 0x730   : >> { %11387 = vrot.lane.b32.xlu0 %v11386_v35, %s12605_s25  ;;  %vm13473_vm5 = vmpackc.low %vm10111_vm4, %vm10111_vm4 }
 0x731   : >> { %vm13501_vm7 = vmpackc.low %vm10112_vm6, %vm10112_vm6 }
 0x732   : >> { %v11373_v34 = vpop.permute.xlu1 %11372 }
 0x733   : >> { %v11375_v2 = vunpack.i.h.bf16 %v11373_v34  ;;  %v11374_v60 = vunpack.i.l.bf16 %v11373_v34 }
 0x735   : >> { %v1898_v58 = vsel %vm1874_vm3, %v11375_v2, %v13412_v8  ;;  %v1895_v13 = vsel %vm1874_vm3, %v11374_v60, %v13414_v9 }
 0x736   : >> { %v11391_v45 = vpack.i.bf16 %v1898_v58, %v1895_v13 }
 0x738   : >> { %11392 = vrot.lane.b32.xlu1 %v11391_v45, %s12605_s25 }
 0x78e   : >> { %v11378_v31 = vpop.permute.xlu0 %11377 }
 0x78f   : >> { %v11380_v47 = vunpack.i.h.bf16 %v11378_v31  ;;  %v11379_v12 = vunpack.i.l.bf16 %v11378_v31 }
 0x791   : >> { %v1916_v54 = vsel %vm1874_vm3, %v11380_v47, %v13389_v41  ;;  %v1915_v28 = vsel %vm1874_vm3, %v11379_v12, %v13392_v56 }
 0x792   : >> { %v11396_v24 = vpack.i.bf16 %v1916_v54, %v1915_v28 }
 0x794   : >> { %11397 = vrot.lane.b32.xlu0 %v11396_v24, %s12606_s23 }
 0x79a   : >> { %v11383_v59 = vpop.permute.xlu1 %11382 }
 0x79b   : >> { %v11385_v25 = vunpack.i.h.bf16 %v11383_v59  ;;  %v11384_v4 = vunpack.i.l.bf16 %v11383_v59 }
 0x79d   : >> { %v1918_v40 = vsel %vm1874_vm3, %v11385_v25, %v13398_v14  ;;  %v1917_v61 = vsel %vm1874_vm3, %v11384_v4, %v13400_v43  ;;  %v2000_v25 = vpack.c.bf16 %v13389_v41, %v13392_v56  ;;  %v2001_v4 = vpack.c.bf16 %v13398_v14, %v13400_v43 }
 0x79e   : >> { %v11401_v26 = vpack.i.bf16 %v1918_v40, %v1917_v61  ;;  %v2002_v40 = vpack.c.bf16 %v13405_v0, %v13407_v11  ;;  %v2003_v41 = vpack.c.bf16 %v13412_v8, %v13414_v9 }
 0x7a0   : >> { %11402 = vrot.lane.b32.xlu1 %v11401_v26, %s12606_s23 }
 0x7a2   : >> { %v11388_v32 = vpop.permute.xlu0 %11387 }
 0x7a3   : >> { %v11390_v29 = vunpack.i.h.bf16 %v11388_v32  ;;  %v11389_v62 = vunpack.i.l.bf16 %v11388_v32 }
 0x7a5   : >> { %v1920_v10 = vsel %vm1874_vm3, %v11390_v29, %v13405_v0  ;;  %v1919_v33 = vsel %vm1874_vm3, %v11389_v62, %v13407_v11 }
 0x7a6   : >> { %v11406_v39 = vpack.i.bf16 %v1920_v10, %v1919_v33 }
 0x7a8   : >> { %11407 = vrot.lane.b32.xlu0 %v11406_v39, %s12606_s23 }
 0x7aa   : >> { %v11393_v51 = vpop.permute.xlu1 %11392 }
 0x7ab   : >> { %v11395_v46 = vunpack.i.h.bf16 %v11393_v51  ;;  %v11394_v44 = vunpack.i.l.bf16 %v11393_v51 }
 0x7ac   : >> { %11417 = vrot.lane.b32.xlu0 %v11396_v24, %s12607_s27 }
 0x7ad   : >> { %v1922_v42 = vsel %vm1874_vm3, %v11395_v46, %v13412_v8  ;;  %v1921_v50 = vsel %vm1874_vm3, %v11394_v44, %v13414_v9  ;;  %v11456_v44 = vld [vmem:[%s13459_s22] ss:$8 sps:$4 sm:$0xff]  }
 0x7ae   : >> { %v11411_v55 = vpack.i.bf16 %v1922_v42, %v1921_v50  ;;  %v11459_v42 = vld [vmem:[%s13459_s22 + $0x14] ss:$8 sps:$4 sm:$0xff]   ;;  %v11461_v50 = vld [vmem:[%s13459_s22 + $0x10] ss:$8 sps:$4 sm:$0xff]  }
 0x7b0   : >> { %11427 = vrot.lane.b32.xlu0 %v11406_v39, %s12607_s27  ;;  %11412 = vrot.lane.b32.xlu1 %v11411_v55, %s12606_s23 }
 0x7b4   : >> { %11422 = vrot.lane.b32.xlu1 %v11401_v26, %s12607_s27  ;;  %2009 = vperm.xlu0 %11436, %v11629_v15  }
 0x7b8   : >> { %11432 = vrot.lane.b32.xlu1 %v11411_v55, %s12607_s27  ;;  %2021 = vperm.xlu0 %11436, %v11631_v36   ;;  %v11462_v55 = vld [vmem:[%s13459_s22 + $0x24] ss:$8 sps:$4 sm:$0xff]  }
 0x7bc   : >> { %2013 = vperm.xlu1 %11437, %v11628_v63   ;;  %2029 = vperm.xlu0 %11436, %v11633_v7   ;;  %v11467_v63 = vld [vmem:[%s13459_s22 + $0x30] ss:$8 sps:$4 sm:$0xff]  }
 0x7c0   : >> { %2017 = vperm.xlu1 %11437, %v11630_v6   ;;  %2037 = vperm.xlu0 %11436, %v11635_v3  }
 0x7c4   : >> { %2025 = vperm.xlu1 %11437, %v11632_v30   ;;  %11439 = vset.pattern.permute.xlu0 %v16348_v57 }
 0x7c8   : >> { %2033 = vperm.xlu1 %11437, %v11634_v37  }
 0x7cc   : >> { %11438 = vset.pattern.permute.xlu1 %v16348_v57 }
 0x806   : >> { %v11398_v38 = vpop.permute.xlu0 %11397 }
 0x807   : >> { %v11400_v52 = vunpack.i.h.bf16 %v11398_v38  ;;  %v11399_v48 = vunpack.i.l.bf16 %v11398_v38 }
 0x809   : >> { %v9634_v34 = vpack.c.bf16 %v11400_v52, %v11399_v48 }
 0x80b   : >> { %9635 = vmatpush1.bf16.msk.msra.mxu1 %vm13473_vm5, %v9634_v34 }
 0x80c   : >> { %2090 = vmatprep.subr.bf16.mxu1 %v16348_v57 }
 0x812   : >> { %v11403_v2 = vpop.permute.xlu1 %11402 }
 0x813   : >> { %v11405_v60 = vunpack.i.h.bf16 %v11403_v2  ;;  %v11404_v58 = vunpack.i.l.bf16 %v11403_v2 }
 0x815   : >> { %v9639_v13 = vpack.c.bf16 %v11405_v60, %v11404_v58 }
 0x817   : >> { %9640 = vmatpush1.bf16.msk.msra.mxu1 %vm13473_vm5, %v9639_v13 }
 0x818   : >> { %2092 = vmatprep.subr.bf16.mxu1 %v16348_v57 }
 0x81a   : >> { %v11408_v45 = vpop.permute.xlu0 %11407 }
 0x81b   : >> { %v11410_v31 = vunpack.i.h.bf16 %v11408_v45  ;;  %v11409_v47 = vunpack.i.l.bf16 %v11408_v45 }
 0x81d   : >> { %v9644_v12 = vpack.c.bf16 %v11410_v31, %v11409_v47 }
 0x81e   : >> { %v11418_v61 = vpop.permute.xlu0 %11417 }
 0x81f   : >> { %9645 = vmatpush1.bf16.msk.msra.mxu1 %vm13473_vm5, %v9644_v12  ;;  %v11420_v26 = vunpack.i.h.bf16 %v11418_v61  ;;  %v11419_v32 = vunpack.i.l.bf16 %v11418_v61 }
 0x820   : >> { %2094 = vmatprep.subr.bf16.mxu1 %v16348_v57 }
 0x821   : >> { %v9654_v43 = vpack.c.bf16 %v11420_v26, %v11419_v32 }
 0x822   : >> { %v11413_v54 = vpop.permute.xlu1 %11412  ;;  %v11428_v29 = vpop.permute.xlu0 %11427 }
 0x823   : >> { %v11415_v28 = vunpack.i.h.bf16 %v11413_v54  ;;  %v11414_v24 = vunpack.i.l.bf16 %v11413_v54  ;;  %v11430_v8 = vunpack.i.h.bf16 %v11428_v29  ;;  %v11429_v9 = vunpack.i.l.bf16 %v11428_v29 }
 0x825   : >> { %v9649_v59 = vpack.c.bf16 %v11415_v28, %v11414_v24  ;;  %v9664_v33 = vpack.c.bf16 %v11430_v8, %v11429_v9 }
 0x826   : >> { %v11423_v56 = vpop.permute.xlu1 %11422 }
 0x827   : >> { %9650 = vmatpush1.bf16.msk.msra.mxu1 %vm13473_vm5, %v9649_v59  ;;  %v11425_v0 = vunpack.i.h.bf16 %v11423_v56  ;;  %v11424_v11 = vunpack.i.l.bf16 %v11423_v56 }
 0x828   : >> { %2096 = vmatprep.subr.bf16.mxu1 %v16348_v57 }
 0x829   : >> { %v9659_v62 = vpack.c.bf16 %v11425_v0, %v11424_v11 }
 0x82a   : >> { %v11433_v10 = vpop.permute.xlu1 %11432 }
 0x82b   : >> { %2097 = vmatpush1.bf16.msra.mxu1 %v2000_v25  ;;  %v11435_v39 = vunpack.i.h.bf16 %v11433_v10  ;;  %v11434_v51 = vunpack.i.l.bf16 %v11433_v10 }
 0x82c   : >> { %2098 = vmatprep.subr.bf16.mxu1 %v16348_v57 }
 0x82d   : >> { %v9669_v46 = vpack.c.bf16 %v11435_v39, %v11434_v51 }
 0x82f   : >> { %2099 = vmatpush1.bf16.msra.mxu1 %v2001_v4 }
 0x830   : >> { %2100 = vmatprep.subr.bf16.mxu1 %v16348_v57 }
 0x833   : >> { %2101 = vmatpush1.bf16.msra.mxu1 %v2002_v40  ;;  %v2010_v15 = vpop.permute.xlu0 %2009 }
 0x834   : >> { %2102 = vmatprep.subr.bf16.mxu1 %v16348_v57 }
 0x837   : >> { %2103 = vmatpush1.bf16.msra.mxu1 %v2003_v41  ;;  %v2022_v13 = vpop.permute.xlu0 %2021 }
 0x838   : >> { %2104 = vmatprep.subr.bf16.mxu1 %v16348_v57 }
 0x83b   : >> { %9655 = vmatpush1.bf16.msk.msra.mxu1 %vm13501_vm7, %v9654_v43  ;;  %v2014_v7 = vpop.permute.xlu1 %2013  ;;  %v2030_v32 = vpop.permute.xlu0 %2029 }
 0x83c   : >> { %2106 = vmatprep.subr.bf16.mxu1 %v16348_v57 }
 0x83f   : >> { %9660 = vmatpush1.bf16.msk.msra.mxu1 %vm13501_vm7, %v9659_v62  ;;  %v2018_v2 = vpop.permute.xlu1 %2017 }
 0x840   : >> { %2108 = vmatprep.subr.bf16.mxu1 %v16348_v57 }
 0x843   : >> { %9665 = vmatpush1.bf16.msk.msra.mxu1 %vm13501_vm7, %v9664_v33  ;;  %v2026_v25 = vpop.permute.xlu1 %2025 }
 0x844   : >> { %2110 = vmatprep.subr.bf16.mxu1 %v16348_v57 }
 0x847   : >> { %9670 = vmatpush1.bf16.msk.msra.mxu1 %vm13501_vm7, %v9669_v46  ;;  %v2034_v62 = vpop.permute.xlu1 %2033  ;;  %v2038_v46 = vpop.permute.xlu0 %2037 }
 0x84a   : >> { %2121 = vmatmul.mubr.bf16.vlgmr.msra.gmra.mrb[16].mxu1 %v11456_v44 }
 0x84b   : >> { %9672 = vmatprep.mubr.msk.bf16.mxu1 %vm713_vm1, %v11459_v42 }
 0x852   : >> { %2129 = vmatmul.mubr.bf16.gmra.mrb[20].mxu1 %v11461_v50 }
 0x853   : >> { %9673 = vmatprep.mubr.msk.bf16.mxu1 %vm713_vm1, %v11462_v55 }
 0x85a   : >> { %2137 = vmatmul.mubr.bf16.gmra.mrb[24].mxu1 %v11464_v49 }
 0x85b   : >> { %9674 = vmatprep.mubr.msk.bf16.mxu1 %vm713_vm1, %v11465_v27 }
 0x862   : >> { %2145 = vmatmul.mubr.bf16.gmra.mrb[28].mxu1 %v11467_v63 }
 0x91d   : >> { %v2122_v6 = vpop.f32.mrb[16].mxu1 }
 0x91e   : >> { %v2123_v36 = vadd.f32 %v2122_v6, %v2010_v15  ;;  %v2124_v30 = vpop.f32.mrb[17].mxu1 }
 0x91f   : >> { %v2125_v37 = vpop.f32.mrb[18].mxu1 }
 0x920   : >> { %v13527_v3 = vadd.f32 %v12521_v16, %v2123_v36  ;;  %v2126_v53 = vadd.f32 %v2125_v37, %v2014_v7  ;;  %v2127_v5 = vpop.f32.mrb[19].mxu1 }
 0x922   : >> { %v13530_v38 = vadd.f32 %v12517_v17, %v2126_v53  ;;  %v2170_v52 = vsel %vm647_vm0, %v13527_v3, 0.0  ;;  %v2194_v34 = vmul.f32 %v13527_v3, %v13527_v3 }
 0x923   : >> { %2171 = vadd.xlane.f32.xlu1 %v2170_v52 }
 0x924   : >> { %v2173_v48 = vsel %vm647_vm0, %v13530_v38, 0.0  ;;  %v2202_v12 = vsel %vm647_vm0, %v2194_v34, 0.0  ;;  %v2195_v54 = vmul.f32 %v13530_v38, %v13530_v38 }
 0x925   : >> { %v2130_v60 = vpop.f32.mrb[20].mxu1  ;;  %2174 = vadd.xlane.f32.xlu0 %v2173_v48 }
 0x926   : >> { %v2131_v16 = vadd.f32 %v2130_v60, %v2018_v2  ;;  %v2132_v58 = vpop.f32.mrb[21].mxu1 }
 0x927   : >> { %v2133_v45 = vpop.f32.mrb[22].mxu1 }
 0x928   : >> { %v13539_v17 = vadd.f32 %v12513_v18, %v2131_v16  ;;  %v2134_v31 = vadd.f32 %v2133_v45, %v2022_v13  ;;  %v2135_v47 = vpop.f32.mrb[23].mxu1  ;;  %v2205_v18 = vsel %vm647_vm0, %v2195_v54, 0.0 }
 0x929   : >> { %2203 = vadd.xlane.f32.xlu0 %v2202_v12 }
 0x92a   : >> { %v2176_v28 = vsel %vm647_vm0, %v13539_v17, 0.0  ;;  %v2196_v24 = vmul.f32 %v13539_v17, %v13539_v17  ;;  %v13549_v59 = vadd.f32 %v12509_v19, %v2134_v31 }
 0x92b   : >> { %2177 = vadd.xlane.f32.xlu1 %v2176_v28 }
 0x92c   : >> { %v2208_v26 = vsel %vm647_vm0, %v2196_v24, 0.0  ;;  %v2179_v19 = vsel %vm647_vm0, %v13549_v59, 0.0  ;;  %v2197_v11 = vmul.f32 %v13549_v59, %v13549_v59 }
 0x92d   : >> { %v2138_v4 = vpop.f32.mrb[24].mxu1  ;;  %2206 = vadd.xlane.f32.xlu0 %v2205_v18 }
 0x92e   : >> { %v2139_v40 = vadd.f32 %v2138_v4, %v2026_v25  ;;  %v2140_v61 = vpop.f32.mrb[25].mxu1 }
 0x92f   : >> { %v2141_v41 = vpop.f32.mrb[26].mxu1  ;;  %2209 = vadd.xlane.f32.xlu1 %v2208_v26 }
 0x930   : >> { %v13554_v56 = vadd.f32 %v12505_v20, %v2139_v40  ;;  %v2142_v43 = vadd.f32 %v2141_v41, %v2030_v32  ;;  %v2143_v0 = vpop.f32.mrb[27].mxu1  ;;  %v2211_v20 = vsel %vm647_vm0, %v2197_v11, 0.0  ;;  %v16356_v11 = vld [vmem:[#allocation7_spill] sm:$0xff] }
 0x931   : >> { %2180 = vadd.xlane.f32.xlu0 %v2179_v19  ;;  %v16354_v0 = vld [vmem:[#allocation5_spill] sm:$0xff]  ;;  %v16355_v19 = vld [vmem:[#allocation6_spill] sm:$0xff] }
 0x932   : >> { %v2182_v29 = vsel %vm647_vm0, %v13554_v56, 0.0  ;;  %v2198_v8 = vmul.f32 %v13554_v56, %v13554_v56  ;;  %v13565_v9 = vadd.f32 %v12501_v21, %v2142_v43 }
 0x933   : >> { %2183 = vadd.xlane.f32.xlu1 %v2182_v29  ;;  %v16357_v29 = vld [vmem:[#allocation8_spill] sm:$0xff] }
 0x934   : >> { %v2214_v51 = vsel %vm647_vm0, %v2198_v8, 0.0  ;;  %v2185_v21 = vsel %vm647_vm0, %v13565_v9, 0.0  ;;  %v2199_v49 = vmul.f32 %v13565_v9, %v13565_v9  ;;  %v16358_v8 = vld [vmem:[#allocation9_spill] sm:$0xff] }
 0x935   : >> { %v2146_v10 = vpop.f32.mrb[28].mxu1  ;;  %2212 = vadd.xlane.f32.xlu0 %v2211_v20  ;;  %v16359_v20 = vld [vmem:[#allocation10_spill] sm:$0xff] }
 0x936   : >> { %v2147_v33 = vadd.f32 %v2146_v10, %v2034_v62  ;;  %v2148_v39 = vpop.f32.mrb[29].mxu1 }
 0x937   : >> { %v2149_v44 = vpop.f32.mrb[30].mxu1  ;;  %2215 = vadd.xlane.f32.xlu1 %v2214_v51 }
 0x938   : >> { %v13570_v42 = vadd.f32 %v12497_v22, %v2147_v33  ;;  %v2150_v50 = vadd.f32 %v2149_v44, %v2038_v46  ;;  %v2151_v55 = vpop.f32.mrb[31].mxu1  ;;  %v2217_v22 = vsel %vm647_vm0, %v2199_v49, 0.0 }
 0x939   : >> { %2186 = vadd.xlane.f32.xlu0 %v2185_v21 }
 0x93a   : >> { %v2188_v27 = vsel %vm647_vm0, %v13570_v42, 0.0  ;;  %v2200_v63 = vmul.f32 %v13570_v42, %v13570_v42  ;;  %v13581_v15 = vadd.f32 %v12493_v23, %v2150_v50 }
 0x93b   : >> { %2189 = vadd.xlane.f32.xlu1 %v2188_v27 }
 0x93c   : >> { %v2220_v6 = vsel %vm647_vm0, %v2200_v63, 0.0  ;;  %v2191_v36 = vsel %vm647_vm0, %v13581_v15, 0.0  ;;  %v2201_v30 = vmul.f32 %v13581_v15, %v13581_v15 }
 0x93d   : >> { %2218 = vadd.xlane.f32.xlu0 %v2217_v22 }
 0x93e   : >> { %v2223_v7 = vsel %vm647_vm0, %v2201_v30, 0.0  ;;  %v13662_v30 = vld [vmem:[%s13657_s24] sm:$0xff] }
 0x93f   : >> { %2221 = vadd.xlane.f32.xlu1 %v2220_v6 }
 0x941   : >> { %2192 = vadd.xlane.f32.xlu0 %v2191_v36 }
 0x945   : >> { %2224 = vadd.xlane.f32.xlu0 %v2223_v7  ;;  %v13667_v7 = vld [vmem:[%s13657_s24 + $0x8] sm:$0xff] }
 0x9b0   : >> { %v2172_v53 = vpop.xlane.xlu1 %2171 }
 0x9b2   : >> { %v2175_v37 = vpop.xlane.xlu0 %2174 }
 0x9b6   : >> { %v2204_v23 = vpop.xlane.xlu0 %2203 }
 0x9b7   : >> { %v2226_v48 = vsel %vm704_vm2, %v2172_v53, %v2204_v23  ;;  %v13679_v53 = vld [vmem:[%s13657_s24 + $0x10] sm:$0xff]  ;;  %v13682_v23 = vld [vmem:[%s13657_s24 + $0x18] sm:$0xff] }
 0x9b8   : >> { %v2178_v5 = vpop.xlane.xlu1 %2177 }
 0x9ba   : >> { %v2207_v52 = vpop.xlane.xlu0 %2206 }
 0x9bb   : >> { %v2227_v34 = vsel %vm704_vm2, %v2175_v37, %v2207_v52  ;;  %v16360_v37 = vmov 1   ;;  %v13696_v52 = vld [vmem:[%s13657_s24 + $0x20] sm:$0xff] }
 0x9bc   : >> { %v10942_v2 = vpack.c.bf16 %v2227_v34, %v2226_v48  ;;  %v2210_v60 = vpop.xlane.xlu1 %2209  ;;  %v13703_v48 = vld [vmem:[%s13657_s24 + $0x30] sm:$0xff] }
 0x9bd   : >> { %v2228_v45 = vsel %vm704_vm2, %v2178_v5, %v2210_v60  ;;  %v13687_v5 = vld [vmem:[%s13657_s24 + $0x28] sm:$0xff] }
 0x9be   : >> { %v2181_v16 = vpop.xlane.xlu0 %2180  ;;  %10943 = vmatprep.subr.bf16.mxu0 %v10942_v2 }
 0x9bf   : >> { %10945 = vmatpush3.bf16.msra.mxu0 %v10942_v2 }
 0x9c0   : >> { %v2184_v58 = vpop.xlane.xlu1 %2183 }
 0x9c2   : >> { %v2213_v13 = vpop.xlane.xlu0 %2212 }
 0x9c3   : >> { %v2229_v31 = vsel %vm704_vm2, %v2181_v16, %v2213_v13 }
 0x9c4   : >> { %v10946_v47 = vpack.c.bf16 %v2229_v31, %v2228_v45  ;;  %v2216_v12 = vpop.xlane.xlu1 %2215 }
 0x9c5   : >> { %v2230_v18 = vsel %vm704_vm2, %v2184_v58, %v2216_v12 }
 0x9c6   : >> { %v2187_v54 = vpop.xlane.xlu0 %2186  ;;  %10947 = vmatprep.subr.bf16.mxu0 %v10946_v47 }
 0x9c7   : >> { %10949 = vmatpush3.bf16.msra.mxu0 %v10946_v47 }
 0x9c8   : >> { %v2190_v28 = vpop.xlane.xlu1 %2189 }
 0x9ca   : >> { %v2219_v24 = vpop.xlane.xlu0 %2218 }
 0x9cb   : >> { %v2231_v25 = vsel %vm704_vm2, %v2187_v54, %v2219_v24 }
 0x9cc   : >> { %v10950_v4 = vpack.c.bf16 %v2231_v25, %v2230_v18  ;;  %v2222_v61 = vpop.xlane.xlu1 %2221 }
 0x9cd   : >> { %v2232_v32 = vsel %vm704_vm2, %v2190_v28, %v2222_v61 }
 0x9ce   : >> { %v2193_v40 = vpop.xlane.xlu0 %2192  ;;  %10951 = vmatprep.subr.bf16.mxu0 %v10950_v4 }
 0x9cf   : >> { %10953 = vmatpush3.bf16.msra.mxu0 %v10950_v4 }
 0x9d2   : >> { %v2225_v26 = vpop.xlane.xlu0 %2224 }
 0x9d3   : >> { %v2233_v41 = vsel %vm704_vm2, %v2193_v40, %v2225_v26 }
 0x9d4   : >> { %v10954_v43 = vpack.c.bf16 %v2233_v41, %v2232_v32 }
 0x9d6   : >> { %10955 = vmatprep.subr.bf16.mxu0 %v10954_v43 }
 0x9d7   : >> { %10957 = vmatpush3.bf16.msra.mxu0 %v10954_v43 }
 0x9da   : >> { %10469 = vmatmul.mubr.msk.f32.vlgmr.msra.gmra.mrb[8].mxu0 %vm713_vm1, %v12747_v1 }
 0x9db   : >> { %10471 = vmatprep.mubr.msk.f32.mxu0 %vm713_vm1, %v16354_v0 }
 0x9de   : >> { %10472 = vmatmul.mubr.msk.f32.gmra.mrb[10].mxu0 %vm713_vm1, %v16355_v19 }
 0x9df   : >> { %10474 = vmatprep.mubr.msk.f32.mxu0 %vm713_vm1, %v16356_v11 }
 0x9e2   : >> { %10475 = vmatmul.mubr.msk.f32.gmra.mrb[12].mxu0 %vm713_vm1, %v16357_v29 }
 0x9e3   : >> { %10477 = vmatprep.mubr.msk.f32.mxu0 %vm713_vm1, %v16358_v8 }
 0x9e6   : >> { %10478 = vmatmul.mubr.msk.f32.gmra.mrb[14].mxu0 %vm713_vm1, %v16359_v20 }
 0xaad   : >> { %v13612_v62 = vpop.f32.mrb[8].mxu0 }
 0xaae   : >> { %v2340_v10 = vmul.f32 %v13612_v62, %v13612_v62  ;;  %v13616_v33 = vpop.f32.mrb[9].mxu0 }
 0xaaf   : >> { %v2339_v39 = vmul.f32 %v13616_v33, %v13616_v33 }
 0xab0   : >> { %2357 = vrot.lane.b32.xlu0 %v2340_v10, %s12600_s21 }
 0xab1   : >> { %2355 = vrot.lane.b32.xlu1 %v2339_v39, %s12600_s21  ;;  %v13622_v51 = vpop.f32.mrb[10].mxu0 }
 0xab2   : >> { %v2342_v46 = vmul.f32 %v13622_v51, %v13622_v51  ;;  %v13626_v44 = vpop.f32.mrb[11].mxu0 }
 0xab3   : >> { %v2341_v49 = vmul.f32 %v13626_v44, %v13626_v44 }
 0xab5   : >> { %2361 = vrot.lane.b32.xlu1 %v2342_v46, %s12600_s21  ;;  %v13629_v50 = vpop.f32.mrb[12].mxu0 }
 0xab6   : >> { %v2344_v55 = vmul.f32 %v13629_v50, %v13629_v50  ;;  %v13633_v21 = vpop.f32.mrb[13].mxu0 }
 0xab7   : >> { %v2343_v27 = vmul.f32 %v13633_v21, %v13633_v21 }
 0xab8   : >> { %2365 = vrot.lane.b32.xlu0 %v2344_v55, %s12600_s21 }
 0xab9   : >> { %2359 = vrot.lane.b32.xlu1 %v2341_v49, %s12600_s21  ;;  %v13641_v63 = vpop.f32.mrb[14].mxu0 }
 0xaba   : >> { %v2346_v22 = vmul.f32 %v13641_v63, %v13641_v63  ;;  %v13645_v6 = vpop.f32.mrb[15].mxu0 }
 0xabb   : >> { %v2345_v36 = vmul.f32 %v13645_v6, %v13645_v6 }
 0xabc   : >> { %2369 = vrot.lane.b32.xlu0 %v2346_v22, %s12600_s21 }
 0xabd   : >> { %2363 = vrot.lane.b32.xlu1 %v2343_v27, %s12600_s21 }
 0xac0   : >> { %2394 = vperm.xlu0 %11439, %v13612_v62  }
 0xac1   : >> { %2367 = vrot.lane.b32.xlu1 %v2345_v36, %s12600_s21  ;;  %s2614_s21 = smul.u32 192, %s12525_s15  ;;  %s619_s15 = sadd.s32 1, %s12525_s15  }
 0xac2   : >> { %p616_p4 = scmp.ge.s32.totalorder %s619_s15, 3  }
 0xac3   : >> { %s13723_s23 = scalar_lea.vmem %s16237_s8, %s2614_s21  ;;  %s12611_s0 = smov (%p616_p4), 16   ;;  %vm3798_vm9 = vcmask (%p616_p4), 392192  }
 0xac4   : >> { %2399 = vperm.xlu0 %11439, %v13626_v44   ;;  %v2616_v46 = vld [vmem:[%s13723_s23] sm:$0xff]  ;;  %v2618_v49 = vld [vmem:[%s13723_s23 + $0x10] sm:$0xff]  ;;  %s14090_s25 = smov (%p616_p4), 3  }
 0xac5   : >> { %2389 = vperm.xlu1 %11438, %v13616_v33   ;;  %v2628_v55 = vld [vmem:[%s13723_s23 + $0x60] sm:$0xff] }
 0xac6   : >> { %v2624_v27 = vld [vmem:[%s13723_s23 + $0x40] sm:$0xff] }
 0xac7   : >> { %v2636_v22 = vld [vmem:[%s13723_s23 + $0xa0] sm:$0xff] }
 0xac8   : >> { %2501 = vperm.xlu0 %11439, %v13662_v30  }
 0xac9   : >> { %2404 = vperm.xlu1 %11438, %v13622_v51  }
 0xacc   : >> { %2414 = vperm.xlu0 %11439, %v13629_v50  }
 0xacd   : >> { %2506 = vperm.xlu1 %11438, %v13667_v7  }
 0xad0   : >> { %2424 = vperm.xlu0 %11439, %v13641_v63  }
 0xad1   : >> { %11440 = vset.pattern.permute.xlu1 %v16360_v37 }
 0xad2   : >> { %2548 = vperm.xlu1 %11440, %v13662_v30  }
 0xad4   : >> { %11444 = vset.pattern.permute.xlu0 %v16360_v37 }
 0xad5   : >> { %2552 = vperm.xlu0 %11444, %v13667_v7  }
 0xad6   : >> { %11441 = vset.pattern.permute.xlu1 %v16348_v57 }
 0xad7   : >> { %2409 = vperm.xlu1 %11441, %v13633_v21  }
 0xad9   : >> { %2560 = vperm.xlu0 %11444, %v13682_v23  }
 0xadb   : >> { %2511 = vperm.xlu1 %11441, %v13679_v53  }
 0xadd   : >> { %2568 = vperm.xlu0 %11444, %v13687_v5  }
 0xadf   : >> { %2516 = vperm.xlu1 %11441, %v13682_v23  }
 0xae3   : >> { %11442 = vset.pattern.permute.xlu1 %v16360_v37 }
 0xae4   : >> { %2556 = vperm.xlu1 %11442, %v13679_v53  }
 0xae8   : >> { %11443 = vset.pattern.permute.xlu1 %v16348_v57 }
 0xae9   : >> { %2419 = vperm.xlu1 %11443, %v13645_v6  }
 0xaed   : >> { %2521 = vperm.xlu1 %11443, %v13696_v52  }
 0xaf1   : >> { %2526 = vperm.xlu1 %11443, %v13687_v5  }
 0xaf5   : >> { %11445 = vset.pattern.permute.xlu1 %v16360_v37 }
 0xaf6   : >> { %2564 = vperm.xlu1 %11445, %v13696_v52  }
 0xafa   : >> { %11446 = vset.pattern.permute.xlu1 %v16348_v57 }
 0xafb   : >> { %2531 = vperm.xlu1 %11446, %v13703_v48  }
 0xaff   : >> { %11447 = vset.pattern.permute.xlu1 %v16360_v37  ;;  %v2617_v37 = vld [vmem:[%s13723_s23 + $0x8] sm:$0xff] }
 0xb22   : >> { %v2358_v34 = vpop.permute.xlu0 %2357 }
 0xb23   : >> { %v2380_v2 = vsub.f32 %v13612_v62, %v2358_v34  ;;  %v2356_v60 = vpop.permute.xlu1 %2355 }
 0xb24   : >> { %v2379_v16 = vsub.f32 %v13616_v33, %v2356_v60  ;;  %v2629_v60 = vld [vmem:[%s13723_s23 + $0x68] sm:$0xff] }
 0xb25   : >> { %v2436_v58 = vadd.f32 1e-05, %v2380_v2  ;;  %v2623_v2 = vld [vmem:[%s13723_s23 + $0x38] sm:$0xff] }
 0xb26   : >> { %v2435_v13 = vadd.f32 1e-05, %v2379_v16 }
 0xb27   : >> { %11580 = vrsqrt.f32 %v2436_v58  ;;  %v2362_v45 = vpop.permute.xlu1 %2361  ;;  %v2635_v58 = vld [vmem:[%s13723_s23 + $0x98] sm:$0xff] }
 0xb28   : >> { %v2382_v31 = vsub.f32 %v13622_v51, %v2362_v45  ;;  %11582 = vrsqrt.f32 %v2435_v13  ;;  %v13718_v51 = vld [vmem:[%s13657_s24 + $0x38] sm:$0xff]  ;;  %s12613_s24 = smov (%p616_p4), 127  }
 0xb29   : >> { %v2619_v45 = vld [vmem:[%s13723_s23 + $0x18] sm:$0xff] }
 0xb2a   : >> { %v2366_v47 = vpop.permute.xlu0 %2365  ;;  %v2438_v12 = vadd.f32 1e-05, %v2382_v31 }
 0xb2b   : >> { %v2384_v54 = vsub.f32 %v13629_v50, %v2366_v47  ;;  %v2360_v28 = vpop.permute.xlu1 %2359  ;;  %v11468_v50 = vld [vmem:[%s12954_s1] sm:$0xff]   ;;  %v2625_v47 = vld [vmem:[%s13723_s23 + $0x48] sm:$0xff] }
 0xb2c   : >> { %v2381_v24 = vsub.f32 %v13626_v44, %v2360_v28  ;;  %11584 = vrsqrt.f32 %v2438_v12  ;;  %v2622_v44 = vld [vmem:[%s13723_s23 + $0x30] sm:$0xff]  ;;  %10488 = vmatprep.mubr.msk.bf16.mxu0 %vm713_vm1, %v11468_v50 }
 0xb2d   : >> { %v2440_v4 = vadd.f32 1e-05, %v2384_v54  ;;  %v2631_v54 = vld [vmem:[%s13723_s23 + $0x78] sm:$0xff] }
 0xb2e   : >> { %v2437_v18 = vadd.f32 1e-05, %v2381_v24  ;;  %v2370_v25 = vpop.permute.xlu0 %2369 }
 0xb2f   : >> { %v2386_v40 = vsub.f32 %v13641_v63, %v2370_v25  ;;  %v2364_v61 = vpop.permute.xlu1 %2363  ;;  %v2630_v63 = vld [vmem:[%s13723_s23 + $0x70] sm:$0xff] }
 0xb30   : >> { %11586 = vrsqrt.f32 %v2437_v18  ;;  %v2383_v26 = vsub.f32 %v13633_v21, %v2364_v61  ;;  %v2634_v21 = vld [vmem:[%s13723_s23 + $0x90] sm:$0xff]  ;;  %v2637_v18 = vld [vmem:[%s13723_s23 + $0xa8] sm:$0xff] }
 0xb31   : >> { %v11581_v32 = vpop.eup %11580  ;;  %11588 = vrsqrt.f32 %v2440_v4  ;;  %v2442_v43 = vadd.f32 1e-05, %v2386_v40 }
 0xb32   : >> { %v2439_v41 = vadd.f32 1e-05, %v2383_v26  ;;  %2458 = vperm.xlu1 %11447, %v11581_v32   ;;  %v11583_v11 = vpop.eup %11582 }
 0xb33   : >> { %v2368_v0 = vpop.permute.xlu1 %2367 }
 0xb34   : >> { %11590 = vrsqrt.f32 %v2439_v41  ;;  %v2385_v19 = vsub.f32 %v13645_v6, %v2368_v0 }
 0xb35   : >> { %11592 = vrsqrt.f32 %v2442_v43 }
 0xb36   : >> { %v2441_v29 = vadd.f32 1e-05, %v2385_v19  ;;  %2453 = vperm.xlu1 %11447, %v11583_v11   ;;  %v11585_v8 = vpop.eup %11584 }
 0xb38   : >> { %11594 = vrsqrt.f32 %v2441_v29 }
 0xb3a   : >> { %v11587_v20 = vpop.eup %11586  ;;  %2468 = vperm.xlu1 %11447, %v11585_v8  }
 0xb3b   : >> { %2463 = vperm.xlu0 %11444, %v11587_v20   ;;  %v11589_v62 = vpop.eup %11588 }
 0xb3e   : >> { %v11591_v10 = vpop.eup %11590  ;;  %2478 = vperm.xlu1 %11447, %v11589_v62  }
 0xb3f   : >> { %2473 = vperm.xlu0 %11444, %v11591_v10   ;;  %v11593_v33 = vpop.eup %11592  ;;  %v2395_v12 = vpop.permute.xlu0 %2394 }
 0xb40   : >> { %v2428_v19 = vsub.f32 %v13530_v38, %v2395_v12 }
 0xb42   : >> { %v11595_v39 = vpop.eup %11594  ;;  %2488 = vperm.xlu1 %11447, %v11593_v33  }
 0xb43   : >> { %2483 = vperm.xlu0 %11444, %v11595_v39   ;;  %v2400_v24 = vpop.permute.xlu0 %2399 }
 0xb44   : >> { %v2429_v50 = vsub.f32 %v13539_v17, %v2400_v24 }
 0xb46   : >> { %2572 = vperm.xlu1 %11447, %v13703_v48  }
 0xb47   : >> { %11448 = vset.pattern.permute.xlu0 %v16348_v57  ;;  %v2502_v4 = vpop.permute.xlu0 %2501 }
 0xb48   : >> { %2536 = vperm.xlu0 %11448, %v13718_v51  }
 0xb4a   : >> { %2576 = vperm.xlu1 %11447, %v13718_v51  }
 0xb4b   : >> { %v2415_v61 = vpop.permute.xlu0 %2414 }
 0xb4c   : >> { %2646 = vperm.xlu0 %11448, %v2616_v46  }
 0xb4e   : >> { %11449 = vset.pattern.permute.xlu1 %v16348_v57  ;;  %v2390_v57 = vpop.permute.xlu1 %2389 }
 0xb4f   : >> { %2651 = vperm.xlu1 %11449, %v2617_v37   ;;  %v2425_v41 = vpop.permute.xlu0 %2424  ;;  %v2427_v20 = vsub.f32 %v13527_v3, %v2390_v57  ;;  %v2432_v37 = vsub.f32 %v13565_v9, %v2415_v61 }
 0xb50   : >> { %2676 = vperm.xlu0 %11448, %v2622_v44  }
 0xb52   : >> { %v2405_v6 = vpop.permute.xlu1 %2404 }
 0xb53   : >> { %2681 = vperm.xlu1 %11449, %v2623_v2   ;;  %v2430_v46 = vsub.f32 %v13549_v59, %v2405_v6 }
 0xb54   : >> { %2706 = vperm.xlu0 %11448, %v2628_v55   ;;  %v2553_v43 = vpop.permute.xlu0 %2552 }
 0xb56   : >> { %v2507_v36 = vpop.permute.xlu1 %2506 }
 0xb57   : >> { %2711 = vperm.xlu1 %11449, %v2629_v60  }
 0xb58   : >> { %2736 = vperm.xlu0 %11448, %v2634_v21   ;;  %v2561_v11 = vpop.permute.xlu0 %2560 }
 0xb5a   : >> { %v2549_v34 = vpop.permute.xlu1 %2548 }
 0xb5b   : >> { %2741 = vperm.xlu1 %11449, %v2635_v58  }
 0xb5c   : >> { %2656 = vperm.xlu0 %11448, %v2618_v49   ;;  %v2569_v10 = vpop.permute.xlu0 %2568 }
 0xb5e   : >> { %v2410_v16 = vpop.permute.xlu1 %2409 }
 0xb5f   : >> { %2661 = vperm.xlu1 %11449, %v2619_v45   ;;  %v2431_v57 = vsub.f32 %v13554_v56, %v2410_v16  ;;  %v2434_v16 = vsub.f32 %v13581_v15, %v2425_v41  ;;  %v11469_v41 = vld [vmem:[%s12954_s1 + $0x8] sm:$0xff]  }
 0xb60   : >> { %2686 = vperm.xlu0 %11448, %v2624_v27  }
 0xb62   : >> { %v2512_v13 = vpop.permute.xlu1 %2511 }
 0xb63   : >> { %2691 = vperm.xlu1 %11449, %v2625_v47  }
 0xb64   : >> { %2716 = vperm.xlu0 %11448, %v2630_v63  }
 0xb66   : >> { %v2517_v31 = vpop.permute.xlu1 %2516 }
 0xb67   : >> { %2721 = vperm.xlu1 %11449, %v2631_v54  }
 0xb68   : >> { %2746 = vperm.xlu0 %11448, %v2636_v22  }
 0xb6a   : >> { %v2557_v28 = vpop.permute.xlu1 %2556 }
 0xb6b   : >> { %2751 = vperm.xlu1 %11449, %v2637_v18  }
 0xb6e   : >> { %v2420_v25 = vpop.permute.xlu1 %2419 }
 0xb72   : >> { %v2522_v40 = vpop.permute.xlu1 %2521 }
 0xb76   : >> { %v2527_v26 = vpop.permute.xlu1 %2526 }
 0xb7a   : >> { %v2565_v32 = vpop.permute.xlu1 %2564 }
 0xb7e   : >> { %v2532_v0 = vpop.permute.xlu1 %2531 }
 0xbb1   : >> { %v2459_v29 = vpop.permute.xlu1 %2458 }
 0xbb2   : >> { %v2492_v8 = vmul.f32 %v2459_v29, %v2428_v19 }
 0xbb4   : >> { %v2540_v33 = vmul.f32 %v2507_v36, %v2492_v8 }
 0xbb5   : >> { %v2454_v62 = vpop.permute.xlu1 %2453 }
 0xbb6   : >> { %v2491_v39 = vmul.f32 %v2454_v62, %v2427_v20  ;;  %v2580_v21 = vadd.f32 %v2553_v43, %v2540_v33  ;;  %v11472_v33 = vld [vmem:[%s12954_s1 + $0x20] sm:$0xff]  }
 0xbb8   : >> { %v2539_v44 = vmul.f32 %v2502_v4, %v2491_v39  ;;  %v11473_v39 = vld [vmem:[%s12954_s1 + $0x28] sm:$0xff]  }
 0xbb9   : >> { %v2469_v55 = vpop.permute.xlu1 %2468 }
 0xbba   : >> { %v2579_v49 = vadd.f32 %v2549_v34, %v2539_v44  ;;  %v2494_v27 = vmul.f32 %v2469_v55, %v2430_v46  ;;  %v2464_v63 = vpop.permute.xlu0 %2463  ;;  %v2433_v34 = vsub.f32 %v13570_v42, %v2420_v25  ;;  %v11474_v46 = vld [vmem:[%s12954_s1 + $0x30] sm:$0xff]   ;;  %v11475_v44 = vld [vmem:[%s12954_s1 + $0x38] sm:$0xff]   ;;  %v11477_v55 = vld [vmem:[%s12954_s1 + $0x48] sm:$0xff]  }
 0xbbb   : >> { %v2493_v22 = vmul.f32 %v2464_v63, %v2429_v50  ;;  %v11476_v50 = vld [vmem:[%s12954_s1 + $0x40] sm:$0xff]  }
 0xbbc   : >> { %v2542_v2 = vmul.f32 %v2517_v31, %v2494_v27  ;;  %v2640_v60 = vpack.c.bf16 %v2580_v21, %v2579_v49  ;;  %v11478_v21 = vld [vmem:[%s12954_s1 + $0x50] sm:$0xff]   ;;  %v11479_v49 = vld [vmem:[%s12954_s1 + $0x58] sm:$0xff]   ;;  %v12609_v27 = vmov 0.0  }
 0xbbd   : >> { %v2541_v58 = vmul.f32 %v2512_v13, %v2493_v22  ;;  %v2479_v36 = vpop.permute.xlu1 %2478  ;;  %10512 = vmatprep.subr.bf16.mxu1 %v12609_v27  ;;  %10514 = vmatprep.mubr.msk.bf16.mxu1 %vm12610_vm8, %v12609_v27 }
 0xbbe   : >> { %v2582_v45 = vadd.f32 %v2561_v11, %v2542_v2  ;;  %v2496_v47 = vmul.f32 %v2479_v36, %v2432_v37  ;;  %v2474_v6 = vpop.permute.xlu0 %2473  ;;  %10480 = vmatprep.subr.bf16.mxu0 %v2640_v60 }
 0xbbf   : >> { %v2581_v12 = vadd.f32 %v2557_v28, %v2541_v58  ;;  %v2495_v54 = vmul.f32 %v2474_v6, %v2431_v57  ;;  %10481 = vmatpush3.bf16.msra.mxu0 %v2640_v60 }
 0xbc0   : >> { %v2544_v24 = vmul.f32 %v2527_v26, %v2496_v47 }
 0xbc1   : >> { %v2543_v18 = vmul.f32 %v2522_v40, %v2495_v54  ;;  %v2489_v4 = vpop.permute.xlu1 %2488  ;;  %v2641_v43 = vpack.c.bf16 %v2582_v45, %v2581_v12 }
 0xbc2   : >> { %v2584_v61 = vadd.f32 %v2569_v10, %v2544_v24  ;;  %v2484_v31 = vpop.permute.xlu0 %2483  ;;  %v2498_v11 = vmul.f32 %v2489_v4, %v2434_v16  ;;  %v11470_v10 = vld [vmem:[%s12954_s1 + $0x10] sm:$0xff]  }
 0xbc3   : >> { %v2583_v19 = vadd.f32 %v2565_v32, %v2543_v18  ;;  %v2497_v29 = vmul.f32 %v2484_v31, %v2433_v34  ;;  %10482 = vmatprep.subr.bf16.mxu0 %v2641_v43 }
 0xbc4   : >> { %10483 = vmatpush3.bf16.msra.mxu0 %v2641_v43 }
 0xbc5   : >> { %v2573_v13 = vpop.permute.xlu1 %2572  ;;  %v2642_v28 = vpack.c.bf16 %v2584_v61, %v2583_v19  ;;  %v2545_v26 = vmul.f32 %v2532_v0, %v2497_v29  ;;  %v11471_v0 = vld [vmem:[%s12954_s1 + $0x18] sm:$0xff]  }
 0xbc7   : >> { %v2537_v25 = vpop.permute.xlu0 %2536  ;;  %10484 = vmatprep.subr.bf16.mxu0 %v2642_v28  ;;  %v2585_v8 = vadd.f32 %v2573_v13, %v2545_v26 }
 0xbc8   : >> { %v2546_v40 = vmul.f32 %v2537_v25, %v2498_v11  ;;  %10485 = vmatpush3.bf16.msra.mxu0 %v2642_v28 }
 0xbc9   : >> { %v2577_v32 = vpop.permute.xlu1 %2576 }
 0xbca   : >> { %v2586_v20 = vadd.f32 %v2577_v32, %v2546_v40 }
 0xbcb   : >> { %v2647_v22 = vpop.permute.xlu0 %2646 }
 0xbcc   : >> { %v2643_v62 = vpack.c.bf16 %v2586_v20, %v2585_v8 }
 0xbce   : >> { %10486 = vmatprep.subr.bf16.mxu0 %v2643_v62  ;;  %v2652_v63 = vpop.permute.xlu1 %2651 }
 0xbcf   : >> { %10487 = vmatpush3.bf16.msra.mxu0 %v2643_v62  ;;  %v2677_v2 = vpop.permute.xlu0 %2676 }
 0xbd0   : >> { %10524 = vmatprep.subr.bf16.mxu0 %v12609_v27 }
 0xbd2   : >> { %10489 = vmatmul.mubr.msk.bf16.vlgmr.msra.gmra.mrb[16].mxu0 %vm713_vm1, %v11469_v41  ;;  %v2682_v37 = vpop.permute.xlu1 %2681 }
 0xbd3   : >> { %10492 = vmatprep.mubr.msk.bf16.mxu0 %vm713_vm1, %v11470_v10  ;;  %v2707_v57 = vpop.permute.xlu0 %2706 }
 0xbd6   : >> { %v2712_v60 = vpop.permute.xlu1 %2711 }
 0xbd7   : >> { %v2737_v36 = vpop.permute.xlu0 %2736 }
 0xbda   : >> { %10493 = vmatmul.mubr.msk.bf16.gmra.mrb[20].mxu0 %vm713_vm1, %v11471_v0  ;;  %v2742_v58 = vpop.permute.xlu1 %2741 }
 0xbdb   : >> { %10496 = vmatprep.mubr.msk.bf16.mxu0 %vm713_vm1, %v11472_v33  ;;  %v2657_v12 = vpop.permute.xlu0 %2656 }
 0xbde   : >> { %v2662_v47 = vpop.permute.xlu1 %2661 }
 0xbdf   : >> { %v2687_v32 = vpop.permute.xlu0 %2686 }
 0xbe2   : >> { %10497 = vmatmul.mubr.msk.bf16.gmra.mrb[24].mxu0 %vm713_vm1, %v11473_v39  ;;  %v2692_v20 = vpop.permute.xlu1 %2691 }
 0xbe3   : >> { %10500 = vmatprep.mubr.msk.bf16.mxu0 %vm713_vm1, %v11474_v46  ;;  %v2717_v39 = vpop.permute.xlu0 %2716 }
 0xbea   : >> { %10501 = vmatmul.mubr.msk.bf16.gmra.mrb[28].mxu0 %vm713_vm1, %v11475_v44  ;;  %v2722_v44 = vpop.permute.xlu1 %2721 }
 0xbeb   : >> { %10504 = vmatprep.mubr.msk.bf16.mxu0 %vm713_vm1, %v11476_v50 }
 0xbf2   : >> { %10505 = vmatmul.mubr.msk.bf16.gmra.mrb[32].mxu0 %vm713_vm1, %v11477_v55 }
 0xbf3   : >> { %10508 = vmatprep.mubr.msk.bf16.mxu0 %vm713_vm1, %v11478_v21 }
 0xbfa   : >> { %10509 = vmatmul.mubr.msk.bf16.gmra.mrb[36].mxu0 %vm713_vm1, %v11479_v49 }
 0xbfb   : >> { %10526 = vmatprep.mubr.msk.bf16.mxu0 %vm12610_vm8, %v12609_v27 }
 0xca5   : >> { %v10490_v45 = vpop.f32.mrb[16].mxu0 }
 0xca6   : >> { %v2894_v6 = vpop.f32.mrb[17].mxu0  ;;  %v2903_v24 = vadd.f32 %v10490_v45, %v2657_v12 }
 0xca7   : >> { %v10491_v54 = vpop.f32.mrb[18].mxu0  ;;  %v2895_v4 = vadd.f32 %v2894_v6, %v2647_v22 }
 0xca8   : >> { %v2906_v34 = vadd.f32 %v10491_v54, %v2662_v47  ;;  %v2897_v18 = vpop.f32.mrb[19].mxu0 }
 0xca9   : >> { %v2898_v43 = vadd.f32 %v2897_v18, %v2652_v63 }
 0xcaa   : >> { %v2990_v61 = vpack.c.bf16 %v2906_v34, %v2903_v24 }
 0xcab   : >> { %v2989_v31 = vpack.c.bf16 %v2898_v43, %v2895_v4  ;;  %v2752_v43 = vpop.permute.xlu1 %2751 }
 0xcac   : >> { %10513 = vmatpush3.bf16.msra.mxu1 %v2990_v61 }
 0xcad   : >> { %v10494_v19 = vpop.f32.mrb[20].mxu0  ;;  %3019 = vxpose.xlu0.c.b16.start.end [1/1] (short) (narrow) %v2989_v31, 16  ;;  %10518 = vmatprep.subr.bf16.mxu1 %v12609_v27 }
 0xcae   : >> { %v13785_v29 = vpop.f32.mrb[21].mxu0  ;;  %v2919_v13 = vadd.f32 %v10494_v19, %v2677_v2 }
 0xcaf   : >> { %v10495_v16 = vpop.f32.mrb[22].mxu0 }
 0xcb0   : >> { %v2922_v28 = vadd.f32 %v10495_v16, %v2682_v37  ;;  %v13787_v11 = vpop.f32.mrb[23].mxu0 }
 0xcb2   : >> { %v2992_v26 = vpack.c.bf16 %v2922_v28, %v2919_v13 }
 0xcb4   : >> { %3079 = vxpose.xlu1.c.b16.start.end [1/1] (short) (narrow) %v2992_v26, 16  ;;  %v10074_v26 = vld [vmem:[%s13820_s28] sm:$0xff]  }
 0xcb5   : >> { %v13789_v25 = vpop.f32.mrb[24].mxu0 }
 0xcb6   : >> { %v2926_v40 = vpop.f32.mrb[25].mxu0 }
 0xcb7   : >> { %v13791_v8 = vpop.f32.mrb[26].mxu0  ;;  %v2927_v41 = vadd.f32 %v2926_v40, %v2687_v32  ;;  %v10075_v40 = vunpack.c.l.bf16 %v10074_v26  ;;  %v10076_v32 = vunpack.c.h.bf16 %v10074_v26 }
 0xcb8   : >> { %v2929_v62 = vpop.f32.mrb[27].mxu0 }
 0xcb9   : >> { %v2930_v10 = vadd.f32 %v2929_v62, %v2692_v20 }
 0xcbb   : >> { %v2993_v0 = vpack.c.bf16 %v2930_v10, %v2927_v41 }
 0xcbd   : >> { %v10502_v33 = vpop.f32.mrb[28].mxu0 }
 0xcbe   : >> { %v2942_v46 = vpop.f32.mrb[29].mxu0  ;;  %v2951_v55 = vadd.f32 %v10502_v33, %v2717_v39 }
 0xcbf   : >> { %v10503_v50 = vpop.f32.mrb[30].mxu0  ;;  %v2943_v63 = vadd.f32 %v2942_v46, %v2707_v57 }
 0xcc0   : >> { %v2954_v21 = vadd.f32 %v10503_v50, %v2722_v44  ;;  %v2945_v49 = vpop.f32.mrb[31].mxu0 }
 0xcc1   : >> { %v2946_v22 = vadd.f32 %v2945_v49, %v2712_v60  ;;  %v2747_v60 = vpop.permute.xlu0 %2746 }
 0xcc2   : >> { %v2996_v37 = vpack.c.bf16 %v2954_v21, %v2951_v55 }
 0xcc3   : >> { %v2995_v2 = vpack.c.bf16 %v2946_v22, %v2943_v63 }
 0xcc4   : >> { %10525 = vmatpush3.bf16.msra.mxu0 %v2996_v37 }
 0xcc5   : >> { %v10506_v45 = vpop.f32.mrb[32].mxu0  ;;  %3139 = vxpose.xlu0.c.b16.start.end [1/1] (short) (narrow) %v2995_v2, 16  ;;  %10536 = vmatprep.subr.bf16.mxu0 %v12609_v27 }
 0xcc6   : >> { %v13794_v47 = vpop.f32.mrb[33].mxu0  ;;  %v2967_v12 = vadd.f32 %v10506_v45, %v2737_v36 }
 0xcc7   : >> { %v10507_v6 = vpop.f32.mrb[34].mxu0 }
 0xcc8   : >> { %v2970_v54 = vadd.f32 %v10507_v6, %v2742_v58  ;;  %v13796_v24 = vpop.f32.mrb[35].mxu0 }
 0xcca   : >> { %v2998_v34 = vpack.c.bf16 %v2970_v54, %v2967_v12  ;;  %v10106_v12 = vld [vmem:[%s13820_s28 + $0x10] sm:$0xff]  }
 0xccb   : >> { %v10083_v54 = vunpack.c.l.bf16 %v10106_v12 }
 0xccc   : >> { %3199 = vxpose.xlu0.c.b16.start.end [1/1] (short) (narrow) %v2998_v34, 16  ;;  %v10084_v34 = vunpack.c.h.bf16 %v10106_v12 }
 0xccd   : >> { %v13798_v18 = vpop.f32.mrb[36].mxu0 }
 0xcce   : >> { %v2974_v57 = vpop.f32.mrb[37].mxu0 }
 0xccf   : >> { %v13800_v4 = vpop.f32.mrb[38].mxu0  ;;  %v2975_v31 = vadd.f32 %v2974_v57, %v2747_v60 }
 0xcd0   : >> { %v2977_v61 = vpop.f32.mrb[39].mxu0 }
 0xcd1   : >> { %v2978_v19 = vadd.f32 %v2977_v61, %v2752_v43  ;;  %v10107_v61 = vld [vmem:[%s13820_s28 + $0x18] sm:$0xff]  }
 0xcd3   : >> { %v2999_v16 = vpack.c.bf16 %v2978_v19, %v2975_v31 }
 0xd13   : >> { %v3027_v13 = vpop.trf.xlu0 }
 0xd14   : >> { %10515 = vmatmul.mubr.msk.bf16.vlgmr.msra.gmra.mrb[32].mxu1 %vm647_vm0, %v3027_v13 }
 0xd15   : >> { %10519 = vmatpush3.bf16.msra.mxu1 %v2993_v0  ;;  %10520 = vmatprep.mubr.msk.bf16.mxu1 %vm12610_vm8, %v12609_v27  ;;  %v10105_v0 = vld [vmem:[%s13820_s28 + $0x8] sm:$0xff]  }
 0xd16   : >> { %10530 = vmatprep.subr.bf16.mxu1 %v12609_v27  ;;  %v10079_v50 = vunpack.c.l.bf16 %v10105_v0  ;;  %v10080_v55 = vunpack.c.h.bf16 %v10105_v0 }
 0xd1a   : >> { %v3087_v58 = vpop.trf.xlu1 }
 0xd1c   : >> { %10521 = vmatmul.mubr.msk.bf16.vlgmr.msra.gmra.mrb[36].mxu1 %vm647_vm0, %v3087_v58  ;;  %v10087_v58 = vunpack.c.l.bf16 %v10107_v61 }
 0xd1d   : >> { %10531 = vmatpush3.bf16.msra.mxu1 %v2999_v16  ;;  %10532 = vmatprep.mubr.msk.bf16.mxu1 %vm12610_vm8, %v12609_v27 }
 0xd1e   : >> { %10542 = vmatprep.subr.bf16.mxu1 %v12609_v27 }
 0xd2b   : >> { %v3147_v36 = vpop.trf.xlu0 }
 0xd2c   : >> { %10527 = vmatmul.mubr.msk.bf16.vlgmr.msra.gmra.mrb[40].mxu0 %vm647_vm0, %v3147_v36 }
 0xd2d   : >> { %10538 = vmatprep.mubr.msk.bf16.mxu0 %vm12610_vm8, %v12609_v27 }
 0xd32   : >> { %v3207_v28 = vpop.trf.xlu0 }
 0xd33   : >> { %10533 = vmatmul.mubr.msk.bf16.vlgmr.msra.gmra.mrb[40].mxu1 %vm647_vm0, %v3207_v28  ;;  %v10088_v28 = vunpack.c.h.bf16 %v10107_v61 }
 0xd34   : >> { %10544 = vmatprep.mubr.msk.bf16.mxu1 %vm12610_vm8, %v12609_v27 }
 0xde7   : >> { %v3072_v20 = vpop.f32.mrb[32].mxu1 }
 0xde8   : >> { %v13823_v62 = vadd.f32 %v10075_v40, %v3072_v20  ;;  %v10516_v41 = vpop.f32.mrb[33].mxu1 }
 0xde9   : >> { %v3075_v10 = vpop.f32.mrb[34].mxu1 }
 0xdea   : >> { %v3076_v33 = vadd.f32 %v10076_v32, %v3075_v10  ;;  %v3259_v39 = vsel %vm647_vm0, %v13823_v62, -inf  ;;  %v10517_v46 = vpop.f32.mrb[35].mxu1 }
 0xdeb   : >> { %3260 = vmax.xlane.f32.xlu0 %v3259_v39  ;;  %v2621_v46 = vld [vmem:[%s13723_s23 + $0x28] sm:$0xff] }
 0xdec   : >> { %v3262_v44 = vsel %vm647_vm0, %v3076_v33, -inf }
 0xded   : >> { %3263 = vmax.xlane.f32.xlu1 %v3262_v44  ;;  %v2620_v44 = vld [vmem:[%s13723_s23 + $0x20] sm:$0xff] }
 0xdef   : >> { %v3132_v21 = vpop.f32.mrb[36].mxu1 }
 0xdf0   : >> { %v3133_v49 = vadd.f32 %v10079_v50, %v3132_v21  ;;  %v10522_v63 = vpop.f32.mrb[37].mxu1  ;;  %v2626_v50 = vld [vmem:[%s13723_s23 + $0x50] sm:$0xff]  ;;  %v2627_v21 = vld [vmem:[%s13723_s23 + $0x58] sm:$0xff] }
 0xdf1   : >> { %v3135_v22 = vpop.f32.mrb[38].mxu1  ;;  %v2633_v63 = vld [vmem:[%s13723_s23 + $0x88] sm:$0xff] }
 0xdf2   : >> { %v3136_v37 = vadd.f32 %v10080_v55, %v3135_v22  ;;  %v3265_v2 = vsel %vm647_vm0, %v3133_v49, -inf  ;;  %v10523_v45 = vpop.f32.mrb[39].mxu1  ;;  %v2632_v55 = vld [vmem:[%s13723_s23 + $0x80] sm:$0xff] }
 0xdf3   : >> { %3266 = vmax.xlane.f32.xlu0 %v3265_v2 }
 0xdf4   : >> { %v3268_v6 = vsel %vm647_vm0, %v3136_v37, -inf }
 0xdf5   : >> { %3269 = vmax.xlane.f32.xlu1 %v3268_v6 }
 0xdff   : >> { %v3192_v57 = vpop.f32.mrb[40].mxu0 }
 0xe00   : >> { %v13832_v60 = vadd.f32 %v10083_v54, %v3192_v57  ;;  %v10528_v43 = vpop.f32.mrb[41].mxu0 }
 0xe01   : >> { %v3195_v31 = vpop.f32.mrb[42].mxu0 }
 0xe02   : >> { %v13835_v19 = vadd.f32 %v10084_v34, %v3195_v31  ;;  %v10529_v16 = vpop.f32.mrb[43].mxu0  ;;  %v3271_v13 = vsel %vm647_vm0, %v13832_v60, -inf }
 0xe03   : >> { %3272 = vmax.xlane.f32.xlu0 %v3271_v13 }
 0xe04   : >> { %v3274_v36 = vsel %vm647_vm0, %v13835_v19, -inf }
 0xe05   : >> { %3275 = vmax.xlane.f32.xlu1 %v3274_v36 }
 0xe06   : >> { %v3252_v26 = vpop.f32.mrb[40].mxu1 }
 0xe07   : >> { %v3253_v40 = vadd.f32 %v10087_v58, %v3252_v26  ;;  %v10534_v32 = vpop.f32.mrb[41].mxu1 }
 0xe08   : >> { %v3255_v20 = vpop.f32.mrb[42].mxu1 }
 0xe09   : >> { %v3256_v41 = vadd.f32 %v10088_v28, %v3255_v20  ;;  %v10535_v10 = vpop.f32.mrb[43].mxu1  ;;  %v3277_v0 = vsel %vm647_vm0, %v3253_v40, -inf }
 0xe0a   : >> { %3278 = vmax.xlane.f32.xlu0 %v3277_v0 }
 0xe0b   : >> { %v3280_v39 = vsel %vm647_vm0, %v3256_v41, -inf }
 0xe0c   : >> { %3281 = vmax.xlane.f32.xlu1 %v3280_v39 }
 0xe1d   : >> { %2671 = vperm.xlu1 %11449, %v2621_v46  }
 0xe20   : >> { %2666 = vperm.xlu0 %11448, %v2620_v44  }
 0xe21   : >> { %2696 = vperm.xlu1 %11449, %v2626_v50  }
 0xe24   : >> { %2726 = vperm.xlu0 %11448, %v2632_v55  }
 0xe25   : >> { %2701 = vperm.xlu1 %11449, %v2627_v21  }
 0xe29   : >> { %2731 = vperm.xlu1 %11449, %v2633_v63  }
 0xe78   : >> { %v3261_v22 = vpop.xlane.xlu0 %3260 }
 0xe79   : >> { %v3283_v2 = vsub.f32 %v13823_v62, %v3261_v22 }
 0xe7a   : >> { %v3264_v45 = vpop.xlane.xlu1 %3263 }
 0xe7b   : >> { %v3291_v6 = vmul.f32 1.442695, %v3283_v2  ;;  %v3284_v12 = vsub.f32 %v3076_v33, %v3264_v45 }
 0xe7d   : >> { %11596 = vpow2.f32 %v3291_v6  ;;  %v3293_v54 = vmul.f32 1.442695, %v3284_v12 }
 0xe7f   : >> { %11598 = vpow2.f32 %v3293_v54 }
 0xe80   : >> { %v3267_v34 = vpop.xlane.xlu0 %3266 }
 0xe81   : >> { %v3285_v57 = vsub.f32 %v3133_v49, %v3267_v34 }
 0xe82   : >> { %v3270_v43 = vpop.xlane.xlu1 %3269 }
 0xe83   : >> { %v3295_v61 = vmul.f32 1.442695, %v3285_v57  ;;  %v3286_v31 = vsub.f32 %v3136_v37, %v3270_v43 }
 0xe85   : >> { %11600 = vpow2.f32 %v3295_v61  ;;  %v3297_v16 = vmul.f32 1.442695, %v3286_v31 }
 0xe87   : >> { %v13850_v13 = vpop.eup %11596  ;;  %11602 = vpow2.f32 %v3297_v16 }
 0xe88   : >> { %v3307_v58 = vsel %vm647_vm0, %v13850_v13, 0.0 }
 0xe89   : >> { %v13854_v62 = vpop.eup %11598  ;;  %3308 = vadd.xlane.f32.xlu0 %v3307_v58 }
 0xe8a   : >> { %v3310_v33 = vsel %vm647_vm0, %v13854_v62, 0.0 }
 0xe8b   : >> { %3311 = vadd.xlane.f32.xlu1 %v3310_v33 }
 0xe8f   : >> { %v13858_v36 = vpop.eup %11600 }
 0xe90   : >> { %v3273_v49 = vpop.xlane.xlu0 %3272  ;;  %v3313_v37 = vsel %vm647_vm0, %v13858_v36, 0.0 }
 0xe91   : >> { %v13862_v28 = vpop.eup %11602  ;;  %v3287_v26 = vsub.f32 %v13832_v60, %v3273_v49  ;;  %3314 = vadd.xlane.f32.xlu0 %v3313_v37 }
 0xe92   : >> { %v3276_v32 = vpop.xlane.xlu1 %3275  ;;  %v3316_v20 = vsel %vm647_vm0, %v13862_v28, 0.0 }
 0xe93   : >> { %v3299_v10 = vmul.f32 1.442695, %v3287_v26  ;;  %v3288_v0 = vsub.f32 %v13835_v19, %v3276_v32  ;;  %3317 = vadd.xlane.f32.xlu1 %v3316_v20  ;;  %v2638_v26 = vld [vmem:[%s13723_s23 + $0xb0] sm:$0xff]  ;;  %v16361_v32 = vmov 2  }
 0xe95   : >> { %11604 = vpow2.f32 %v3299_v10  ;;  %v3301_v39 = vmul.f32 1.442695, %v3288_v0 }
 0xe97   : >> { %11606 = vpow2.f32 %v3301_v39  ;;  %v3279_v46 = vpop.xlane.xlu0 %3278 }
 0xe98   : >> { %v3289_v44 = vsub.f32 %v3253_v40, %v3279_v46 }
 0xe99   : >> { %v3282_v50 = vpop.xlane.xlu1 %3281 }
 0xe9a   : >> { %v3303_v55 = vmul.f32 1.442695, %v3289_v44  ;;  %v3290_v21 = vsub.f32 %v3256_v41, %v3282_v50 }
 0xe9c   : >> { %11608 = vpow2.f32 %v3303_v55  ;;  %v3305_v63 = vmul.f32 1.442695, %v3290_v21 }
 0xe9d   : >> { %v2672_v60 = vpop.permute.xlu1 %2671 }
 0xe9e   : >> { %11610 = vpow2.f32 %v3305_v63  ;;  %v2914_v45 = vadd.f32 %v13787_v11, %v2672_v60 }
 0xe9f   : >> { %v13868_v22 = vpop.eup %11604  ;;  %v2667_v2 = vpop.permute.xlu0 %2666 }
 0xea0   : >> { %v2911_v19 = vadd.f32 %v13785_v29, %v2667_v2  ;;  %v3319_v6 = vsel %vm647_vm0, %v13868_v22, 0.0 }
 0xea1   : >> { %v13874_v12 = vpop.eup %11606  ;;  %3320 = vadd.xlane.f32.xlu0 %v3319_v6  ;;  %v2697_v40 = vpop.permute.xlu1 %2696 }
 0xea2   : >> { %v2991_v54 = vpack.c.bf16 %v2914_v45, %v2911_v19  ;;  %v3322_v41 = vsel %vm647_vm0, %v13874_v12, 0.0  ;;  %v2935_v11 = vadd.f32 %v13789_v25, %v2697_v40 }
 0xea3   : >> { %3323 = vadd.xlane.f32.xlu1 %v3322_v41  ;;  %v2727_v43 = vpop.permute.xlu0 %2726 }
 0xea4   : >> { %v13889_v49 = vadd.f32 %v13794_v47, %v2727_v43 }
 0xea5   : >> { %v2702_v34 = vpop.permute.xlu1 %2701 }
 0xea6   : >> { %v13878_v57 = vpop.eup %11608  ;;  %v2938_v29 = vadd.f32 %v13791_v8, %v2702_v34  ;;  %v2639_v8 = vld [vmem:[%s13723_s23 + $0xb8] sm:$0xff] }
 0xea7   : >> { %v3325_v61 = vsel %vm647_vm0, %v13878_v57, 0.0 }
 0xea8   : >> { %v13884_v31 = vpop.eup %11610  ;;  %v2994_v16 = vpack.c.bf16 %v2938_v29, %v2935_v11  ;;  %3326 = vadd.xlane.f32.xlu0 %v3325_v61 }
 0xea9   : >> { %v2732_v58 = vpop.permute.xlu1 %2731  ;;  %v3328_v33 = vsel %vm647_vm0, %v13884_v31, 0.0 }
 0xeaa   : >> { %v13892_v37 = vadd.f32 %v13796_v24, %v2732_v58  ;;  %3329 = vadd.xlane.f32.xlu1 %v3328_v33 }
 0xeac   : >> { %v2997_v25 = vpack.c.bf16 %v13892_v37, %v13889_v49 }
 0xebb   : >> { %2761 = vperm.xlu1 %11449, %v2639_v8  }
 0xebe   : >> { %2756 = vperm.xlu0 %11448, %v2638_v26  }
 0xebf   : >> { %11451 = vset.pattern.permute.xlu1 %v16361_v32 }
 0xec0   : >> { %3558 = vperm.xlu1 %11451, %v13667_v7  }
 0xec2   : >> { %11450 = vset.pattern.permute.xlu0 %v16361_v32 }
 0xec3   : >> { %3554 = vperm.xlu0 %11450, %v13662_v30  }
 0xec4   : >> { %3562 = vperm.xlu1 %11451, %v13679_v53  }
 0xec7   : >> { %3566 = vperm.xlu0 %11450, %v13682_v23  }
 0xec8   : >> { %3570 = vperm.xlu1 %11451, %v13696_v52  }
 0xecb   : >> { %3574 = vperm.xlu0 %11450, %v13687_v5  }
 0xecc   : >> { %3578 = vperm.xlu1 %11451, %v13703_v48  }
 0xecf   : >> { %3582 = vperm.xlu0 %11450, %v13718_v51  }
 0xf16   : >> { %v3309_v47 = vpop.xlane.xlu0 %3308 }
 0xf17   : >> { %11612 = vrcp.f32 %v3309_v47 }
 0xf18   : >> { %v3312_v24 = vpop.xlane.xlu1 %3311 }
 0xf19   : >> { %11614 = vrcp.f32 %v3312_v24 }
 0xf1e   : >> { %v3315_v7 = vpop.xlane.xlu0 %3314 }
 0xf1f   : >> { %11616 = vrcp.f32 %v3315_v7 }
 0xf20   : >> { %v3318_v20 = vpop.xlane.xlu1 %3317 }
 0xf21   : >> { %v11613_v30 = vpop.eup %11612  ;;  %11618 = vrcp.f32 %v3318_v20 }
 0xf22   : >> { %v3339_v23 = vmul.f32 %v11613_v30, %v13850_v13 }
 0xf23   : >> { %v11615_v53 = vpop.eup %11614 }
 0xf24   : >> { %v3340_v52 = vmul.f32 %v11615_v53, %v13854_v62  ;;  %v11481_v53 = vld [vmem:[%s13939_s29 + $0x8] sm:$0xff]  }
 0xf26   : >> { %v3347_v10 = vpack.c.bf16 %v3340_v52, %v3339_v23  ;;  %v11482_v23 = vld [vmem:[%s13939_s29 + $0x10] sm:$0xff]   ;;  %v11483_v52 = vld [vmem:[%s13939_s29 + $0x18] sm:$0xff]  }
 0xf28   : >> { %v3355_v5 = vsel %vm647_vm0, %v3347_v10, 0 }
 0xf29   : >> { %v11617_v48 = vpop.eup %11616  ;;  %10537 = vmatpush3.bf16.xpose.msra.mxu0 %v3355_v5 }
 0xf2a   : >> { %10548 = vmatprep.subr.bf16.mxu0 %v12609_v27  ;;  %v3341_v0 = vmul.f32 %v11617_v48, %v13858_v36 }
 0xf2b   : >> { %v11619_v51 = vpop.eup %11618 }
 0xf2c   : >> { %v3342_v39 = vmul.f32 %v11619_v51, %v13862_v28 }
 0xf2e   : >> { %v3321_v46 = vpop.xlane.xlu0 %3320  ;;  %v3348_v44 = vpack.c.bf16 %v3342_v39, %v3341_v0 }
 0xf2f   : >> { %11620 = vrcp.f32 %v3321_v46 }
 0xf30   : >> { %10539 = vmatmul.mubr.msk.bf16.vlgmr.msra.gmra.mrb[44].mxu0 %vm647_vm0, %v2991_v54  ;;  %v3324_v13 = vpop.xlane.xlu1 %3323  ;;  %v3402_v62 = vsel %vm647_vm0, %v3348_v44, 0 }
 0xf31   : >> { %11622 = vrcp.f32 %v3324_v13  ;;  %10543 = vmatpush3.bf16.xpose.msra.mxu1 %v3402_v62  ;;  %10550 = vmatprep.mubr.msk.bf16.mxu0 %vm12610_vm8, %v12609_v27 }
 0xf32   : >> { %10554 = vmatprep.subr.bf16.mxu1 %v12609_v27 }
 0xf35   : >> { %v3327_v50 = vpop.xlane.xlu0 %3326 }
 0xf36   : >> { %11624 = vrcp.f32 %v3327_v50 }
 0xf37   : >> { %v3330_v36 = vpop.xlane.xlu1 %3329 }
 0xf38   : >> { %11626 = vrcp.f32 %v3330_v36  ;;  %10545 = vmatmul.mubr.msk.bf16.vlgmr.msra.gmra.mrb[44].mxu1 %vm647_vm0, %v2994_v16 }
 0xf39   : >> { %v11621_v28 = vpop.eup %11620  ;;  %10556 = vmatprep.mubr.msk.bf16.mxu1 %vm12610_vm8, %v12609_v27 }
 0xf3a   : >> { %v3343_v63 = vmul.f32 %v11621_v28, %v13868_v22 }
 0xf3b   : >> { %v11623_v55 = vpop.eup %11622  ;;  %v2762_v21 = vpop.permute.xlu1 %2761 }
 0xf3c   : >> { %v3344_v60 = vmul.f32 %v11623_v55, %v13874_v12  ;;  %v2986_v45 = vadd.f32 %v13800_v4, %v2762_v21 }
 0xf3d   : >> { %v2757_v2 = vpop.permute.xlu0 %2756 }
 0xf3e   : >> { %v2983_v19 = vadd.f32 %v13798_v18, %v2757_v2  ;;  %v3349_v6 = vpack.c.bf16 %v3344_v60, %v3343_v63  ;;  %v11480_v18 = vld [vmem:[%s13939_s29] sm:$0xff]  }
 0xf3f   : >> { %v3559_v10 = vpop.permute.xlu1 %3558 }
 0xf40   : >> { %v11625_v40 = vpop.eup %11624  ;;  %v3000_v54 = vpack.c.bf16 %v2986_v45, %v2983_v19  ;;  %v3449_v41 = vsel %vm647_vm0, %v3349_v6, 0 }
 0xf41   : >> { %10549 = vmatpush3.bf16.xpose.msra.mxu0 %v3449_v41  ;;  %v3345_v27 = vmul.f32 %v11625_v40, %v13878_v57 }
 0xf42   : >> { %v11627_v34 = vpop.eup %11626  ;;  %v3555_v5 = vpop.permute.xlu0 %3554 }
 0xf43   : >> { %v3346_v11 = vmul.f32 %v11627_v34, %v13884_v31  ;;  %v3563_v48 = vpop.permute.xlu1 %3562 }
 0xf45   : >> { %v3350_v22 = vpack.c.bf16 %v3346_v11, %v3345_v27 }
 0xf46   : >> { %v3567_v51 = vpop.permute.xlu0 %3566 }
 0xf47   : >> { %v3496_v12 = vsel %vm647_vm0, %v3350_v22, 0  ;;  %v3571_v44 = vpop.permute.xlu1 %3570 }
 0xf48   : >> { %10551 = vmatmul.mubr.msk.bf16.vlgmr.msra.gmra.mrb[48].mxu0 %vm647_vm0, %v2997_v25  ;;  %10555 = vmatpush3.bf16.xpose.msra.mxu1 %v3496_v12 }
 0xf49   : >> { %10568 = vmatprep.mubr.msk.bf16.mxu0 %vm713_vm1, %v11480_v18 }
 0xf4a   : >> { %v3575_v55 = vpop.permute.xlu0 %3574 }
 0xf4b   : >> { %v3579_v45 = vpop.permute.xlu1 %3578 }
 0xf4e   : >> { %v3583_v41 = vpop.permute.xlu0 %3582 }
 0xf4f   : >> { %10557 = vmatmul.mubr.msk.bf16.vlgmr.msra.gmra.mrb[48].mxu1 %vm647_vm0, %v3000_v54 }
0x1003   : >> { %v3391_v4 = vpop.f32.mrb[44].mxu0 }
0x1004   : >> { %v10540_v57 = vpop.f32.mrb[45].mxu0 }
0x1005   : >> { %v3394_v29 = vpop.f32.mrb[46].mxu0 }
0x1006   : >> { %v3549_v43 = vpack.c.bf16 %v3394_v29, %v3391_v4  ;;  %v10541_v61 = vpop.f32.mrb[47].mxu0 }
0x1008   : >> { %10560 = vmatprep.subr.bf16.mxu0 %v3549_v43 }
0x1009   : >> { %10561 = vmatpush3.bf16.msra.mxu0 %v3549_v43 }
0x100b   : >> { %v3438_v31 = vpop.f32.mrb[44].mxu1 }
0x100c   : >> { %v10546_v16 = vpop.f32.mrb[45].mxu1 }
0x100d   : >> { %v3441_v58 = vpop.f32.mrb[46].mxu1 }
0x100e   : >> { %v3550_v33 = vpack.c.bf16 %v3441_v58, %v3438_v31  ;;  %v10547_v49 = vpop.f32.mrb[47].mxu1 }
0x100f   : > { %v11660_v49 = vld [vmem:[%s16240_s11] sm:$0xff] (%p616_p4)  }
0x1010   : >> { %10562 = vmatprep.subr.bf16.mxu0 %v3550_v33 }
0x1011   : >> { %10563 = vmatpush3.bf16.msra.mxu0 %v3550_v33 }
0x101b   : >> { %v3485_v37 = vpop.f32.mrb[48].mxu0 }
0x101c   : >> { %v10552_v25 = vpop.f32.mrb[49].mxu0 }
0x101d   : >> { %v3488_v8 = vpop.f32.mrb[50].mxu0  ;;  %v16378_v25 = vld [vmem:[#allocation11_spill] sm:$0xff] (%p616_p4) }
0x101e   : >> { %v3551_v26 = vpack.c.bf16 %v3488_v8, %v3485_v37  ;;  %v10553_v32 = vpop.f32.mrb[51].mxu0  ;;  %v16295_v37 = vmov (%p616_p4), 0   ;;  %v16379_v8 = vld [vmem:[#allocation12_spill] sm:$0xff] (%p616_p4) }
0x101f   : > { %11657 = vset.pattern.permute.xlu1 (%p616_p4), %v16295_v37  ;;  %11656 = vset.pattern.permute.xlu0 (%p616_p4), %v16295_v37  ;;  %v16381_v32 = vld [vmem:[#allocation13_spill] sm:$0xff] (%p616_p4) }
0x1020   : >> { %10564 = vmatprep.subr.bf16.mxu0 %v3551_v26 }
0x1021   : >> { %10565 = vmatpush3.bf16.msra.mxu0 %v3551_v26  ;;  %v16380_v26 = vld [vmem:[#allocation14_spill] sm:$0xff] (%p616_p4) }
0x1022   : >> { %v3532_v47 = vpop.f32.mrb[48].mxu1 }
0x1023   : >> { %v10558_v24 = vpop.f32.mrb[49].mxu1 }
0x1024   : >> { %v3535_v7 = vpop.f32.mrb[50].mxu1  ;;  %v16383_v24 = vld [vmem:[#allocation15_spill] sm:$0xff] (%p616_p4) }
0x1025   : >> { %v3552_v20 = vpack.c.bf16 %v3535_v7, %v3532_v47  ;;  %v10559_v30 = vpop.f32.mrb[51].mxu1  ;;  %v16382_v47 = vld [vmem:[#allocation16_spill] sm:$0xff] (%p616_p4)  ;;  %v16384_v7 = vld [vmem:[#allocation18_spill] sm:$0xff] (%p616_p4) }
0x1027   : >> { %10566 = vmatprep.subr.bf16.mxu0 %v3552_v20 }
0x1028   : >> { %10567 = vmatpush3.bf16.msra.mxu0 %v3552_v20 }
0x102b   : >> { %10569 = vmatmul.mubr.msk.bf16.vlgmr.msra.gmra.mrb[52].mxu0 %vm713_vm1, %v11481_v53 }
0x102c   : >> { %10572 = vmatprep.mubr.msk.bf16.mxu0 %vm713_vm1, %v11482_v23 }
0x1033   : >> { %10573 = vmatmul.mubr.msk.bf16.gmra.mrb[56].mxu0 %vm713_vm1, %v11483_v52 }
0x1034   : > { %10582 = vmatprep.mubr.msk.bf16.mxu0 (%p616_p4), %vm3798_vm9, %v11660_v49 }
0x10fe   : >> { %v10570_v0 = vpop.f32.mrb[52].mxu0 }
0x10ff   : >> { %v3660_v39 = vadd.f32 %v10570_v0, %v3563_v48  ;;  %v3651_v46 = vpop.f32.mrb[53].mxu0 }
0x1100   : >> { %v3652_v13 = vadd.f32 %v3651_v46, %v3555_v5  ;;  %v10571_v62 = vpop.f32.mrb[54].mxu0  ;;  %v11662_v46 = vld [vmem:[%s16240_s11 + $0x10] sm:$0xff] (%p616_p4)  }
0x1101   : >> { %v13950_v18 = vadd.f32 %v3660_v39, %v13539_v17   ;;  %v3663_v36 = vadd.f32 %v10571_v62, %v3567_v51  ;;  %v3654_v28 = vpop.f32.mrb[55].mxu0  ;;  %v11661_v39 = vld [vmem:[%s16240_s11 + $0x8] sm:$0xff] (%p616_p4)   ;;  %v16293_v62 = vmov (%p616_p4), 1  }
0x1102   : >> { %v13953_v16 = vadd.f32 %v3652_v13, %v13527_v3   ;;  %v3655_v21 = vadd.f32 %v3654_v28, %v3559_v10  ;;  %v11664_v13 = vld [vmem:[%s16241_s12] sm:$0xff] (%p616_p4)  }
0x1103   : >> { %v16362_v50 = vmov %v13950_v18  ;;  %v13956_v19 = vadd.f32 %v3663_v36, %v13549_v59   ;;  %10606 = vmatprep.mubr.bf16.mxu1 (%p616_p4), %v11664_v13 }
0x1104   : >> { %v16363_v63 = vmov %v13953_v16  ;;  %v13959_v17 = vadd.f32 %v3655_v21, %v13530_v38   ;;  %v16375_v18 = vmov %v16362_v50 }
0x1105   : >> { %v16364_v60 = vmov %v13956_v19  ;;  %v16377_v16 = vmov %v16363_v63 }
0x1106   : >> { %v16365_v2 = vmov %v13959_v17  ;;  %v10574_v6 = vpop.f32.mrb[56].mxu0  ;;  %v16374_v19 = vmov %v16364_v60  ;;  %v3889_v49 = vpack.c.bf16 (%p616_p4), %v16364_v60, %v16362_v50  ;;  %v11666_v50 = vld [vmem:[%s16241_s12 + $0x10] sm:$0xff] (%p616_p4)   ;;  %v11667_v60 = vld [vmem:[%s16241_s12 + $0x18] sm:$0xff] (%p616_p4)  }
0x1107   : >> { %v3676_v40 = vadd.f32 %v10574_v6, %v3579_v45  ;;  %v3667_v54 = vpop.f32.mrb[57].mxu0  ;;  %v16376_v17 = vmov %v16365_v2 }
0x1108   : >> { %v3668_v34 = vadd.f32 %v3667_v54, %v3571_v44  ;;  %v10575_v27 = vpop.f32.mrb[58].mxu0  ;;  %v11663_v44 = vld [vmem:[%s16240_s11 + $0x18] sm:$0xff] (%p616_p4)  }
0x1109   : >> { %v13962_v22 = vadd.f32 %v3676_v40, %v13570_v42   ;;  %v3679_v12 = vadd.f32 %v10575_v27, %v3583_v41  ;;  %v3670_v3 = vpop.f32.mrb[59].mxu0  ;;  %618 = sbr.rel (!%p616_p4) target bundleno = 30 (0x1e), region = 167 }
0x110a   : >> { %v13965_v20 = vadd.f32 %v3668_v34, %v13554_v56   ;;  %v3671_v59 = vadd.f32 %v3670_v3, %v3575_v55  ;;  %v3690_v56 = vld [vmem:[%s12817_s20] sm:$0xff] (%p616_p4) }
0x110b   : >> { %v16366_v11 = vmov %v13962_v22  ;;  %v13968_v23 = vadd.f32 %v3679_v12, %v13581_v15  }
0x110c   : >> { %v16367_v4 = vmov %v13965_v20  ;;  %v13971_v21 = vadd.f32 %v3671_v59, %v13565_v9   ;;  %v16371_v22 = vmov %v16366_v11  ;;  %v3691_v9 = vld [vmem:[%s12817_s20 + $0x8] sm:$0xff] (%p616_p4)  ;;  %s12612_s20 = smov (%p616_p4), 113  }
0x110d   : >> { %v16368_v38 = vmov %v13968_v23  ;;  %v16373_v20 = vmov %v16367_v4  ;;  %v11636_v42 = vpack.i.bf16 (%p616_p4), %v3691_v9, %v3690_v56  ;;  %v3736_v10 = vpack.c.bf16 (%p616_p4), %v3691_v9, %v3690_v56 }
0x110e   : >> { %v16369_v57 = vmov %v13971_v21  ;;  %v16370_v23 = vmov %v16368_v38  ;;  %v16385_v20 = vld [vmem:[#allocation17_spill] sm:$0xff] (%p616_p4) }
0x110f   : >> { %v16372_v21 = vmov %v16369_v57  ;;  %11637 = vrot.lane.b32.xlu0 (%p616_p4), %v11636_v42, %s12611_s0 }
0x1181   : > { %v11638_v15 = vpop.permute.xlu0 %11637 }
0x1182   : > { %v11640_v29 = vunpack.i.h.bf16 %v11638_v15  ;;  %v11639_v43 = vunpack.i.l.bf16 %v11638_v15 }
0x1184   : > { %v3709_v61 = vsel %vm1874_vm3, %v11640_v29, %v3691_v9  ;;  %v3706_v31 = vsel %vm1874_vm3, %v11639_v43, %v3690_v56 }
0x1185   : > { %v11641_v16 = vpack.i.bf16 %v3709_v61, %v3706_v31 }
0x1187   : > { %11642 = vrot.lane.b32.xlu0 %v11641_v16, %s12611_s0 }
0x118b   : > { %3740 = vperm.xlu0 %11656, %v16378_v25  }
0x118f   : > { %3755 = vperm.xlu0 %11656, %v16380_v26  }
0x1193   : > { %3765 = vperm.xlu0 %11656, %v16382_v47  }
0x1197   : > { %3775 = vperm.xlu0 %11656, %v16384_v7  }
0x119b   : > { %11659 = vset.pattern.permute.xlu0 %v16293_v62 }
0x119c   : > { %3897 = vperm.xlu0 %11659, %v16379_v8  }
0x11a0   : > { %3909 = vperm.xlu0 %11659, %v16383_v24  }
0x11a4   : > { %3917 = vperm.xlu0 %11659, %v16385_v20  }
0x11f9   : > { %v11643_v58 = vpop.permute.xlu0 %11642 }
0x11fa   : > { %v11645_v33 = vunpack.i.h.bf16 %v11643_v58  ;;  %v11644_v17 = vunpack.i.l.bf16 %v11643_v58 }
0x11fc   : > { %v3714_v19 = vsel %vm1874_vm3, %v11644_v17, %v3690_v56  ;;  %v3715_v22 = vsel %vm1874_vm3, %v11645_v33, %v3691_v9 }
0x11fd   : > { %v11646_v18 = vpack.i.bf16 %v3715_v22, %v3714_v19 }
0x11ff   : > { %11647 = vrot.lane.b32.xlu1 %v11646_v18, %s12612_s20 }
0x1203   : > { %11652 = vrot.lane.b32.xlu1 %v11646_v18, %s12613_s24  ;;  %v3888_v18 = vpack.c.bf16 %v16365_v2, %v16363_v63  ;;  %v11665_v63 = vld [vmem:[%s16241_s12 + $0x8] sm:$0xff]  }
0x1207   : > { %3745 = vperm.xlu1 %11657, %v16379_v8   ;;  %v3891_v8 = vpack.c.bf16 %v16368_v38, %v16366_v11 }
0x120a   : > { %v3741_v36 = vpop.permute.xlu0 %3740 }
0x120b   : > { %3750 = vperm.xlu1 %11657, %v16381_v32  }
0x120e   : > { %v3756_v55 = vpop.permute.xlu0 %3755 }
0x120f   : > { %3760 = vperm.xlu1 %11657, %v16383_v24  }
0x1212   : > { %v3766_v54 = vpop.permute.xlu0 %3765 }
0x1213   : > { %3770 = vperm.xlu1 %11657, %v16385_v20  }
0x1216   : > { %v3776_v15 = vpop.permute.xlu0 %3775 }
0x1217   : > { %11658 = vset.pattern.permute.xlu1 %v16293_v62 }
0x1218   : > { %3893 = vperm.xlu1 %11658, %v16378_v25   ;;  %v3890_v25 = vpack.c.bf16 %v16369_v57, %v16367_v4 }
0x121b   : > { %v3898_v4 = vpop.permute.xlu0 %3897 }
0x121c   : > { %3901 = vperm.xlu1 %11658, %v16381_v32  }
0x1220   : > { %3905 = vperm.xlu1 %11658, %v16380_v26  }
0x1224   : > { %3913 = vperm.xlu1 %11658, %v16382_v47   ;;  %v3910_v47 = vpop.permute.xlu0 %3909 }
0x1228   : > { %3921 = vperm.xlu1 %11658, %v16384_v7  }
0x1271   : > { %v11648_v30 = vpop.permute.xlu1 %11647 }
0x1272   : > { %v11650_v53 = vunpack.i.h.bf16 %v11648_v30  ;;  %v11649_v23 = vunpack.i.l.bf16 %v11648_v30 }
0x1274   : > { %v9733_v52 = vpack.c.bf16 %v11650_v53, %v11649_v23 }
0x1275   : > { %v11653_v5 = vpop.permute.xlu1 %11652 }
0x1276   : > { %v11655_v48 = vunpack.i.h.bf16 %v11653_v5  ;;  %v11654_v51 = vunpack.i.l.bf16 %v11653_v5  ;;  %10576 = vmatprep.subr.msk.bf16.mxu0 %vm13473_vm5, %v9733_v52 }
0x1277   : > { %10577 = vmatpush3.bf16.msk.msra.mxu0 %vm13473_vm5, %v9733_v52  ;;  %v3918_v52 = vpop.permute.xlu0 %3917 }
0x1278   : > { %10578 = vmatprep.subr.bf16.mxu0 %v3736_v10  ;;  %v9738_v0 = vpack.c.bf16 %v11655_v48, %v11654_v51 }
0x127b   : > { %10579 = vmatpush3.bf16.msra.mxu0 %v3736_v10 }
0x127c   : > { %10580 = vmatprep.subr.msk.bf16.mxu0 %vm13501_vm7, %v9738_v0 }
0x127f   : > { %10581 = vmatpush3.bf16.msk.msra.mxu0 %vm13501_vm7, %v9738_v0 }
0x1282   : > { %10583 = vmatmul.mubr.msk.bf16.vlgmr.msra.gmra.mrb[0].mxu0 %vm3798_vm9, %v11661_v39 }
0x1283   : > { %10586 = vmatprep.mubr.msk.bf16.mxu0 %vm3798_vm9, %v11662_v46 }
0x1286   : > { %v3746_v28 = vpop.permute.xlu1 %3745 }
0x128a   : > { %10587 = vmatmul.mubr.msk.bf16.gmra.mrb[4].mxu0 %vm3798_vm9, %v11663_v44  ;;  %v3751_v21 = vpop.permute.xlu1 %3750 }
0x128e   : > { %v3761_v12 = vpop.permute.xlu1 %3760 }
0x1292   : > { %v3771_v43 = vpop.permute.xlu1 %3770 }
0x1297   : > { %v3894_v2 = vpop.permute.xlu1 %3893 }
0x129b   : > { %v3902_v11 = vpop.permute.xlu1 %3901 }
0x129f   : > { %v3906_v38 = vpop.permute.xlu1 %3905 }
0x12a3   : > { %v3914_v53 = vpop.permute.xlu1 %3913 }
0x12a7   : > { %v3922_v51 = vpop.permute.xlu1 %3921 }
0x1355   : > { %v10584_v45 = vpop.f32.mrb[0].mxu0 }
0x1356   : > { %v3845_v6 = vpop.f32.mrb[1].mxu0  ;;  %v3854_v41 = vadd.f32 %v10584_v45, %v3751_v21 }
0x1357   : > { %v10585_v40 = vpop.f32.mrb[2].mxu0  ;;  %v3846_v3 = vadd.f32 %v3845_v6, %v3741_v36 }
0x1358   : > { %v3857_v34 = vadd.f32 %v10585_v40, %v3756_v55  ;;  %v3848_v27 = vpop.f32.mrb[3].mxu0 }
0x1359   : > { %v3849_v59 = vadd.f32 %v3848_v27, %v3746_v28 }
0x135a   : > { %v3885_v56 = vpack.c.bf16 %v3857_v34, %v3854_v41 }
0x135b   : > { %v3884_v9 = vpack.c.bf16 %v3849_v59, %v3846_v3 }
0x135d   : > { %v10588_v42 = vpop.f32.mrb[4].mxu0  ;;  %10590 = vmatprep.subr.bf16.mxu1 %v3884_v9 }
0x135e   : > { %v3861_v29 = vpop.f32.mrb[5].mxu0  ;;  %10591 = vmatpush3.bf16.msra.mxu1 %v3884_v9  ;;  %v3870_v31 = vadd.f32 %v10588_v42, %v3771_v43 }
0x135f   : > { %v10589_v61 = vpop.f32.mrb[6].mxu0  ;;  %10592 = vmatprep.subr.bf16.mxu1 %v3885_v56  ;;  %v3862_v33 = vadd.f32 %v3861_v29, %v3761_v12 }
0x1360   : > { %v3873_v16 = vadd.f32 %v10589_v61, %v3776_v15  ;;  %v3864_v58 = vpop.f32.mrb[7].mxu0 }
0x1361   : > { %v3865_v17 = vadd.f32 %v3864_v58, %v3766_v54 }
0x1362   : > { %v3887_v19 = vpack.c.bf16 %v3873_v16, %v3870_v31  ;;  %10593 = vmatpush3.bf16.msra.mxu1 %v3885_v56 }
0x1363   : > { %v3886_v22 = vpack.c.bf16 %v3865_v17, %v3862_v33 }
0x1365   : > { %10594 = vmatprep.subr.bf16.mxu1 %v3886_v22 }
0x1366   : > { %10595 = vmatpush3.bf16.msra.mxu1 %v3886_v22 }
0x1367   : > { %10596 = vmatprep.subr.bf16.mxu1 %v3887_v19 }
0x136a   : > { %10597 = vmatpush3.bf16.msra.mxu1 %v3887_v19 }
0x136b   : > { %10598 = vmatprep.subr.bf16.mxu1 %v3888_v18 }
0x136e   : > { %10599 = vmatpush3.bf16.msra.mxu1 %v3888_v18 }
0x136f   : > { %10600 = vmatprep.subr.bf16.mxu1 %v3889_v49 }
0x1372   : > { %10601 = vmatpush3.bf16.msra.mxu1 %v3889_v49 }
0x1373   : > { %10602 = vmatprep.subr.bf16.mxu1 %v3890_v25 }
0x1376   : > { %10603 = vmatpush3.bf16.msra.mxu1 %v3890_v25 }
0x1377   : > { %10604 = vmatprep.subr.bf16.mxu1 %v3891_v8 }
0x137a   : > { %10605 = vmatpush3.bf16.msra.mxu1 %v3891_v8 }
0x137d   : > { %10607 = vmatmul.mubr.bf16.vlgmr.msra.gmra.mrb[0].mxu1 %v11665_v63 }
0x137e   : > { %10610 = vmatprep.mubr.bf16.mxu1 %v11666_v50 }
0x1385   : > { %10611 = vmatmul.mubr.bf16.gmra.mrb[4].mxu1 %v11667_v60 }
0x1450   : > { %v10608_v57 = vpop.f32.mrb[0].mxu1 }
0x1451   : > { %v3991_v26 = vadd.f32 %v10608_v57, %v3902_v11   ;;  %v3982_v32 = vpop.f32.mrb[1].mxu1 }
0x1452   : > { %v3983_v24 = vadd.f32 %v3982_v32, %v3894_v2   ;;  %v10609_v7 = vpop.f32.mrb[2].mxu1 }
0x1453   : > { %v3994_v20 = vadd.f32 %v10609_v7, %v3906_v38   ;;  %v3985_v30 = vpop.f32.mrb[3].mxu1 }
0x1454   : > { %v3986_v23 = vadd.f32 %v3985_v30, %v3898_v4  }
0x1458   : > { %v10612_v10 = vpop.f32.mrb[4].mxu1 }
0x1459   : > { %v4007_v5 = vadd.f32 %v10612_v10, %v3918_v52   ;;  %v3998_v48 = vpop.f32.mrb[5].mxu1 }
0x145a   : > { %v3999_v0 = vadd.f32 %v3998_v48, %v3910_v47   ;;  %v10613_v39 = vpop.f32.mrb[6].mxu1 }
0x145b   : > { %v4010_v46 = vadd.f32 %v10613_v39, %v3922_v51   ;;  %v4001_v44 = vpop.f32.mrb[7].mxu1 }
0x145c   : > { %v4002_v13 = vadd.f32 %v4001_v44, %v3914_v53  }
0x145d LB: >> { %v16386_v1 = vld [vmem:[#allocation4_spill] sm:$0xff]  ;;  %v16387_v36 = vld [vmem:[#allocation3_spill] sm:$0xff]  ;;  %v4047_v28 = vsel %vm647_vm0, %v12557_v24, 0.0  ;;  %v4071_v55 = vmul.f32 %v12557_v24, %v12557_v24  ;;  %v4072_v21 = vmul.f32 %v12553_v23, %v12553_v23  ;;  %v4050_v6 = vsel %vm647_vm0, %v12553_v23, 0.0  ;;  %s10068_s23 = smul.u32 96, %s12561_s25  ;;  %s12617_s30 = smov 1   ;;  %v12529_v46 = vphi %v4010_v46, %v16405_v46   ;;  %s12561_s25 = sphi %s14090_s25, %s4018_s25   ;;  %v12557_v24 = vphi %v3983_v24, %v16412_v24   ;;  %v12553_v23 = vphi %v3986_v23, %v16411_v23   ;;  %v12549_v26 = vphi %v3991_v26, %v16410_v26   ;;  %v12545_v20 = vphi %v3994_v20, %v16409_v20   ;;  %v12541_v0 = vphi %v3999_v0, %v16408_v0   ;;  %v12537_v13 = vphi %v4002_v13, %v16407_v13   ;;  %v12533_v5 = vphi %v4007_v5, %v16406_v5  }
0x145e   : >> { %10630 = vmatprep.mubr.msk.f32.mxu1 %vm713_vm1, %v16387_v36  ;;  %10674 = vmatprep.mubr.msk.f32.mxu0 %vm713_vm1, %v16387_v36  ;;  %v4053_v54 = vsel %vm647_vm0, %v12549_v26, 0.0  ;;  %v4073_v41 = vmul.f32 %v12549_v26, %v12549_v26  ;;  %v4056_v34 = vsel %vm647_vm0, %v12545_v20, 0.0  ;;  %v4074_v27 = vmul.f32 %v12545_v20, %v12545_v20  ;;  %s14232_s22 = sshll.u32 %s12561_s25, 6  ;;  %s14307_s21 = sshll.u32 %s12561_s25, 5 }
0x145f   : >> { %4048 = vadd.xlane.f32.xlu0 %v4047_v28  ;;  %v4079_v45 = vsel %vm647_vm0, %v4071_v55, 0.0  ;;  %v4082_v40 = vsel %vm647_vm0, %v4072_v21, 0.0  ;;  %v4059_v59 = vsel %vm647_vm0, %v12541_v0, 0.0  ;;  %v4075_v56 = vmul.f32 %v12541_v0, %v12541_v0  ;;  %v16388_v21 = vld [vmem:[#allocation5_spill] sm:$0xff]  ;;  %s14191_s28 = scalar_lea.vmem %s16236_s7, %s10068_s23  ;;  %s14239_s19 = scalar_lea.vmem %s16232_s3, %s14232_s22 }
0x1460   : >> { %4080 = vadd.xlane.f32.xlu1 %v4079_v45  ;;  %v4085_v12 = vsel %vm647_vm0, %v4073_v41, 0.0  ;;  %v4088_v3 = vsel %vm647_vm0, %v4074_v27, 0.0  ;;  %v4062_v9 = vsel %vm647_vm0, %v12537_v13, 0.0  ;;  %v4076_v42 = vmul.f32 %v12537_v13, %v12537_v13  ;;  %v16389_v45 = vld [vmem:[#allocation6_spill] sm:$0xff]  ;;  %s14313_s1 = scalar_lea.vmem %s16233_s4, %s14307_s21  ;;  %s14469_s27 = scalar_lea.vmem %s12830_s18, %s14232_s22 }
0x1461   : >> { %v4091_v15 = vsel %vm647_vm0, %v4075_v56, 0.0  ;;  %v4065_v43 = vsel %vm647_vm0, %v12533_v5, 0.0  ;;  %v4077_v61 = vmul.f32 %v12533_v5, %v12533_v5  ;;  %v4068_v31 = vsel %vm647_vm0, %v12529_v46, 0.0  ;;  %v16393_v41 = vld [vmem:[#allocation10_spill] sm:$0xff]  ;;  %s12622_s29 = smov 16   ;;  %s12623_s15 = smov 113  }
0x1462   : >> { %v4094_v29 = vsel %vm647_vm0, %v4076_v42, 0.0  ;;  %v4078_v16 = vmul.f32 %v12529_v46, %v12529_v46  ;;  %s12624_s26 = smov 127   ;;  %vm12627_vm10 = vmmov 0  }
0x1463   : >> { %4051 = vadd.xlane.f32.xlu0 %v4050_v6  ;;  %v4097_v58 = vsel %vm647_vm0, %v4077_v61, 0.0  ;;  %v16390_v6 = vld [vmem:[#allocation7_spill] sm:$0xff] }
0x1464   : >> { %4083 = vadd.xlane.f32.xlu1 %v4082_v40  ;;  %v4100_v33 = vsel %vm647_vm0, %v4078_v16, 0.0  ;;  %v16391_v40 = vld [vmem:[#allocation8_spill] sm:$0xff] }
0x1467   : >> { %4054 = vadd.xlane.f32.xlu0 %v4053_v54  ;;  %v16392_v54 = vld [vmem:[#allocation9_spill] sm:$0xff] }
0x1468   : >> { %4057 = vadd.xlane.f32.xlu1 %v4056_v34  ;;  %v16301_v34 = vmov 0  }
0x1469   : >> { %11668 = vset.pattern.permute.xlu0 %v16301_v34  ;;  %11669 = vset.pattern.permute.xlu1 %v16301_v34 }
0x146b   : >> { %4086 = vadd.xlane.f32.xlu0 %v4085_v12 }
0x146c   : >> { %4089 = vadd.xlane.f32.xlu1 %v4088_v3 }
0x146f   : >> { %4060 = vadd.xlane.f32.xlu0 %v4059_v59 }
0x1470   : >> { %4063 = vadd.xlane.f32.xlu1 %v4062_v9 }
0x1473   : >> { %4092 = vadd.xlane.f32.xlu0 %v4091_v15 }
0x1474   : >> { %4095 = vadd.xlane.f32.xlu1 %v4094_v29 }
0x1477   : >> { %4066 = vadd.xlane.f32.xlu0 %v4065_v43 }
0x1478   : >> { %4069 = vadd.xlane.f32.xlu1 %v4068_v31 }
0x147b   : >> { %4098 = vadd.xlane.f32.xlu0 %v4097_v58 }
0x147c   : >> { %4101 = vadd.xlane.f32.xlu1 %v4100_v33 }
0x14ec   : >> { %v4049_v17 = vpop.xlane.xlu0 %4048 }
0x14ed   : >> { %v4081_v19 = vpop.xlane.xlu1 %4080 }
0x14ee   : >> { %v4104_v49 = vsel %vm704_vm2, %v4049_v17, %v4081_v19  ;;  %v14244_v19 = vld [vmem:[%s14239_s19] sm:$0xff] }
0x14f0   : >> { %v4052_v22 = vpop.xlane.xlu0 %4051 }
0x14f1   : >> { %v4084_v18 = vpop.xlane.xlu1 %4083 }
0x14f2   : >> { %v4105_v25 = vsel %vm704_vm2, %v4052_v22, %v4084_v18  ;;  %v14251_v22 = vld [vmem:[%s14239_s19 + $0x18] sm:$0xff]  ;;  %v14256_v18 = vld [vmem:[%s14239_s19 + $0x8] sm:$0xff] }
0x14f3   : >> { %v10958_v63 = vpack.c.bf16 %v4105_v25, %v4104_v49  ;;  %v14261_v49 = vld [vmem:[%s14239_s19 + $0x28] sm:$0xff]  ;;  %v16299_v25 = vmov 1  }
0x14f4   : >> { %v4055_v8 = vpop.xlane.xlu0 %4054 }
0x14f5   : >> { %10959 = vmatprep.subr.bf16.mxu1 %v10958_v63  ;;  %v4058_v50 = vpop.xlane.xlu1 %4057 }
0x14f6   : >> { %10961 = vmatpush3.bf16.msra.mxu1 %v10958_v63  ;;  %v14275_v63 = vld [vmem:[%s14239_s19 + $0x10] sm:$0xff] }
0x14f8   : >> { %v4087_v60 = vpop.xlane.xlu0 %4086 }
0x14f9   : >> { %v4090_v2 = vpop.xlane.xlu1 %4089  ;;  %v4106_v11 = vsel %vm704_vm2, %v4055_v8, %v4087_v60  ;;  %v14267_v8 = vld [vmem:[%s14239_s19 + $0x30] sm:$0xff]  ;;  %v14291_v60 = vld [vmem:[%s14239_s19 + $0x38] sm:$0xff] }
0x14fa   : >> { %v4107_v4 = vsel %vm704_vm2, %v4058_v50, %v4090_v2  ;;  %v14284_v50 = vld [vmem:[%s14239_s19 + $0x20] sm:$0xff] }
0x14fb   : >> { %v10962_v38 = vpack.c.bf16 %v4107_v4, %v4106_v11 }
0x14fc   : >> { %v4061_v57 = vpop.xlane.xlu0 %4060 }
0x14fd   : >> { %10963 = vmatprep.subr.bf16.mxu1 %v10962_v38  ;;  %v4064_v32 = vpop.xlane.xlu1 %4063 }
0x14fe   : >> { %10965 = vmatpush3.bf16.msra.mxu1 %v10962_v38 }
0x1500   : >> { %v4093_v47 = vpop.xlane.xlu0 %4092 }
0x1501   : >> { %v4096_v7 = vpop.xlane.xlu1 %4095  ;;  %v4108_v30 = vsel %vm704_vm2, %v4061_v57, %v4093_v47 }
0x1502   : >> { %v4109_v53 = vsel %vm704_vm2, %v4064_v32, %v4096_v7 }
0x1503   : >> { %v10966_v52 = vpack.c.bf16 %v4109_v53, %v4108_v30 }
0x1504   : >> { %v4067_v10 = vpop.xlane.xlu0 %4066 }
0x1505   : >> { %10967 = vmatprep.subr.bf16.mxu1 %v10966_v52  ;;  %v4070_v48 = vpop.xlane.xlu1 %4069 }
0x1506   : >> { %10969 = vmatpush3.bf16.msra.mxu1 %v10966_v52 }
0x1508   : >> { %v4099_v51 = vpop.xlane.xlu0 %4098 }
0x1509   : >> { %v4102_v39 = vpop.xlane.xlu1 %4101  ;;  %v4110_v44 = vsel %vm704_vm2, %v4067_v10, %v4099_v51 }
0x150a   : >> { %v4111_v28 = vsel %vm704_vm2, %v4070_v48, %v4102_v39 }
0x150b   : >> { %v10970_v55 = vpack.c.bf16 %v4111_v28, %v4110_v44 }
0x150d   : >> { %10971 = vmatprep.subr.bf16.mxu1 %v10970_v55 }
0x150e   : >> { %10973 = vmatpush3.bf16.msra.mxu1 %v10970_v55 }
0x1511   : >> { %10631 = vmatmul.mubr.msk.f32.vlgmr.msra.gmra.mrb[0].mxu1 %vm713_vm1, %v16386_v1 }
0x1512   : >> { %10633 = vmatprep.mubr.msk.f32.mxu1 %vm713_vm1, %v16388_v21 }
0x1515   : >> { %10634 = vmatmul.mubr.msk.f32.gmra.mrb[2].mxu1 %vm713_vm1, %v16389_v45 }
0x1516   : >> { %10636 = vmatprep.mubr.msk.f32.mxu1 %vm713_vm1, %v16390_v6 }
0x1519   : >> { %10637 = vmatmul.mubr.msk.f32.gmra.mrb[4].mxu1 %vm713_vm1, %v16391_v40 }
0x151a   : >> { %10639 = vmatprep.mubr.msk.f32.mxu1 %vm713_vm1, %v16392_v54 }
0x151d   : >> { %10640 = vmatmul.mubr.msk.f32.gmra.mrb[6].mxu1 %vm713_vm1, %v16393_v41 }
0x15e4   : >> { %v14193_v27 = vpop.f32.mrb[0].mxu1 }
0x15e5   : >> { %v4243_v12 = vmul.f32 %v14193_v27, %v14193_v27  ;;  %v14197_v3 = vpop.f32.mrb[1].mxu1 }
0x15e6   : >> { %v4242_v59 = vmul.f32 %v14197_v3, %v14197_v3 }
0x15e7   : >> { %4260 = vrot.lane.b32.xlu1 %v4243_v12, %s12617_s30 }
0x15e8   : >> { %4258 = vrot.lane.b32.xlu0 %v4242_v59, %s12617_s30  ;;  %v14203_v56 = vpop.f32.mrb[2].mxu1 }
0x15e9   : >> { %v4245_v9 = vmul.f32 %v14203_v56, %v14203_v56  ;;  %v14207_v42 = vpop.f32.mrb[3].mxu1 }
0x15ea   : >> { %v4244_v29 = vmul.f32 %v14207_v42, %v14207_v42 }
0x15eb   : >> { %4264 = vrot.lane.b32.xlu1 %v4245_v9, %s12617_s30 }
0x15ec   : >> { %v14210_v15 = vpop.f32.mrb[4].mxu1 }
0x15ed   : >> { %v14214_v43 = vpop.f32.mrb[5].mxu1  ;;  %v4247_v31 = vmul.f32 %v14210_v15, %v14210_v15 }
0x15ee   : >> { %v4246_v61 = vmul.f32 %v14214_v43, %v14214_v43 }
0x15ef   : >> { %4262 = vrot.lane.b32.xlu1 %v4244_v29, %s12617_s30 }
0x15f0   : >> { %4266 = vrot.lane.b32.xlu0 %v4246_v61, %s12617_s30  ;;  %v14222_v16 = vpop.f32.mrb[6].mxu1 }
0x15f1   : >> { %v14224_v58 = vpop.f32.mrb[7].mxu1  ;;  %v4249_v17 = vmul.f32 %v14222_v16, %v14222_v16 }
0x15f2   : >> { %v4248_v33 = vmul.f32 %v14224_v58, %v14224_v58 }
0x15f3   : >> { %4268 = vrot.lane.b32.xlu1 %v4247_v31, %s12617_s30 }
0x15f4   : >> { %4270 = vrot.lane.b32.xlu0 %v4248_v33, %s12617_s30 }
0x15f7   : >> { %4272 = vrot.lane.b32.xlu1 %v4249_v17, %s12617_s30 }
0x15f8   : >> { %4292 = vperm.xlu0 %11668, %v14197_v3  }
0x15fb   : >> { %4297 = vperm.xlu1 %11669, %v14193_v27  }
0x15fc   : >> { %4404 = vperm.xlu0 %11668, %v14244_v19  }
0x15ff   : >> { %4302 = vperm.xlu1 %11669, %v14207_v42  }
0x1600   : >> { %4312 = vperm.xlu0 %11668, %v14214_v43  }
0x1603   : >> { %4307 = vperm.xlu1 %11669, %v14203_v56  }
0x1604   : >> { %4419 = vperm.xlu0 %11668, %v14251_v22  }
0x1607   : >> { %4409 = vperm.xlu1 %11669, %v14256_v18  }
0x1608   : >> { %4322 = vperm.xlu0 %11668, %v14224_v58  }
0x160b   : >> { %11670 = vset.pattern.permute.xlu1 %v16299_v25 }
0x160c   : >> { %4451 = vperm.xlu1 %11670, %v14244_v19   ;;  %4429 = vperm.xlu0 %11668, %v14261_v49  }
0x1610   : >> { %4455 = vperm.xlu1 %11670, %v14256_v18   ;;  %4434 = vperm.xlu0 %11668, %v14267_v8  }
0x1614   : >> { %11671 = vset.pattern.permute.xlu1 %v16301_v34  ;;  %11676 = vset.pattern.permute.xlu0 %v16299_v25 }
0x1615   : >> { %4317 = vperm.xlu1 %11671, %v14210_v15  }
0x1619   : >> { %4414 = vperm.xlu1 %11671, %v14275_v63  }
0x161d   : >> { %11672 = vset.pattern.permute.xlu1 %v16299_v25 }
0x161e   : >> { %4459 = vperm.xlu1 %11672, %v14275_v63  }
0x1622   : >> { %4463 = vperm.xlu1 %11672, %v14251_v22  }
0x1626   : >> { %11673 = vset.pattern.permute.xlu1 %v16301_v34 }
0x1627   : >> { %4327 = vperm.xlu1 %11673, %v14222_v16  }
0x162b   : >> { %4424 = vperm.xlu1 %11673, %v14284_v50  }
0x162f   : >> { %11674 = vset.pattern.permute.xlu1 %v16299_v25 }
0x1630   : >> { %4467 = vperm.xlu1 %11674, %v14284_v50  }
0x1634   : >> { %4471 = vperm.xlu1 %11674, %v14261_v49  }
0x1638   : >> { %11675 = vset.pattern.permute.xlu1 %v16301_v34 }
0x1639   : >> { %4439 = vperm.xlu1 %11675, %v14291_v60  }
0x163d   : >> { %11677 = vset.pattern.permute.xlu1 %v16299_v25 }
0x1659   : >> { %v4261_v2 = vpop.permute.xlu1 %4260 }
0x165a   : >> { %v4283_v11 = vsub.f32 %v14193_v27, %v4261_v2  ;;  %v4259_v4 = vpop.permute.xlu0 %4258  ;;  %v11800_v2 = vld [vmem:[%s14313_s1] sm:$0xff]  }
0x165b   : >> { %v4282_v38 = vsub.f32 %v14197_v3, %v4259_v4  ;;  %10650 = vmatprep.mubr.msk.bf16.mxu1 %vm713_vm1, %v11800_v2 }
0x165c   : >> { %v4339_v57 = vadd.f32 1e-05, %v4283_v11 }
0x165d   : >> { %v4338_v32 = vadd.f32 1e-05, %v4282_v38  ;;  %v4265_v47 = vpop.permute.xlu1 %4264 }
0x165e   : >> { %11832 = vrsqrt.f32 %v4339_v57  ;;  %v4285_v7 = vsub.f32 %v14203_v56, %v4265_v47  ;;  %v16297_v57 = vmov 2  }
0x165f   : >> { %11834 = vrsqrt.f32 %v4338_v32 }
0x1660   : >> { %v4341_v30 = vadd.f32 1e-05, %v4285_v7 }
0x1661   : >> { %v4263_v53 = vpop.permute.xlu1 %4262 }
0x1662   : >> { %11836 = vrsqrt.f32 %v4341_v30  ;;  %v4284_v52 = vsub.f32 %v14207_v42, %v4263_v53  ;;  %v4267_v10 = vpop.permute.xlu0 %4266 }
0x1663   : >> { %v4286_v48 = vsub.f32 %v14214_v43, %v4267_v10 }
0x1664   : >> { %v4340_v51 = vadd.f32 1e-05, %v4284_v52 }
0x1665   : >> { %v4342_v39 = vadd.f32 1e-05, %v4286_v48  ;;  %v4269_v44 = vpop.permute.xlu1 %4268 }
0x1666   : >> { %11838 = vrsqrt.f32 %v4340_v51  ;;  %v4287_v28 = vsub.f32 %v14210_v15, %v4269_v44  ;;  %v4271_v55 = vpop.permute.xlu0 %4270 }
0x1667   : >> { %v4288_v27 = vsub.f32 %v14224_v58, %v4271_v55  ;;  %11840 = vrsqrt.f32 %v4342_v39 }
0x1668   : >> { %v11833_v12 = vpop.eup %11832  ;;  %v4343_v3 = vadd.f32 1e-05, %v4287_v28 }
0x1669   : >> { %v11835_v59 = vpop.eup %11834  ;;  %v4344_v56 = vadd.f32 1e-05, %v4288_v27  ;;  %v4273_v9 = vpop.permute.xlu1 %4272  ;;  %4361 = vperm.xlu0 %11676, %v11833_v12  }
0x166a   : >> { %11842 = vrsqrt.f32 %v4343_v3  ;;  %v4289_v42 = vsub.f32 %v14222_v16, %v4273_v9  ;;  %4356 = vperm.xlu1 %11677, %v11835_v59  }
0x166b   : >> { %11844 = vrsqrt.f32 %v4344_v56 }
0x166c   : >> { %v11837_v29 = vpop.eup %11836  ;;  %v4345_v43 = vadd.f32 1e-05, %v4289_v42 }
0x166d   : >> { %4371 = vperm.xlu0 %11676, %v11837_v29  }
0x166e   : >> { %11846 = vrsqrt.f32 %v4345_v43 }
0x1670   : >> { %v11839_v15 = vpop.eup %11838 }
0x1671   : >> { %4366 = vperm.xlu1 %11677, %v11839_v15   ;;  %v11841_v61 = vpop.eup %11840 }
0x1674   : >> { %v11843_v31 = vpop.eup %11842 }
0x1675   : >> { %4376 = vperm.xlu1 %11677, %v11841_v61   ;;  %4381 = vperm.xlu0 %11676, %v11843_v31   ;;  %v11845_v58 = vpop.eup %11844 }
0x1677   : >> { %v4293_v30 = vpop.permute.xlu0 %4292 }
0x1678   : >> { %v11847_v33 = vpop.eup %11846  ;;  %v4330_v9 = vsub.f32 %v12557_v24, %v4293_v30 }
0x1679   : >> { %4391 = vperm.xlu0 %11676, %v11847_v33   ;;  %4386 = vperm.xlu1 %11677, %v11845_v58  }
0x167a   : >> { %v4298_v16 = vpop.permute.xlu1 %4297 }
0x167b   : >> { %v4405_v52 = vpop.permute.xlu0 %4404  ;;  %v4331_v56 = vsub.f32 %v12553_v23, %v4298_v16 }
0x167d   : >> { %4479 = vperm.xlu0 %11676, %v14291_v60   ;;  %4475 = vperm.xlu1 %11677, %v14267_v8  }
0x167e   : >> { %v4303_v17 = vpop.permute.xlu1 %4302 }
0x167f   : >> { %v4313_v48 = vpop.permute.xlu0 %4312 }
0x1681   : >> { %11678 = vset.pattern.permute.xlu1 %v16297_v57  ;;  %11679 = vset.pattern.permute.xlu0 %v16297_v57  ;;  %v4332_v57 = vsub.f32 %v12549_v26, %v4303_v17 }
0x1682   : >> { %v4308_v11 = vpop.permute.xlu1 %4307  ;;  %4562 = vperm.xlu1 %11678, %v14244_v19   ;;  %4570 = vperm.xlu0 %11679, %v14275_v63  }
0x1683   : >> { %v4420_v44 = vpop.permute.xlu0 %4419  ;;  %v4333_v61 = vsub.f32 %v12545_v20, %v4308_v11 }
0x1686   : >> { %v4410_v4 = vpop.permute.xlu1 %4409  ;;  %4566 = vperm.xlu1 %11678, %v14256_v18   ;;  %4582 = vperm.xlu0 %11679, %v14261_v49  }
0x1687   : >> { %v4323_v55 = vpop.permute.xlu0 %4322 }
0x168a   : >> { %4574 = vperm.xlu1 %11678, %v14251_v22   ;;  %4590 = vperm.xlu0 %11679, %v14291_v60  }
0x168b   : >> { %v4452_v38 = vpop.permute.xlu1 %4451  ;;  %v4430_v27 = vpop.permute.xlu0 %4429 }
0x168e   : >> { %4578 = vperm.xlu1 %11678, %v14284_v50  }
0x168f   : >> { %v4456_v32 = vpop.permute.xlu1 %4455  ;;  %v4435_v59 = vpop.permute.xlu0 %4434 }
0x1692   : >> { %4586 = vperm.xlu1 %11678, %v14267_v8  }
0x1694   : >> { %v4318_v47 = vpop.permute.xlu1 %4317 }
0x1696   : >> { %11680 = vset.pattern.permute.xlu1 %v16301_v34 }
0x1698   : >> { %v4415_v7 = vpop.permute.xlu1 %4414 }
0x169d   : >> { %v4460_v53 = vpop.permute.xlu1 %4459 }
0x16a1   : >> { %v4464_v10 = vpop.permute.xlu1 %4463 }
0x16a6   : >> { %v4328_v51 = vpop.permute.xlu1 %4327 }
0x16aa   : >> { %v4425_v39 = vpop.permute.xlu1 %4424 }
0x16af   : >> { %v4468_v28 = vpop.permute.xlu1 %4467 }
0x16b3   : >> { %v4472_v12 = vpop.permute.xlu1 %4471 }
0x16b8   : >> { %v4440_v3 = vpop.permute.xlu1 %4439 }
0x16e8   : >> { %v4362_v42 = vpop.permute.xlu0 %4361 }
0x16e9   : >> { %v4395_v29 = vmul.f32 %v4362_v42, %v4331_v56  ;;  %v4357_v43 = vpop.permute.xlu1 %4356 }
0x16ea   : >> { %v4394_v15 = vmul.f32 %v4357_v43, %v4330_v9  ;;  %v4336_v43 = vsub.f32 %v12533_v5, %v4323_v55 }
0x16eb   : >> { %v4443_v31 = vmul.f32 %v4410_v4, %v4395_v29  ;;  %v4334_v4 = vsub.f32 %v12541_v0, %v4313_v48 }
0x16ec   : >> { %v4442_v58 = vmul.f32 %v4405_v52, %v4394_v15  ;;  %v4372_v33 = vpop.permute.xlu0 %4371 }
0x16ed   : >> { %v14331_v2 = vadd.f32 %v4456_v32, %v4443_v31  ;;  %v4397_v62 = vmul.f32 %v4372_v33, %v4333_v61  ;;  %v4335_v32 = vsub.f32 %v12537_v13, %v4318_v47 }
0x16ee   : >> { %v14333_v37 = vadd.f32 %v4452_v38, %v4442_v58 }
0x16ef   : >> { %v9758_v16 = vmul.f32 -1.442695, %v14331_v2  ;;  %v4445_v25 = vmul.f32 %v4420_v44, %v4397_v62 }
0x16f0   : >> { %v9757_v30 = vmul.f32 -1.442695, %v14333_v37  ;;  %v4367_v56 = vpop.permute.xlu1 %4366 }
0x16f1   : >> { %11848 = vpow2.f32 %v9758_v16  ;;  %v14338_v9 = vadd.f32 %v4464_v10, %v4445_v25  ;;  %v4396_v11 = vmul.f32 %v4367_v56, %v4332_v57  ;;  %v4337_v57 = vsub.f32 %v12529_v46, %v4328_v51 }
0x16f2   : >> { %11850 = vpow2.f32 %v9757_v30 }
0x16f3   : >> { %v9760_v38 = vmul.f32 -1.442695, %v14338_v9  ;;  %v4444_v52 = vmul.f32 %v4415_v7, %v4396_v11 }
0x16f4   : >> { %v4377_v42 = vpop.permute.xlu1 %4376  ;;  %v4382_v17 = vpop.permute.xlu0 %4381 }
0x16f5   : >> { %11852 = vpow2.f32 %v9760_v38  ;;  %v4484_v29 = vadd.f32 %v4460_v53, %v4444_v52  ;;  %v4398_v62 = vmul.f32 %v4377_v42, %v4334_v4  ;;  %v4399_v44 = vmul.f32 %v4382_v17, %v4335_v32 }
0x16f7   : >> { %v9759_v15 = vmul.f32 -1.442695, %v4484_v29  ;;  %v4446_v25 = vmul.f32 %v4425_v39, %v4398_v62  ;;  %v4447_v10 = vmul.f32 %v4430_v27, %v4399_v44 }
0x16f8   : >> { %v4387_v61 = vpop.permute.xlu1 %4386  ;;  %v4392_v48 = vpop.permute.xlu0 %4391 }
0x16f9   : >> { %11854 = vpow2.f32 %v9759_v15  ;;  %v4486_v47 = vadd.f32 %v4468_v28, %v4446_v25  ;;  %v4487_v31 = vadd.f32 %v4472_v12, %v4447_v10  ;;  %v4400_v58 = vmul.f32 %v4387_v61, %v4336_v43 }
0x16fa   : >> { %v4401_v7 = vmul.f32 %v4392_v48, %v4337_v57 }
0x16fb   : >> { %v11849_v33 = vpop.eup %11848  ;;  %v9761_v16 = vmul.f32 -1.442695, %v4486_v47  ;;  %v4448_v30 = vmul.f32 %v4435_v59, %v4400_v58  ;;  %v9762_v11 = vmul.f32 -1.442695, %v4487_v31 }
0x16fc   : >> { %v11851_v53 = vpop.eup %11850  ;;  %v4515_v56 = vadd.f32 1.0, %v11849_v33  ;;  %v4476_v4 = vpop.permute.xlu1 %4475  ;;  %v4449_v55 = vmul.f32 %v4440_v3, %v4401_v7 }
0x16fd   : >> { %v4480_v32 = vpop.permute.xlu0 %4479  ;;  %v4514_v39 = vadd.f32 1.0, %v11851_v53  ;;  %11856 = vpow2.f32 %v9761_v16  ;;  %v4488_v27 = vadd.f32 %v4476_v4, %v4448_v30 }
0x16fe   : >> { %11858 = vrcp.f32 %v4515_v56  ;;  %v4489_v51 = vadd.f32 %v4480_v32, %v4449_v55 }
0x16ff   : >> { %v11853_v38 = vpop.eup %11852  ;;  %11860 = vrcp.f32 %v4514_v39  ;;  %v9763_v28 = vmul.f32 -1.442695, %v4488_v27 }
0x1700   : >> { %v4517_v12 = vadd.f32 1.0, %v11853_v38  ;;  %11862 = vpow2.f32 %v9762_v11  ;;  %v9764_v52 = vmul.f32 -1.442695, %v4489_v51 }
0x1701   : >> { %11864 = vpow2.f32 %v9763_v28 }
0x1702   : >> { %11866 = vpow2.f32 %v9764_v52 }
0x1703   : >> { %v11855_v42 = vpop.eup %11854  ;;  %11868 = vrcp.f32 %v4517_v12  ;;  %v11802_v12 = vld [vmem:[%s14313_s1 + $0x10] sm:$0xff]  }
0x1704   : >> { %v4516_v59 = vadd.f32 1.0, %v11855_v42 }
0x1706   : >> { %11870 = vrcp.f32 %v4516_v59 }
0x1707   : >> { %v11857_v17 = vpop.eup %11856 }
0x1708   : >> { %v11859_v3 = vpop.eup %11858  ;;  %v4518_v62 = vadd.f32 1.0, %v11857_v17 }
0x1709   : >> { %v11861_v44 = vpop.eup %11860  ;;  %v4539_v43 = vmul.f32 %v11859_v3, %v14331_v2 }
0x170a   : >> { %v11863_v15 = vpop.eup %11862  ;;  %11872 = vrcp.f32 %v4518_v62  ;;  %v4538_v25 = vmul.f32 %v11861_v44, %v14333_v37 }
0x170b   : >> { %v11865_v10 = vpop.eup %11864  ;;  %v4519_v57 = vadd.f32 1.0, %v11863_v15 }
0x170c   : >> { %v4520_v61 = vadd.f32 1.0, %v11865_v10  ;;  %v4557_v48 = vpack.c.bf16 %v4539_v43, %v4538_v25  ;;  %v11867_v58 = vpop.eup %11866 }
0x170d   : >> { %11874 = vrcp.f32 %v4519_v57  ;;  %v11869_v7 = vpop.eup %11868  ;;  %v4521_v33 = vadd.f32 1.0, %v11867_v58 }
0x170e   : >> { %11876 = vrcp.f32 %v4520_v61  ;;  %10642 = vmatprep.subr.bf16.mxu1 %v4557_v48  ;;  %v4541_v2 = vmul.f32 %v11869_v7, %v14338_v9  ;;  %v11801_v9 = vld [vmem:[%s14313_s1 + $0x8] sm:$0xff]  }
0x170f   : >> { %10643 = vmatpush3.bf16.msra.mxu1 %v4557_v48  ;;  %11878 = vrcp.f32 %v4521_v33 }
0x1710   : >> { %v11871_v16 = vpop.eup %11870 }
0x1711   : >> { %v4540_v30 = vmul.f32 %v11871_v16, %v4484_v29 }
0x1713   : >> { %v4558_v53 = vpack.c.bf16 %v4541_v2, %v4540_v30 }
0x1714   : >> { %v11873_v56 = vpop.eup %11872 }
0x1715   : >> { %10644 = vmatprep.subr.bf16.mxu1 %v4558_v53  ;;  %v4542_v37 = vmul.f32 %v11873_v56, %v4486_v47  ;;  %v11803_v47 = vld [vmem:[%s14313_s1 + $0x18] sm:$0xff]  }
0x1716   : >> { %10645 = vmatpush3.bf16.msra.mxu1 %v4558_v53 }
0x1717   : >> { %v11875_v11 = vpop.eup %11874 }
0x1718   : >> { %v11877_v4 = vpop.eup %11876  ;;  %v4543_v55 = vmul.f32 %v11875_v11, %v4487_v31  ;;  %v4563_v31 = vpop.permute.xlu1 %4562 }
0x1719   : >> { %v4544_v32 = vmul.f32 %v11877_v4, %v4488_v27  ;;  %v11879_v39 = vpop.eup %11878 }
0x171a   : >> { %v4559_v38 = vpack.c.bf16 %v4543_v55, %v4542_v37  ;;  %v4545_v28 = vmul.f32 %v11879_v39, %v4489_v51  ;;  %v4571_v51 = vpop.permute.xlu0 %4570 }
0x171c   : >> { %10646 = vmatprep.subr.bf16.mxu1 %v4559_v38  ;;  %v4560_v29 = vpack.c.bf16 %v4545_v28, %v4544_v32  ;;  %v4567_v27 = vpop.permute.xlu1 %4566 }
0x171d   : >> { %10647 = vmatpush3.bf16.msra.mxu1 %v4559_v38 }
0x171e   : >> { %10648 = vmatprep.subr.bf16.mxu1 %v4560_v29  ;;  %v4583_v11 = vpop.permute.xlu0 %4582 }
0x1720   : >> { %v4575_v52 = vpop.permute.xlu1 %4574 }
0x1721   : >> { %10649 = vmatpush3.bf16.msra.mxu1 %v4560_v29 }
0x1722   : >> { %5482 = vmatprep.subr.bf16.mxu1 %v16301_v34  ;;  %v4591_v29 = vpop.permute.xlu0 %4590 }
0x1724   : >> { %10651 = vmatmul.mubr.msk.bf16.vlgmr.msra.gmra.mrb[8].mxu1 %vm713_vm1, %v11801_v9  ;;  %v4579_v25 = vpop.permute.xlu1 %4578 }
0x1725   : >> { %10654 = vmatprep.mubr.msk.bf16.mxu1 %vm713_vm1, %v11802_v12 }
0x1728   : >> { %v4587_v30 = vpop.permute.xlu1 %4586 }
0x172c   : >> { %10655 = vmatmul.mubr.msk.bf16.gmra.mrb[12].mxu1 %vm713_vm1, %v11803_v47 }
0x17f7   : >> { %v10652_v42 = vpop.f32.mrb[8].mxu1 }
0x17f8   : >> { %v14355_v59 = vadd.f32 %v10652_v42, %v4571_v51  ;;  %v4659_v17 = vpop.f32.mrb[9].mxu1 }
0x17f9   : >> { %v10653_v3 = vpop.f32.mrb[10].mxu1  ;;  %v14357_v62 = vadd.f32 %v4659_v17, %v4563_v31 }
0x17fa   : >> { %v14359_v44 = vadd.f32 %v10653_v3, %v4575_v52  ;;  %v4662_v43 = vpop.f32.mrb[11].mxu1  ;;  %v4696_v15 = vsel %vm647_vm0, %v14355_v59, 0.0  ;;  %v4716_v48 = vmul.f32 %v14355_v59, %v14355_v59 }
0x17fb   : >> { %4697 = vadd.xlane.f32.xlu1 %v4696_v15  ;;  %v14363_v10 = vadd.f32 %v4662_v43, %v4567_v27  ;;  %v4690_v61 = vsel %vm647_vm0, %v14357_v62, 0.0  ;;  %v4714_v16 = vmul.f32 %v14357_v62, %v14357_v62 }
0x17fc   : >> { %v4699_v57 = vsel %vm647_vm0, %v14359_v44, 0.0  ;;  %v4728_v37 = vsel %vm647_vm0, %v4716_v48, 0.0  ;;  %v4717_v55 = vmul.f32 %v14359_v44, %v14359_v44 }
0x17fd   : >> { %4700 = vadd.xlane.f32.xlu0 %v4699_v57  ;;  %v4693_v33 = vsel %vm647_vm0, %v14363_v10, 0.0  ;;  %v4722_v4 = vsel %vm647_vm0, %v4714_v16, 0.0  ;;  %v4715_v28 = vmul.f32 %v14363_v10, %v14363_v10 }
0x17fe   : >> { %v4731_v38 = vsel %vm647_vm0, %v4717_v55, 0.0 }
0x17ff   : >> { %v10656_v58 = vpop.f32.mrb[12].mxu1  ;;  %4691 = vadd.xlane.f32.xlu1 %v4690_v61  ;;  %v4725_v31 = vsel %vm647_vm0, %v4715_v28, 0.0 }
0x1800   : >> { %v4675_v7 = vpop.f32.mrb[13].mxu1  ;;  %v14375_v53 = vadd.f32 %v10656_v58, %v4587_v30 }
0x1801   : >> { %v10657_v2 = vpop.f32.mrb[14].mxu1  ;;  %4694 = vadd.xlane.f32.xlu0 %v4693_v33  ;;  %v14381_v32 = vadd.f32 %v4675_v7, %v4579_v25 }
0x1802   : >> { %v4678_v56 = vpop.f32.mrb[15].mxu1  ;;  %v4708_v39 = vsel %vm647_vm0, %v14375_v53, 0.0  ;;  %v14392_v47 = vadd.f32 %v10657_v2, %v4591_v29  ;;  %v4720_v52 = vmul.f32 %v14375_v53, %v14375_v53 }
0x1803   : >> { %4729 = vadd.xlane.f32.xlu1 %v4728_v37  ;;  %v4702_v9 = vsel %vm647_vm0, %v14381_v32, 0.0  ;;  %v4718_v12 = vmul.f32 %v14381_v32, %v14381_v32  ;;  %v14398_v51 = vadd.f32 %v4678_v56, %v4583_v11 }
0x1804   : >> { %v4711_v42 = vsel %vm647_vm0, %v14392_v47, 0.0  ;;  %v4740_v17 = vsel %vm647_vm0, %v4720_v52, 0.0  ;;  %v4721_v25 = vmul.f32 %v14392_v47, %v14392_v47 }
0x1805   : >> { %4723 = vadd.xlane.f32.xlu0 %v4722_v4  ;;  %v4734_v27 = vsel %vm647_vm0, %v4718_v12, 0.0  ;;  %v4705_v3 = vsel %vm647_vm0, %v14398_v51, 0.0  ;;  %v4719_v43 = vmul.f32 %v14398_v51, %v14398_v51 }
0x1806   : >> { %v4743_v57 = vsel %vm647_vm0, %v4721_v25, 0.0 }
0x1807   : >> { %4709 = vadd.xlane.f32.xlu1 %v4708_v39  ;;  %v4737_v15 = vsel %vm647_vm0, %v4719_v43, 0.0 }
0x1809   : >> { %4732 = vadd.xlane.f32.xlu0 %v4731_v38 }
0x180b   : >> { %4703 = vadd.xlane.f32.xlu1 %v4702_v9 }
0x180d   : >> { %4726 = vadd.xlane.f32.xlu0 %v4725_v31 }
0x180f   : >> { %4735 = vadd.xlane.f32.xlu1 %v4734_v27 }
0x1811   : >> { %4712 = vadd.xlane.f32.xlu0 %v4711_v42 }
0x1813   : >> { %4741 = vadd.xlane.f32.xlu1 %v4740_v17 }
0x1815   : >> { %4706 = vadd.xlane.f32.xlu0 %v4705_v3 }
0x1819   : >> { %4738 = vadd.xlane.f32.xlu0 %v4737_v15 }
0x181d   : >> { %4744 = vadd.xlane.f32.xlu0 %v4743_v57  ;;  %v12620_v57 = vmov 4  }
0x181e   : >> { %11687 = vset.pattern.permute.xlu0 %v12620_v57 }
0x1888   : >> { %v4698_v61 = vpop.xlane.xlu1 %4697 }
0x188a   : >> { %v4701_v48 = vpop.xlane.xlu0 %4700 }
0x188c   : >> { %v4692_v58 = vpop.xlane.xlu1 %4691 }
0x188e   : >> { %v4695_v7 = vpop.xlane.xlu0 %4694 }
0x1890   : >> { %v4730_v33 = vpop.xlane.xlu1 %4729 }
0x1891   : >> { %v4748_v38 = vsel %vm704_vm2, %v4698_v61, %v4730_v33 }
0x1892   : >> { %v4724_v16 = vpop.xlane.xlu0 %4723 }
0x1893   : >> { %v4746_v37 = vsel %vm704_vm2, %v4692_v58, %v4724_v16 }
0x1894   : >> { %v4710_v30 = vpop.xlane.xlu1 %4709 }
0x1896   : >> { %v4733_v2 = vpop.xlane.xlu0 %4732 }
0x1897   : >> { %v4749_v11 = vsel %vm704_vm2, %v4701_v48, %v4733_v2 }
0x1898   : >> { %v4704_v55 = vpop.xlane.xlu1 %4703  ;;  %v10978_v28 = vpack.c.bf16 %v4749_v11, %v4748_v38 }
0x189a   : >> { %v4727_v56 = vpop.xlane.xlu0 %4726 }
0x189b   : >> { %v4747_v4 = vsel %vm704_vm2, %v4695_v7, %v4727_v56 }
0x189c   : >> { %v10974_v39 = vpack.c.bf16 %v4747_v4, %v4746_v37  ;;  %v4736_v9 = vpop.xlane.xlu1 %4735  ;;  %v4038_v4 = vld [vmem:[%s14469_s27] sm:$0xff] }
0x189d   : >> { %v4750_v27 = vsel %vm704_vm2, %v4704_v55, %v4736_v9  ;;  %v5099_v55 = vadd.f32 1.0, %v4038_v4 }
0x189e   : >> { %10975 = vmatprep.subr.bf16.mxu0 %v10974_v39  ;;  %v4713_v29 = vpop.xlane.xlu0 %4712 }
0x189f   : >> { %10977 = vmatpush3.bf16.msra.mxu0 %v10974_v39  ;;  %v4039_v39 = vld [vmem:[%s14469_s27 + $0x8] sm:$0xff] }
0x18a0   : >> { %10979 = vmatprep.subr.bf16.mxu0 %v10978_v28  ;;  %v4742_v42 = vpop.xlane.xlu1 %4741  ;;  %v5100_v38 = vadd.f32 1.0, %v4039_v39 }
0x18a1   : >> { %v4752_v43 = vsel %vm704_vm2, %v4710_v30, %v4742_v42 }
0x18a2   : >> { %v4707_v12 = vpop.xlane.xlu0 %4706 }
0x18a3   : >> { %10981 = vmatpush3.bf16.msra.mxu0 %v10978_v28 }
0x18a6   : >> { %v4739_v31 = vpop.xlane.xlu0 %4738 }
0x18a7   : >> { %v4751_v52 = vsel %vm704_vm2, %v4707_v12, %v4739_v31  ;;  %v4042_v12 = vld [vmem:[%s14469_s27 + $0x20] sm:$0xff]  ;;  %v4040_v31 = vld [vmem:[%s14469_s27 + $0x10] sm:$0xff] }
0x18a8   : >> { %v10982_v17 = vpack.c.bf16 %v4751_v52, %v4750_v27  ;;  %v5101_v27 = vadd.f32 1.0, %v4040_v31  ;;  %v4041_v52 = vld [vmem:[%s14469_s27 + $0x18] sm:$0xff] }
0x18a9   : >> { %v5102_v42 = vadd.f32 1.0, %v4041_v52 }
0x18aa   : >> { %10983 = vmatprep.subr.bf16.mxu0 %v10982_v17  ;;  %v4745_v3 = vpop.xlane.xlu0 %4744 }
0x18ab   : >> { %v4753_v15 = vsel %vm704_vm2, %v4713_v29, %v4745_v3  ;;  %10985 = vmatpush3.bf16.msra.mxu0 %v10982_v17  ;;  %v16394_v29 = vmov 1   ;;  %v5103_v17 = vadd.f32 1.0, %v4042_v12 }
0x18ac   : >> { %v10986_v25 = vpack.c.bf16 %v4753_v15, %v4752_v43  ;;  %v4044_v15 = vld [vmem:[%s14469_s27 + $0x30] sm:$0xff] }
0x18ae   : >> { %10987 = vmatprep.subr.bf16.mxu0 %v10986_v25 }
0x18af   : >> { %10989 = vmatpush3.bf16.msra.mxu0 %v10986_v25 }
0x18b2   : >> { %10675 = vmatmul.mubr.msk.f32.vlgmr.msra.gmra.mrb[0].mxu0 %vm713_vm1, %v16386_v1 }
0x18b3   : >> { %10677 = vmatprep.mubr.msk.f32.mxu0 %vm713_vm1, %v16388_v21 }
0x18b6   : >> { %10678 = vmatmul.mubr.msk.f32.gmra.mrb[2].mxu0 %vm713_vm1, %v16389_v45 }
0x18b7   : >> { %10680 = vmatprep.mubr.msk.f32.mxu0 %vm713_vm1, %v16390_v6 }
0x18ba   : >> { %10681 = vmatmul.mubr.msk.f32.gmra.mrb[4].mxu0 %vm713_vm1, %v16391_v40 }
0x18bb   : >> { %10683 = vmatprep.mubr.msk.f32.mxu0 %vm713_vm1, %v16392_v54 }
0x18be   : >> { %10684 = vmatmul.mubr.msk.f32.gmra.mrb[6].mxu0 %vm713_vm1, %v16393_v41 }
0x18bf   : >> { %10702 = vmatprep.mubr.msk.f32.mxu0 %vm713_vm1, %v16387_v36  ;;  %v12621_v36 = vmov 3  }
0x1985   : >> { %v14436_v61 = vpop.f32.mrb[0].mxu0 }
0x1986   : >> { %v4860_v48 = vmul.f32 %v14436_v61, %v14436_v61  ;;  %v14440_v58 = vpop.f32.mrb[1].mxu0 }
0x1987   : >> { %4909 = vperm.xlu1 %11680, %v14440_v58  }
0x1988   : >> { %4877 = vrot.lane.b32.xlu0 %v4860_v48, %s12617_s30  ;;  %v5105_v48 = vadd.f32 1.0, %v4044_v15 }
0x1989   : >> { %v14444_v7 = vpop.f32.mrb[2].mxu0 }
0x198a   : >> { %v14446_v33 = vpop.f32.mrb[3].mxu0 }
0x198b   : >> { %11681 = vset.pattern.permute.xlu1 %v12621_v36 }
0x198c   : >> { %5024 = vperm.xlu1 %11681, %v14256_v18  }
0x198d   : >> { %v14450_v16 = vpop.f32.mrb[4].mxu0 }
0x198e   : >> { %v4864_v30 = vmul.f32 %v14450_v16, %v14450_v16  ;;  %v14454_v2 = vpop.f32.mrb[5].mxu0 }
0x1990   : >> { %11682 = vset.pattern.permute.xlu1 %v12620_v57  ;;  %4885 = vrot.lane.b32.xlu0 %v4864_v30, %s12617_s30 }
0x1991   : >> { %5060 = vperm.xlu1 %11682, %v14244_v19   ;;  %v14459_v56 = vpop.f32.mrb[6].mxu0 }
0x1992   : >> { %v4866_v37 = vmul.f32 %v14459_v56, %v14459_v56  ;;  %v14463_v11 = vpop.f32.mrb[7].mxu0 }
0x1993   : >> { %v4865_v9 = vmul.f32 %v14463_v11, %v14463_v11 }
0x1994   : >> { %4889 = vrot.lane.b32.xlu0 %v4866_v37, %s12617_s30 }
0x1995   : >> { %5064 = vperm.xlu1 %11682, %v14256_v18   ;;  %v4859_v18 = vmul.f32 %v14440_v58, %v14440_v58 }
0x1998   : >> { %5072 = vperm.xlu0 %11687, %v14251_v22  }
0x1999   : >> { %11683 = vset.pattern.permute.xlu1 %v12621_v36 }
0x199a   : >> { %5028 = vperm.xlu1 %11683, %v14275_v63  }
0x199c   : >> { %5080 = vperm.xlu0 %11687, %v14261_v49  }
0x199e   : >> { %11684 = vset.pattern.permute.xlu1 %v16301_v34 }
0x199f   : >> { %5109 = vperm.xlu1 %11684, %v5099_v55  }
0x19a0   : >> { %11693 = vset.pattern.permute.xlu0 %v12621_v36 }
0x19a1   : >> { %5020 = vperm.xlu0 %11693, %v14244_v19   ;;  %v4862_v19 = vmul.f32 %v14444_v7, %v14444_v7 }
0x19a3   : >> { %5114 = vperm.xlu1 %11684, %v5100_v38  }
0x19a5   : >> { %5032 = vperm.xlu0 %11693, %v14251_v22   ;;  %v4861_v22 = vmul.f32 %v14446_v33, %v14446_v33 }
0x19a7   : >> { %11685 = vset.pattern.permute.xlu1 %v12620_v57 }
0x19a8   : >> { %5068 = vperm.xlu1 %11685, %v14275_v63   ;;  %v4863_v63 = vmul.f32 %v14454_v2, %v14454_v2 }
0x19a9   : >> { %5040 = vperm.xlu0 %11693, %v14261_v49   ;;  %v4043_v49 = vld [vmem:[%s14469_s27 + $0x28] sm:$0xff] }
0x19aa   : >> { %v5104_v28 = vadd.f32 1.0, %v4043_v49 }
0x19ac   : >> { %4875 = vrot.lane.b32.xlu1 %v4859_v18, %s12617_s30 }
0x19ad   : >> { %5044 = vperm.xlu0 %11693, %v14267_v8   ;;  %11686 = vset.pattern.permute.xlu1 %v16301_v34 }
0x19b0   : >> { %4924 = vperm.xlu1 %11686, %v14444_v7  }
0x19b1   : >> { %11695 = vset.pattern.permute.xlu0 %v16301_v34 }
0x19b2   : >> { %4914 = vperm.xlu0 %11695, %v14436_v61  }
0x19b4   : >> { %4881 = vrot.lane.b32.xlu1 %v4862_v19, %s12617_s30 }
0x19b6   : >> { %4919 = vperm.xlu0 %11695, %v14446_v33  }
0x19b8   : >> { %4879 = vrot.lane.b32.xlu1 %v4861_v22, %s12617_s30 }
0x19ba   : >> { %4929 = vperm.xlu0 %11695, %v14454_v2  }
0x19bc   : >> { %4934 = vperm.xlu1 %11686, %v14450_v16  }
0x19be   : >> { %4939 = vperm.xlu0 %11695, %v14463_v11  }
0x19c0   : >> { %4883 = vrot.lane.b32.xlu1 %v4863_v63, %s12617_s30 }
0x19c1   : >> { %11688 = vset.pattern.permute.xlu1 %v16394_v29 }
0x19c2   : >> { %5134 = vperm.xlu0 %11695, %v5104_v28  }
0x19c4   : >> { %5157 = vperm.xlu1 %11688, %v4038_v4  }
0x19c6   : >> { %11699 = vset.pattern.permute.xlu0 %v16394_v29 }
0x19c7   : >> { %5177 = vperm.xlu0 %11699, %v4042_v12  }
0x19c8   : >> { %4887 = vrot.lane.b32.xlu1 %v4865_v9, %s12617_s30 }
0x19cc   : >> { %5162 = vperm.xlu1 %11688, %v4039_v39  }
0x19d0   : >> { %11689 = vset.pattern.permute.xlu1 %v16301_v34 }
0x19d1   : >> { %4944 = vperm.xlu1 %11689, %v14459_v56  }
0x19d5   : >> { %11690 = vset.pattern.permute.xlu1 %v12621_v36 }
0x19d6   : >> { %5036 = vperm.xlu1 %11690, %v14284_v50  }
0x19da   : >> { %11691 = vset.pattern.permute.xlu1 %v16301_v34 }
0x19db   : >> { %5119 = vperm.xlu1 %11691, %v5101_v27  }
0x19df   : >> { %5124 = vperm.xlu1 %11691, %v5102_v42  }
0x19e3   : >> { %11692 = vset.pattern.permute.xlu1 %v12620_v57 }
0x19e4   : >> { %5076 = vperm.xlu1 %11692, %v14284_v50  }
0x19e8   : >> { %11694 = vset.pattern.permute.xlu1 %v16394_v29 }
0x19e9   : >> { %5167 = vperm.xlu1 %11694, %v4040_v31  }
0x19ed   : >> { %5172 = vperm.xlu1 %11694, %v4041_v52  }
0x19f1   : >> { %11696 = vset.pattern.permute.xlu1 %v12621_v36 }
0x19f2   : >> { %5048 = vperm.xlu1 %11696, %v14291_v60  }
0x19f6   : >> { %11697 = vset.pattern.permute.xlu1 %v16301_v34 }
0x19f7   : >> { %5129 = vperm.xlu1 %11697, %v5103_v17  }
0x19fa   : >> { %v4878_v3 = vpop.permute.xlu0 %4877 }
0x19fb   : >> { %11698 = vset.pattern.permute.xlu1 %v12620_v57  ;;  %v4900_v43 = vsub.f32 %v14436_v61, %v4878_v3 }
0x19fc   : >> { %5084 = vperm.xlu1 %11698, %v14267_v8  }
0x19fd   : >> { %v4956_v50 = vadd.f32 1e-05, %v4900_v43 }
0x19ff   : >> { %11880 = vrsqrt.f32 %v4956_v50 }
0x1a00   : >> { %5088 = vperm.xlu1 %11698, %v14291_v60  }
0x1a02   : >> { %v4886_v19 = vpop.permute.xlu0 %4885 }
0x1a03   : >> { %v4904_v9 = vsub.f32 %v14450_v16, %v4886_v19 }
0x1a04   : >> { %11700 = vset.pattern.permute.xlu1 %v16394_v29 }
0x1a05   : >> { %5182 = vperm.xlu1 %11700, %v4043_v49   ;;  %v4960_v17 = vadd.f32 1e-05, %v4904_v9 }
0x1a06   : >> { %v14531_v25 = vpop.permute.xlu1 %4909  ;;  %v4890_v12 = vpop.permute.xlu0 %4889 }
0x1a07   : >> { %v4947_v6 = vsub.f32 %v14357_v62, %v14531_v25 }
0x1a09   : >> { %11701 = vset.pattern.permute.xlu1 %v16301_v34  ;;  %v11881_v57 = vpop.eup %11880 }
0x1a0a   : >> { %5139 = vperm.xlu1 %11701, %v5105_v48  }
0x1a0b   : >> { %v14534_v36 = vpop.permute.xlu1 %5024 }
0x1a0e   : >> { %11702 = vset.pattern.permute.xlu1 %v16394_v29 }
0x1a0f   : >> { %4978 = vperm.xlu1 %11702, %v11881_v57  }
0x1a10   : >> { %v14537_v8 = vpop.permute.xlu1 %5060 }
0x1a14   : >> { %v14539_v60 = vpop.permute.xlu1 %5064 }
0x1a19   : >> { %v14541_v61 = vpop.permute.xlu1 %5028 }
0x1a1e   : >> { %v14543_v30 = vpop.permute.xlu1 %5109 }
0x1a22   : >> { %v14545_v37 = vpop.permute.xlu1 %5114 }
0x1a27   : >> { %v14547_v4 = vpop.permute.xlu1 %5068 }
0x1a2b   : >> { %v4876_v55 = vpop.permute.xlu1 %4875 }
0x1a2c   : >> { %v4899_v39 = vsub.f32 %v14440_v58, %v4876_v55  ;;  %v4906_v58 = vsub.f32 %v14459_v56, %v4890_v12 }
0x1a2e   : >> { %v4955_v38 = vadd.f32 1e-05, %v4899_v39  ;;  %v4962_v3 = vadd.f32 1e-05, %v4906_v58 }
0x1a2f   : >> { %v14550_v18 = vpop.permute.xlu1 %4924 }
0x1a30   : >> { %11882 = vrsqrt.f32 %v4955_v38 }
0x1a33   : >> { %v4882_v22 = vpop.permute.xlu1 %4881 }
0x1a34   : >> { %v4902_v49 = vsub.f32 %v14444_v7, %v4882_v22  ;;  %v4045_v22 = vld [vmem:[%s14469_s27 + $0x38] sm:$0xff]  ;;  %s14696_s27 = scalar_lea.vmem %s16234_s5, %s14232_s22 }
0x1a36   : >> { %v4958_v63 = vadd.f32 1e-05, %v4902_v49 }
0x1a37   : >> { %v4880_v28 = vpop.permute.xlu1 %4879 }
0x1a38   : >> { %11884 = vrsqrt.f32 %v4958_v63  ;;  %v4901_v31 = vsub.f32 %v14446_v33, %v4880_v28  ;;  %v5106_v63 = vadd.f32 1.0, %v4045_v22 }
0x1a3a   : >> { %v11883_v27 = vpop.eup %11882  ;;  %v4957_v52 = vadd.f32 1e-05, %v4901_v31 }
0x1a3b   : >> { %v14556_v42 = vpop.permute.xlu1 %4934  ;;  %4973 = vperm.xlu1 %11702, %v11883_v27  }
0x1a3c   : >> { %11886 = vrsqrt.f32 %v4957_v52 }
0x1a3d   : >> { %11888 = vrsqrt.f32 %v4960_v17 }
0x1a3e   : >> { %11890 = vrsqrt.f32 %v4962_v3 }
0x1a3f   : >> { %v4884_v43 = vpop.permute.xlu1 %4883 }
0x1a40   : >> { %v4903_v7 = vsub.f32 %v14454_v2, %v4884_v43 }
0x1a42   : >> { %v11885_v50 = vpop.eup %11884  ;;  %v4959_v16 = vadd.f32 1e-05, %v4903_v7 }
0x1a43   : >> { %v14559_v48 = vpop.permute.xlu1 %5157  ;;  %4988 = vperm.xlu0 %11699, %v11885_v50  }
0x1a44   : >> { %11892 = vrsqrt.f32 %v4959_v16 }
0x1a46   : >> { %v11887_v33 = vpop.eup %11886 }
0x1a47   : >> { %4983 = vperm.xlu1 %11702, %v11887_v33   ;;  %v4888_v56 = vpop.permute.xlu1 %4887  ;;  %v11889_v55 = vpop.eup %11888 }
0x1a48   : >> { %v4905_v57 = vsub.f32 %v14463_v11, %v4888_v56  ;;  %v11891_v38 = vpop.eup %11890 }
0x1a4a   : >> { %v4961_v39 = vadd.f32 1e-05, %v4905_v57 }
0x1a4b   : >> { %4998 = vperm.xlu1 %11702, %v11889_v55   ;;  %v5163_v2 = vpop.permute.xlu1 %5162 }
0x1a4c   : >> { %11894 = vrsqrt.f32 %v4961_v39 }
0x1a4e   : >> { %v11893_v19 = vpop.eup %11892 }
0x1a4f   : >> { %4993 = vperm.xlu0 %11699, %v11893_v19   ;;  %5008 = vperm.xlu1 %11702, %v11891_v38  }
0x1a50   : >> { %v14563_v28 = vpop.permute.xlu1 %4944 }
0x1a53   : >> { %5187 = vperm.xlu1 %11702, %v4044_v15   ;;  %v5073_v15 = vpop.permute.xlu0 %5072 }
0x1a55   : >> { %v14566_v11 = vpop.permute.xlu1 %5036 }
0x1a56   : >> { %v11895_v49 = vpop.eup %11894 }
0x1a57   : >> { %5192 = vperm.xlu1 %11702, %v4045_v22   ;;  %5003 = vperm.xlu0 %11699, %v11895_v49   ;;  %v5081_v17 = vpop.permute.xlu0 %5080 }
0x1a5a   : >> { %v5120_v9 = vpop.permute.xlu1 %5119 }
0x1a5b   : >> { %11703 = vset.pattern.permute.xlu0 %v16301_v34  ;;  %v5021_v43 = vpop.permute.xlu0 %5020 }
0x1a5c   : >> { %5144 = vperm.xlu0 %11703, %v5106_v63  }
0x1a5e   : >> { %v5125_v12 = vpop.permute.xlu1 %5124 }
0x1a5f   : >> { %v5033_v50 = vpop.permute.xlu0 %5032 }
0x1a63   : >> { %v14568_v31 = vpop.permute.xlu1 %5076  ;;  %v5041_v33 = vpop.permute.xlu0 %5040 }
0x1a67   : >> { %v14580_v57 = vpop.permute.xlu0 %5044 }
0x1a68   : >> { %v5168_v27 = vpop.permute.xlu1 %5167 }
0x1a6b   : >> { %v4915_v39 = vpop.permute.xlu0 %4914 }
0x1a6c   : >> { %v5173_v52 = vpop.permute.xlu1 %5172  ;;  %v4948_v19 = vsub.f32 %v14363_v10, %v4915_v39 }
0x1a6f   : >> { %v4920_v22 = vpop.permute.xlu0 %4919 }
0x1a70   : >> { %v4949_v62 = vsub.f32 %v14355_v59, %v4920_v22 }
0x1a71   : >> { %v14570_v58 = vpop.permute.xlu1 %5048 }
0x1a73   : >> { %v4930_v34 = vpop.permute.xlu0 %4929 }
0x1a74   : >> { %v4951_v22 = vsub.f32 %v14381_v32, %v4930_v34 }
0x1a76   : >> { %v14572_v3 = vpop.permute.xlu1 %5129 }
0x1a77   : >> { %v14587_v41 = vpop.permute.xlu0 %4939 }
0x1a7b   : >> { %v14574_v7 = vpop.permute.xlu1 %5084  ;;  %v5135_v40 = vpop.permute.xlu0 %5134 }
0x1a7f   : >> { %v14576_v16 = vpop.permute.xlu1 %5088  ;;  %v5178_v10 = vpop.permute.xlu0 %5177 }
0x1a84   : >> { %v14578_v56 = vpop.permute.xlu1 %5182 }
0x1a89   : >> { %v14582_v55 = vpop.permute.xlu1 %5139 }
0x1a8e   : >> { %v4979_v38 = vpop.permute.xlu1 %4978 }
0x1a8f   : >> { %v5012_v49 = vmul.f32 %v4979_v38, %v4948_v19 }
0x1a91   : >> { %v5052_v63 = vmul.f32 %v14534_v36, %v5012_v49 }
0x1a93   : >> { %v5092_v29 = vadd.f32 %v14539_v60, %v5052_v63  ;;  %v4950_v60 = vsub.f32 %v14359_v44, %v14550_v18  ;;  %v4952_v44 = vsub.f32 %v14398_v51, %v14556_v42 }
0x1a95   : >> { %v5148_v54 = vmul.f32 %v14545_v37, %v5092_v29 }
0x1a97   : >> { %v14592_v45 = vadd.f32 %v5163_v2, %v5148_v54 }
0x1a99   : >> { %v9784_v39 = vmul.f32 -1.442695, %v14592_v45 }
0x1a9b   : >> { %11896 = vpow2.f32 %v9784_v39 }
0x1aba   : >> { %v4974_v21 = vpop.permute.xlu1 %4973 }
0x1abb   : >> { %v5011_v1 = vmul.f32 %v4974_v21, %v4947_v6 }
0x1abd   : >> { %v5051_v38 = vmul.f32 %v5021_v43, %v5011_v1  ;;  %v11897_v43 = vpop.eup %11896 }
0x1abe   : >> { %v5228_v39 = vadd.f32 1.0, %v11897_v43 }
0x1abf   : >> { %v5091_v36 = vadd.f32 %v14537_v8, %v5051_v38 }
0x1ac1   : >> { %v5147_v29 = vmul.f32 %v14543_v30, %v5091_v36 }
0x1ac2   : >> { %v4989_v37 = vpop.permute.xlu0 %4988 }
0x1ac3   : >> { %v14600_v19 = vadd.f32 %v14559_v48, %v5147_v29  ;;  %v5014_v54 = vmul.f32 %v4989_v37, %v4950_v60 }
0x1ac5   : >> { %v9783_v21 = vmul.f32 -1.442695, %v14600_v19  ;;  %v5054_v6 = vmul.f32 %v5033_v50, %v5014_v54 }
0x1ac6   : >> { %v4984_v25 = vpop.permute.xlu1 %4983 }
0x1ac7   : >> { %11898 = vpow2.f32 %v9783_v21  ;;  %v5094_v1 = vadd.f32 %v5073_v15, %v5054_v6  ;;  %v5013_v8 = vmul.f32 %v4984_v25, %v4949_v62 }
0x1ac9   : >> { %v5150_v18 = vmul.f32 %v5125_v12, %v5094_v1  ;;  %v5053_v30 = vmul.f32 %v14541_v61, %v5013_v8 }
0x1aca   : >> { %v4999_v2 = vpop.permute.xlu1 %4998 }
0x1acb   : >> { %v14607_v48 = vadd.f32 %v5173_v52, %v5150_v18  ;;  %v5093_v49 = vadd.f32 %v14547_v4, %v5053_v30  ;;  %v5016_v59 = vmul.f32 %v4999_v2, %v4952_v44  ;;  %v4954_v52 = vsub.f32 %v14392_v47, %v14563_v28 }
0x1acd   : >> { %v9786_v50 = vmul.f32 -1.442695, %v14607_v48  ;;  %v5149_v63 = vmul.f32 %v5120_v9, %v5093_v49  ;;  %v5056_v15 = vmul.f32 %v5041_v33, %v5016_v59 }
0x1ace   : >> { %v4994_v38 = vpop.permute.xlu0 %4993  ;;  %v5009_v61 = vpop.permute.xlu1 %5008 }
0x1acf   : >> { %11900 = vpow2.f32 %v9786_v50  ;;  %v5197_v51 = vadd.f32 %v5168_v27, %v5149_v63  ;;  %v5096_v42 = vadd.f32 %v5081_v17, %v5056_v15  ;;  %v5015_v12 = vmul.f32 %v4994_v38, %v4951_v22 }
0x1ad0   : >> { %11902 = vrcp.f32 %v5228_v39  ;;  %v5018_v32 = vmul.f32 %v5009_v61, %v4954_v52  ;;  %v4953_v27 = vsub.f32 %v14375_v53, %v14587_v41 }
0x1ad1   : >> { %v11899_v36 = vpop.eup %11898  ;;  %v9785_v60 = vmul.f32 -1.442695, %v5197_v51  ;;  %v5152_v4 = vmul.f32 %v5135_v40, %v5096_v42  ;;  %v5055_v29 = vmul.f32 %v14566_v11, %v5015_v12 }
0x1ad2   : >> { %v5227_v34 = vadd.f32 1.0, %v11899_v36  ;;  %v5058_v28 = vmul.f32 %v14570_v58, %v5018_v32  ;;  %v5188_v37 = vpop.permute.xlu1 %5187 }
0x1ad3   : >> { %11904 = vpow2.f32 %v9785_v60  ;;  %v5200_v9 = vadd.f32 %v14578_v56, %v5152_v4  ;;  %v5095_v33 = vadd.f32 %v14568_v31, %v5055_v29 }
0x1ad4   : >> { %11906 = vrcp.f32 %v5227_v34  ;;  %v5098_v31 = vadd.f32 %v14576_v16, %v5058_v28 }
0x1ad5   : >> { %v9788_v17 = vmul.f32 -1.442695, %v5200_v9  ;;  %v5151_v47 = vmul.f32 %v14572_v3, %v5095_v33 }
0x1ad6   : >> { %v5004_v40 = vpop.permute.xlu0 %5003  ;;  %v5193_v8 = vpop.permute.xlu1 %5192 }
0x1ad7   : >> { %11908 = vpow2.f32 %v9788_v17  ;;  %v5199_v11 = vadd.f32 %v5178_v10, %v5151_v47  ;;  %v5017_v54 = vmul.f32 %v5004_v40, %v4953_v27 }
0x1ad9   : >> { %v11901_v62 = vpop.eup %11900  ;;  %v9787_v21 = vmul.f32 -1.442695, %v5199_v11  ;;  %v5057_v56 = vmul.f32 %v14580_v57, %v5017_v54 }
0x1ada   : >> { %v5230_v6 = vadd.f32 1.0, %v11901_v62  ;;  %v11903_v25 = vpop.eup %11902 }
0x1adb   : >> { %11910 = vpow2.f32 %v9787_v21  ;;  %v5097_v41 = vadd.f32 %v14574_v7, %v5057_v56  ;;  %v5145_v53 = vpop.permute.xlu0 %5144  ;;  %v14626_v30 = vmul.f32 %v11903_v25, %v14592_v45 }
0x1adc   : >> { %v5154_v3 = vmul.f32 %v5145_v53, %v5098_v31  ;;  %11912 = vrcp.f32 %v5230_v6 }
0x1add   : >> { %v11905_v1 = vpop.eup %11904  ;;  %v5153_v58 = vmul.f32 %v14582_v55, %v5097_v41 }
0x1ade   : >> { %v11907_v10 = vpop.eup %11906  ;;  %v5229_v44 = vadd.f32 1.0, %v11905_v1  ;;  %v5202_v18 = vadd.f32 %v5193_v8, %v5154_v3 }
0x1adf   : >> { %v14629_v57 = vmul.f32 %v11907_v10, %v14600_v19  ;;  %v5201_v16 = vadd.f32 %v5188_v37, %v5153_v58 }
0x1ae0   : >> { %11914 = vrcp.f32 %v5229_v44  ;;  %v9790_v7 = vmul.f32 -1.442695, %v5202_v18 }
0x1ae1   : >> { %v11909_v2 = vpop.eup %11908  ;;  %v9789_v43 = vmul.f32 -1.442695, %v5201_v16  ;;  %v11704_v49 = vpack.i.bf16 %v14626_v30, %v14629_v57 }
0x1ae2   : >> { %v5232_v55 = vadd.f32 1.0, %v11909_v2  ;;  %11916 = vpow2.f32 %v9790_v7 }
0x1ae3   : >> { %11918 = vpow2.f32 %v9789_v43  ;;  %11705 = vrot.lane.b32.xlu0 %v11704_v49, %s12622_s29 }
0x1ae4   : >> { %11920 = vrcp.f32 %v5232_v55 }
0x1ae5   : >> { %v11911_v59 = vpop.eup %11910 }
0x1ae6   : >> { %v5231_v45 = vadd.f32 1.0, %v11911_v59  ;;  %v11913_v22 = vpop.eup %11912 }
0x1ae7   : >> { %v14635_v50 = vmul.f32 %v11913_v22, %v14607_v48 }
0x1ae8   : >> { %11922 = vrcp.f32 %v5231_v45 }
0x1aea   : >> { %v11915_v19 = vpop.eup %11914 }
0x1aeb   : >> { %v14637_v63 = vmul.f32 %v11915_v19, %v5197_v51 }
0x1aec   : >> { %v11917_v15 = vpop.eup %11916 }
0x1aed   : >> { %v11919_v39 = vpop.eup %11918  ;;  %v5234_v38 = vadd.f32 1.0, %v11917_v15  ;;  %v11709_v42 = vpack.i.bf16 %v14635_v50, %v14637_v63 }
0x1aee   : >> { %v5233_v12 = vadd.f32 1.0, %v11919_v39  ;;  %v11921_v61 = vpop.eup %11920 }
0x1aef   : >> { %11924 = vrcp.f32 %v5234_v38  ;;  %11710 = vrot.lane.b32.xlu1 %v11709_v42, %s12622_s29  ;;  %v14642_v36 = vmul.f32 %v11921_v61, %v5200_v9 }
0x1af0   : >> { %11926 = vrcp.f32 %v5233_v12 }
0x1af2   : >> { %v11923_v52 = vpop.eup %11922 }
0x1af3   : >> { %v14644_v60 = vmul.f32 %v11923_v52, %v5199_v11 }
0x1af5   : >> { %v11714_v48 = vpack.i.bf16 %v14642_v36, %v14644_v60 }
0x1af7   : >> { %11715 = vrot.lane.b32.xlu0 %v11714_v48, %s12622_s29 }
0x1af9   : >> { %v11925_v51 = vpop.eup %11924 }
0x1afa   : >> { %v11927_v4 = vpop.eup %11926  ;;  %v14649_v29 = vmul.f32 %v11925_v51, %v5202_v18 }
0x1afb   : >> { %v14651_v34 = vmul.f32 %v11927_v4, %v5201_v16 }
0x1afd   : >> { %v11719_v32 = vpack.i.bf16 %v14649_v29, %v14651_v34 }
0x1aff   : >> { %11720 = vrot.lane.b32.xlu1 %v11719_v32, %s12622_s29 }
0x1b55   : >> { %v11706_v9 = vpop.permute.xlu0 %11705 }
0x1b56   : >> { %v11708_v33 = vunpack.i.h.bf16 %v11706_v9  ;;  %v11707_v27 = vunpack.i.l.bf16 %v11706_v9 }
0x1b58   : >> { %v5275_v17 = vsel %vm1874_vm3, %v11708_v33, %v14626_v30  ;;  %v5272_v47 = vsel %vm1874_vm3, %v11707_v27, %v14629_v57  ;;  %v11806_v27 = vld [vmem:[%s14696_s27 + $0x4] ss:$8 sps:$4 sm:$0xff]  }
0x1b59   : >> { %v11724_v28 = vpack.i.bf16 %v5275_v17, %v5272_v47  ;;  %9841 = vmatprep.mubr.msk.bf16.mxu1 %vm713_vm1, %v11806_v27  ;;  %v12625_v17 = vmov 5   ;;  %v11976_v47 = vld [vmem:[%s14239_s19 + $0x8] sm:$0xff] }
0x1b5a   : >> { %11785 = vset.pattern.permute.xlu1 %v12625_v17  ;;  %11784 = vset.pattern.permute.xlu0 %v12625_v17 }
0x1b5b   : >> { %11725 = vrot.lane.b32.xlu0 %v11724_v28, %s12622_s29  ;;  %v11977_v28 = vld [vmem:[%s14239_s19] sm:$0xff] }
0x1b61   : >> { %v11711_v40 = vpop.permute.xlu1 %11710 }
0x1b62   : >> { %v11713_v11 = vunpack.i.h.bf16 %v11711_v40  ;;  %v11712_v37 = vunpack.i.l.bf16 %v11711_v40  ;;  %v11978_v40 = vld [vmem:[%s14239_s19 + $0x10] sm:$0xff] }
0x1b64   : >> { %v5281_v54 = vsel %vm1874_vm3, %v11713_v11, %v14635_v50  ;;  %v5278_v62 = vsel %vm1874_vm3, %v11712_v37, %v14637_v63  ;;  %v11979_v11 = vld [vmem:[%s14239_s19 + $0x18] sm:$0xff]  ;;  %v11980_v37 = vld [vmem:[%s14239_s19 + $0x20] sm:$0xff] }
0x1b65   : >> { %v11729_v21 = vpack.i.bf16 %v5281_v54, %v5278_v62  ;;  %v11981_v54 = vld [vmem:[%s14239_s19 + $0x28] sm:$0xff]  ;;  %v11982_v62 = vld [vmem:[%s14239_s19 + $0x30] sm:$0xff] }
0x1b67   : >> { %11730 = vrot.lane.b32.xlu1 %v11729_v21, %s12622_s29  ;;  %v11983_v21 = vld [vmem:[%s14239_s19 + $0x38] sm:$0xff] }
0x1b69   : >> { %v11716_v56 = vpop.permute.xlu0 %11715 }
0x1b6a   : >> { %v11718_v6 = vunpack.i.h.bf16 %v11716_v56  ;;  %v11717_v31 = vunpack.i.l.bf16 %v11716_v56  ;;  %v16395_v56 = vmov 0  }
0x1b6c   : >> { %v5287_v41 = vsel %vm1874_vm3, %v11718_v6, %v14642_v36  ;;  %v5284_v53 = vsel %vm1874_vm3, %v11717_v31, %v14644_v60 }
0x1b6d   : >> { %v11734_v25 = vpack.i.bf16 %v5287_v41, %v5284_v53 }
0x1b6f   : >> { %11735 = vrot.lane.b32.xlu0 %v11734_v25, %s12622_s29 }
0x1b71   : >> { %v11721_v3 = vpop.permute.xlu1 %11720 }
0x1b72   : >> { %v11723_v1 = vunpack.i.h.bf16 %v11721_v3  ;;  %v11722_v58 = vunpack.i.l.bf16 %v11721_v3 }
0x1b74   : >> { %v5293_v8 = vsel %vm1874_vm3, %v11723_v1, %v14649_v29  ;;  %v5290_v10 = vsel %vm1874_vm3, %v11722_v58, %v14651_v34 }
0x1b75   : >> { %v11739_v44 = vpack.i.bf16 %v5293_v8, %v5290_v10 }
0x1b77   : >> { %11740 = vrot.lane.b32.xlu1 %v11739_v44, %s12622_s29 }
0x1bcd   : >> { %v11726_v18 = vpop.permute.xlu0 %11725 }
0x1bce   : >> { %v11728_v16 = vunpack.i.h.bf16 %v11726_v18  ;;  %v11727_v7 = vunpack.i.l.bf16 %v11726_v18 }
0x1bd0   : >> { %v5311_v2 = vsel %vm1874_vm3, %v11728_v16, %v14626_v30  ;;  %v5310_v43 = vsel %vm1874_vm3, %v11727_v7, %v14629_v57 }
0x1bd1   : >> { %v11744_v49 = vpack.i.bf16 %v5311_v2, %v5310_v43 }
0x1bd3   : >> { %11745 = vrot.lane.b32.xlu0 %v11744_v49, %s12623_s15 }
0x1bd9   : >> { %v11731_v55 = vpop.permute.xlu1 %11730 }
0x1bda   : >> { %v11733_v59 = vunpack.i.h.bf16 %v11731_v55  ;;  %v11732_v45 = vunpack.i.l.bf16 %v11731_v55  ;;  %v5395_v55 = vpack.c.bf16 %v14635_v50, %v14637_v63 }
0x1bdc   : >> { %v5313_v22 = vsel %vm1874_vm3, %v11733_v59, %v14635_v50  ;;  %v5312_v19 = vsel %vm1874_vm3, %v11732_v45, %v14637_v63  ;;  %v5396_v59 = vpack.c.bf16 %v14642_v36, %v14644_v60 }
0x1bdd   : >> { %v11749_v15 = vpack.i.bf16 %v5313_v22, %v5312_v19 }
0x1bdf   : >> { %11750 = vrot.lane.b32.xlu1 %v11749_v15, %s12623_s15 }
0x1be1   : >> { %v11736_v39 = vpop.permute.xlu0 %11735 }
0x1be2   : >> { %v11738_v38 = vunpack.i.h.bf16 %v11736_v39  ;;  %v11737_v42 = vunpack.i.l.bf16 %v11736_v39 }
0x1be4   : >> { %v5315_v12 = vsel %vm1874_vm3, %v11738_v38, %v14642_v36  ;;  %v5314_v61 = vsel %vm1874_vm3, %v11737_v42, %v14644_v60 }
0x1be5   : >> { %v11754_v52 = vpack.i.bf16 %v5315_v12, %v5314_v61 }
0x1be7   : >> { %11755 = vrot.lane.b32.xlu0 %v11754_v52, %s12623_s15 }
0x1be9   : >> { %v11741_v48 = vpop.permute.xlu1 %11740 }
0x1bea   : >> { %v11743_v51 = vunpack.i.h.bf16 %v11741_v48  ;;  %v11742_v4 = vunpack.i.l.bf16 %v11741_v48  ;;  %v11807_v48 = vld [vmem:[%s14696_s27 + $0x14] ss:$8 sps:$4 sm:$0xff]  }
0x1beb   : >> { %11765 = vrot.lane.b32.xlu0 %v11744_v49, %s12624_s26  ;;  %v5394_v49 = vpack.c.bf16 %v14626_v30, %v14629_v57  ;;  %v5397_v30 = vpack.c.bf16 %v14649_v29, %v14651_v34 }
0x1bec   : >> { %v5317_v32 = vsel %vm1874_vm3, %v11743_v51, %v14649_v29  ;;  %v5316_v9 = vsel %vm1874_vm3, %v11742_v4, %v14651_v34  ;;  %v11809_v51 = vld [vmem:[%s14696_s27 + $0x10] ss:$8 sps:$4 sm:$0xff]   ;;  %v11810_v4 = vld [vmem:[%s14696_s27 + $0x24] ss:$8 sps:$4 sm:$0xff]  }
0x1bed   : >> { %v11759_v33 = vpack.i.bf16 %v5317_v32, %v5316_v9  ;;  %v11812_v32 = vld [vmem:[%s14696_s27 + $0x20] ss:$8 sps:$4 sm:$0xff]   ;;  %v11813_v9 = vld [vmem:[%s14696_s27 + $0x34] ss:$8 sps:$4 sm:$0xff]  }
0x1bef   : >> { %11775 = vrot.lane.b32.xlu0 %v11754_v52, %s12624_s26  ;;  %11760 = vrot.lane.b32.xlu1 %v11759_v33, %s12623_s15  ;;  %v11804_v52 = vld [vmem:[%s14696_s27] ss:$8 sps:$4 sm:$0xff]   ;;  %s14886_s15 = scalar_lea.vmem %s16235_s6, %s14232_s22 }
0x1bf3   : >> { %11770 = vrot.lane.b32.xlu1 %v11749_v15, %s12624_s26  ;;  %5403 = vperm.xlu0 %11784, %v11977_v28  }
0x1bf7   : >> { %11780 = vrot.lane.b32.xlu1 %v11759_v33, %s12624_s26  ;;  %5415 = vperm.xlu0 %11784, %v11979_v11   ;;  %v11815_v33 = vld [vmem:[%s14696_s27 + $0x30] ss:$8 sps:$4 sm:$0xff]   ;;  %s15049_s27 = scalar_lea.vmem %s16239_s10, %s14307_s21 }
0x1bfb   : >> { %5407 = vperm.xlu1 %11785, %v11976_v47   ;;  %5423 = vperm.xlu0 %11784, %v11981_v54  }
0x1bff   : >> { %5411 = vperm.xlu1 %11785, %v11978_v40   ;;  %5431 = vperm.xlu0 %11784, %v11983_v21  }
0x1c03   : >> { %5419 = vperm.xlu1 %11785, %v11980_v37   ;;  %11787 = vset.pattern.permute.xlu0 %v16395_v56 }
0x1c07   : >> { %5427 = vperm.xlu1 %11785, %v11982_v62  }
0x1c0b   : >> { %11786 = vset.pattern.permute.xlu1 %v16395_v56 }
0x1c45   : >> { %v11746_v6 = vpop.permute.xlu0 %11745 }
0x1c46   : >> { %v11748_v31 = vunpack.i.h.bf16 %v11746_v6  ;;  %v11747_v41 = vunpack.i.l.bf16 %v11746_v6 }
0x1c48   : >> { %v9804_v53 = vpack.c.bf16 %v11748_v31, %v11747_v41 }
0x1c4a   : >> { %9805 = vmatpush1.bf16.msk.msra.mxu1 %vm13473_vm5, %v9804_v53 }
0x1c4b   : >> { %5484 = vmatprep.subr.bf16.mxu1 %v16395_v56 }
0x1c51   : >> { %v11751_v25 = vpop.permute.xlu1 %11750 }
0x1c52   : >> { %v11753_v3 = vunpack.i.h.bf16 %v11751_v25  ;;  %v11752_v1 = vunpack.i.l.bf16 %v11751_v25 }
0x1c54   : >> { %v9809_v58 = vpack.c.bf16 %v11753_v3, %v11752_v1 }
0x1c56   : >> { %9810 = vmatpush1.bf16.msk.msra.mxu1 %vm13473_vm5, %v9809_v58 }
0x1c57   : >> { %5486 = vmatprep.subr.bf16.mxu1 %v16395_v56 }
0x1c59   : >> { %v11756_v8 = vpop.permute.xlu0 %11755 }
0x1c5a   : >> { %v11758_v10 = vunpack.i.h.bf16 %v11756_v8  ;;  %v11757_v44 = vunpack.i.l.bf16 %v11756_v8 }
0x1c5c   : >> { %v9814_v18 = vpack.c.bf16 %v11758_v10, %v11757_v44 }
0x1c5d   : >> { %v11766_v45 = vpop.permute.xlu0 %11765 }
0x1c5e   : >> { %9815 = vmatpush1.bf16.msk.msra.mxu1 %vm13473_vm5, %v9814_v18  ;;  %v11768_v22 = vunpack.i.h.bf16 %v11766_v45  ;;  %v11767_v19 = vunpack.i.l.bf16 %v11766_v45 }
0x1c5f   : >> { %5488 = vmatprep.subr.bf16.mxu1 %v16395_v56 }
0x1c60   : >> { %v9824_v50 = vpack.c.bf16 %v11768_v22, %v11767_v19 }
0x1c61   : >> { %v11761_v16 = vpop.permute.xlu1 %11760  ;;  %v11776_v39 = vpop.permute.xlu0 %11775 }
0x1c62   : >> { %v11763_v7 = vunpack.i.h.bf16 %v11761_v16  ;;  %v11762_v2 = vunpack.i.l.bf16 %v11761_v16  ;;  %v11778_v36 = vunpack.i.h.bf16 %v11776_v39  ;;  %v11777_v60 = vunpack.i.l.bf16 %v11776_v39 }
0x1c64   : >> { %v9819_v43 = vpack.c.bf16 %v11763_v7, %v11762_v2  ;;  %v9834_v34 = vpack.c.bf16 %v11778_v36, %v11777_v60 }
0x1c65   : >> { %v11771_v57 = vpop.permute.xlu1 %11770 }
0x1c66   : >> { %9820 = vmatpush1.bf16.msk.msra.mxu1 %vm13473_vm5, %v9819_v43  ;;  %v11773_v63 = vunpack.i.h.bf16 %v11771_v57  ;;  %v11772_v15 = vunpack.i.l.bf16 %v11771_v57 }
0x1c67   : >> { %5490 = vmatprep.subr.bf16.mxu1 %v16395_v56 }
0x1c68   : >> { %v9829_v38 = vpack.c.bf16 %v11773_v63, %v11772_v15 }
0x1c69   : >> { %v11781_v29 = vpop.permute.xlu1 %11780 }
0x1c6a   : >> { %5491 = vmatpush1.bf16.msra.mxu1 %v5394_v49  ;;  %v11783_v42 = vunpack.i.h.bf16 %v11781_v29  ;;  %v11782_v12 = vunpack.i.l.bf16 %v11781_v29 }
0x1c6b   : >> { %5492 = vmatprep.subr.bf16.mxu1 %v16395_v56 }
0x1c6c   : >> { %v9839_v61 = vpack.c.bf16 %v11783_v42, %v11782_v12 }
0x1c6e   : >> { %5493 = vmatpush1.bf16.msra.mxu1 %v5395_v55 }
0x1c6f   : >> { %5494 = vmatprep.subr.bf16.mxu1 %v16395_v56 }
0x1c72   : >> { %5495 = vmatpush1.bf16.msra.mxu1 %v5396_v59  ;;  %v5404_v27 = vpop.permute.xlu0 %5403 }
0x1c73   : >> { %5496 = vmatprep.subr.bf16.mxu1 %v16395_v56 }
0x1c76   : >> { %5497 = vmatpush1.bf16.msra.mxu1 %v5397_v30  ;;  %v5416_v1 = vpop.permute.xlu0 %5415 }
0x1c77   : >> { %5498 = vmatprep.subr.bf16.mxu1 %v16395_v56 }
0x1c7a   : >> { %9825 = vmatpush1.bf16.msk.msra.mxu1 %vm13501_vm7, %v9824_v50  ;;  %v5408_v40 = vpop.permute.xlu1 %5407  ;;  %v5424_v22 = vpop.permute.xlu0 %5423 }
0x1c7b   : >> { %5500 = vmatprep.subr.bf16.mxu1 %v16395_v56 }
0x1c7e   : >> { %9830 = vmatpush1.bf16.msk.msra.mxu1 %vm13501_vm7, %v9829_v38  ;;  %v5412_v53 = vpop.permute.xlu1 %5411  ;;  %v5432_v12 = vpop.permute.xlu0 %5431 }
0x1c7f   : >> { %5502 = vmatprep.subr.bf16.mxu1 %v16395_v56 }
0x1c82   : >> { %9835 = vmatpush1.bf16.msk.msra.mxu1 %vm13501_vm7, %v9834_v34  ;;  %v5420_v43 = vpop.permute.xlu1 %5419 }
0x1c83   : >> { %5504 = vmatprep.subr.bf16.mxu1 %v16395_v56 }
0x1c86   : >> { %9840 = vmatpush1.bf16.msk.msra.mxu1 %vm13501_vm7, %v9839_v61  ;;  %v5428_v60 = vpop.permute.xlu1 %5427 }
0x1c89   : >> { %5515 = vmatmul.mubr.bf16.vlgmr.msra.gmra.mrb[16].mxu1 %v11804_v52 }
0x1c8a   : >> { %9842 = vmatprep.mubr.msk.bf16.mxu1 %vm713_vm1, %v11807_v48 }
0x1c91   : >> { %5523 = vmatmul.mubr.bf16.gmra.mrb[20].mxu1 %v11809_v51 }
0x1c92   : >> { %9843 = vmatprep.mubr.msk.bf16.mxu1 %vm713_vm1, %v11810_v4 }
0x1c99   : >> { %5531 = vmatmul.mubr.bf16.gmra.mrb[24].mxu1 %v11812_v32 }
0x1c9a   : >> { %9844 = vmatprep.mubr.msk.bf16.mxu1 %vm713_vm1, %v11813_v9 }
0x1ca1   : >> { %5539 = vmatmul.mubr.bf16.gmra.mrb[28].mxu1 %v11815_v33 }
0x1d5c   : >> { %v5516_v17 = vpop.f32.mrb[16].mxu1 }
0x1d5d   : >> { %v5517_v47 = vadd.f32 %v5516_v17, %v5404_v27  ;;  %v5518_v28 = vpop.f32.mrb[17].mxu1 }
0x1d5e   : >> { %v5519_v11 = vpop.f32.mrb[18].mxu1 }
0x1d5f   : >> { %v14756_v37 = vadd.f32 %v12557_v24, %v5517_v47  ;;  %v5520_v54 = vadd.f32 %v5519_v11, %v5408_v40  ;;  %v5521_v62 = vpop.f32.mrb[19].mxu1 }
0x1d61   : >> { %v14759_v21 = vadd.f32 %v12553_v23, %v5520_v54  ;;  %v5564_v6 = vsel %vm647_vm0, %v14756_v37, 0.0  ;;  %v5588_v41 = vmul.f32 %v14756_v37, %v14756_v37 }
0x1d62   : >> { %5565 = vadd.xlane.f32.xlu1 %v5564_v6 }
0x1d63   : >> { %v5567_v31 = vsel %vm647_vm0, %v14759_v21, 0.0  ;;  %v5596_v44 = vsel %vm647_vm0, %v5588_v41, 0.0  ;;  %v5589_v18 = vmul.f32 %v14759_v21, %v14759_v21 }
0x1d64   : >> { %v5524_v25 = vpop.f32.mrb[20].mxu1  ;;  %5568 = vadd.xlane.f32.xlu0 %v5567_v31 }
0x1d65   : >> { %v5525_v24 = vadd.f32 %v5524_v25, %v5412_v53  ;;  %v5526_v3 = vpop.f32.mrb[21].mxu1 }
0x1d66   : >> { %v5527_v58 = vpop.f32.mrb[22].mxu1 }
0x1d67   : >> { %v14768_v23 = vadd.f32 %v12549_v26, %v5525_v24  ;;  %v5528_v8 = vadd.f32 %v5527_v58, %v5416_v1  ;;  %v5529_v10 = vpop.f32.mrb[23].mxu1  ;;  %v5599_v26 = vsel %vm647_vm0, %v5589_v18, 0.0 }
0x1d68   : >> { %5597 = vadd.xlane.f32.xlu0 %v5596_v44 }
0x1d69   : >> { %v5570_v16 = vsel %vm647_vm0, %v14768_v23, 0.0  ;;  %v5590_v7 = vmul.f32 %v14768_v23, %v14768_v23  ;;  %v14778_v2 = vadd.f32 %v12545_v20, %v5528_v8 }
0x1d6a   : >> { %5571 = vadd.xlane.f32.xlu1 %v5570_v16 }
0x1d6b   : >> { %v5602_v45 = vsel %vm647_vm0, %v5590_v7, 0.0  ;;  %v5573_v20 = vsel %vm647_vm0, %v14778_v2, 0.0  ;;  %v5591_v63 = vmul.f32 %v14778_v2, %v14778_v2 }
0x1d6c   : >> { %v5532_v49 = vpop.f32.mrb[24].mxu1  ;;  %5600 = vadd.xlane.f32.xlu0 %v5599_v26 }
0x1d6d   : >> { %v5533_v55 = vadd.f32 %v5532_v49, %v5420_v43  ;;  %v5534_v59 = vpop.f32.mrb[25].mxu1 }
0x1d6e   : >> { %v5535_v19 = vpop.f32.mrb[26].mxu1  ;;  %5603 = vadd.xlane.f32.xlu1 %v5602_v45 }
0x1d6f   : >> { %v14783_v30 = vadd.f32 %v12541_v0, %v5533_v55  ;;  %v5536_v57 = vadd.f32 %v5535_v19, %v5424_v22  ;;  %v5537_v50 = vpop.f32.mrb[27].mxu1  ;;  %v5605_v0 = vsel %vm647_vm0, %v5591_v63, 0.0  ;;  %v16399_v63 = vld [vmem:[#allocation7_spill] sm:$0xff] }
0x1d70   : >> { %5574 = vadd.xlane.f32.xlu0 %v5573_v20  ;;  %v16397_v50 = vld [vmem:[#allocation5_spill] sm:$0xff]  ;;  %v16398_v20 = vld [vmem:[#allocation6_spill] sm:$0xff] }
0x1d71   : >> { %v5576_v15 = vsel %vm647_vm0, %v14783_v30, 0.0  ;;  %v5592_v39 = vmul.f32 %v14783_v30, %v14783_v30  ;;  %v14794_v36 = vadd.f32 %v12537_v13, %v5536_v57  ;;  %v16396_v57 = vld [vmem:[#allocation4_spill] sm:$0xff] }
0x1d72   : >> { %5577 = vadd.xlane.f32.xlu1 %v5576_v15  ;;  %v16400_v15 = vld [vmem:[#allocation8_spill] sm:$0xff] }
0x1d73   : >> { %v5608_v42 = vsel %vm647_vm0, %v5592_v39, 0.0  ;;  %v5579_v13 = vsel %vm647_vm0, %v14794_v36, 0.0  ;;  %v5593_v4 = vmul.f32 %v14794_v36, %v14794_v36  ;;  %v16401_v39 = vld [vmem:[#allocation9_spill] sm:$0xff] }
0x1d74   : >> { %v5540_v38 = vpop.f32.mrb[28].mxu1  ;;  %5606 = vadd.xlane.f32.xlu0 %v5605_v0  ;;  %v16402_v0 = vld [vmem:[#allocation10_spill] sm:$0xff] }
0x1d75   : >> { %v5541_v29 = vadd.f32 %v5540_v38, %v5428_v60  ;;  %v5542_v34 = vpop.f32.mrb[29].mxu1 }
0x1d76   : >> { %v5543_v61 = vpop.f32.mrb[30].mxu1  ;;  %5609 = vadd.xlane.f32.xlu1 %v5608_v42 }
0x1d77   : >> { %v14799_v52 = vadd.f32 %v12533_v5, %v5541_v29  ;;  %v5544_v48 = vadd.f32 %v5543_v61, %v5432_v12  ;;  %v5545_v51 = vpop.f32.mrb[31].mxu1  ;;  %v5611_v5 = vsel %vm647_vm0, %v5593_v4, 0.0 }
0x1d78   : >> { %5580 = vadd.xlane.f32.xlu0 %v5579_v13 }
0x1d79   : >> { %v5582_v32 = vsel %vm647_vm0, %v14799_v52, 0.0  ;;  %v5594_v9 = vmul.f32 %v14799_v52, %v14799_v52  ;;  %v14810_v33 = vadd.f32 %v12529_v46, %v5544_v48 }
0x1d7a   : >> { %5583 = vadd.xlane.f32.xlu1 %v5582_v32 }
0x1d7b   : >> { %v5614_v27 = vsel %vm647_vm0, %v5594_v9, 0.0  ;;  %v5585_v17 = vsel %vm647_vm0, %v14810_v33, 0.0  ;;  %v5595_v47 = vmul.f32 %v14810_v33, %v14810_v33 }
0x1d7c   : >> { %5612 = vadd.xlane.f32.xlu0 %v5611_v5 }
0x1d7d   : >> { %v5617_v28 = vsel %vm647_vm0, %v5595_v47, 0.0  ;;  %v14891_v47 = vld [vmem:[%s14886_s15] sm:$0xff] }
0x1d7e   : >> { %5615 = vadd.xlane.f32.xlu1 %v5614_v27 }
0x1d80   : >> { %5586 = vadd.xlane.f32.xlu0 %v5585_v17 }
0x1d84   : >> { %5618 = vadd.xlane.f32.xlu0 %v5617_v28  ;;  %v14896_v28 = vld [vmem:[%s14886_s15 + $0x8] sm:$0xff] }
0x1def   : >> { %v5566_v11 = vpop.xlane.xlu1 %5565 }
0x1df1   : >> { %v5569_v40 = vpop.xlane.xlu0 %5568 }
0x1df5   : >> { %v5598_v46 = vpop.xlane.xlu0 %5597 }
0x1df6   : >> { %v5620_v6 = vsel %vm704_vm2, %v5566_v11, %v5598_v46  ;;  %v14908_v11 = vld [vmem:[%s14886_s15 + $0x10] sm:$0xff]  ;;  %v14911_v46 = vld [vmem:[%s14886_s15 + $0x18] sm:$0xff] }
0x1df7   : >> { %v5572_v54 = vpop.xlane.xlu1 %5571 }
0x1df9   : >> { %v5601_v62 = vpop.xlane.xlu0 %5600 }
0x1dfa   : >> { %v5621_v31 = vsel %vm704_vm2, %v5569_v40, %v5601_v62  ;;  %v16403_v40 = vmov 1   ;;  %v14925_v62 = vld [vmem:[%s14886_s15 + $0x20] sm:$0xff] }
0x1dfb   : >> { %v10990_v41 = vpack.c.bf16 %v5621_v31, %v5620_v6  ;;  %v5604_v53 = vpop.xlane.xlu1 %5603  ;;  %v14932_v6 = vld [vmem:[%s14886_s15 + $0x30] sm:$0xff] }
0x1dfc   : >> { %v5622_v1 = vsel %vm704_vm2, %v5572_v54, %v5604_v53  ;;  %v14916_v54 = vld [vmem:[%s14886_s15 + $0x28] sm:$0xff] }
0x1dfd   : >> { %v5575_v25 = vpop.xlane.xlu0 %5574  ;;  %10991 = vmatprep.subr.bf16.mxu0 %v10990_v41 }
0x1dfe   : >> { %10993 = vmatpush3.bf16.msra.mxu0 %v10990_v41 }
0x1dff   : >> { %v5578_v24 = vpop.xlane.xlu1 %5577 }
0x1e01   : >> { %v5607_v3 = vpop.xlane.xlu0 %5606 }
0x1e02   : >> { %v5623_v58 = vsel %vm704_vm2, %v5575_v25, %v5607_v3 }
0x1e03   : >> { %v10994_v8 = vpack.c.bf16 %v5623_v58, %v5622_v1  ;;  %v5610_v10 = vpop.xlane.xlu1 %5609 }
0x1e04   : >> { %v5624_v7 = vsel %vm704_vm2, %v5578_v24, %v5610_v10 }
0x1e05   : >> { %v5581_v44 = vpop.xlane.xlu0 %5580  ;;  %10995 = vmatprep.subr.bf16.mxu0 %v10994_v8 }
0x1e06   : >> { %10997 = vmatpush3.bf16.msra.mxu0 %v10994_v8 }
0x1e07   : >> { %v5584_v18 = vpop.xlane.xlu1 %5583 }
0x1e09   : >> { %v5613_v16 = vpop.xlane.xlu0 %5612 }
0x1e0a   : >> { %v5625_v26 = vsel %vm704_vm2, %v5581_v44, %v5613_v16 }
0x1e0b   : >> { %v10998_v43 = vpack.c.bf16 %v5625_v26, %v5624_v7  ;;  %v5616_v55 = vpop.xlane.xlu1 %5615 }
0x1e0c   : >> { %v5626_v45 = vsel %vm704_vm2, %v5584_v18, %v5616_v55 }
0x1e0d   : >> { %v5587_v49 = vpop.xlane.xlu0 %5586  ;;  %10999 = vmatprep.subr.bf16.mxu0 %v10998_v43 }
0x1e0e   : >> { %11001 = vmatpush3.bf16.msra.mxu0 %v10998_v43 }
0x1e11   : >> { %v5619_v59 = vpop.xlane.xlu0 %5618 }
0x1e12   : >> { %v5627_v22 = vsel %vm704_vm2, %v5587_v49, %v5619_v59 }
0x1e13   : >> { %v11002_v19 = vpack.c.bf16 %v5627_v22, %v5626_v45 }
0x1e15   : >> { %11003 = vmatprep.subr.bf16.mxu0 %v11002_v19 }
0x1e16   : >> { %11005 = vmatpush3.bf16.msra.mxu0 %v11002_v19 }
0x1e19   : >> { %10703 = vmatmul.mubr.msk.f32.vlgmr.msra.gmra.mrb[8].mxu0 %vm713_vm1, %v16396_v57 }
0x1e1a   : >> { %10705 = vmatprep.mubr.msk.f32.mxu0 %vm713_vm1, %v16397_v50 }
0x1e1d   : >> { %10706 = vmatmul.mubr.msk.f32.gmra.mrb[10].mxu0 %vm713_vm1, %v16398_v20 }
0x1e1e   : >> { %10708 = vmatprep.mubr.msk.f32.mxu0 %vm713_vm1, %v16399_v63 }
0x1e21   : >> { %10709 = vmatmul.mubr.msk.f32.gmra.mrb[12].mxu0 %vm713_vm1, %v16400_v15 }
0x1e22   : >> { %10711 = vmatprep.mubr.msk.f32.mxu0 %vm713_vm1, %v16401_v39 }
0x1e25   : >> { %10712 = vmatmul.mubr.msk.f32.gmra.mrb[14].mxu0 %vm713_vm1, %v16402_v0 }
0x1eec   : >> { %v14841_v60 = vpop.f32.mrb[8].mxu0 }
0x1eed   : >> { %v5734_v38 = vmul.f32 %v14841_v60, %v14841_v60  ;;  %v14845_v29 = vpop.f32.mrb[9].mxu0 }
0x1eee   : >> { %v5733_v34 = vmul.f32 %v14845_v29, %v14845_v29 }
0x1eef   : >> { %5751 = vrot.lane.b32.xlu0 %v5734_v38, %s12617_s30 }
0x1ef0   : >> { %5749 = vrot.lane.b32.xlu1 %v5733_v34, %s12617_s30  ;;  %v14851_v42 = vpop.f32.mrb[10].mxu0  ;;  %v14947_v34 = vld [vmem:[%s14886_s15 + $0x38] sm:$0xff]  ;;  %s15168_s15 = scalar_lea.vmem %s16238_s9, %s14307_s21 }
0x1ef1   : >> { %v5736_v12 = vmul.f32 %v14851_v42, %v14851_v42  ;;  %v14855_v61 = vpop.f32.mrb[11].mxu0 }
0x1ef2   : >> { %v5735_v4 = vmul.f32 %v14855_v61, %v14855_v61 }
0x1ef4   : >> { %5755 = vrot.lane.b32.xlu1 %v5736_v12, %s12617_s30  ;;  %v14858_v48 = vpop.f32.mrb[12].mxu0 }
0x1ef5   : >> { %v5738_v51 = vmul.f32 %v14858_v48, %v14858_v48  ;;  %v14862_v13 = vpop.f32.mrb[13].mxu0 }
0x1ef6   : >> { %v5737_v32 = vmul.f32 %v14862_v13, %v14862_v13 }
0x1ef7   : >> { %5759 = vrot.lane.b32.xlu0 %v5738_v51, %s12617_s30 }
0x1ef8   : >> { %5753 = vrot.lane.b32.xlu1 %v5735_v4, %s12617_s30  ;;  %v14870_v9 = vpop.f32.mrb[14].mxu0 }
0x1ef9   : >> { %v5740_v5 = vmul.f32 %v14870_v9, %v14870_v9  ;;  %v14874_v27 = vpop.f32.mrb[15].mxu0 }
0x1efa   : >> { %v5739_v17 = vmul.f32 %v14874_v27, %v14874_v27 }
0x1efb   : >> { %5763 = vrot.lane.b32.xlu0 %v5740_v5, %s12617_s30 }
0x1efc   : >> { %5757 = vrot.lane.b32.xlu1 %v5737_v32, %s12617_s30 }
0x1eff   : >> { %5788 = vperm.xlu0 %11787, %v14841_v60  }
0x1f00   : >> { %5761 = vrot.lane.b32.xlu1 %v5739_v17, %s12617_s30  ;;  %s6008_s30 = smul.u32 192, %s12561_s25  ;;  %s4018_s25 = sadd.s32 1, %s12561_s25  }
0x1f01   : >> { %p4015_p5 = scmp.ge.s32.totalorder %s4018_s25, 5  }
0x1f02   : >> { %s14952_s23 = scalar_lea.vmem %s16237_s8, %s6008_s30  ;;  %s15221_s21 = smov (%p4015_p5), 5  }
0x1f03   : >> { %5793 = vperm.xlu0 %11787, %v14855_v61   ;;  %v6016_v12 = vld [vmem:[%s14952_s23 + $0x30] sm:$0xff]  ;;  %v6018_v4 = vld [vmem:[%s14952_s23 + $0x40] sm:$0xff]  ;;  %v6011_v17 = vld [vmem:[%s14952_s23 + $0x8] sm:$0xff] }
0x1f04   : >> { %5783 = vperm.xlu1 %11786, %v14845_v29   ;;  %v6028_v51 = vld [vmem:[%s14952_s23 + $0x90] sm:$0xff] }
0x1f05   : >> { %v6024_v32 = vld [vmem:[%s14952_s23 + $0x70] sm:$0xff] }
0x1f07   : >> { %5895 = vperm.xlu0 %11787, %v14891_v47  }
0x1f08   : >> { %5798 = vperm.xlu1 %11786, %v14851_v42  }
0x1f0b   : >> { %5808 = vperm.xlu0 %11787, %v14858_v48  }
0x1f0c   : >> { %5900 = vperm.xlu1 %11786, %v14896_v28  }
0x1f0f   : >> { %5818 = vperm.xlu0 %11787, %v14870_v9  }
0x1f10   : >> { %11788 = vset.pattern.permute.xlu1 %v16403_v40 }
0x1f11   : >> { %5942 = vperm.xlu1 %11788, %v14891_v47  }
0x1f13   : >> { %11792 = vset.pattern.permute.xlu0 %v16403_v40 }
0x1f14   : >> { %5946 = vperm.xlu0 %11792, %v14896_v28  }
0x1f15   : >> { %11789 = vset.pattern.permute.xlu1 %v16395_v56 }
0x1f16   : >> { %5803 = vperm.xlu1 %11789, %v14862_v13  }
0x1f18   : >> { %5954 = vperm.xlu0 %11792, %v14911_v46  }
0x1f1a   : >> { %5905 = vperm.xlu1 %11789, %v14908_v11  }
0x1f1c   : >> { %5962 = vperm.xlu0 %11792, %v14916_v54  }
0x1f1e   : >> { %5910 = vperm.xlu1 %11789, %v14911_v46  }
0x1f22   : >> { %11790 = vset.pattern.permute.xlu1 %v16403_v40 }
0x1f23   : >> { %5950 = vperm.xlu1 %11790, %v14908_v11  }
0x1f27   : >> { %11791 = vset.pattern.permute.xlu1 %v16395_v56 }
0x1f28   : >> { %5813 = vperm.xlu1 %11791, %v14874_v27  }
0x1f2c   : >> { %5915 = vperm.xlu1 %11791, %v14925_v62  }
0x1f30   : >> { %5920 = vperm.xlu1 %11791, %v14916_v54  }
0x1f34   : >> { %11793 = vset.pattern.permute.xlu1 %v16403_v40 }
0x1f35   : >> { %5958 = vperm.xlu1 %11793, %v14925_v62  }
0x1f39   : >> { %11794 = vset.pattern.permute.xlu1 %v16395_v56 }
0x1f3a   : >> { %5925 = vperm.xlu1 %11794, %v14932_v6  }
0x1f3e   : >> { %11795 = vset.pattern.permute.xlu1 %v16403_v40 }
0x1f61   : >> { %v5752_v31 = vpop.permute.xlu0 %5751 }
0x1f62   : >> { %v5774_v41 = vsub.f32 %v14841_v60, %v5752_v31  ;;  %v5750_v53 = vpop.permute.xlu1 %5749  ;;  %v6017_v31 = vld [vmem:[%s14952_s23 + $0x38] sm:$0xff] }
0x1f63   : >> { %v5773_v25 = vsub.f32 %v14845_v29, %v5750_v53 }
0x1f64   : >> { %v5830_v24 = vadd.f32 1e-05, %v5774_v41  ;;  %v6023_v41 = vld [vmem:[%s14952_s23 + $0x68] sm:$0xff] }
0x1f65   : >> { %v5829_v3 = vadd.f32 1e-05, %v5773_v25  ;;  %v6029_v25 = vld [vmem:[%s14952_s23 + $0x98] sm:$0xff] }
0x1f66   : >> { %11928 = vrsqrt.f32 %v5830_v24  ;;  %v5756_v1 = vpop.permute.xlu1 %5755 }
0x1f67   : >> { %v5776_v58 = vsub.f32 %v14851_v42, %v5756_v1  ;;  %11930 = vrsqrt.f32 %v5829_v3  ;;  %v6010_v42 = vld [vmem:[%s14952_s23] sm:$0xff]  ;;  %v6013_v3 = vld [vmem:[%s14952_s23 + $0x18] sm:$0xff] }
0x1f69   : >> { %v5760_v8 = vpop.permute.xlu0 %5759  ;;  %v5832_v10 = vadd.f32 1e-05, %v5776_v58  ;;  %v6019_v58 = vld [vmem:[%s14952_s23 + $0x48] sm:$0xff] }
0x1f6a   : >> { %v5778_v44 = vsub.f32 %v14858_v48, %v5760_v8  ;;  %v5754_v18 = vpop.permute.xlu1 %5753  ;;  %v6022_v48 = vld [vmem:[%s14952_s23 + $0x60] sm:$0xff] }
0x1f6b   : >> { %v5775_v16 = vsub.f32 %v14855_v61, %v5754_v18  ;;  %11932 = vrsqrt.f32 %v5832_v10  ;;  %v11816_v61 = vld [vmem:[%s14191_s28] sm:$0xff]   ;;  %v6025_v10 = vld [vmem:[%s14952_s23 + $0x78] sm:$0xff] }
0x1f6c   : >> { %v5834_v43 = vadd.f32 1e-05, %v5778_v44  ;;  %10722 = vmatprep.mubr.msk.bf16.mxu0 %vm713_vm1, %v11816_v61 }
0x1f6d   : >> { %v5831_v7 = vadd.f32 1e-05, %v5775_v16  ;;  %v5764_v26 = vpop.permute.xlu0 %5763  ;;  %v6031_v16 = vld [vmem:[%s14952_s23 + $0xa8] sm:$0xff] }
0x1f6e   : >> { %v5780_v49 = vsub.f32 %v14870_v9, %v5764_v26  ;;  %v5758_v55 = vpop.permute.xlu1 %5757  ;;  %v6030_v9 = vld [vmem:[%s14952_s23 + $0xa0] sm:$0xff] }
0x1f6f   : >> { %11934 = vrsqrt.f32 %v5831_v7  ;;  %v5777_v59 = vsub.f32 %v14862_v13, %v5758_v55  ;;  %v6012_v13 = vld [vmem:[%s14952_s23 + $0x10] sm:$0xff] }
0x1f70   : >> { %v11929_v45 = vpop.eup %11928  ;;  %11936 = vrsqrt.f32 %v5834_v43  ;;  %v5836_v19 = vadd.f32 1e-05, %v5780_v49 }
0x1f71   : >> { %v5833_v22 = vadd.f32 1e-05, %v5777_v59  ;;  %5852 = vperm.xlu1 %11795, %v11929_v45   ;;  %v11931_v20 = vpop.eup %11930 }
0x1f72   : >> { %v5762_v57 = vpop.permute.xlu1 %5761 }
0x1f73   : >> { %11938 = vrsqrt.f32 %v5833_v22  ;;  %v5779_v50 = vsub.f32 %v14874_v27, %v5762_v57 }
0x1f74   : >> { %11940 = vrsqrt.f32 %v5836_v19 }
0x1f75   : >> { %v5835_v63 = vadd.f32 1e-05, %v5779_v50  ;;  %5847 = vperm.xlu1 %11795, %v11931_v20   ;;  %v11933_v15 = vpop.eup %11932 }
0x1f77   : >> { %11942 = vrsqrt.f32 %v5835_v63 }
0x1f79   : >> { %v11935_v39 = vpop.eup %11934  ;;  %5862 = vperm.xlu1 %11795, %v11933_v15  }
0x1f7a   : >> { %5857 = vperm.xlu0 %11792, %v11935_v39   ;;  %v11937_v0 = vpop.eup %11936 }
0x1f7d   : >> { %v11939_v60 = vpop.eup %11938  ;;  %5872 = vperm.xlu1 %11795, %v11937_v0  }
0x1f7e   : >> { %5867 = vperm.xlu0 %11792, %v11939_v60   ;;  %v11941_v38 = vpop.eup %11940  ;;  %v5789_v8 = vpop.permute.xlu0 %5788 }
0x1f7f   : >> { %v5822_v57 = vsub.f32 %v14759_v21, %v5789_v8 }
0x1f81   : >> { %v11943_v29 = vpop.eup %11942  ;;  %5882 = vperm.xlu1 %11795, %v11941_v38  }
0x1f82   : >> { %5877 = vperm.xlu0 %11792, %v11943_v29   ;;  %v5794_v18 = vpop.permute.xlu0 %5793 }
0x1f85   : >> { %5966 = vperm.xlu1 %11795, %v14932_v6  }
0x1f86   : >> { %11796 = vset.pattern.permute.xlu0 %v16395_v56  ;;  %v5896_v26 = vpop.permute.xlu0 %5895 }
0x1f87   : >> { %5930 = vperm.xlu0 %11796, %v14947_v34  }
0x1f89   : >> { %5970 = vperm.xlu1 %11795, %v14947_v34  }
0x1f8a   : >> { %v5809_v49 = vpop.permute.xlu0 %5808 }
0x1f8b   : >> { %6040 = vperm.xlu0 %11796, %v6010_v42  }
0x1f8d   : >> { %11797 = vset.pattern.permute.xlu1 %v16395_v56  ;;  %v5784_v56 = vpop.permute.xlu1 %5783 }
0x1f8e   : >> { %6045 = vperm.xlu1 %11797, %v6011_v17   ;;  %v5819_v45 = vpop.permute.xlu0 %5818  ;;  %v5821_v15 = vsub.f32 %v14756_v37, %v5784_v56 }
0x1f8f   : >> { %6070 = vperm.xlu0 %11796, %v6016_v12   ;;  %v5823_v12 = vsub.f32 %v14768_v23, %v5794_v18 }
0x1f91   : >> { %v5799_v5 = vpop.permute.xlu1 %5798 }
0x1f92   : >> { %6075 = vperm.xlu1 %11797, %v6017_v31   ;;  %v5824_v29 = vsub.f32 %v14778_v2, %v5799_v5 }
0x1f93   : >> { %6100 = vperm.xlu0 %11796, %v6022_v48   ;;  %v5947_v22 = vpop.permute.xlu0 %5946 }
0x1f95   : >> { %v5901_v27 = vpop.permute.xlu1 %5900 }
0x1f96   : >> { %6105 = vperm.xlu1 %11797, %v6023_v41  }
0x1f97   : >> { %6130 = vperm.xlu0 %11796, %v6028_v51   ;;  %v5955_v50 = vpop.permute.xlu0 %5954 }
0x1f99   : >> { %v5943_v40 = vpop.permute.xlu1 %5942 }
0x1f9a   : >> { %6135 = vperm.xlu1 %11797, %v6029_v25  }
0x1f9b   : >> { %6050 = vperm.xlu0 %11796, %v6012_v13   ;;  %v5963_v0 = vpop.permute.xlu0 %5962 }
0x1f9d   : >> { %v5804_v53 = vpop.permute.xlu1 %5803 }
0x1f9e   : >> { %6055 = vperm.xlu1 %11797, %v6013_v3   ;;  %v5825_v56 = vsub.f32 %v14783_v30, %v5804_v53  ;;  %v5828_v53 = vsub.f32 %v14810_v33, %v5819_v45  ;;  %v11817_v45 = vld [vmem:[%s14191_s28 + $0x8] sm:$0xff]  }
0x1f9f   : >> { %6080 = vperm.xlu0 %11796, %v6018_v4  }
0x1fa1   : >> { %v5906_v24 = vpop.permute.xlu1 %5905 }
0x1fa2   : >> { %6085 = vperm.xlu1 %11797, %v6019_v58  }
0x1fa3   : >> { %6110 = vperm.xlu0 %11796, %v6024_v32  }
0x1fa5   : >> { %v5911_v1 = vpop.permute.xlu1 %5910 }
0x1fa6   : >> { %6115 = vperm.xlu1 %11797, %v6025_v10  }
0x1fa7   : >> { %6140 = vperm.xlu0 %11796, %v6030_v9   ;;  %v5826_v9 = vsub.f32 %v14794_v36, %v5809_v49 }
0x1fa9   : >> { %v5951_v44 = vpop.permute.xlu1 %5950 }
0x1faa   : >> { %6145 = vperm.xlu1 %11797, %v6031_v16  }
0x1fad   : >> { %v5814_v7 = vpop.permute.xlu1 %5813 }
0x1fb1   : >> { %v5916_v43 = vpop.permute.xlu1 %5915 }
0x1fb5   : >> { %v5921_v55 = vpop.permute.xlu1 %5920 }
0x1fb9   : >> { %v5959_v59 = vpop.permute.xlu1 %5958 }
0x1fbd   : >> { %v5926_v19 = vpop.permute.xlu1 %5925 }
0x1ff0   : >> { %v5853_v20 = vpop.permute.xlu1 %5852 }
0x1ff1   : >> { %v5886_v63 = vmul.f32 %v5853_v20, %v5822_v57 }
0x1ff3   : >> { %v5934_v60 = vmul.f32 %v5901_v27, %v5886_v63 }
0x1ff4   : >> { %v5848_v39 = vpop.permute.xlu1 %5847 }
0x1ff5   : >> { %v5885_v38 = vmul.f32 %v5848_v39, %v5821_v15  ;;  %v5974_v48 = vadd.f32 %v5947_v22, %v5934_v60  ;;  %v11818_v39 = vld [vmem:[%s14191_s28 + $0x10] sm:$0xff]   ;;  %v11821_v60 = vld [vmem:[%s14191_s28 + $0x28] sm:$0xff]  }
0x1ff7   : >> { %v5933_v42 = vmul.f32 %v5896_v26, %v5885_v38  ;;  %v11822_v38 = vld [vmem:[%s14191_s28 + $0x30] sm:$0xff]  }
0x1ff8   : >> { %v5863_v61 = vpop.permute.xlu1 %5862 }
0x1ff9   : >> { %v5973_v51 = vadd.f32 %v5943_v40, %v5933_v42  ;;  %v5888_v13 = vmul.f32 %v5863_v61, %v5824_v29  ;;  %v5858_v4 = vpop.permute.xlu0 %5857  ;;  %v5827_v40 = vsub.f32 %v14799_v52, %v5814_v7  ;;  %v11823_v29 = vld [vmem:[%s14191_s28 + $0x38] sm:$0xff]   ;;  %v11824_v42 = vld [vmem:[%s14191_s28 + $0x40] sm:$0xff]   ;;  %v11826_v61 = vld [vmem:[%s14191_s28 + $0x50] sm:$0xff]  }
0x1ffa   : >> { %v5887_v32 = vmul.f32 %v5858_v4, %v5823_v12  ;;  %v11825_v12 = vld [vmem:[%s14191_s28 + $0x48] sm:$0xff]  }
0x1ffb   : >> { %v5936_v17 = vmul.f32 %v5911_v1, %v5888_v13  ;;  %v6034_v31 = vpack.c.bf16 %v5974_v48, %v5973_v51  ;;  %v11827_v48 = vld [vmem:[%s14191_s28 + $0x58] sm:$0xff]   ;;  %v12626_v51 = vmov 0.0  }
0x1ffc   : >> { %v5935_v41 = vmul.f32 %v5906_v24, %v5887_v32  ;;  %v5873_v27 = vpop.permute.xlu1 %5872  ;;  %10746 = vmatprep.subr.bf16.mxu1 %v12626_v51  ;;  %10748 = vmatprep.mubr.msk.bf16.mxu1 %vm12627_vm10, %v12626_v51 }
0x1ffd   : >> { %v5976_v25 = vadd.f32 %v5955_v50, %v5936_v17  ;;  %v5890_v3 = vmul.f32 %v5873_v27, %v5826_v9  ;;  %v5868_v5 = vpop.permute.xlu0 %5867  ;;  %10714 = vmatprep.subr.bf16.mxu0 %v6034_v31 }
0x1ffe   : >> { %v5975_v58 = vadd.f32 %v5951_v44, %v5935_v41  ;;  %v5889_v8 = vmul.f32 %v5868_v5, %v5825_v56  ;;  %10715 = vmatpush3.bf16.msra.mxu0 %v6034_v31 }
0x1fff   : >> { %v5938_v10 = vmul.f32 %v5921_v55, %v5890_v3 }
0x2000   : >> { %v5937_v18 = vmul.f32 %v5916_v43, %v5889_v8  ;;  %v5883_v16 = vpop.permute.xlu1 %5882  ;;  %v6035_v26 = vpack.c.bf16 %v5976_v25, %v5975_v58 }
0x2001   : >> { %v5978_v49 = vadd.f32 %v5963_v0, %v5938_v10  ;;  %v5878_v1 = vpop.permute.xlu0 %5877  ;;  %v5892_v50 = vmul.f32 %v5883_v16, %v5828_v53  ;;  %v11820_v0 = vld [vmem:[%s14191_s28 + $0x20] sm:$0xff]  }
0x2002   : >> { %v5977_v22 = vadd.f32 %v5959_v59, %v5937_v18  ;;  %v5891_v57 = vmul.f32 %v5878_v1, %v5827_v40  ;;  %10716 = vmatprep.subr.bf16.mxu0 %v6035_v26 }
0x2003   : >> { %10717 = vmatpush3.bf16.msra.mxu0 %v6035_v26 }
0x2004   : >> { %v5967_v24 = vpop.permute.xlu1 %5966  ;;  %v6036_v44 = vpack.c.bf16 %v5978_v49, %v5977_v22  ;;  %v5939_v55 = vmul.f32 %v5926_v19, %v5891_v57  ;;  %v11819_v19 = vld [vmem:[%s14191_s28 + $0x18] sm:$0xff]  }
0x2006   : >> { %v5931_v7 = vpop.permute.xlu0 %5930  ;;  %10718 = vmatprep.subr.bf16.mxu0 %v6036_v44  ;;  %v5979_v20 = vadd.f32 %v5967_v24, %v5939_v55 }
0x2007   : >> { %v5940_v43 = vmul.f32 %v5931_v7, %v5892_v50  ;;  %10719 = vmatpush3.bf16.msra.mxu0 %v6036_v44 }
0x2008   : >> { %v5971_v59 = vpop.permute.xlu1 %5970 }
0x2009   : >> { %v5980_v63 = vadd.f32 %v5971_v59, %v5940_v43 }
0x200a   : >> { %v6041_v4 = vpop.permute.xlu0 %6040 }
0x200b   : >> { %v6037_v15 = vpack.c.bf16 %v5980_v63, %v5979_v20 }
0x200d   : >> { %10720 = vmatprep.subr.bf16.mxu0 %v6037_v15  ;;  %v6046_v13 = vpop.permute.xlu1 %6045 }
0x200e   : >> { %10721 = vmatpush3.bf16.msra.mxu0 %v6037_v15  ;;  %v6071_v9 = vpop.permute.xlu0 %6070 }
0x200f   : >> { %10758 = vmatprep.subr.bf16.mxu0 %v12626_v51 }
0x2011   : >> { %10723 = vmatmul.mubr.msk.bf16.vlgmr.msra.gmra.mrb[16].mxu0 %vm713_vm1, %v11817_v45  ;;  %v6076_v32 = vpop.permute.xlu1 %6075 }
0x2012   : >> { %10726 = vmatprep.mubr.msk.bf16.mxu0 %vm713_vm1, %v11818_v39  ;;  %v6101_v31 = vpop.permute.xlu0 %6100 }
0x2015   : >> { %v6106_v17 = vpop.permute.xlu1 %6105 }
0x2016   : >> { %v6131_v41 = vpop.permute.xlu0 %6130 }
0x2019   : >> { %10727 = vmatmul.mubr.msk.bf16.gmra.mrb[20].mxu0 %vm713_vm1, %v11819_v19  ;;  %v6136_v56 = vpop.permute.xlu1 %6135 }
0x201a   : >> { %10730 = vmatprep.mubr.msk.bf16.mxu0 %vm713_vm1, %v11820_v0  ;;  %v6051_v5 = vpop.permute.xlu0 %6050 }
0x201d   : >> { %v6056_v25 = vpop.permute.xlu1 %6055 }
0x201e   : >> { %v6081_v43 = vpop.permute.xlu0 %6080 }
0x2021   : >> { %10731 = vmatmul.mubr.msk.bf16.gmra.mrb[24].mxu0 %vm713_vm1, %v11821_v60  ;;  %v6086_v20 = vpop.permute.xlu1 %6085 }
0x2022   : >> { %10734 = vmatprep.mubr.msk.bf16.mxu0 %vm713_vm1, %v11822_v38  ;;  %v6111_v0 = vpop.permute.xlu0 %6110 }
0x2025   : >> { %v6116_v38 = vpop.permute.xlu1 %6115 }
0x2029   : >> { %10735 = vmatmul.mubr.msk.bf16.gmra.mrb[28].mxu0 %vm713_vm1, %v11823_v29 }
0x202a   : >> { %10738 = vmatprep.mubr.msk.bf16.mxu0 %vm713_vm1, %v11824_v42 }
0x2031   : >> { %10739 = vmatmul.mubr.msk.bf16.gmra.mrb[32].mxu0 %vm713_vm1, %v11825_v12 }
0x2032   : >> { %10742 = vmatprep.mubr.msk.bf16.mxu0 %vm713_vm1, %v11826_v61 }
0x2039   : >> { %10743 = vmatmul.mubr.msk.bf16.gmra.mrb[36].mxu0 %vm713_vm1, %v11827_v48 }
0x203a   : >> { %10760 = vmatprep.mubr.msk.bf16.mxu0 %vm12627_vm10, %v12626_v51 }
0x20e4   : >> { %v10724_v27 = vpop.f32.mrb[16].mxu0 }
0x20e5   : >> { %v6288_v3 = vpop.f32.mrb[17].mxu0  ;;  %v6297_v8 = vadd.f32 %v10724_v27, %v6051_v5 }
0x20e6   : >> { %v10725_v58 = vpop.f32.mrb[18].mxu0  ;;  %v6289_v18 = vadd.f32 %v6288_v3, %v6041_v4 }
0x20e7   : >> { %v6300_v10 = vadd.f32 %v10725_v58, %v6056_v25  ;;  %v6291_v40 = vpop.f32.mrb[19].mxu0 }
0x20e8   : >> { %v6292_v16 = vadd.f32 %v6291_v40, %v6046_v13 }
0x20e9   : >> { %v6384_v26 = vpack.c.bf16 %v6300_v10, %v6297_v8 }
0x20ea   : >> { %v6383_v49 = vpack.c.bf16 %v6292_v16, %v6289_v18  ;;  %v6146_v18 = vpop.permute.xlu1 %6145 }
0x20eb   : >> { %10747 = vmatpush3.bf16.msra.mxu1 %v6384_v26 }
0x20ec   : >> { %v10728_v1 = vpop.f32.mrb[20].mxu0  ;;  %6413 = vxpose.xlu0.c.b16.start.end [1/1] (short) (narrow) %v6383_v49, 16  ;;  %10752 = vmatprep.subr.bf16.mxu1 %v12626_v51 }
0x20ed   : >> { %v15014_v22 = vpop.f32.mrb[21].mxu0  ;;  %v6313_v53 = vadd.f32 %v10728_v1, %v6071_v9 }
0x20ee   : >> { %v10729_v57 = vpop.f32.mrb[22].mxu0 }
0x20ef   : >> { %v6316_v24 = vadd.f32 %v10729_v57, %v6076_v32  ;;  %v15016_v44 = vpop.f32.mrb[23].mxu0 }
0x20f1   : >> { %v6386_v50 = vpack.c.bf16 %v6316_v24, %v6313_v53  ;;  %v10090_v24 = vld [vmem:[%s15049_s27] sm:$0xff]  }
0x20f3   : >> { %6473 = vxpose.xlu1.c.b16.start.end [1/1] (short) (narrow) %v6386_v50, 16  ;;  %v10091_v50 = vunpack.c.l.bf16 %v10090_v24 }
0x20f4   : >> { %v15018_v55 = vpop.f32.mrb[24].mxu0 }
0x20f5   : >> { %v6320_v7 = vpop.f32.mrb[25].mxu0 }
0x20f6   : >> { %v15020_v59 = vpop.f32.mrb[26].mxu0  ;;  %v6321_v15 = vadd.f32 %v6320_v7, %v6081_v43  ;;  %v10092_v7 = vunpack.c.h.bf16 %v10090_v24 }
0x20f7   : >> { %v6323_v63 = vpop.f32.mrb[27].mxu0 }
0x20f8   : >> { %v6324_v45 = vadd.f32 %v6323_v63, %v6086_v20 }
0x20fa   : >> { %v6387_v39 = vpack.c.bf16 %v6324_v45, %v6321_v15  ;;  %v10108_v45 = vld [vmem:[%s15049_s27 + $0x8] sm:$0xff]  }
0x20fc   : >> { %v10736_v19 = vpop.f32.mrb[28].mxu0 }
0x20fd   : >> { %v6336_v60 = vpop.f32.mrb[29].mxu0  ;;  %v6345_v42 = vadd.f32 %v10736_v19, %v6111_v0 }
0x20fe   : >> { %v10737_v29 = vpop.f32.mrb[30].mxu0  ;;  %v6337_v48 = vadd.f32 %v6336_v60, %v6101_v31 }
0x20ff   : >> { %v6348_v12 = vadd.f32 %v10737_v29, %v6116_v38  ;;  %v6339_v61 = vpop.f32.mrb[31].mxu0  ;;  %v10095_v38 = vunpack.c.l.bf16 %v10108_v45  ;;  %v10096_v29 = vunpack.c.h.bf16 %v10108_v45 }
0x2100   : >> { %v6340_v13 = vadd.f32 %v6339_v61, %v6106_v17  ;;  %v6141_v17 = vpop.permute.xlu0 %6140 }
0x2101   : >> { %v6390_v4 = vpack.c.bf16 %v6348_v12, %v6345_v42 }
0x2102   : >> { %v6389_v32 = vpack.c.bf16 %v6340_v13, %v6337_v48 }
0x2103   : >> { %10759 = vmatpush3.bf16.msra.mxu0 %v6390_v4 }
0x2104   : >> { %v10740_v9 = vpop.f32.mrb[32].mxu0  ;;  %6533 = vxpose.xlu0.c.b16.start.end [1/1] (short) (narrow) %v6389_v32, 16  ;;  %10770 = vmatprep.subr.bf16.mxu0 %v12626_v51 }
0x2105   : >> { %v15023_v27 = vpop.f32.mrb[33].mxu0  ;;  %v6361_v3 = vadd.f32 %v10740_v9, %v6131_v41 }
0x2106   : >> { %v10741_v25 = vpop.f32.mrb[34].mxu0 }
0x2107   : >> { %v6364_v5 = vadd.f32 %v10741_v25, %v6136_v56  ;;  %v15025_v58 = vpop.f32.mrb[35].mxu0  ;;  %v10109_v25 = vld [vmem:[%s15049_s27 + $0x10] sm:$0xff]  }
0x2109   : >> { %v6392_v8 = vpack.c.bf16 %v6364_v5, %v6361_v3  ;;  %v10099_v3 = vunpack.c.l.bf16 %v10109_v25  ;;  %v10100_v5 = vunpack.c.h.bf16 %v10109_v25 }
0x210b   : >> { %6593 = vxpose.xlu0.c.b16.start.end [1/1] (short) (narrow) %v6392_v8, 16 }
0x210c   : >> { %v15027_v10 = vpop.f32.mrb[36].mxu0 }
0x210d   : >> { %v6368_v31 = vpop.f32.mrb[37].mxu0 }
0x210e   : >> { %v15029_v40 = vpop.f32.mrb[38].mxu0  ;;  %v6369_v26 = vadd.f32 %v6368_v31, %v6141_v17 }
0x210f   : >> { %v6371_v16 = vpop.f32.mrb[39].mxu0 }
0x2110   : >> { %v6372_v49 = vadd.f32 %v6371_v16, %v6146_v18  ;;  %v10110_v18 = vld [vmem:[%s15049_s27 + $0x18] sm:$0xff]  }
0x2112   : >> { %v6393_v1 = vpack.c.bf16 %v6372_v49, %v6369_v26 }
0x2152   : >> { %v6421_v57 = vpop.trf.xlu0 }
0x2153   : >> { %10749 = vmatmul.mubr.msk.bf16.vlgmr.msra.gmra.mrb[32].mxu1 %vm647_vm0, %v6421_v57  ;;  %v10103_v57 = vunpack.c.l.bf16 %v10110_v18 }
0x2154   : >> { %10753 = vmatpush3.bf16.msra.mxu1 %v6387_v39  ;;  %10754 = vmatprep.mubr.msk.bf16.mxu1 %vm12627_vm10, %v12626_v51 }
0x2155   : >> { %10764 = vmatprep.subr.bf16.mxu1 %v12626_v51 }
0x2159   : >> { %v6481_v56 = vpop.trf.xlu1 }
0x215b   : >> { %10755 = vmatmul.mubr.msk.bf16.vlgmr.msra.gmra.mrb[36].mxu1 %vm647_vm0, %v6481_v56 }
0x215c   : >> { %10765 = vmatpush3.bf16.msra.mxu1 %v6393_v1  ;;  %10766 = vmatprep.mubr.msk.bf16.mxu1 %vm12627_vm10, %v12626_v51 }
0x215d   : >> { %10776 = vmatprep.subr.bf16.mxu1 %v12626_v51 }
0x216a   : >> { %v6541_v41 = vpop.trf.xlu0 }
0x216b   : >> { %10761 = vmatmul.mubr.msk.bf16.vlgmr.msra.gmra.mrb[40].mxu0 %vm647_vm0, %v6541_v41  ;;  %v10104_v41 = vunpack.c.h.bf16 %v10110_v18 }
0x216c   : >> { %10772 = vmatprep.mubr.msk.bf16.mxu0 %vm12627_vm10, %v12626_v51 }
0x2171   : >> { %v6601_v53 = vpop.trf.xlu0 }
0x2172   : >> { %10767 = vmatmul.mubr.msk.bf16.vlgmr.msra.gmra.mrb[40].mxu1 %vm647_vm0, %v6601_v53 }
0x2173   : >> { %10778 = vmatprep.mubr.msk.bf16.mxu1 %vm12627_vm10, %v12626_v51 }
0x2226   : >> { %v6466_v43 = vpop.f32.mrb[32].mxu1 }
0x2227   : >> { %v15052_v20 = vadd.f32 %v10091_v50, %v6466_v43  ;;  %v10750_v63 = vpop.f32.mrb[33].mxu1 }
0x2228   : >> { %v6469_v15 = vpop.f32.mrb[34].mxu1 }
0x2229   : >> { %v6470_v39 = vadd.f32 %v10092_v7, %v6469_v15  ;;  %v6653_v19 = vsel %vm647_vm0, %v15052_v20, -inf  ;;  %v10751_v0 = vpop.f32.mrb[35].mxu1 }
0x222a   : >> { %6654 = vmax.xlane.f32.xlu0 %v6653_v19  ;;  %v6015_v19 = vld [vmem:[%s14952_s23 + $0x28] sm:$0xff]  ;;  %v6014_v0 = vld [vmem:[%s14952_s23 + $0x20] sm:$0xff] }
0x222b   : >> { %v6656_v60 = vsel %vm647_vm0, %v6470_v39, -inf }
0x222c   : >> { %6657 = vmax.xlane.f32.xlu1 %v6656_v60  ;;  %v6020_v60 = vld [vmem:[%s14952_s23 + $0x50] sm:$0xff] }
0x222e   : >> { %v6526_v42 = vpop.f32.mrb[36].mxu1 }
0x222f   : >> { %v6527_v12 = vadd.f32 %v10095_v38, %v6526_v42  ;;  %v10756_v61 = vpop.f32.mrb[37].mxu1  ;;  %v6026_v38 = vld [vmem:[%s14952_s23 + $0x80] sm:$0xff]  ;;  %v6027_v42 = vld [vmem:[%s14952_s23 + $0x88] sm:$0xff] }
0x2230   : >> { %v6529_v48 = vpop.f32.mrb[38].mxu1 }
0x2231   : >> { %v6530_v13 = vadd.f32 %v10096_v29, %v6529_v48  ;;  %v6659_v4 = vsel %vm647_vm0, %v6527_v12, -inf  ;;  %v10757_v32 = vpop.f32.mrb[39].mxu1  ;;  %v6021_v29 = vld [vmem:[%s14952_s23 + $0x58] sm:$0xff] }
0x2232   : >> { %6660 = vmax.xlane.f32.xlu0 %v6659_v4 }
0x2233   : >> { %v6662_v9 = vsel %vm647_vm0, %v6530_v13, -inf }
0x2234   : >> { %6663 = vmax.xlane.f32.xlu1 %v6662_v9 }
0x223e   : >> { %v6586_v8 = vpop.f32.mrb[40].mxu0 }
0x223f   : >> { %v15061_v31 = vadd.f32 %v10099_v3, %v6586_v8  ;;  %v10762_v17 = vpop.f32.mrb[41].mxu0 }
0x2240   : >> { %v6589_v16 = vpop.f32.mrb[42].mxu0 }
0x2241   : >> { %v15064_v26 = vadd.f32 %v10100_v5, %v6589_v16  ;;  %v10763_v49 = vpop.f32.mrb[43].mxu0  ;;  %v6665_v1 = vsel %vm647_vm0, %v15061_v31, -inf }
0x2242   : >> { %6666 = vmax.xlane.f32.xlu0 %v6665_v1 }
0x2243   : >> { %v6668_v56 = vsel %vm647_vm0, %v15064_v26, -inf }
0x2244   : >> { %6669 = vmax.xlane.f32.xlu1 %v6668_v56 }
0x2245   : >> { %v6646_v53 = vpop.f32.mrb[40].mxu1 }
0x2246   : >> { %v6647_v24 = vadd.f32 %v10103_v57, %v6646_v53  ;;  %v10768_v50 = vpop.f32.mrb[41].mxu1 }
0x2247   : >> { %v6649_v7 = vpop.f32.mrb[42].mxu1 }
0x2248   : >> { %v6650_v43 = vadd.f32 %v10104_v41, %v6649_v7  ;;  %v10769_v63 = vpop.f32.mrb[43].mxu1  ;;  %v6671_v15 = vsel %vm647_vm0, %v6647_v24, -inf }
0x2249   : >> { %6672 = vmax.xlane.f32.xlu0 %v6671_v15 }
0x224a   : >> { %v6674_v45 = vsel %vm647_vm0, %v6650_v43, -inf }
0x224b   : >> { %6675 = vmax.xlane.f32.xlu1 %v6674_v45 }
0x225c   : >> { %6065 = vperm.xlu1 %11797, %v6015_v19  }
0x225f   : >> { %6060 = vperm.xlu0 %11796, %v6014_v0  }
0x2260   : >> { %6090 = vperm.xlu1 %11797, %v6020_v60  }
0x2263   : >> { %6120 = vperm.xlu0 %11796, %v6026_v38  }
0x2264   : >> { %6095 = vperm.xlu1 %11797, %v6021_v29  }
0x2268   : >> { %6125 = vperm.xlu1 %11797, %v6027_v42  }
0x22b7   : >> { %v6655_v61 = vpop.xlane.xlu0 %6654 }
0x22b8   : >> { %v6677_v48 = vsub.f32 %v15052_v20, %v6655_v61 }
0x22b9   : >> { %v6658_v4 = vpop.xlane.xlu1 %6657 }
0x22ba   : >> { %v6685_v32 = vmul.f32 1.442695, %v6677_v48  ;;  %v6678_v9 = vsub.f32 %v6470_v39, %v6658_v4 }
0x22bc   : >> { %11944 = vpow2.f32 %v6685_v32  ;;  %v6687_v25 = vmul.f32 1.442695, %v6678_v9 }
0x22be   : >> { %11946 = vpow2.f32 %v6687_v25 }
0x22bf   : >> { %v6661_v3 = vpop.xlane.xlu0 %6660 }
0x22c0   : >> { %v6679_v5 = vsub.f32 %v6527_v12, %v6661_v3 }
0x22c1   : >> { %v6664_v8 = vpop.xlane.xlu1 %6663 }
0x22c2   : >> { %v6689_v17 = vmul.f32 1.442695, %v6679_v5  ;;  %v6680_v18 = vsub.f32 %v6530_v13, %v6664_v8 }
0x22c4   : >> { %11948 = vpow2.f32 %v6689_v17  ;;  %v6691_v16 = vmul.f32 1.442695, %v6680_v18 }
0x22c6   : >> { %v15079_v49 = vpop.eup %11944  ;;  %11950 = vpow2.f32 %v6691_v16 }
0x22c7   : >> { %v6701_v1 = vsel %vm647_vm0, %v15079_v49, 0.0 }
0x22c8   : >> { %v15083_v20 = vpop.eup %11946  ;;  %6702 = vadd.xlane.f32.xlu0 %v6701_v1 }
0x22c9   : >> { %v6704_v39 = vsel %vm647_vm0, %v15083_v20, 0.0 }
0x22ca   : >> { %6705 = vadd.xlane.f32.xlu1 %v6704_v39 }
0x22ce   : >> { %v15087_v57 = vpop.eup %11948 }
0x22cf   : >> { %v6667_v12 = vpop.xlane.xlu0 %6666  ;;  %v6707_v13 = vsel %vm647_vm0, %v15087_v57, 0.0 }
0x22d0   : >> { %v15091_v56 = vpop.eup %11950  ;;  %v6681_v41 = vsub.f32 %v15061_v31, %v6667_v12  ;;  %6708 = vadd.xlane.f32.xlu0 %v6707_v13  ;;  %v6032_v13 = vld [vmem:[%s14952_s23 + $0xb0] sm:$0xff] }
0x22d1   : >> { %v6670_v53 = vpop.xlane.xlu1 %6669  ;;  %v6710_v50 = vsel %vm647_vm0, %v15091_v56, 0.0 }
0x22d2   : >> { %v6693_v7 = vmul.f32 1.442695, %v6681_v41  ;;  %v6682_v63 = vsub.f32 %v15064_v26, %v6670_v53  ;;  %6711 = vadd.xlane.f32.xlu1 %v6710_v50  ;;  %v16404_v41 = vmov 2  }
0x22d4   : >> { %11952 = vpow2.f32 %v6693_v7  ;;  %v6695_v15 = vmul.f32 1.442695, %v6682_v63 }
0x22d6   : >> { %11954 = vpow2.f32 %v6695_v15  ;;  %v6673_v45 = vpop.xlane.xlu0 %6672 }
0x22d7   : >> { %v6683_v19 = vsub.f32 %v6647_v24, %v6673_v45 }
0x22d8   : >> { %v6676_v0 = vpop.xlane.xlu1 %6675 }
0x22d9   : >> { %v6697_v60 = vmul.f32 1.442695, %v6683_v19  ;;  %v6684_v38 = vsub.f32 %v6650_v43, %v6676_v0 }
0x22db   : >> { %11956 = vpow2.f32 %v6697_v60  ;;  %v6699_v29 = vmul.f32 1.442695, %v6684_v38 }
0x22dc   : >> { %v6066_v31 = vpop.permute.xlu1 %6065 }
0x22dd   : >> { %11958 = vpow2.f32 %v6699_v29  ;;  %v6308_v48 = vadd.f32 %v15016_v44, %v6066_v31 }
0x22de   : >> { %v15097_v42 = vpop.eup %11952  ;;  %v6061_v61 = vpop.permute.xlu0 %6060 }
0x22df   : >> { %v6305_v26 = vadd.f32 %v15014_v22, %v6061_v61  ;;  %v6713_v4 = vsel %vm647_vm0, %v15097_v42, 0.0 }
0x22e0   : >> { %v15103_v32 = vpop.eup %11954  ;;  %6714 = vadd.xlane.f32.xlu0 %v6713_v4  ;;  %v6091_v24 = vpop.permute.xlu1 %6090 }
0x22e1   : >> { %v6385_v9 = vpack.c.bf16 %v6308_v48, %v6305_v26  ;;  %v6716_v43 = vsel %vm647_vm0, %v15103_v32, 0.0  ;;  %v6329_v44 = vadd.f32 %v15018_v55, %v6091_v24 }
0x22e2   : >> { %6717 = vadd.xlane.f32.xlu1 %v6716_v43  ;;  %v6121_v5 = vpop.permute.xlu0 %6120 }
0x22e3   : >> { %v15118_v39 = vadd.f32 %v15023_v27, %v6121_v5 }
0x22e4   : >> { %v6096_v25 = vpop.permute.xlu1 %6095 }
0x22e5   : >> { %v15107_v3 = vpop.eup %11956  ;;  %v6332_v22 = vadd.f32 %v15020_v59, %v6096_v25  ;;  %v6033_v59 = vld [vmem:[%s14952_s23 + $0xb8] sm:$0xff] }
0x22e6   : >> { %v6719_v8 = vsel %vm647_vm0, %v15107_v3, 0.0 }
0x22e7   : >> { %v15113_v17 = vpop.eup %11958  ;;  %v6388_v18 = vpack.c.bf16 %v6332_v22, %v6329_v44  ;;  %6720 = vadd.xlane.f32.xlu0 %v6719_v8 }
0x22e8   : >> { %v6126_v16 = vpop.permute.xlu1 %6125  ;;  %v6722_v1 = vsel %vm647_vm0, %v15113_v17, 0.0 }
0x22e9   : >> { %v15121_v12 = vadd.f32 %v15025_v58, %v6126_v16  ;;  %6723 = vadd.xlane.f32.xlu1 %v6722_v1 }
0x22eb   : >> { %v6391_v55 = vpack.c.bf16 %v15121_v12, %v15118_v39 }
0x22fa   : >> { %6155 = vperm.xlu1 %11797, %v6033_v59  }
0x22fd   : >> { %6150 = vperm.xlu0 %11796, %v6032_v13  }
0x22fe   : >> { %11799 = vset.pattern.permute.xlu1 %v16404_v41 }
0x22ff   : >> { %6952 = vperm.xlu1 %11799, %v14896_v28  }
0x2301   : >> { %11798 = vset.pattern.permute.xlu0 %v16404_v41 }
0x2302   : >> { %6948 = vperm.xlu0 %11798, %v14891_v47  }
0x2303   : >> { %6956 = vperm.xlu1 %11799, %v14908_v11  }
0x2306   : >> { %6960 = vperm.xlu0 %11798, %v14911_v46  }
0x2307   : >> { %6964 = vperm.xlu1 %11799, %v14925_v62  }
0x230a   : >> { %6968 = vperm.xlu0 %11798, %v14916_v54  }
0x230b   : >> { %6972 = vperm.xlu1 %11799, %v14932_v6  }
0x230e   : >> { %6976 = vperm.xlu0 %11798, %v14947_v34  }
0x2355   : >> { %v6703_v27 = vpop.xlane.xlu0 %6702 }
0x2356   : >> { %11960 = vrcp.f32 %v6703_v27 }
0x2357   : >> { %v6706_v58 = vpop.xlane.xlu1 %6705 }
0x2358   : >> { %11962 = vrcp.f32 %v6706_v58 }
0x235d   : >> { %v6709_v28 = vpop.xlane.xlu0 %6708 }
0x235e   : >> { %11964 = vrcp.f32 %v6709_v28 }
0x235f   : >> { %v6712_v53 = vpop.xlane.xlu1 %6711 }
0x2360   : >> { %v11961_v47 = vpop.eup %11960  ;;  %11966 = vrcp.f32 %v6712_v53 }
0x2361   : >> { %v6733_v46 = vmul.f32 %v11961_v47, %v15079_v49  ;;  %v11829_v47 = vld [vmem:[%s15168_s15 + $0x8] sm:$0xff]  }
0x2362   : >> { %v11963_v11 = vpop.eup %11962 }
0x2363   : >> { %v6734_v62 = vmul.f32 %v11963_v11, %v15083_v20  ;;  %v11830_v11 = vld [vmem:[%s15168_s15 + $0x10] sm:$0xff]  }
0x2365   : >> { %v6741_v50 = vpack.c.bf16 %v6734_v62, %v6733_v46  ;;  %v11831_v46 = vld [vmem:[%s15168_s15 + $0x18] sm:$0xff]  }
0x2367   : >> { %v6749_v54 = vsel %vm647_vm0, %v6741_v50, 0 }
0x2368   : >> { %v11965_v6 = vpop.eup %11964  ;;  %10771 = vmatpush3.bf16.xpose.msra.mxu0 %v6749_v54 }
0x2369   : >> { %10782 = vmatprep.subr.bf16.mxu0 %v12626_v51  ;;  %v6735_v7 = vmul.f32 %v11965_v6, %v15087_v57 }
0x236a   : >> { %v11967_v34 = vpop.eup %11966 }
0x236b   : >> { %v6736_v63 = vmul.f32 %v11967_v34, %v15091_v56 }
0x236d   : >> { %v6715_v15 = vpop.xlane.xlu0 %6714  ;;  %v6742_v45 = vpack.c.bf16 %v6736_v63, %v6735_v7 }
0x236e   : >> { %11968 = vrcp.f32 %v6715_v15 }
0x236f   : >> { %10773 = vmatmul.mubr.msk.bf16.vlgmr.msra.gmra.mrb[44].mxu0 %vm647_vm0, %v6385_v9  ;;  %v6718_v49 = vpop.xlane.xlu1 %6717  ;;  %v6796_v20 = vsel %vm647_vm0, %v6742_v45, 0 }
0x2370   : >> { %11970 = vrcp.f32 %v6718_v49  ;;  %10777 = vmatpush3.bf16.xpose.msra.mxu1 %v6796_v20  ;;  %10784 = vmatprep.mubr.msk.bf16.mxu0 %vm12627_vm10, %v12626_v51 }
0x2371   : >> { %10788 = vmatprep.subr.bf16.mxu1 %v12626_v51 }
0x2374   : >> { %v6721_v19 = vpop.xlane.xlu0 %6720 }
0x2375   : >> { %11972 = vrcp.f32 %v6721_v19 }
0x2376   : >> { %v6724_v57 = vpop.xlane.xlu1 %6723 }
0x2377   : >> { %11974 = vrcp.f32 %v6724_v57  ;;  %10779 = vmatmul.mubr.msk.bf16.vlgmr.msra.gmra.mrb[44].mxu1 %vm647_vm0, %v6388_v18 }
0x2378   : >> { %v11969_v56 = vpop.eup %11968  ;;  %10790 = vmatprep.mubr.msk.bf16.mxu1 %vm12627_vm10, %v12626_v51 }
0x2379   : >> { %v6737_v38 = vmul.f32 %v11969_v56, %v15097_v42 }
0x237a   : >> { %v11971_v0 = vpop.eup %11970  ;;  %v6156_v60 = vpop.permute.xlu1 %6155 }
0x237b   : >> { %v6738_v29 = vmul.f32 %v11971_v0, %v15103_v32  ;;  %v6380_v61 = vadd.f32 %v15029_v40, %v6156_v60 }
0x237c   : >> { %v6151_v31 = vpop.permute.xlu0 %6150 }
0x237d   : >> { %v6377_v48 = vadd.f32 %v15027_v10, %v6151_v31  ;;  %v6743_v26 = vpack.c.bf16 %v6738_v29, %v6737_v38  ;;  %v11828_v10 = vld [vmem:[%s15168_s15] sm:$0xff]  }
0x237e   : >> { %v6953_v62 = vpop.permute.xlu1 %6952 }
0x237f   : >> { %v11973_v4 = vpop.eup %11972  ;;  %v6394_v24 = vpack.c.bf16 %v6380_v61, %v6377_v48  ;;  %v6843_v9 = vsel %vm647_vm0, %v6743_v26, 0 }
0x2380   : >> { %10783 = vmatpush3.bf16.xpose.msra.mxu0 %v6843_v9  ;;  %v6739_v51 = vmul.f32 %v11973_v4, %v15107_v3 }
0x2381   : >> { %v11975_v43 = vpop.eup %11974  ;;  %v6949_v50 = vpop.permute.xlu0 %6948 }
0x2382   : >> { %v6740_v25 = vmul.f32 %v11975_v43, %v15113_v17  ;;  %v6957_v54 = vpop.permute.xlu1 %6956 }
0x2384   : >> { %v6744_v42 = vpack.c.bf16 %v6740_v25, %v6739_v51 }
0x2385   : >> { %v6961_v6 = vpop.permute.xlu0 %6960 }
0x2386   : >> { %v6890_v32 = vsel %vm647_vm0, %v6744_v42, 0  ;;  %v6965_v15 = vpop.permute.xlu1 %6964 }
0x2387   : >> { %10785 = vmatmul.mubr.msk.bf16.vlgmr.msra.gmra.mrb[48].mxu0 %vm647_vm0, %v6391_v55  ;;  %10789 = vmatpush3.bf16.xpose.msra.mxu1 %v6890_v32 }
0x2388   : >> { %10802 = vmatprep.mubr.msk.bf16.mxu0 %vm713_vm1, %v11828_v10 }
0x2389   : >> { %v6969_v56 = vpop.permute.xlu0 %6968 }
0x238a   : >> { %v6973_v31 = vpop.permute.xlu1 %6972 }
0x238d   : >> { %v6977_v4 = vpop.permute.xlu0 %6976 }
0x238e   : >> { %10791 = vmatmul.mubr.msk.bf16.vlgmr.msra.gmra.mrb[48].mxu1 %vm647_vm0, %v6394_v24 }
0x2442   : >> { %v6785_v40 = vpop.f32.mrb[44].mxu0 }
0x2443   : >> { %v10774_v3 = vpop.f32.mrb[45].mxu0 }
0x2444   : >> { %v6788_v44 = vpop.f32.mrb[46].mxu0 }
0x2445   : >> { %v6943_v22 = vpack.c.bf16 %v6788_v44, %v6785_v40  ;;  %v10775_v5 = vpop.f32.mrb[47].mxu0 }
0x2447   : >> { %10794 = vmatprep.subr.bf16.mxu0 %v6943_v22 }
0x2448   : >> { %10795 = vmatpush3.bf16.msra.mxu0 %v6943_v22 }
0x244a   : >> { %v6832_v8 = vpop.f32.mrb[44].mxu1 }
0x244b   : >> { %v10780_v17 = vpop.f32.mrb[45].mxu1 }
0x244c   : >> { %v6835_v18 = vpop.f32.mrb[46].mxu1 }
0x244d   : >> { %v6944_v16 = vpack.c.bf16 %v6835_v18, %v6832_v8  ;;  %v10781_v1 = vpop.f32.mrb[47].mxu1 }
0x244f   : >> { %10796 = vmatprep.subr.bf16.mxu0 %v6944_v16 }
0x2450   : >> { %10797 = vmatpush3.bf16.msra.mxu0 %v6944_v16 }
0x245a   : >> { %v6879_v39 = vpop.f32.mrb[48].mxu0 }
0x245b   : >> { %v10786_v12 = vpop.f32.mrb[49].mxu0 }
0x245c   : >> { %v6882_v55 = vpop.f32.mrb[50].mxu0 }
0x245d   : >> { %v6945_v59 = vpack.c.bf16 %v6882_v55, %v6879_v39  ;;  %v10787_v13 = vpop.f32.mrb[51].mxu0 }
0x245f   : >> { %10798 = vmatprep.subr.bf16.mxu0 %v6945_v59 }
0x2460   : >> { %10799 = vmatpush3.bf16.msra.mxu0 %v6945_v59 }
0x2461   : >> { %v6926_v41 = vpop.f32.mrb[48].mxu1 }
0x2462   : >> { %v10792_v27 = vpop.f32.mrb[49].mxu1 }
0x2463   : >> { %v6929_v58 = vpop.f32.mrb[50].mxu1 }
0x2464   : >> { %v6946_v28 = vpack.c.bf16 %v6929_v58, %v6926_v41  ;;  %v10793_v53 = vpop.f32.mrb[51].mxu1 }
0x2466   : >> { %10800 = vmatprep.subr.bf16.mxu0 %v6946_v28 }
0x2467   : >> { %10801 = vmatpush3.bf16.msra.mxu0 %v6946_v28 }
0x246a   : >> { %10803 = vmatmul.mubr.msk.bf16.vlgmr.msra.gmra.mrb[52].mxu0 %vm713_vm1, %v11829_v47 }
0x246b   : >> { %10806 = vmatprep.mubr.msk.bf16.mxu0 %vm713_vm1, %v11830_v11 }
0x2472   : >> { %10807 = vmatmul.mubr.msk.bf16.gmra.mrb[56].mxu0 %vm713_vm1, %v11831_v46 }
0x253d   : >> { %v10804_v34 = vpop.f32.mrb[52].mxu0 }
0x253e   : >> { %v7054_v7 = vadd.f32 %v10804_v34, %v6957_v54  ;;  %v7045_v63 = vpop.f32.mrb[53].mxu0 }
0x253f   : >> { %v7046_v45 = vadd.f32 %v7045_v63, %v6949_v50  ;;  %v10805_v49 = vpop.f32.mrb[54].mxu0 }
0x2540   : >> { %v7078_v19 = vadd.f32 %v7054_v7, %v14768_v23   ;;  %v7057_v20 = vadd.f32 %v10805_v49, %v6961_v6  ;;  %v7048_v57 = vpop.f32.mrb[55].mxu0 }
0x2541   : >> { %v7076_v60 = vadd.f32 %v7046_v45, %v14756_v37   ;;  %v7049_v0 = vadd.f32 %v7048_v57, %v6953_v62 }
0x2542   : >> { %v7079_v38 = vadd.f32 %v7057_v20, %v14778_v2  }
0x2543   : >> { %v7077_v29 = vadd.f32 %v7049_v0, %v14759_v21  }
0x2544   : >> { %v16409_v20 = vmov %v7079_v38 }
0x2545   : >> { %v10808_v61 = vpop.f32.mrb[56].mxu0 }
0x2546   : >> { %v7070_v48 = vadd.f32 %v10808_v61, %v6973_v31  ;;  %v7061_v26 = vpop.f32.mrb[57].mxu0 }
0x2547   : >> { %v7062_v24 = vadd.f32 %v7061_v26, %v6965_v15  ;;  %v10809_v9 = vpop.f32.mrb[58].mxu0  ;;  %v16410_v26 = vmov %v7078_v19  ;;  %4017 = sbr.rel (!%p4015_p5) target bundleno = 5213 (0x145d), region = 178 }
0x2548   : >> { %v7082_v43 = vadd.f32 %v7070_v48, %v14799_v52   ;;  %v7073_v23 = vadd.f32 %v10809_v9, %v6977_v4  ;;  %v7064_v51 = vpop.f32.mrb[59].mxu0 }
0x2549   : >> { %v7080_v25 = vadd.f32 %v7062_v24, %v14783_v30   ;;  %v7065_v42 = vadd.f32 %v7064_v51, %v6969_v56  ;;  %v16412_v24 = vmov %v7076_v60 }
0x254a   : >> { %v7083_v37 = vadd.f32 %v7073_v23, %v14810_v33   ;;  %v16406_v5 = vmov %v7082_v43  ;;  %v16411_v23 = vmov %v7077_v29 }
0x254b   : >> { %v7081_v2 = vadd.f32 %v7065_v42, %v14794_v36   ;;  %v16408_v0 = vmov %v7080_v25 }
0x254c   : >> { %v16405_v46 = vmov %v7083_v37 }
0x254d   : >> { %v16407_v13 = vmov %v7081_v2 }
0x254e LB: >> { %v16413_v21 = vld [vmem:[#allocation3_spill] sm:$0xff]  ;;  %v7118_v30 = vsel %vm647_vm0, %v12593_v60, 0.0  ;;  %v7142_v36 = vmul.f32 %v12593_v60, %v12593_v60  ;;  %v7143_v52 = vmul.f32 %v12589_v29, %v12589_v29  ;;  %v7121_v32 = vsel %vm647_vm0, %v12589_v29, 0.0  ;;  %v16414_v42 = vld [vmem:[#allocation4_spill] sm:$0xff]  ;;  %s12629_s25 = smov 1   ;;  %s15356_s30 = sshll.u32 %s12597_s21, 6  ;;  %s12597_s21 = sphi %s15221_s21, %s7089_s21   ;;  %v12593_v60 = vphi %v7076_v60, %v16438_v60   ;;  %v12589_v29 = vphi %v7077_v29, %v16437_v29   ;;  %v12585_v19 = vphi %v7078_v19, %v16436_v19   ;;  %v12581_v38 = vphi %v7079_v38, %v16435_v38   ;;  %v12577_v25 = vphi %v7080_v25, %v16434_v25   ;;  %v12573_v2 = vphi %v7081_v2, %v16433_v2   ;;  %v12569_v43 = vphi %v7082_v43, %v16432_v43   ;;  %v12565_v37 = vphi %v7083_v37, %v16431_v37  }
0x254f   : >> { %10826 = vmatprep.mubr.msk.f32.mxu0 %vm713_vm1, %v16413_v21  ;;  %7119 = vadd.xlane.f32.xlu0 %v7118_v30  ;;  %v7124_v40 = vsel %vm647_vm0, %v12585_v19, 0.0  ;;  %v7144_v3 = vmul.f32 %v12585_v19, %v12585_v19  ;;  %v7127_v44 = vsel %vm647_vm0, %v12581_v38, 0.0  ;;  %v7145_v22 = vmul.f32 %v12581_v38, %v12581_v38  ;;  %v16415_v30 = vld [vmem:[#allocation5_spill] sm:$0xff]  ;;  %s15363_s23 = scalar_lea.vmem %s16232_s3, %s15356_s30  ;;  %s10071_s28 = sshll.u32 %s12597_s21, 5 }
0x2550   : >> { %v7150_v33 = vsel %vm647_vm0, %v7142_v36, 0.0  ;;  %v7153_v10 = vsel %vm647_vm0, %v7143_v52, 0.0  ;;  %v7130_v17 = vsel %vm647_vm0, %v12577_v25, 0.0  ;;  %v7146_v18 = vmul.f32 %v12577_v25, %v12577_v25  ;;  %v16416_v36 = vld [vmem:[#allocation6_spill] sm:$0xff]  ;;  %v16417_v52 = vld [vmem:[#allocation7_spill] sm:$0xff]  ;;  %s15434_s19 = scalar_lea.vmem %s16233_s4, %s10071_s28  ;;  %s15587_s29 = scalar_lea.vmem %s12830_s18, %s15356_s30 }
0x2551   : >> { %7151 = vadd.xlane.f32.xlu1 %v7150_v33  ;;  %v7156_v5 = vsel %vm647_vm0, %v7144_v3, 0.0  ;;  %v7159_v8 = vsel %vm647_vm0, %v7145_v22, 0.0  ;;  %v7133_v16 = vsel %vm647_vm0, %v12573_v2, 0.0  ;;  %v7147_v1 = vmul.f32 %v12573_v2, %v12573_v2  ;;  %v16418_v33 = vld [vmem:[#allocation8_spill] sm:$0xff]  ;;  %s12634_s15 = smov 16   ;;  %s12636_s22 = smov 127  }
0x2552   : >> { %v7162_v39 = vsel %vm647_vm0, %v7146_v18, 0.0  ;;  %v7136_v55 = vsel %vm647_vm0, %v12569_v43, 0.0  ;;  %v7148_v59 = vmul.f32 %v12569_v43, %v12569_v43  ;;  %v7139_v13 = vsel %vm647_vm0, %v12565_v37, 0.0  ;;  %s15814_s1 = scalar_lea.vmem %s16234_s5, %s15356_s30  ;;  %s7089_s21 = sadd.s32 1, %s12597_s21  }
0x2553   : >> { %7122 = vadd.xlane.f32.xlu0 %v7121_v32  ;;  %v7165_v12 = vsel %vm647_vm0, %v7147_v1, 0.0  ;;  %v7149_v41 = vmul.f32 %v12565_v37, %v12565_v37  ;;  %v16419_v32 = vld [vmem:[#allocation9_spill] sm:$0xff]  ;;  %p7086_p6 = scmp.ge.s32.totalorder %s7089_s21, 8  }
0x2554   : >> { %v7168_v27 = vsel %vm647_vm0, %v7148_v59, 0.0  ;;  %s12639_s18 = smov (%p7086_p6), 1   ;;  %s16457_s27 = sld [smem:[#allocation21_spill]] (%p7086_p6) }
0x2555   : >> { %7154 = vadd.xlane.f32.xlu1 %v7153_v10  ;;  %v7171_v58 = vsel %vm647_vm0, %v7149_v41, 0.0  ;;  %v16420_v10 = vld [vmem:[#allocation10_spill] sm:$0xff] }
0x2557   : >> { %7125 = vadd.xlane.f32.xlu0 %v7124_v40  ;;  %v16315_v40 = vmov 0  }
0x2558   : >> { %11984 = vset.pattern.permute.xlu0 %v16315_v40  ;;  %11985 = vset.pattern.permute.xlu1 %v16315_v40 }
0x2559   : >> { %7128 = vadd.xlane.f32.xlu1 %v7127_v44  ;;  %8553 = vmatprep.subr.bf16.mxu1 %v16315_v40 }
0x255b   : >> { %7157 = vadd.xlane.f32.xlu0 %v7156_v5 }
0x255d   : >> { %7160 = vadd.xlane.f32.xlu1 %v7159_v8 }
0x255f   : >> { %7131 = vadd.xlane.f32.xlu0 %v7130_v17 }
0x2561   : >> { %7134 = vadd.xlane.f32.xlu1 %v7133_v16 }
0x2563   : >> { %7163 = vadd.xlane.f32.xlu0 %v7162_v39 }
0x2565   : >> { %7166 = vadd.xlane.f32.xlu1 %v7165_v12 }
0x2567   : >> { %7137 = vadd.xlane.f32.xlu0 %v7136_v55 }
0x2569   : >> { %7140 = vadd.xlane.f32.xlu1 %v7139_v13 }
0x256b   : >> { %7169 = vadd.xlane.f32.xlu0 %v7168_v27 }
0x256d   : >> { %7172 = vadd.xlane.f32.xlu1 %v7171_v58  ;;  %v15368_v58 = vld [vmem:[%s15363_s23] sm:$0xff] }
0x25dc   : >> { %v7120_v28 = vpop.xlane.xlu0 %7119 }
0x25de   : >> { %v7152_v53 = vpop.xlane.xlu1 %7151 }
0x25df   : >> { %v7175_v46 = vsel %vm704_vm2, %v7120_v28, %v7152_v53  ;;  %v15375_v28 = vld [vmem:[%s15363_s23 + $0x18] sm:$0xff]  ;;  %v15380_v53 = vld [vmem:[%s15363_s23 + $0x8] sm:$0xff] }
0x25e0   : >> { %v7123_v47 = vpop.xlane.xlu0 %7122 }
0x25e2   : >> { %v7155_v11 = vpop.xlane.xlu1 %7154 }
0x25e3   : >> { %v7176_v62 = vsel %vm704_vm2, %v7123_v47, %v7155_v11  ;;  %v15385_v47 = vld [vmem:[%s15363_s23 + $0x28] sm:$0xff]  ;;  %v16313_v11 = vmov 1  }
0x25e4   : >> { %v7126_v50 = vpop.xlane.xlu0 %7125  ;;  %v11006_v54 = vpack.c.bf16 %v7176_v62, %v7175_v46  ;;  %v15391_v46 = vld [vmem:[%s15363_s23 + $0x30] sm:$0xff] }
0x25e5   : >> { %v15399_v62 = vld [vmem:[%s15363_s23 + $0x10] sm:$0xff] }
0x25e6   : >> { %11007 = vmatprep.subr.bf16.mxu0 %v11006_v54  ;;  %v7129_v6 = vpop.xlane.xlu1 %7128 }
0x25e7   : >> { %11009 = vmatpush3.bf16.msra.mxu0 %v11006_v54  ;;  %v15415_v54 = vld [vmem:[%s15363_s23 + $0x38] sm:$0xff] }
0x25e8   : >> { %v7158_v34 = vpop.xlane.xlu0 %7157 }
0x25e9   : >> { %v7177_v63 = vsel %vm704_vm2, %v7126_v50, %v7158_v34  ;;  %v15408_v50 = vld [vmem:[%s15363_s23 + $0x20] sm:$0xff] }
0x25ea   : >> { %v7161_v7 = vpop.xlane.xlu1 %7160 }
0x25eb   : >> { %v7178_v15 = vsel %vm704_vm2, %v7129_v6, %v7161_v7 }
0x25ec   : >> { %v11010_v45 = vpack.c.bf16 %v7178_v15, %v7177_v63  ;;  %v7132_v49 = vpop.xlane.xlu0 %7131 }
0x25ee   : >> { %11011 = vmatprep.subr.bf16.mxu0 %v11010_v45  ;;  %v7135_v20 = vpop.xlane.xlu1 %7134 }
0x25ef   : >> { %11013 = vmatpush3.bf16.msra.mxu0 %v11010_v45 }
0x25f0   : >> { %v7164_v57 = vpop.xlane.xlu0 %7163 }
0x25f1   : >> { %v7179_v0 = vsel %vm704_vm2, %v7132_v49, %v7164_v57 }
0x25f2   : >> { %v7167_v56 = vpop.xlane.xlu1 %7166 }
0x25f3   : >> { %v7180_v31 = vsel %vm704_vm2, %v7135_v20, %v7167_v56 }
0x25f4   : >> { %v11014_v61 = vpack.c.bf16 %v7180_v31, %v7179_v0  ;;  %v7138_v48 = vpop.xlane.xlu0 %7137 }
0x25f6   : >> { %11015 = vmatprep.subr.bf16.mxu0 %v11014_v61  ;;  %v7141_v26 = vpop.xlane.xlu1 %7140 }
0x25f7   : >> { %11017 = vmatpush3.bf16.msra.mxu0 %v11014_v61 }
0x25f8   : >> { %v7170_v4 = vpop.xlane.xlu0 %7169 }
0x25f9   : >> { %v7181_v9 = vsel %vm704_vm2, %v7138_v48, %v7170_v4 }
0x25fa   : >> { %v7173_v24 = vpop.xlane.xlu1 %7172 }
0x25fb   : >> { %v7182_v23 = vsel %vm704_vm2, %v7141_v26, %v7173_v24 }
0x25fc   : >> { %v11018_v51 = vpack.c.bf16 %v7182_v23, %v7181_v9 }
0x25fe   : >> { %11019 = vmatprep.subr.bf16.mxu0 %v11018_v51 }
0x25ff   : >> { %11021 = vmatpush3.bf16.msra.mxu0 %v11018_v51 }
0x2602   : >> { %10827 = vmatmul.mubr.msk.f32.vlgmr.msra.gmra.mrb[0].mxu0 %vm713_vm1, %v16414_v42 }
0x2603   : >> { %10829 = vmatprep.mubr.msk.f32.mxu0 %vm713_vm1, %v16415_v30 }
0x2606   : >> { %10830 = vmatmul.mubr.msk.f32.gmra.mrb[2].mxu0 %vm713_vm1, %v16416_v36 }
0x2607   : >> { %10832 = vmatprep.mubr.msk.f32.mxu0 %vm713_vm1, %v16417_v52 }
0x260a   : >> { %10833 = vmatmul.mubr.msk.f32.gmra.mrb[4].mxu0 %vm713_vm1, %v16418_v33 }
0x260b   : >> { %10835 = vmatprep.mubr.msk.f32.mxu0 %vm713_vm1, %v16419_v32 }
0x260e   : >> { %10836 = vmatmul.mubr.msk.f32.gmra.mrb[6].mxu0 %vm713_vm1, %v16420_v10 }
0x26d5   : >> { %v15317_v3 = vpop.f32.mrb[0].mxu0 }
0x26d6   : >> { %v7314_v44 = vmul.f32 %v15317_v3, %v15317_v3  ;;  %v15321_v22 = vpop.f32.mrb[1].mxu0 }
0x26d7   : >> { %v7313_v5 = vmul.f32 %v15321_v22, %v15321_v22 }
0x26d8   : >> { %7331 = vrot.lane.b32.xlu1 %v7314_v44, %s12629_s25 }
0x26d9   : >> { %7329 = vrot.lane.b32.xlu0 %v7313_v5, %s12629_s25  ;;  %v15327_v8 = vpop.f32.mrb[2].mxu0 }
0x26da   : >> { %v7316_v17 = vmul.f32 %v15327_v8, %v15327_v8  ;;  %v15331_v18 = vpop.f32.mrb[3].mxu0 }
0x26db   : >> { %v7315_v1 = vmul.f32 %v15331_v18, %v15331_v18 }
0x26dc   : >> { %7335 = vrot.lane.b32.xlu1 %v7316_v17, %s12629_s25 }
0x26dd   : >> { %v15334_v16 = vpop.f32.mrb[4].mxu0 }
0x26de   : >> { %v15338_v39 = vpop.f32.mrb[5].mxu0  ;;  %v7318_v55 = vmul.f32 %v15334_v16, %v15334_v16 }
0x26df   : >> { %v7317_v12 = vmul.f32 %v15338_v39, %v15338_v39 }
0x26e0   : >> { %7333 = vrot.lane.b32.xlu1 %v7315_v1, %s12629_s25 }
0x26e1   : >> { %7337 = vrot.lane.b32.xlu0 %v7317_v12, %s12629_s25  ;;  %v15346_v59 = vpop.f32.mrb[6].mxu0 }
0x26e2   : >> { %v15348_v13 = vpop.f32.mrb[7].mxu0  ;;  %v7320_v27 = vmul.f32 %v15346_v59, %v15346_v59 }
0x26e3   : >> { %v7319_v41 = vmul.f32 %v15348_v13, %v15348_v13 }
0x26e4   : >> { %7339 = vrot.lane.b32.xlu1 %v7318_v55, %s12629_s25 }
0x26e5   : >> { %7341 = vrot.lane.b32.xlu0 %v7319_v41, %s12629_s25  ;;  %v12102_v41 = vld [vmem:[%s15434_s19] sm:$0xff]  }
0x26e6   : >> { %10846 = vmatprep.mubr.msk.bf16.mxu0 %vm713_vm1, %v12102_v41 }
0x26e8   : >> { %7343 = vrot.lane.b32.xlu1 %v7320_v27, %s12629_s25 }
0x26e9   : >> { %7363 = vperm.xlu0 %11984, %v15321_v22  }
0x26ec   : >> { %7368 = vperm.xlu1 %11985, %v15317_v3  }
0x26ed   : >> { %7475 = vperm.xlu0 %11984, %v15368_v58  }
0x26f0   : >> { %7373 = vperm.xlu1 %11985, %v15331_v18  }
0x26f1   : >> { %7383 = vperm.xlu0 %11984, %v15338_v39  }
0x26f4   : >> { %7378 = vperm.xlu1 %11985, %v15327_v8  }
0x26f5   : >> { %7490 = vperm.xlu0 %11984, %v15375_v28  }
0x26f8   : >> { %7480 = vperm.xlu1 %11985, %v15380_v53  }
0x26f9   : >> { %7393 = vperm.xlu0 %11984, %v15348_v13  }
0x26fc   : >> { %11986 = vset.pattern.permute.xlu1 %v16313_v11 }
0x26fd   : >> { %7522 = vperm.xlu1 %11986, %v15368_v58   ;;  %7500 = vperm.xlu0 %11984, %v15385_v47  }
0x2701   : >> { %7526 = vperm.xlu1 %11986, %v15380_v53   ;;  %7505 = vperm.xlu0 %11984, %v15391_v46  }
0x2705   : >> { %11987 = vset.pattern.permute.xlu1 %v16315_v40  ;;  %11992 = vset.pattern.permute.xlu0 %v16313_v11 }
0x2706   : >> { %7388 = vperm.xlu1 %11987, %v15334_v16  }
0x270a   : >> { %7485 = vperm.xlu1 %11987, %v15399_v62  }
0x270e   : >> { %11988 = vset.pattern.permute.xlu1 %v16313_v11 }
0x270f   : >> { %7530 = vperm.xlu1 %11988, %v15399_v62  }
0x2713   : >> { %7534 = vperm.xlu1 %11988, %v15375_v28  }
0x2717   : >> { %11989 = vset.pattern.permute.xlu1 %v16315_v40 }
0x2718   : >> { %7398 = vperm.xlu1 %11989, %v15346_v59  }
0x271c   : >> { %7495 = vperm.xlu1 %11989, %v15408_v50  }
0x2720   : >> { %11990 = vset.pattern.permute.xlu1 %v16313_v11 }
0x2721   : >> { %7538 = vperm.xlu1 %11990, %v15408_v50  }
0x2725   : >> { %7542 = vperm.xlu1 %11990, %v15385_v47  }
0x2729   : >> { %11991 = vset.pattern.permute.xlu1 %v16315_v40 }
0x272a   : >> { %7510 = vperm.xlu1 %11991, %v15415_v54  }
0x272e   : >> { %11993 = vset.pattern.permute.xlu1 %v16313_v11 }
0x274a   : >> { %v7332_v6 = vpop.permute.xlu1 %7331 }
0x274b   : >> { %v7354_v34 = vsub.f32 %v15317_v3, %v7332_v6  ;;  %v7330_v7 = vpop.permute.xlu0 %7329 }
0x274c   : >> { %v7353_v63 = vsub.f32 %v15321_v22, %v7330_v7  ;;  %v12631_v7 = vmov 2  }
0x274d   : >> { %v7410_v15 = vadd.f32 1e-05, %v7354_v34 }
0x274e   : >> { %v7409_v45 = vadd.f32 1e-05, %v7353_v63  ;;  %v7336_v49 = vpop.permute.xlu1 %7335 }
0x274f   : >> { %12118 = vrsqrt.f32 %v7410_v15  ;;  %v7356_v20 = vsub.f32 %v15327_v8, %v7336_v49 }
0x2750   : >> { %12120 = vrsqrt.f32 %v7409_v45 }
0x2751   : >> { %v7412_v57 = vadd.f32 1e-05, %v7356_v20 }
0x2752   : >> { %v7334_v56 = vpop.permute.xlu1 %7333 }
0x2753   : >> { %12122 = vrsqrt.f32 %v7412_v57  ;;  %v7355_v0 = vsub.f32 %v15331_v18, %v7334_v56  ;;  %v7338_v31 = vpop.permute.xlu0 %7337 }
0x2754   : >> { %v7357_v61 = vsub.f32 %v15338_v39, %v7338_v31 }
0x2755   : >> { %v7411_v48 = vadd.f32 1e-05, %v7355_v0 }
0x2756   : >> { %v7413_v26 = vadd.f32 1e-05, %v7357_v61  ;;  %v7340_v4 = vpop.permute.xlu1 %7339 }
0x2757   : >> { %12124 = vrsqrt.f32 %v7411_v48  ;;  %v7358_v24 = vsub.f32 %v15334_v16, %v7340_v4  ;;  %v7342_v9 = vpop.permute.xlu0 %7341 }
0x2758   : >> { %v7359_v23 = vsub.f32 %v15348_v13, %v7342_v9  ;;  %12126 = vrsqrt.f32 %v7413_v26 }
0x2759   : >> { %v12119_v51 = vpop.eup %12118  ;;  %v7414_v3 = vadd.f32 1e-05, %v7358_v24 }
0x275a   : >> { %v12121_v44 = vpop.eup %12120  ;;  %v7415_v22 = vadd.f32 1e-05, %v7359_v23  ;;  %v7344_v5 = vpop.permute.xlu1 %7343  ;;  %7432 = vperm.xlu0 %11992, %v12119_v51  }
0x275b   : >> { %12128 = vrsqrt.f32 %v7414_v3  ;;  %v7360_v8 = vsub.f32 %v15346_v59, %v7344_v5  ;;  %7427 = vperm.xlu1 %11993, %v12121_v44  }
0x275c   : >> { %12130 = vrsqrt.f32 %v7415_v22 }
0x275d   : >> { %v12123_v17 = vpop.eup %12122  ;;  %v7416_v18 = vadd.f32 1e-05, %v7360_v8 }
0x275e   : >> { %7442 = vperm.xlu0 %11992, %v12123_v17  }
0x275f   : >> { %12132 = vrsqrt.f32 %v7416_v18 }
0x2761   : >> { %v12125_v16 = vpop.eup %12124 }
0x2762   : >> { %7437 = vperm.xlu1 %11993, %v12125_v16   ;;  %v12127_v1 = vpop.eup %12126 }
0x2765   : >> { %v12129_v39 = vpop.eup %12128 }
0x2766   : >> { %7447 = vperm.xlu1 %11993, %v12127_v1   ;;  %7452 = vperm.xlu0 %11992, %v12129_v39   ;;  %v12131_v12 = vpop.eup %12130 }
0x2768   : >> { %v7364_v49 = vpop.permute.xlu0 %7363 }
0x2769   : >> { %v12133_v55 = vpop.eup %12132  ;;  %v7401_v44 = vsub.f32 %v12593_v60, %v7364_v49 }
0x276a   : >> { %7462 = vperm.xlu0 %11992, %v12133_v55   ;;  %7457 = vperm.xlu1 %11993, %v12131_v12  }
0x276b   : >> { %v7369_v59 = vpop.permute.xlu1 %7368 }
0x276c   : >> { %v7476_v57 = vpop.permute.xlu0 %7475  ;;  %v7402_v3 = vsub.f32 %v12589_v29, %v7369_v59 }
0x276e   : >> { %7550 = vperm.xlu0 %11992, %v15415_v54   ;;  %7546 = vperm.xlu1 %11993, %v15391_v46  }
0x276f   : >> { %v7374_v13 = vpop.permute.xlu1 %7373 }
0x2770   : >> { %v7384_v0 = vpop.permute.xlu0 %7383 }
0x2772   : >> { %11994 = vset.pattern.permute.xlu1 %v12631_v7  ;;  %11995 = vset.pattern.permute.xlu0 %v12631_v7  ;;  %v7403_v7 = vsub.f32 %v12585_v19, %v7374_v13 }
0x2773   : >> { %v7379_v27 = vpop.permute.xlu1 %7378  ;;  %7633 = vperm.xlu1 %11994, %v15368_v58   ;;  %7641 = vperm.xlu0 %11995, %v15399_v62  }
0x2774   : >> { %v7491_v48 = vpop.permute.xlu0 %7490  ;;  %v7404_v18 = vsub.f32 %v12581_v38, %v7379_v27 }
0x2777   : >> { %v7481_v6 = vpop.permute.xlu1 %7480  ;;  %7637 = vperm.xlu1 %11994, %v15380_v53   ;;  %7653 = vperm.xlu0 %11995, %v15385_v47  }
0x2778   : >> { %v7394_v4 = vpop.permute.xlu0 %7393 }
0x277b   : >> { %7645 = vperm.xlu1 %11994, %v15375_v28   ;;  %7661 = vperm.xlu0 %11995, %v15415_v54  }
0x277c   : >> { %v7523_v34 = vpop.permute.xlu1 %7522  ;;  %v7501_v24 = vpop.permute.xlu0 %7500 }
0x277f   : >> { %7649 = vperm.xlu1 %11994, %v15408_v50  }
0x2780   : >> { %v7527_v63 = vpop.permute.xlu1 %7526  ;;  %v7506_v51 = vpop.permute.xlu0 %7505 }
0x2783   : >> { %7657 = vperm.xlu1 %11994, %v15391_v46  }
0x2785   : >> { %v7389_v15 = vpop.permute.xlu1 %7388 }
0x2787   : >> { %11996 = vset.pattern.permute.xlu1 %v16315_v40 }
0x2789   : >> { %v7486_v45 = vpop.permute.xlu1 %7485 }
0x278e   : >> { %v7531_v20 = vpop.permute.xlu1 %7530 }
0x2792   : >> { %v7535_v56 = vpop.permute.xlu1 %7534 }
0x2797   : >> { %v7399_v31 = vpop.permute.xlu1 %7398 }
0x279b   : >> { %v7496_v61 = vpop.permute.xlu1 %7495 }
0x27a0   : >> { %v7539_v26 = vpop.permute.xlu1 %7538 }
0x27a4   : >> { %v7543_v9 = vpop.permute.xlu1 %7542 }
0x27a9   : >> { %v7511_v23 = vpop.permute.xlu1 %7510 }
0x27d9   : >> { %v7433_v22 = vpop.permute.xlu0 %7432 }
0x27da   : >> { %v7466_v5 = vmul.f32 %v7433_v22, %v7402_v3  ;;  %v7428_v8 = vpop.permute.xlu1 %7427 }
0x27db   : >> { %v7465_v17 = vmul.f32 %v7428_v8, %v7401_v44 }
0x27dc   : >> { %v7514_v16 = vmul.f32 %v7481_v6, %v7466_v5  ;;  %v7405_v6 = vsub.f32 %v12577_v25, %v7384_v0 }
0x27dd   : >> { %v7513_v1 = vmul.f32 %v7476_v57, %v7465_v17  ;;  %v7443_v39 = vpop.permute.xlu0 %7442  ;;  %v7407_v17 = vsub.f32 %v12569_v43, %v7394_v4 }
0x27de   : >> { %v15450_v12 = vadd.f32 %v7527_v63, %v7514_v16  ;;  %v7468_v55 = vmul.f32 %v7443_v39, %v7404_v18  ;;  %v7406_v63 = vsub.f32 %v12573_v2, %v7389_v15  ;;  %v7408_v16 = vsub.f32 %v12565_v37, %v7399_v31 }
0x27df   : >> { %v15452_v41 = vadd.f32 %v7523_v34, %v7513_v1 }
0x27e0   : >> { %v9906_v59 = vmul.f32 -1.442695, %v15450_v12  ;;  %v7516_v11 = vmul.f32 %v7491_v48, %v7468_v55 }
0x27e1   : >> { %v9905_v49 = vmul.f32 -1.442695, %v15452_v41  ;;  %v7438_v3 = vpop.permute.xlu1 %7437 }
0x27e2   : >> { %12134 = vpow2.f32 %v9906_v59  ;;  %v15457_v44 = vadd.f32 %v7535_v56, %v7516_v11  ;;  %v7467_v27 = vmul.f32 %v7438_v3, %v7403_v7 }
0x27e3   : >> { %12136 = vpow2.f32 %v9905_v49 }
0x27e4   : >> { %v9908_v34 = vmul.f32 -1.442695, %v15457_v44  ;;  %v7515_v57 = vmul.f32 %v7486_v45, %v7467_v27 }
0x27e5   : >> { %v7448_v22 = vpop.permute.xlu1 %7447  ;;  %v7453_v13 = vpop.permute.xlu0 %7452 }
0x27e6   : >> { %12138 = vpow2.f32 %v9908_v34  ;;  %v7555_v5 = vadd.f32 %v7531_v20, %v7515_v57  ;;  %v7469_v48 = vmul.f32 %v7448_v22, %v7405_v6  ;;  %v7470_v8 = vmul.f32 %v7453_v13, %v7406_v63 }
0x27e8   : >> { %v9907_v18 = vmul.f32 -1.442695, %v7555_v5  ;;  %v7517_v11 = vmul.f32 %v7496_v61, %v7469_v48  ;;  %v7518_v56 = vmul.f32 %v7501_v24, %v7470_v8 }
0x27e9   : >> { %v7458_v1 = vpop.permute.xlu1 %7457  ;;  %v7463_v0 = vpop.permute.xlu0 %7462 }
0x27ea   : >> { %12140 = vpow2.f32 %v9907_v18  ;;  %v7557_v15 = vadd.f32 %v7539_v26, %v7517_v11  ;;  %v7558_v39 = vadd.f32 %v7543_v9, %v7518_v56  ;;  %v7471_v55 = vmul.f32 %v7458_v1, %v7407_v17 }
0x27eb   : >> { %v7472_v45 = vmul.f32 %v7463_v0, %v7408_v16 }
0x27ec   : >> { %v12135_v7 = vpop.eup %12134  ;;  %v9909_v59 = vmul.f32 -1.442695, %v7557_v15  ;;  %v7519_v49 = vmul.f32 %v7506_v51, %v7471_v55  ;;  %v9910_v27 = vmul.f32 -1.442695, %v7558_v39 }
0x27ed   : >> { %v12137_v20 = vpop.eup %12136  ;;  %v7586_v3 = vadd.f32 1.0, %v12135_v7  ;;  %v7547_v6 = vpop.permute.xlu1 %7546  ;;  %v7520_v4 = vmul.f32 %v7511_v23, %v7472_v45 }
0x27ee   : >> { %v7551_v63 = vpop.permute.xlu0 %7550  ;;  %v7585_v61 = vadd.f32 1.0, %v12137_v20  ;;  %12142 = vpow2.f32 %v9909_v59  ;;  %v7559_v24 = vadd.f32 %v7547_v6, %v7519_v49 }
0x27ef   : >> { %12144 = vrcp.f32 %v7586_v3  ;;  %v7560_v31 = vadd.f32 %v7551_v63, %v7520_v4 }
0x27f0   : >> { %v12139_v34 = vpop.eup %12138  ;;  %12146 = vrcp.f32 %v7585_v61  ;;  %v9911_v26 = vmul.f32 -1.442695, %v7559_v24 }
0x27f1   : >> { %v7588_v9 = vadd.f32 1.0, %v12139_v34  ;;  %12148 = vpow2.f32 %v9910_v27  ;;  %v9912_v57 = vmul.f32 -1.442695, %v7560_v31 }
0x27f2   : >> { %12150 = vpow2.f32 %v9911_v26 }
0x27f3   : >> { %12152 = vpow2.f32 %v9912_v57  ;;  %v7642_v57 = vpop.permute.xlu0 %7641 }
0x27f4   : >> { %v12141_v22 = vpop.eup %12140  ;;  %12154 = vrcp.f32 %v7588_v9  ;;  %v12104_v9 = vld [vmem:[%s15434_s19 + $0x10] sm:$0xff]  }
0x27f5   : >> { %v7587_v51 = vadd.f32 1.0, %v12141_v22 }
0x27f7   : >> { %12156 = vrcp.f32 %v7587_v51 }
0x27f8   : >> { %v12143_v13 = vpop.eup %12142 }
0x27f9   : >> { %v12145_v23 = vpop.eup %12144  ;;  %v7589_v48 = vadd.f32 1.0, %v12143_v13 }
0x27fa   : >> { %v12147_v8 = vpop.eup %12146  ;;  %v7610_v17 = vmul.f32 %v12145_v23, %v15450_v12 }
0x27fb   : >> { %v12149_v18 = vpop.eup %12148  ;;  %12158 = vrcp.f32 %v7589_v48  ;;  %v7609_v11 = vmul.f32 %v12147_v8, %v15452_v41 }
0x27fc   : >> { %v12151_v56 = vpop.eup %12150  ;;  %v7590_v16 = vadd.f32 1.0, %v12149_v18 }
0x27fd   : >> { %v7591_v1 = vadd.f32 1.0, %v12151_v56  ;;  %v7628_v0 = vpack.c.bf16 %v7610_v17, %v7609_v11  ;;  %v12153_v55 = vpop.eup %12152 }
0x27fe   : >> { %12160 = vrcp.f32 %v7590_v16  ;;  %v12155_v45 = vpop.eup %12154  ;;  %v7592_v7 = vadd.f32 1.0, %v12153_v55 }
0x27ff   : >> { %12162 = vrcp.f32 %v7591_v1  ;;  %10838 = vmatprep.subr.bf16.mxu0 %v7628_v0  ;;  %v7612_v12 = vmul.f32 %v12155_v45, %v15457_v44  ;;  %v12103_v44 = vld [vmem:[%s15434_s19 + $0x8] sm:$0xff]  }
0x2800   : >> { %10839 = vmatpush3.bf16.msra.mxu0 %v7628_v0  ;;  %12164 = vrcp.f32 %v7592_v7 }
0x2801   : >> { %v12157_v59 = vpop.eup %12156 }
0x2802   : >> { %v7611_v49 = vmul.f32 %v12157_v59, %v7555_v5 }
0x2804   : >> { %v7629_v20 = vpack.c.bf16 %v7612_v12, %v7611_v49 }
0x2805   : >> { %v12159_v3 = vpop.eup %12158 }
0x2806   : >> { %10840 = vmatprep.subr.bf16.mxu0 %v7629_v20  ;;  %v7613_v41 = vmul.f32 %v12159_v3, %v7557_v15  ;;  %v12105_v15 = vld [vmem:[%s15434_s19 + $0x18] sm:$0xff]  }
0x2807   : >> { %10841 = vmatpush3.bf16.msra.mxu0 %v7629_v20 }
0x2808   : >> { %v12161_v27 = vpop.eup %12160 }
0x2809   : >> { %v12163_v6 = vpop.eup %12162  ;;  %v7614_v4 = vmul.f32 %v12161_v27, %v7558_v39  ;;  %v7634_v39 = vpop.permute.xlu1 %7633 }
0x280a   : >> { %v7615_v63 = vmul.f32 %v12163_v6, %v7559_v24  ;;  %v12165_v61 = vpop.eup %12164 }
0x280b   : >> { %v7630_v34 = vpack.c.bf16 %v7614_v4, %v7613_v41  ;;  %v7616_v26 = vmul.f32 %v12165_v61, %v7560_v31  ;;  %v7654_v41 = vpop.permute.xlu0 %7653 }
0x280d   : >> { %10842 = vmatprep.subr.bf16.mxu0 %v7630_v34  ;;  %v7631_v5 = vpack.c.bf16 %v7616_v26, %v7615_v63  ;;  %v7638_v24 = vpop.permute.xlu1 %7637 }
0x280e   : >> { %10843 = vmatpush3.bf16.msra.mxu0 %v7630_v34 }
0x280f   : >> { %10844 = vmatprep.subr.bf16.mxu0 %v7631_v5  ;;  %v7662_v26 = vpop.permute.xlu0 %7661 }
0x2811   : >> { %v7646_v31 = vpop.permute.xlu1 %7645 }
0x2812   : >> { %10845 = vmatpush3.bf16.msra.mxu0 %v7631_v5 }
0x2815   : >> { %10847 = vmatmul.mubr.msk.bf16.vlgmr.msra.gmra.mrb[8].mxu0 %vm713_vm1, %v12103_v44  ;;  %v7650_v11 = vpop.permute.xlu1 %7649 }
0x2816   : >> { %10850 = vmatprep.mubr.msk.bf16.mxu0 %vm713_vm1, %v12104_v9 }
0x2819   : >> { %v7658_v59 = vpop.permute.xlu1 %7657 }
0x281d   : >> { %10851 = vmatmul.mubr.msk.bf16.gmra.mrb[12].mxu0 %vm713_vm1, %v12105_v15 }
0x281e   : >> { %10870 = vmatprep.mubr.msk.f32.mxu0 %vm713_vm1, %v16413_v21 }
0x28e8   : >> { %v10848_v22 = vpop.f32.mrb[8].mxu0 }
0x28e9   : >> { %v15475_v51 = vadd.f32 %v10848_v22, %v7642_v57  ;;  %v7730_v13 = vpop.f32.mrb[9].mxu0 }
0x28ea   : >> { %v10849_v23 = vpop.f32.mrb[10].mxu0  ;;  %v15477_v48 = vadd.f32 %v7730_v13, %v7634_v39 }
0x28eb   : >> { %v15479_v8 = vadd.f32 %v10849_v23, %v7646_v31  ;;  %v7733_v17 = vpop.f32.mrb[11].mxu0  ;;  %v7767_v18 = vsel %vm647_vm0, %v15475_v51, 0.0  ;;  %v7787_v1 = vmul.f32 %v15475_v51, %v15475_v51 }
0x28ec   : >> { %7768 = vadd.xlane.f32.xlu1 %v7767_v18  ;;  %v15483_v21 = vadd.f32 %v7733_v17, %v7638_v24  ;;  %v7761_v16 = vsel %vm647_vm0, %v15477_v48, 0.0  ;;  %v7785_v7 = vmul.f32 %v15477_v48, %v15477_v48 }
0x28ed   : >> { %v7770_v56 = vsel %vm647_vm0, %v15479_v8, 0.0  ;;  %v7799_v3 = vsel %vm647_vm0, %v7787_v1, 0.0  ;;  %v7788_v6 = vmul.f32 %v15479_v8, %v15479_v8 }
0x28ee   : >> { %7771 = vadd.xlane.f32.xlu0 %v7770_v56  ;;  %v7764_v45 = vsel %vm647_vm0, %v15483_v21, 0.0  ;;  %v7793_v27 = vsel %vm647_vm0, %v7785_v7, 0.0  ;;  %v7786_v34 = vmul.f32 %v15483_v21, %v15483_v21 }
0x28ef   : >> { %v7802_v61 = vsel %vm647_vm0, %v7788_v6, 0.0 }
0x28f0   : >> { %v10852_v0 = vpop.f32.mrb[12].mxu0  ;;  %7762 = vadd.xlane.f32.xlu1 %v7761_v16  ;;  %v7796_v15 = vsel %vm647_vm0, %v7786_v34, 0.0 }
0x28f1   : >> { %v7746_v55 = vpop.f32.mrb[13].mxu0  ;;  %v15495_v12 = vadd.f32 %v10852_v0, %v7658_v59 }
0x28f2   : >> { %v10853_v49 = vpop.f32.mrb[14].mxu0  ;;  %7765 = vadd.xlane.f32.xlu0 %v7764_v45  ;;  %v15501_v4 = vadd.f32 %v7746_v55, %v7650_v11 }
0x28f3   : >> { %v7749_v20 = vpop.f32.mrb[15].mxu0  ;;  %v7779_v63 = vsel %vm647_vm0, %v15495_v12, 0.0  ;;  %v15512_v9 = vadd.f32 %v10853_v49, %v7662_v26  ;;  %v7791_v24 = vmul.f32 %v15495_v12, %v15495_v12 }
0x28f4   : >> { %7800 = vadd.xlane.f32.xlu1 %v7799_v3  ;;  %v7773_v5 = vsel %vm647_vm0, %v15501_v4, 0.0  ;;  %v7789_v44 = vmul.f32 %v15501_v4, %v15501_v4  ;;  %v15518_v31 = vadd.f32 %v7749_v20, %v7654_v41 }
0x28f5   : >> { %v7782_v57 = vsel %vm647_vm0, %v15512_v9, 0.0  ;;  %v7811_v22 = vsel %vm647_vm0, %v7791_v24, 0.0  ;;  %v7792_v18 = vmul.f32 %v15512_v9, %v15512_v9 }
0x28f6   : >> { %7794 = vadd.xlane.f32.xlu0 %v7793_v27  ;;  %v7805_v39 = vsel %vm647_vm0, %v7789_v44, 0.0  ;;  %v7776_v13 = vsel %vm647_vm0, %v15518_v31, 0.0  ;;  %v7790_v23 = vmul.f32 %v15518_v31, %v15518_v31 }
0x28f7   : >> { %v7814_v11 = vsel %vm647_vm0, %v7792_v18, 0.0  ;;  %v12632_v18 = vmov 4  }
0x28f8   : >> { %7780 = vadd.xlane.f32.xlu1 %v7779_v63  ;;  %v7808_v17 = vsel %vm647_vm0, %v7790_v23, 0.0  ;;  %12003 = vset.pattern.permute.xlu0 %v12632_v18 }
0x28fa   : >> { %7803 = vadd.xlane.f32.xlu0 %v7802_v61 }
0x28fc   : >> { %7774 = vadd.xlane.f32.xlu1 %v7773_v5 }
0x28fe   : >> { %7797 = vadd.xlane.f32.xlu0 %v7796_v15 }
0x2900   : >> { %7806 = vadd.xlane.f32.xlu1 %v7805_v39 }
0x2902   : >> { %7783 = vadd.xlane.f32.xlu0 %v7782_v57 }
0x2904   : >> { %7812 = vadd.xlane.f32.xlu1 %v7811_v22 }
0x2906   : >> { %7777 = vadd.xlane.f32.xlu0 %v7776_v13 }
0x290a   : >> { %7809 = vadd.xlane.f32.xlu0 %v7808_v17 }
0x290e   : >> { %7815 = vadd.xlane.f32.xlu0 %v7814_v11 }
0x2979   : >> { %v7769_v56 = vpop.xlane.xlu1 %7768 }
0x297b   : >> { %v7772_v16 = vpop.xlane.xlu0 %7771 }
0x297d   : >> { %v7763_v1 = vpop.xlane.xlu1 %7762 }
0x297f   : >> { %v7766_v0 = vpop.xlane.xlu0 %7765 }
0x2981   : >> { %v7801_v55 = vpop.xlane.xlu1 %7800 }
0x2982   : >> { %v7819_v63 = vsel %vm704_vm2, %v7769_v56, %v7801_v55  ;;  %v7109_v55 = vld [vmem:[%s15587_s29] sm:$0xff] }
0x2983   : >> { %v7795_v45 = vpop.xlane.xlu0 %7794 }
0x2984   : >> { %v7817_v20 = vsel %vm704_vm2, %v7763_v1, %v7795_v45  ;;  %v8170_v45 = vadd.f32 1.0, %v7109_v55 }
0x2985   : >> { %v7781_v7 = vpop.xlane.xlu1 %7780 }
0x2987   : >> { %v7804_v59 = vpop.xlane.xlu0 %7803 }
0x2988   : >> { %v7820_v3 = vsel %vm704_vm2, %v7772_v16, %v7804_v59 }
0x2989   : >> { %v7775_v27 = vpop.xlane.xlu1 %7774  ;;  %v11026_v61 = vpack.c.bf16 %v7820_v3, %v7819_v63  ;;  %v7112_v63 = vld [vmem:[%s15587_s29 + $0x18] sm:$0xff] }
0x298b   : >> { %v7798_v49 = vpop.xlane.xlu0 %7797 }
0x298c   : >> { %v7818_v41 = vsel %vm704_vm2, %v7766_v0, %v7798_v49 }
0x298d   : >> { %v11022_v6 = vpack.c.bf16 %v7818_v41, %v7817_v20  ;;  %v7807_v26 = vpop.xlane.xlu1 %7806  ;;  %v16421_v20 = vmov 1   ;;  %v7113_v41 = vld [vmem:[%s15587_s29 + $0x20] sm:$0xff] }
0x298e   : >> { %v7821_v15 = vsel %vm704_vm2, %v7775_v27, %v7807_v26  ;;  %v7111_v27 = vld [vmem:[%s15587_s29 + $0x10] sm:$0xff] }
0x298f   : >> { %11023 = vmatprep.subr.bf16.mxu0 %v11022_v6  ;;  %v7784_v34 = vpop.xlane.xlu0 %7783 }
0x2990   : >> { %11025 = vmatpush3.bf16.msra.mxu0 %v11022_v6  ;;  %v8172_v6 = vadd.f32 1.0, %v7111_v27 }
0x2991   : >> { %11027 = vmatprep.subr.bf16.mxu0 %v11026_v61  ;;  %v7813_v24 = vpop.xlane.xlu1 %7812 }
0x2992   : >> { %v7823_v13 = vsel %vm704_vm2, %v7781_v7, %v7813_v24  ;;  %v7110_v7 = vld [vmem:[%s15587_s29 + $0x8] sm:$0xff] }
0x2993   : >> { %v7778_v5 = vpop.xlane.xlu0 %7777  ;;  %v8171_v59 = vadd.f32 1.0, %v7110_v7 }
0x2994   : >> { %11029 = vmatpush3.bf16.msra.mxu0 %v11026_v61  ;;  %v8173_v61 = vadd.f32 1.0, %v7112_v63 }
0x2997   : >> { %v7810_v44 = vpop.xlane.xlu0 %7809 }
0x2998   : >> { %v7822_v39 = vsel %vm704_vm2, %v7778_v5, %v7810_v44  ;;  %v7115_v44 = vld [vmem:[%s15587_s29 + $0x30] sm:$0xff] }
0x2999   : >> { %v11030_v57 = vpack.c.bf16 %v7822_v39, %v7821_v15  ;;  %v8176_v39 = vadd.f32 1.0, %v7115_v44 }
0x299b   : >> { %11031 = vmatprep.subr.bf16.mxu0 %v11030_v57  ;;  %v7816_v22 = vpop.xlane.xlu0 %7815 }
0x299c   : >> { %v7824_v23 = vsel %vm704_vm2, %v7784_v34, %v7816_v22  ;;  %11033 = vmatpush3.bf16.msra.mxu0 %v11030_v57  ;;  %v8174_v34 = vadd.f32 1.0, %v7113_v41 }
0x299d   : >> { %v11034_v17 = vpack.c.bf16 %v7824_v23, %v7823_v13 }
0x299f   : >> { %11035 = vmatprep.subr.bf16.mxu0 %v11034_v17 }
0x29a0   : >> { %11037 = vmatpush3.bf16.msra.mxu0 %v11034_v17 }
0x29a3   : >> { %10871 = vmatmul.mubr.msk.f32.vlgmr.msra.gmra.mrb[16].mxu0 %vm713_vm1, %v16414_v42 }
0x29a4   : >> { %10873 = vmatprep.mubr.msk.f32.mxu0 %vm713_vm1, %v16415_v30 }
0x29a7   : >> { %10874 = vmatmul.mubr.msk.f32.gmra.mrb[18].mxu0 %vm713_vm1, %v16416_v36 }
0x29a8   : >> { %10876 = vmatprep.mubr.msk.f32.mxu0 %vm713_vm1, %v16417_v52 }
0x29ab   : >> { %10877 = vmatmul.mubr.msk.f32.gmra.mrb[20].mxu0 %vm713_vm1, %v16418_v33 }
0x29ac   : >> { %10879 = vmatprep.mubr.msk.f32.mxu0 %vm713_vm1, %v16419_v32  ;;  %v12633_v32 = vmov 3  }
0x29af   : >> { %10880 = vmatmul.mubr.msk.f32.gmra.mrb[22].mxu0 %vm713_vm1, %v16420_v10 }
0x2a76   : >> { %v15554_v42 = vpop.f32.mrb[16].mxu0 }
0x2a77   : >> { %v7931_v30 = vmul.f32 %v15554_v42, %v15554_v42  ;;  %v15558_v36 = vpop.f32.mrb[17].mxu0 }
0x2a78   : >> { %7980 = vperm.xlu1 %11996, %v15558_v36  }
0x2a79   : >> { %7948 = vrot.lane.b32.xlu0 %v7931_v30, %s12629_s25 }
0x2a7a   : >> { %v15562_v52 = vpop.f32.mrb[18].mxu0 }
0x2a7b   : >> { %v15564_v33 = vpop.f32.mrb[19].mxu0 }
0x2a7c   : >> { %11997 = vset.pattern.permute.xlu1 %v12633_v32 }
0x2a7d   : >> { %8095 = vperm.xlu1 %11997, %v15380_v53  }
0x2a7e   : >> { %v15568_v10 = vpop.f32.mrb[20].mxu0 }
0x2a7f   : >> { %v7935_v11 = vmul.f32 %v15568_v10, %v15568_v10  ;;  %v15572_v56 = vpop.f32.mrb[21].mxu0 }
0x2a81   : >> { %11998 = vset.pattern.permute.xlu1 %v12632_v18  ;;  %7956 = vrot.lane.b32.xlu0 %v7935_v11, %s12629_s25 }
0x2a82   : >> { %8131 = vperm.xlu1 %11998, %v15368_v58   ;;  %v15577_v16 = vpop.f32.mrb[22].mxu0 }
0x2a83   : >> { %v7937_v1 = vmul.f32 %v15577_v16, %v15577_v16  ;;  %v15581_v0 = vpop.f32.mrb[23].mxu0 }
0x2a84   : >> { %v7936_v3 = vmul.f32 %v15581_v0, %v15581_v0 }
0x2a85   : >> { %7960 = vrot.lane.b32.xlu0 %v7937_v1, %s12629_s25 }
0x2a86   : >> { %8135 = vperm.xlu1 %11998, %v15380_v53   ;;  %v7930_v53 = vmul.f32 %v15558_v36, %v15558_v36 }
0x2a89   : >> { %8143 = vperm.xlu0 %12003, %v15375_v28  }
0x2a8a   : >> { %11999 = vset.pattern.permute.xlu1 %v12633_v32 }
0x2a8b   : >> { %8099 = vperm.xlu1 %11999, %v15399_v62  }
0x2a8d   : >> { %8151 = vperm.xlu0 %12003, %v15385_v47  }
0x2a8f   : >> { %12000 = vset.pattern.permute.xlu1 %v16315_v40 }
0x2a90   : >> { %8180 = vperm.xlu1 %12000, %v8170_v45  }
0x2a91   : >> { %12009 = vset.pattern.permute.xlu0 %v12633_v32 }
0x2a92   : >> { %8091 = vperm.xlu0 %12009, %v15368_v58   ;;  %v7933_v58 = vmul.f32 %v15562_v52, %v15562_v52 }
0x2a94   : >> { %8185 = vperm.xlu1 %12000, %v8171_v59  }
0x2a96   : >> { %8103 = vperm.xlu0 %12009, %v15375_v28   ;;  %v7932_v28 = vmul.f32 %v15564_v33, %v15564_v33 }
0x2a98   : >> { %12001 = vset.pattern.permute.xlu1 %v12632_v18 }
0x2a99   : >> { %8139 = vperm.xlu1 %12001, %v15399_v62   ;;  %v7934_v62 = vmul.f32 %v15572_v56, %v15572_v56 }
0x2a9a   : >> { %8111 = vperm.xlu0 %12009, %v15385_v47   ;;  %v7114_v47 = vld [vmem:[%s15587_s29 + $0x28] sm:$0xff] }
0x2a9b   : >> { %v8175_v49 = vadd.f32 1.0, %v7114_v47 }
0x2a9d   : >> { %7946 = vrot.lane.b32.xlu1 %v7930_v53, %s12629_s25 }
0x2a9e   : >> { %8115 = vperm.xlu0 %12009, %v15391_v46   ;;  %12002 = vset.pattern.permute.xlu1 %v16315_v40 }
0x2aa1   : >> { %7995 = vperm.xlu1 %12002, %v15562_v52  }
0x2aa2   : >> { %12011 = vset.pattern.permute.xlu0 %v16315_v40 }
0x2aa3   : >> { %7985 = vperm.xlu0 %12011, %v15554_v42  }
0x2aa5   : >> { %7952 = vrot.lane.b32.xlu1 %v7933_v58, %s12629_s25 }
0x2aa7   : >> { %7990 = vperm.xlu0 %12011, %v15564_v33  }
0x2aa9   : >> { %7950 = vrot.lane.b32.xlu1 %v7932_v28, %s12629_s25 }
0x2aab   : >> { %8000 = vperm.xlu0 %12011, %v15572_v56  }
0x2aad   : >> { %8005 = vperm.xlu1 %12002, %v15568_v10  }
0x2aaf   : >> { %8010 = vperm.xlu0 %12011, %v15581_v0  }
0x2ab1   : >> { %7954 = vrot.lane.b32.xlu1 %v7934_v62, %s12629_s25 }
0x2ab2   : >> { %12004 = vset.pattern.permute.xlu1 %v16421_v20 }
0x2ab3   : >> { %8205 = vperm.xlu0 %12011, %v8175_v49  }
0x2ab5   : >> { %8228 = vperm.xlu1 %12004, %v7109_v55  }
0x2ab7   : >> { %12015 = vset.pattern.permute.xlu0 %v16421_v20 }
0x2ab8   : >> { %8248 = vperm.xlu0 %12015, %v7113_v41  }
0x2ab9   : >> { %7958 = vrot.lane.b32.xlu1 %v7936_v3, %s12629_s25  ;;  %s12635_s25 = smov 113  }
0x2abd   : >> { %8233 = vperm.xlu1 %12004, %v7110_v7  }
0x2ac1   : >> { %12005 = vset.pattern.permute.xlu1 %v16315_v40 }
0x2ac2   : >> { %8015 = vperm.xlu1 %12005, %v15577_v16  }
0x2ac6   : >> { %12006 = vset.pattern.permute.xlu1 %v12633_v32 }
0x2ac7   : >> { %8107 = vperm.xlu1 %12006, %v15408_v50  }
0x2acb   : >> { %12007 = vset.pattern.permute.xlu1 %v16315_v40 }
0x2acc   : >> { %8190 = vperm.xlu1 %12007, %v8172_v6  }
0x2ad0   : >> { %8195 = vperm.xlu1 %12007, %v8173_v61  }
0x2ad4   : >> { %12008 = vset.pattern.permute.xlu1 %v12632_v18 }
0x2ad5   : >> { %8147 = vperm.xlu1 %12008, %v15408_v50  }
0x2ad9   : >> { %12010 = vset.pattern.permute.xlu1 %v16421_v20 }
0x2ada   : >> { %8238 = vperm.xlu1 %12010, %v7111_v27  }
0x2ade   : >> { %8243 = vperm.xlu1 %12010, %v7112_v63  }
0x2ae2   : >> { %12012 = vset.pattern.permute.xlu1 %v12633_v32 }
0x2ae3   : >> { %8119 = vperm.xlu1 %12012, %v15415_v54  }
0x2ae7   : >> { %12013 = vset.pattern.permute.xlu1 %v16315_v40 }
0x2ae8   : >> { %8200 = vperm.xlu1 %12013, %v8174_v34  }
0x2aeb   : >> { %v7949_v26 = vpop.permute.xlu0 %7948 }
0x2aec   : >> { %12014 = vset.pattern.permute.xlu1 %v12632_v18  ;;  %v7971_v5 = vsub.f32 %v15554_v42, %v7949_v26 }
0x2aed   : >> { %8155 = vperm.xlu1 %12014, %v15391_v46  }
0x2aee   : >> { %v8027_v50 = vadd.f32 1e-05, %v7971_v5  ;;  %v7116_v5 = vld [vmem:[%s15587_s29 + $0x38] sm:$0xff] }
0x2af0   : >> { %12166 = vrsqrt.f32 %v8027_v50 }
0x2af1   : >> { %8159 = vperm.xlu1 %12014, %v15415_v54  }
0x2af3   : >> { %v7957_v11 = vpop.permute.xlu0 %7956 }
0x2af4   : >> { %v7975_v59 = vsub.f32 %v15568_v10, %v7957_v11 }
0x2af5   : >> { %12016 = vset.pattern.permute.xlu1 %v16421_v20 }
0x2af6   : >> { %8253 = vperm.xlu1 %12016, %v7114_v47   ;;  %v8031_v49 = vadd.f32 1e-05, %v7975_v59 }
0x2af7   : >> { %v15649_v15 = vpop.permute.xlu1 %7980  ;;  %v7961_v53 = vpop.permute.xlu0 %7960 }
0x2afa   : >> { %12017 = vset.pattern.permute.xlu1 %v16315_v40  ;;  %v12167_v57 = vpop.eup %12166 }
0x2afb   : >> { %8210 = vperm.xlu1 %12017, %v8176_v39   ;;  %v8177_v39 = vadd.f32 1.0, %v7116_v5 }
0x2afc   : >> { %v15652_v24 = vpop.permute.xlu1 %8095 }
0x2aff   : >> { %12018 = vset.pattern.permute.xlu1 %v16421_v20 }
0x2b00   : >> { %8049 = vperm.xlu1 %12018, %v12167_v57  }
0x2b01   : >> { %v15655_v46 = vpop.permute.xlu1 %8131 }
0x2b05   : >> { %v15657_v54 = vpop.permute.xlu1 %8135 }
0x2b0a   : >> { %v15659_v22 = vpop.permute.xlu1 %8099 }
0x2b0f   : >> { %v15661_v13 = vpop.permute.xlu1 %8180 }
0x2b13   : >> { %v15663_v23 = vpop.permute.xlu1 %8185 }
0x2b18   : >> { %v15665_v17 = vpop.permute.xlu1 %8139 }
0x2b1c   : >> { %v7947_v18 = vpop.permute.xlu1 %7946 }
0x2b1d   : >> { %v7970_v42 = vsub.f32 %v15558_v36, %v7947_v18  ;;  %v7977_v36 = vsub.f32 %v15577_v16, %v7961_v53 }
0x2b1f   : >> { %v8026_v30 = vadd.f32 1e-05, %v7970_v42  ;;  %v8033_v20 = vadd.f32 1e-05, %v7977_v36 }
0x2b20   : >> { %v15668_v32 = vpop.permute.xlu1 %7995 }
0x2b21   : >> { %12168 = vrsqrt.f32 %v8026_v30 }
0x2b24   : >> { %v7953_v1 = vpop.permute.xlu1 %7952 }
0x2b25   : >> { %v7973_v55 = vsub.f32 %v15562_v52, %v7953_v1 }
0x2b27   : >> { %v8029_v45 = vadd.f32 1e-05, %v7973_v55 }
0x2b28   : >> { %v7951_v7 = vpop.permute.xlu1 %7950 }
0x2b29   : >> { %12170 = vrsqrt.f32 %v8029_v45  ;;  %v7972_v58 = vsub.f32 %v15564_v33, %v7951_v7 }
0x2b2b   : >> { %v12169_v28 = vpop.eup %12168  ;;  %v8028_v47 = vadd.f32 1e-05, %v7972_v58 }
0x2b2c   : >> { %v15674_v62 = vpop.permute.xlu1 %8005  ;;  %8044 = vperm.xlu1 %12018, %v12169_v28  }
0x2b2d   : >> { %12172 = vrsqrt.f32 %v8028_v47 }
0x2b2e   : >> { %12174 = vrsqrt.f32 %v8031_v49 }
0x2b2f   : >> { %12176 = vrsqrt.f32 %v8033_v20 }
0x2b30   : >> { %v7955_v3 = vpop.permute.xlu1 %7954 }
0x2b31   : >> { %v7974_v52 = vsub.f32 %v15572_v56, %v7955_v3 }
0x2b33   : >> { %v12171_v41 = vpop.eup %12170  ;;  %v8030_v10 = vadd.f32 1e-05, %v7974_v52 }
0x2b34   : >> { %v15677_v27 = vpop.permute.xlu1 %8228  ;;  %8059 = vperm.xlu0 %12015, %v12171_v41  }
0x2b35   : >> { %12178 = vrsqrt.f32 %v8030_v10 }
0x2b37   : >> { %v12173_v33 = vpop.eup %12172 }
0x2b38   : >> { %8054 = vperm.xlu1 %12018, %v12173_v33   ;;  %v7959_v16 = vpop.permute.xlu1 %7958  ;;  %v12175_v63 = vpop.eup %12174 }
0x2b39   : >> { %v7976_v6 = vsub.f32 %v15581_v0, %v7959_v16  ;;  %v12177_v34 = vpop.eup %12176 }
0x2b3b   : >> { %v8032_v61 = vadd.f32 1e-05, %v7976_v6 }
0x2b3c   : >> { %8069 = vperm.xlu1 %12018, %v12175_v63   ;;  %v8234_v56 = vpop.permute.xlu1 %8233 }
0x2b3d   : >> { %12180 = vrsqrt.f32 %v8032_v61 }
0x2b3f   : >> { %v12179_v26 = vpop.eup %12178 }
0x2b40   : >> { %8064 = vperm.xlu0 %12015, %v12179_v26   ;;  %8079 = vperm.xlu1 %12018, %v12177_v34  }
0x2b41   : >> { %v15681_v57 = vpop.permute.xlu1 %8015 }
0x2b44   : >> { %8258 = vperm.xlu1 %12018, %v7115_v44   ;;  %v8144_v44 = vpop.permute.xlu0 %8143 }
0x2b46   : >> { %v15684_v0 = vpop.permute.xlu1 %8107 }
0x2b47   : >> { %v12181_v50 = vpop.eup %12180 }
0x2b48   : >> { %8263 = vperm.xlu1 %12018, %v7116_v5   ;;  %8074 = vperm.xlu0 %12015, %v12181_v50   ;;  %v8152_v45 = vpop.permute.xlu0 %8151  ;;  %v8018_v5 = vsub.f32 %v15477_v48, %v15649_v15 }
0x2b4b   : >> { %v8191_v18 = vpop.permute.xlu1 %8190 }
0x2b4c   : >> { %12019 = vset.pattern.permute.xlu0 %v16315_v40  ;;  %v8092_v59 = vpop.permute.xlu0 %8091 }
0x2b4d   : >> { %8215 = vperm.xlu0 %12019, %v8177_v39  }
0x2b4f   : >> { %v8196_v42 = vpop.permute.xlu1 %8195 }
0x2b50   : >> { %v8104_v58 = vpop.permute.xlu0 %8103 }
0x2b54   : >> { %v15686_v30 = vpop.permute.xlu1 %8147  ;;  %v8112_v47 = vpop.permute.xlu0 %8111 }
0x2b58   : >> { %v15698_v49 = vpop.permute.xlu0 %8115 }
0x2b59   : >> { %v8239_v11 = vpop.permute.xlu1 %8238 }
0x2b5c   : >> { %v7986_v3 = vpop.permute.xlu0 %7985 }
0x2b5d   : >> { %v8244_v1 = vpop.permute.xlu1 %8243  ;;  %v8019_v41 = vsub.f32 %v15483_v21, %v7986_v3 }
0x2b60   : >> { %v7991_v10 = vpop.permute.xlu0 %7990 }
0x2b61   : >> { %v8020_v15 = vsub.f32 %v15475_v51, %v7991_v10 }
0x2b62   : >> { %v15688_v55 = vpop.permute.xlu1 %8119 }
0x2b64   : >> { %v8001_v6 = vpop.permute.xlu0 %8000 }
0x2b65   : >> { %v8022_v10 = vsub.f32 %v15501_v4, %v8001_v6 }
0x2b67   : >> { %v15690_v7 = vpop.permute.xlu1 %8200 }
0x2b68   : >> { %v15705_v61 = vpop.permute.xlu0 %8010 }
0x2b6c   : >> { %v15692_v53 = vpop.permute.xlu1 %8155  ;;  %v8206_v26 = vpop.permute.xlu0 %8205 }
0x2b70   : >> { %v15694_v28 = vpop.permute.xlu1 %8159  ;;  %v8249_v21 = vpop.permute.xlu0 %8248 }
0x2b75   : >> { %v15696_v36 = vpop.permute.xlu1 %8253 }
0x2b7a   : >> { %v15700_v20 = vpop.permute.xlu1 %8210 }
0x2b7f   : >> { %v8050_v52 = vpop.permute.xlu1 %8049 }
0x2b80   : >> { %v8083_v33 = vmul.f32 %v8050_v52, %v8019_v41 }
0x2b82   : >> { %v8123_v16 = vmul.f32 %v15652_v24, %v8083_v33 }
0x2b84   : >> { %v8163_v63 = vadd.f32 %v15657_v54, %v8123_v16  ;;  %v8021_v54 = vsub.f32 %v15479_v8, %v15668_v32  ;;  %v8023_v8 = vsub.f32 %v15518_v31, %v15674_v62 }
0x2b86   : >> { %v8219_v34 = vmul.f32 %v15663_v23, %v8163_v63 }
0x2b88   : >> { %v15710_v50 = vadd.f32 %v8234_v56, %v8219_v34 }
0x2b8a   : >> { %v9932_v3 = vmul.f32 -1.442695, %v15710_v50 }
0x2b8c   : >> { %12182 = vpow2.f32 %v9932_v3 }
0x2b96   : >> { %v12183_v34 = vpop.eup %12182 }
0x2b97   : >> { %v8299_v3 = vadd.f32 1.0, %v12183_v34 }
0x2bab   : >> { %v8045_v39 = vpop.permute.xlu1 %8044 }
0x2bac   : >> { %v8082_v40 = vmul.f32 %v8045_v39, %v8018_v5 }
0x2bae   : >> { %v8122_v52 = vmul.f32 %v8092_v59, %v8082_v40 }
0x2bb0   : >> { %v8162_v24 = vadd.f32 %v15655_v46, %v8122_v52 }
0x2bb2   : >> { %v8218_v23 = vmul.f32 %v15661_v13, %v8162_v24 }
0x2bb3   : >> { %v8060_v41 = vpop.permute.xlu0 %8059 }
0x2bb4   : >> { %v15718_v33 = vadd.f32 %v15677_v27, %v8218_v23  ;;  %v8085_v48 = vmul.f32 %v8060_v41, %v8021_v54 }
0x2bb6   : >> { %v9931_v56 = vmul.f32 -1.442695, %v15718_v33  ;;  %v8125_v16 = vmul.f32 %v8104_v58, %v8085_v48 }
0x2bb7   : >> { %v8055_v63 = vpop.permute.xlu1 %8054 }
0x2bb8   : >> { %12184 = vpow2.f32 %v9931_v56  ;;  %v8165_v40 = vadd.f32 %v8144_v44, %v8125_v16  ;;  %v8084_v46 = vmul.f32 %v8055_v63, %v8020_v15 }
0x2bba   : >> { %v8221_v32 = vmul.f32 %v8196_v42, %v8165_v40  ;;  %v8124_v13 = vmul.f32 %v15659_v22, %v8084_v46 }
0x2bbb   : >> { %v8070_v59 = vpop.permute.xlu1 %8069 }
0x2bbc   : >> { %v15725_v27 = vadd.f32 %v8244_v1, %v8221_v32  ;;  %v8164_v5 = vadd.f32 %v15665_v17, %v8124_v13  ;;  %v8087_v51 = vmul.f32 %v8070_v59, %v8023_v8  ;;  %v8025_v1 = vsub.f32 %v15512_v9, %v15681_v57 }
0x2bbe   : >> { %v9934_v58 = vmul.f32 -1.442695, %v15725_v27  ;;  %v8220_v39 = vmul.f32 %v8191_v18, %v8164_v5  ;;  %v8127_v44 = vmul.f32 %v8112_v47, %v8087_v51 }
0x2bbf   : >> { %v8065_v52 = vpop.permute.xlu0 %8064  ;;  %v8080_v22 = vpop.permute.xlu1 %8079 }
0x2bc0   : >> { %12186 = vpow2.f32 %v9934_v58  ;;  %v8268_v31 = vadd.f32 %v8239_v11, %v8220_v39  ;;  %v8167_v62 = vadd.f32 %v8152_v45, %v8127_v44  ;;  %v8086_v42 = vmul.f32 %v8065_v52, %v8022_v10 }
0x2bc1   : >> { %12188 = vrcp.f32 %v8299_v3  ;;  %v8089_v6 = vmul.f32 %v8080_v22, %v8025_v1  ;;  %v8024_v11 = vsub.f32 %v15495_v12, %v15705_v61 }
0x2bc2   : >> { %v12185_v24 = vpop.eup %12184  ;;  %v9933_v54 = vmul.f32 -1.442695, %v8268_v31  ;;  %v8223_v17 = vmul.f32 %v8206_v26, %v8167_v62  ;;  %v8126_v23 = vmul.f32 %v15684_v0, %v8086_v42 }
0x2bc3   : >> { %v8298_v4 = vadd.f32 1.0, %v12185_v24  ;;  %v8129_v57 = vmul.f32 %v15688_v55, %v8089_v6  ;;  %v8259_v41 = vpop.permute.xlu1 %8258 }
0x2bc4   : >> { %12190 = vpow2.f32 %v9933_v54  ;;  %v8271_v18 = vadd.f32 %v15696_v36, %v8223_v17  ;;  %v8166_v47 = vadd.f32 %v15686_v30, %v8126_v23 }
0x2bc5   : >> { %12192 = vrcp.f32 %v8298_v4  ;;  %v8169_v30 = vadd.f32 %v15694_v28, %v8129_v57 }
0x2bc6   : >> { %v9936_v45 = vmul.f32 -1.442695, %v8271_v18  ;;  %v8222_v9 = vmul.f32 %v15690_v7, %v8166_v47 }
0x2bc7   : >> { %v8075_v26 = vpop.permute.xlu0 %8074  ;;  %v8264_v46 = vpop.permute.xlu1 %8263 }
0x2bc8   : >> { %12194 = vpow2.f32 %v9936_v45  ;;  %v8270_v0 = vadd.f32 %v8249_v21, %v8222_v9  ;;  %v8088_v48 = vmul.f32 %v8075_v26, %v8024_v11 }
0x2bca   : >> { %v12187_v15 = vpop.eup %12186  ;;  %v9935_v56 = vmul.f32 -1.442695, %v8270_v0  ;;  %v8128_v36 = vmul.f32 %v15698_v49, %v8088_v48 }
0x2bcb   : >> { %v8301_v16 = vadd.f32 1.0, %v12187_v15  ;;  %v12189_v63 = vpop.eup %12188 }
0x2bcc   : >> { %12196 = vpow2.f32 %v9935_v56  ;;  %v8168_v12 = vadd.f32 %v15692_v53, %v8128_v36  ;;  %v8216_v61 = vpop.permute.xlu0 %8215  ;;  %v15744_v13 = vmul.f32 %v12189_v63, %v15710_v50 }
0x2bcd   : >> { %v8225_v7 = vmul.f32 %v8216_v61, %v8169_v30  ;;  %12198 = vrcp.f32 %v8301_v16 }
0x2bce   : >> { %v12191_v40 = vpop.eup %12190  ;;  %v8224_v55 = vmul.f32 %v15700_v20, %v8168_v12 }
0x2bcf   : >> { %v12193_v21 = vpop.eup %12192  ;;  %v8300_v8 = vadd.f32 1.0, %v12191_v40  ;;  %v8273_v32 = vadd.f32 %v8264_v46, %v8225_v7 }
0x2bd0   : >> { %v15747_v49 = vmul.f32 %v12193_v21, %v15718_v33  ;;  %v8272_v28 = vadd.f32 %v8259_v41, %v8224_v55 }
0x2bd1   : >> { %12200 = vrcp.f32 %v8300_v8  ;;  %v9938_v53 = vmul.f32 -1.442695, %v8273_v32 }
0x2bd2   : >> { %v12195_v59 = vpop.eup %12194  ;;  %v9937_v34 = vmul.f32 -1.442695, %v8272_v28  ;;  %v12020_v5 = vpack.i.bf16 %v15744_v13, %v15747_v49 }
0x2bd3   : >> { %v8303_v20 = vadd.f32 1.0, %v12195_v59  ;;  %12202 = vpow2.f32 %v9938_v53 }
0x2bd4   : >> { %12204 = vpow2.f32 %v9937_v34  ;;  %12021 = vrot.lane.b32.xlu0 %v12020_v5, %s12634_s15 }
0x2bd5   : >> { %12206 = vrcp.f32 %v8303_v20 }
0x2bd6   : >> { %v12197_v51 = vpop.eup %12196 }
0x2bd7   : >> { %v8302_v50 = vadd.f32 1.0, %v12197_v51  ;;  %v12199_v10 = vpop.eup %12198 }
0x2bd8   : >> { %v15753_v58 = vmul.f32 %v12199_v10, %v15725_v27 }
0x2bd9   : >> { %12208 = vrcp.f32 %v8302_v50 }
0x2bdb   : >> { %v12201_v33 = vpop.eup %12200 }
0x2bdc   : >> { %v15755_v39 = vmul.f32 %v12201_v33, %v8268_v31 }
0x2bdd   : >> { %v12203_v44 = vpop.eup %12202 }
0x2bde   : >> { %v12205_v3 = vpop.eup %12204  ;;  %v8305_v52 = vadd.f32 1.0, %v12203_v44  ;;  %v12025_v62 = vpack.i.bf16 %v15753_v58, %v15755_v39 }
0x2bdf   : >> { %v8304_v42 = vadd.f32 1.0, %v12205_v3  ;;  %v12207_v22 = vpop.eup %12206 }
0x2be0   : >> { %12210 = vrcp.f32 %v8305_v52  ;;  %12026 = vrot.lane.b32.xlu1 %v12025_v62, %s12634_s15  ;;  %v15760_v24 = vmul.f32 %v12207_v22, %v8271_v18 }
0x2be1   : >> { %12212 = vrcp.f32 %v8304_v42 }
0x2be3   : >> { %v12209_v1 = vpop.eup %12208 }
0x2be4   : >> { %v15762_v54 = vmul.f32 %v12209_v1, %v8270_v0 }
0x2be6   : >> { %v12030_v27 = vpack.i.bf16 %v15760_v24, %v15762_v54 }
0x2be8   : >> { %12031 = vrot.lane.b32.xlu0 %v12030_v27, %s12634_s15 }
0x2bea   : >> { %v12211_v31 = vpop.eup %12210 }
0x2beb   : >> { %v12213_v17 = vpop.eup %12212  ;;  %v15767_v23 = vmul.f32 %v12211_v31, %v8273_v32 }
0x2bec   : >> { %v15769_v4 = vmul.f32 %v12213_v17, %v8272_v28 }
0x2bee   : >> { %v12035_v6 = vpack.i.bf16 %v15767_v23, %v15769_v4 }
0x2bf0   : >> { %12036 = vrot.lane.b32.xlu1 %v12035_v6, %s12634_s15 }
0x2c46   : >> { %v12022_v18 = vpop.permute.xlu0 %12021 }
0x2c47   : >> { %v12024_v47 = vunpack.i.h.bf16 %v12022_v18  ;;  %v12023_v11 = vunpack.i.l.bf16 %v12022_v18 }
0x2c49   : >> { %v8346_v45 = vsel %vm1874_vm3, %v12024_v47, %v15744_v13  ;;  %v8343_v9 = vsel %vm1874_vm3, %v12023_v11, %v15747_v49  ;;  %v12108_v11 = vld [vmem:[%s15814_s1 + $0x4] ss:$8 sps:$4 sm:$0xff]  }
0x2c4a   : >> { %v12040_v57 = vpack.i.bf16 %v8346_v45, %v8343_v9  ;;  %9989 = vmatprep.mubr.msk.bf16.mxu1 %vm713_vm1, %v12108_v11  ;;  %v12637_v45 = vmov 5   ;;  %v12214_v9 = vld [vmem:[%s15363_s23] sm:$0xff] }
0x2c4b   : >> { %12100 = vset.pattern.permute.xlu0 %v12637_v45  ;;  %12101 = vset.pattern.permute.xlu1 %v12637_v45 }
0x2c4c   : >> { %12041 = vrot.lane.b32.xlu0 %v12040_v57, %s12634_s15  ;;  %v12215_v57 = vld [vmem:[%s15363_s23 + $0x8] sm:$0xff] }
0x2c52   : >> { %v12027_v26 = vpop.permute.xlu1 %12026 }
0x2c53   : >> { %v12029_v0 = vunpack.i.h.bf16 %v12027_v26  ;;  %v12028_v41 = vunpack.i.l.bf16 %v12027_v26  ;;  %v12216_v26 = vld [vmem:[%s15363_s23 + $0x18] sm:$0xff] }
0x2c55   : >> { %v8352_v48 = vsel %vm1874_vm3, %v12029_v0, %v15753_v58  ;;  %v8349_v15 = vsel %vm1874_vm3, %v12028_v41, %v15755_v39  ;;  %v12217_v0 = vld [vmem:[%s15363_s23 + $0x10] sm:$0xff]  ;;  %v12218_v41 = vld [vmem:[%s15363_s23 + $0x28] sm:$0xff] }
0x2c56   : >> { %v12045_v56 = vpack.i.bf16 %v8352_v48, %v8349_v15  ;;  %v12219_v48 = vld [vmem:[%s15363_s23 + $0x20] sm:$0xff]  ;;  %v12220_v15 = vld [vmem:[%s15363_s23 + $0x38] sm:$0xff] }
0x2c58   : >> { %12046 = vrot.lane.b32.xlu1 %v12045_v56, %s12634_s15  ;;  %v12221_v56 = vld [vmem:[%s15363_s23 + $0x30] sm:$0xff] }
0x2c5a   : >> { %v12032_v36 = vpop.permute.xlu0 %12031 }
0x2c5b   : >> { %v12034_v16 = vunpack.i.h.bf16 %v12032_v36  ;;  %v12033_v30 = vunpack.i.l.bf16 %v12032_v36 }
0x2c5d   : >> { %v8358_v12 = vsel %vm1874_vm3, %v12034_v16, %v15760_v24  ;;  %v8355_v61 = vsel %vm1874_vm3, %v12033_v30, %v15762_v54 }
0x2c5e   : >> { %v12050_v63 = vpack.i.bf16 %v8358_v12, %v8355_v61  ;;  %v16422_v61 = vmov 0  }
0x2c60   : >> { %12051 = vrot.lane.b32.xlu0 %v12050_v63, %s12634_s15 }
0x2c62   : >> { %v12037_v7 = vpop.permute.xlu1 %12036 }
0x2c63   : >> { %v12039_v40 = vunpack.i.h.bf16 %v12037_v7  ;;  %v12038_v55 = vunpack.i.l.bf16 %v12037_v7 }
0x2c65   : >> { %v8364_v46 = vsel %vm1874_vm3, %v12039_v40, %v15767_v23  ;;  %v8361_v21 = vsel %vm1874_vm3, %v12038_v55, %v15769_v4 }
0x2c66   : >> { %v12055_v8 = vpack.i.bf16 %v8364_v46, %v8361_v21 }
0x2c68   : >> { %12056 = vrot.lane.b32.xlu1 %v12055_v8, %s12634_s15 }
0x2cbe   : >> { %v12042_v32 = vpop.permute.xlu0 %12041 }
0x2cbf   : >> { %v12044_v28 = vunpack.i.h.bf16 %v12042_v32  ;;  %v12043_v53 = vunpack.i.l.bf16 %v12042_v32 }
0x2cc1   : >> { %v8382_v59 = vsel %vm1874_vm3, %v12044_v28, %v15744_v13  ;;  %v8381_v34 = vsel %vm1874_vm3, %v12043_v53, %v15747_v49 }
0x2cc2   : >> { %v12060_v5 = vpack.i.bf16 %v8382_v59, %v8381_v34 }
0x2cc4   : >> { %12061 = vrot.lane.b32.xlu0 %v12060_v5, %s12635_s25 }
0x2cca   : >> { %v12047_v20 = vpop.permute.xlu1 %12046 }
0x2ccb   : >> { %v12049_v51 = vunpack.i.h.bf16 %v12047_v20  ;;  %v12048_v50 = vunpack.i.l.bf16 %v12047_v20  ;;  %v8466_v20 = vpack.c.bf16 %v15753_v58, %v15755_v39 }
0x2ccd   : >> { %v8384_v10 = vsel %vm1874_vm3, %v12049_v51, %v15753_v58  ;;  %v8383_v33 = vsel %vm1874_vm3, %v12048_v50, %v15755_v39  ;;  %v8467_v51 = vpack.c.bf16 %v15760_v24, %v15762_v54 }
0x2cce   : >> { %v12065_v44 = vpack.i.bf16 %v8384_v10, %v8383_v33 }
0x2cd0   : >> { %12066 = vrot.lane.b32.xlu1 %v12065_v44, %s12635_s25 }
0x2cd2   : >> { %v12052_v3 = vpop.permute.xlu0 %12051 }
0x2cd3   : >> { %v12054_v52 = vunpack.i.h.bf16 %v12052_v3  ;;  %v12053_v62 = vunpack.i.l.bf16 %v12052_v3 }
0x2cd5   : >> { %v8386_v42 = vsel %vm1874_vm3, %v12054_v52, %v15760_v24  ;;  %v8385_v22 = vsel %vm1874_vm3, %v12053_v62, %v15762_v54 }
0x2cd6   : >> { %v12070_v1 = vpack.i.bf16 %v8386_v42, %v8385_v22 }
0x2cd8   : >> { %12071 = vrot.lane.b32.xlu0 %v12070_v1, %s12635_s25 }
0x2cda   : >> { %v12057_v27 = vpop.permute.xlu1 %12056 }
0x2cdb   : >> { %v12059_v31 = vunpack.i.h.bf16 %v12057_v27  ;;  %v12058_v17 = vunpack.i.l.bf16 %v12057_v27  ;;  %v12109_v27 = vld [vmem:[%s15814_s1 + $0x14] ss:$8 sps:$4 sm:$0xff]  }
0x2cdc   : >> { %12081 = vrot.lane.b32.xlu0 %v12060_v5, %s12636_s22  ;;  %v8465_v5 = vpack.c.bf16 %v15744_v13, %v15747_v49  ;;  %v8468_v13 = vpack.c.bf16 %v15767_v23, %v15769_v4 }
0x2cdd   : >> { %v8388_v6 = vsel %vm1874_vm3, %v12059_v31, %v15767_v23  ;;  %v8387_v18 = vsel %vm1874_vm3, %v12058_v17, %v15769_v4  ;;  %v12111_v31 = vld [vmem:[%s15814_s1 + $0x10] ss:$8 sps:$4 sm:$0xff]   ;;  %v12112_v17 = vld [vmem:[%s15814_s1 + $0x24] ss:$8 sps:$4 sm:$0xff]  }
0x2cde   : >> { %v12075_v47 = vpack.i.bf16 %v8388_v6, %v8387_v18  ;;  %v12114_v6 = vld [vmem:[%s15814_s1 + $0x20] ss:$8 sps:$4 sm:$0xff]   ;;  %v12115_v18 = vld [vmem:[%s15814_s1 + $0x34] ss:$8 sps:$4 sm:$0xff]  }
0x2ce0   : >> { %12091 = vrot.lane.b32.xlu0 %v12070_v1, %s12636_s22  ;;  %12076 = vrot.lane.b32.xlu1 %v12075_v47, %s12635_s25  ;;  %v12106_v1 = vld [vmem:[%s15814_s1] ss:$8 sps:$4 sm:$0xff]  }
0x2ce4   : >> { %12086 = vrot.lane.b32.xlu1 %v12065_v44, %s12636_s22  ;;  %8474 = vperm.xlu0 %12100, %v12214_v9  }
0x2ce8   : >> { %12096 = vrot.lane.b32.xlu1 %v12075_v47, %s12636_s22  ;;  %8486 = vperm.xlu0 %12100, %v12216_v26   ;;  %v12117_v47 = vld [vmem:[%s15814_s1 + $0x30] ss:$8 sps:$4 sm:$0xff]  }
0x2cec   : >> { %8478 = vperm.xlu1 %12101, %v12215_v57   ;;  %8494 = vperm.xlu0 %12100, %v12218_v41  }
0x2cf0   : >> { %8482 = vperm.xlu1 %12101, %v12217_v0   ;;  %8502 = vperm.xlu0 %12100, %v12220_v15  }
0x2cf4   : >> { %8490 = vperm.xlu1 %12101, %v12219_v48  }
0x2cf8   : >> { %8498 = vperm.xlu1 %12101, %v12221_v56  }
0x2d36   : >> { %v12062_v36 = vpop.permute.xlu0 %12061 }
0x2d37   : >> { %v12064_v16 = vunpack.i.h.bf16 %v12062_v36  ;;  %v12063_v30 = vunpack.i.l.bf16 %v12062_v36 }
0x2d39   : >> { %v9952_v12 = vpack.c.bf16 %v12064_v16, %v12063_v30 }
0x2d3b   : >> { %9953 = vmatpush1.bf16.msk.msra.mxu1 %vm13473_vm5, %v9952_v12 }
0x2d3c   : >> { %8555 = vmatprep.subr.bf16.mxu1 %v16422_v61 }
0x2d42   : >> { %v12067_v63 = vpop.permute.xlu1 %12066 }
0x2d43   : >> { %v12069_v7 = vunpack.i.h.bf16 %v12067_v63  ;;  %v12068_v40 = vunpack.i.l.bf16 %v12067_v63 }
0x2d45   : >> { %v9957_v55 = vpack.c.bf16 %v12069_v7, %v12068_v40 }
0x2d47   : >> { %9958 = vmatpush1.bf16.msk.msra.mxu1 %vm13473_vm5, %v9957_v55 }
0x2d48   : >> { %8557 = vmatprep.subr.bf16.mxu1 %v16422_v61 }
0x2d4a   : >> { %v12072_v46 = vpop.permute.xlu0 %12071 }
0x2d4b   : >> { %v12074_v21 = vunpack.i.h.bf16 %v12072_v46  ;;  %v12073_v8 = vunpack.i.l.bf16 %v12072_v46 }
0x2d4d   : >> { %v9962_v32 = vpack.c.bf16 %v12074_v21, %v12073_v8 }
0x2d4e   : >> { %v12082_v50 = vpop.permute.xlu0 %12081 }
0x2d4f   : >> { %9963 = vmatpush1.bf16.msk.msra.mxu1 %vm13473_vm5, %v9962_v32  ;;  %v12084_v10 = vunpack.i.h.bf16 %v12082_v50  ;;  %v12083_v33 = vunpack.i.l.bf16 %v12082_v50 }
0x2d50   : >> { %8559 = vmatprep.subr.bf16.mxu1 %v16422_v61 }
0x2d51   : >> { %v9972_v58 = vpack.c.bf16 %v12084_v10, %v12083_v33 }
0x2d52   : >> { %v12077_v28 = vpop.permute.xlu1 %12076  ;;  %v12092_v3 = vpop.permute.xlu0 %12091 }
0x2d53   : >> { %v12079_v53 = vunpack.i.h.bf16 %v12077_v28  ;;  %v12078_v59 = vunpack.i.l.bf16 %v12077_v28  ;;  %v12094_v24 = vunpack.i.h.bf16 %v12092_v3  ;;  %v12093_v54 = vunpack.i.l.bf16 %v12092_v3 }
0x2d55   : >> { %v9967_v34 = vpack.c.bf16 %v12079_v53, %v12078_v59  ;;  %v9982_v4 = vpack.c.bf16 %v12094_v24, %v12093_v54  ;;  %v16439_v24 = vld [vmem:[#allocation3_spill] sm:$0xff] (%p7086_p6)  ;;  %v16440_v54 = vmov (%p7086_p6), 0  }
0x2d56   : >> { %v12087_v49 = vpop.permute.xlu1 %12086  ;;  %10898 = vmatprep.mubr.msk.f32.mxu0 (%p7086_p6), %vm713_vm1, %v16439_v24  ;;  %12222 = vset.pattern.permute.xlu1 (%p7086_p6), %v16440_v54  ;;  %v16444_v24 = vld [vmem:[#allocation7_spill] sm:$0xff] (%p7086_p6) }
0x2d57   : >> { %9968 = vmatpush1.bf16.msk.msra.mxu1 %vm13473_vm5, %v9967_v34  ;;  %v12089_v39 = vunpack.i.h.bf16 %v12087_v49  ;;  %v12088_v44 = vunpack.i.l.bf16 %v12087_v49 }
0x2d58   : >> { %8561 = vmatprep.subr.bf16.mxu1 %v16422_v61 }
0x2d59   : >> { %v9977_v52 = vpack.c.bf16 %v12089_v39, %v12088_v44 }
0x2d5a   : >> { %v12097_v23 = vpop.permute.xlu1 %12096 }
0x2d5b   : >> { %8562 = vmatpush1.bf16.msra.mxu1 %v8465_v5  ;;  %v12099_v62 = vunpack.i.h.bf16 %v12097_v23  ;;  %v12098_v42 = vunpack.i.l.bf16 %v12097_v23 }
0x2d5c   : >> { %8563 = vmatprep.subr.bf16.mxu1 %v16422_v61 }
0x2d5d   : >> { %v9987_v22 = vpack.c.bf16 %v12099_v62, %v12098_v42 }
0x2d5f   : >> { %8564 = vmatpush1.bf16.msra.mxu1 %v8466_v20 }
0x2d60   : >> { %8565 = vmatprep.subr.bf16.mxu1 %v16422_v61 }
0x2d63   : >> { %8566 = vmatpush1.bf16.msra.mxu1 %v8467_v51  ;;  %v8475_v11 = vpop.permute.xlu0 %8474 }
0x2d64   : >> { %8567 = vmatprep.subr.bf16.mxu1 %v16422_v61 }
0x2d67   : >> { %8568 = vmatpush1.bf16.msra.mxu1 %v8468_v13 }
0x2d68   : >> { %8569 = vmatprep.subr.bf16.mxu1 %v16422_v61 }
0x2d6b   : >> { %9973 = vmatpush1.bf16.msk.msra.mxu1 %vm13501_vm7, %v9972_v58  ;;  %v8479_v9 = vpop.permute.xlu1 %8478 }
0x2d6c   : >> { %8571 = vmatprep.subr.bf16.mxu1 %v16422_v61 }
0x2d6f   : >> { %9978 = vmatpush1.bf16.msk.msra.mxu1 %vm13501_vm7, %v9977_v52  ;;  %v8483_v36 = vpop.permute.xlu1 %8482 }
0x2d70   : >> { %8573 = vmatprep.subr.bf16.mxu1 %v16422_v61 }
0x2d73   : >> { %9983 = vmatpush1.bf16.msk.msra.mxu1 %vm13501_vm7, %v9982_v4 }
0x2d74   : >> { %8575 = vmatprep.subr.bf16.mxu1 %v16422_v61  ;;  %v8487_v61 = vpop.permute.xlu0 %8486 }
0x2d77   : >> { %9988 = vmatpush1.bf16.msk.msra.mxu1 %vm13501_vm7, %v9987_v22 }
0x2d78   : >> { %v8495_v28 = vpop.permute.xlu0 %8494  ;;  %9302 = vmatprep.subr.bf16.mxu1 (%p7086_p6), %v16440_v54 }
0x2d7a   : >> { %8586 = vmatmul.mubr.bf16.vlgmr.msra.gmra.mrb[0].mxu1 %v12106_v1 }
0x2d7b   : >> { %9990 = vmatprep.mubr.msk.bf16.mxu1 %vm713_vm1, %v12109_v27 }
0x2d7c   : >> { %v8503_v10 = vpop.permute.xlu0 %8502 }
0x2d82   : >> { %8594 = vmatmul.mubr.bf16.gmra.mrb[4].mxu1 %v12111_v31 }
0x2d83   : >> { %9991 = vmatprep.mubr.msk.bf16.mxu1 %vm713_vm1, %v12112_v17 }
0x2d8a   : >> { %8602 = vmatmul.mubr.bf16.gmra.mrb[8].mxu1 %v12114_v6 }
0x2d8b   : >> { %9992 = vmatprep.mubr.msk.bf16.mxu1 %vm713_vm1, %v12115_v18 }
0x2d92   : >> { %8610 = vmatmul.mubr.bf16.gmra.mrb[12].mxu1 %v12117_v47 }
0x2e4d   : >> { %v8587_v45 = vpop.f32.mrb[0].mxu1 }
0x2e4e   : >> { %v8588_v57 = vadd.f32 %v8587_v45, %v8475_v11  ;;  %v8589_v26 = vpop.f32.mrb[1].mxu1 }
0x2e4f   : >> { %v8590_v0 = vpop.f32.mrb[2].mxu1 }
0x2e50   : >> { %v15872_v60 = vadd.f32 %v12593_v60, %v8588_v57   ;;  %v8591_v48 = vadd.f32 %v8590_v0, %v8479_v9  ;;  %v8592_v15 = vpop.f32.mrb[3].mxu1 }
0x2e52   : >> { %v16423_v41 = vmov %v15872_v60  ;;  %v15875_v29 = vadd.f32 %v12589_v29, %v8591_v48   ;;  %v8491_v60 = vpop.permute.xlu1 %8490 }
0x2e53   : > { %v8627_v39 = vsel (%p7086_p6), %vm647_vm0, %v16423_v41, 0.0  ;;  %v8651_v44 = vmul.f32 (%p7086_p6), %v16423_v41, %v16423_v41 }
0x2e54   : >> { %v16424_v56 = vmov %v15875_v29  ;;  %8628 = vadd.xlane.f32.xlu0 (%p7086_p6), %v8627_v39  ;;  %v16441_v39 = vld [vmem:[#allocation4_spill] sm:$0xff] (%p7086_p6) }
0x2e55   : >> { %v8595_v16 = vpop.f32.mrb[4].mxu1  ;;  %v8652_v3 = vmul.f32 (%p7086_p6), %v16424_v56, %v16424_v56  ;;  %v8659_v52 = vsel (%p7086_p6), %vm647_vm0, %v8651_v44, 0.0  ;;  %v16442_v44 = vld [vmem:[#allocation5_spill] sm:$0xff] (%p7086_p6) }
0x2e56   : >> { %v8596_v30 = vadd.f32 %v8595_v16, %v8483_v36  ;;  %v8597_v12 = vpop.f32.mrb[5].mxu1  ;;  %8660 = vadd.xlane.f32.xlu1 (%p7086_p6), %v8659_v52  ;;  %v16445_v52 = vld [vmem:[#allocation8_spill] sm:$0xff] (%p7086_p6) }
0x2e57   : >> { %v8598_v63 = vpop.f32.mrb[6].mxu1 }
0x2e58   : >> { %v15878_v19 = vadd.f32 %v12585_v19, %v8596_v30   ;;  %v8599_v40 = vadd.f32 %v8598_v63, %v8487_v61  ;;  %v8600_v55 = vpop.f32.mrb[7].mxu1 }
0x2e5a   : >> { %v16425_v7 = vmov %v15878_v19  ;;  %v15881_v38 = vadd.f32 %v12581_v38, %v8599_v40   ;;  %v8499_v19 = vpop.permute.xlu1 %8498 }
0x2e5c   : >> { %v16426_v46 = vmov %v15881_v38 }
0x2e5d   : >> { %v8603_v21 = vpop.f32.mrb[8].mxu1  ;;  %v8636_v23 = vsel (%p7086_p6), %vm647_vm0, %v16426_v46, 0.0  ;;  %v8654_v4 = vmul.f32 (%p7086_p6), %v16426_v46, %v16426_v46 }
0x2e5e   : >> { %v8604_v8 = vadd.f32 %v8603_v21, %v8491_v60  ;;  %v8605_v32 = vpop.f32.mrb[9].mxu1  ;;  %v16438_v60 = vmov %v16423_v41 }
0x2e5f   : >> { %v8606_v29 = vpop.f32.mrb[10].mxu1  ;;  %v8668_v42 = vsel (%p7086_p6), %vm647_vm0, %v8654_v4, 0.0 }
0x2e60   : >> { %v15884_v25 = vadd.f32 %v12577_v25, %v8604_v8   ;;  %v8607_v59 = vadd.f32 %v8606_v29, %v8495_v28  ;;  %v8608_v34 = vpop.f32.mrb[11].mxu1  ;;  %v16437_v29 = vmov %v16424_v56 }
0x2e62   : >> { %v16427_v53 = vmov %v15884_v25  ;;  %v15887_v2 = vadd.f32 %v12573_v2, %v8607_v59  }
0x2e63   : >> { %v16434_v25 = vmov %v16427_v53  ;;  %v8639_v22 = vsel (%p7086_p6), %vm647_vm0, %v16427_v53, 0.0  ;;  %v8655_v1 = vmul.f32 (%p7086_p6), %v16427_v53, %v16427_v53 }
0x2e64   : >> { %v16428_v5 = vmov %v15887_v2  ;;  %v8662_v25 = vsel (%p7086_p6), %vm647_vm0, %v8652_v3, 0.0  ;;  %v16443_v3 = vld [vmem:[#allocation6_spill] sm:$0xff] (%p7086_p6) }
0x2e65   : >> { %v8611_v20 = vpop.f32.mrb[12].mxu1  ;;  %v16433_v2 = vmov %v16428_v5  ;;  %8663 = vadd.xlane.f32.xlu1 (%p7086_p6), %v8662_v25  ;;  %v8642_v27 = vsel (%p7086_p6), %vm647_vm0, %v16428_v5, 0.0  ;;  %v8656_v31 = vmul.f32 (%p7086_p6), %v16428_v5, %v16428_v5  ;;  %v8671_v17 = vsel (%p7086_p6), %vm647_vm0, %v8655_v1, 0.0  ;;  %v16447_v25 = vld [vmem:[#allocation10_spill] sm:$0xff] (%p7086_p6) }
0x2e66   : >> { %v8612_v51 = vadd.f32 %v8611_v20, %v8499_v19  ;;  %v8613_v50 = vpop.f32.mrb[13].mxu1  ;;  %v16436_v19 = vmov %v16425_v7  ;;  %v8653_v2 = vmul.f32 (%p7086_p6), %v16425_v7, %v16425_v7 }
0x2e67   : >> { %v8614_v38 = vpop.f32.mrb[14].mxu1  ;;  %7088 = sbr.rel (!%p7086_p6) target bundleno = 9550 (0x254e), region = 189  ;;  %v8674_v6 = vsel (%p7086_p6), %vm647_vm0, %v8656_v31, 0.0 }
0x2e68   : >> { %v15890_v43 = vadd.f32 %v12569_v43, %v8612_v51   ;;  %v8615_v13 = vadd.f32 %v8614_v38, %v8503_v10  ;;  %v8616_v49 = vpop.f32.mrb[15].mxu1  ;;  %v16435_v38 = vmov %v16426_v46  ;;  %v8665_v62 = vsel (%p7086_p6), %vm647_vm0, %v8653_v2, 0.0 }
0x2e69   : > { %8637 = vadd.xlane.f32.xlu1 (%p7086_p6), %v8636_v23 }
0x2e6a   : >> { %v16429_v33 = vmov %v15890_v43  ;;  %v15893_v37 = vadd.f32 %v12565_v37, %v8615_v13  }
0x2e6b   : >> { %v16432_v43 = vmov %v16429_v33  ;;  %v8645_v18 = vsel (%p7086_p6), %vm647_vm0, %v16429_v33, 0.0  ;;  %v8657_v47 = vmul.f32 (%p7086_p6), %v16429_v33, %v16429_v33 }
0x2e6c   : >> { %v16430_v58 = vmov %v15893_v37  ;;  %v8630_v43 = vsel (%p7086_p6), %vm647_vm0, %v16424_v56, 0.0 }
0x2e6d   : >> { %v16431_v37 = vmov %v16430_v58  ;;  %8631 = vadd.xlane.f32.xlu0 (%p7086_p6), %v8630_v43  ;;  %8669 = vadd.xlane.f32.xlu1 (%p7086_p6), %v8668_v42  ;;  %v8648_v11 = vsel (%p7086_p6), %vm647_vm0, %v16430_v58, 0.0  ;;  %v8658_v45 = vmul.f32 (%p7086_p6), %v16430_v58, %v16430_v58  ;;  %v8677_v9 = vsel (%p7086_p6), %vm647_vm0, %v8657_v47, 0.0  ;;  %v16446_v43 = vld [vmem:[#allocation9_spill] sm:$0xff] (%p7086_p6) }
0x2e6e   : > { %v8633_v37 = vsel %vm647_vm0, %v16425_v7, 0.0 }
0x2e6f   : > { %v8680_v57 = vsel %vm647_vm0, %v8658_v45, 0.0 }
0x2e71   : > { %8634 = vadd.xlane.f32.xlu0 %v8633_v37  ;;  %8643 = vadd.xlane.f32.xlu1 %v8642_v27  ;;  %v12638_v37 = vmov 2  }
0x2e72   : > { %12223 = vset.pattern.permute.xlu0 %v12638_v37 }
0x2e75   : > { %8666 = vadd.xlane.f32.xlu0 %v8665_v62  ;;  %8675 = vadd.xlane.f32.xlu1 %v8674_v6 }
0x2e79   : > { %8640 = vadd.xlane.f32.xlu0 %v8639_v22  ;;  %8649 = vadd.xlane.f32.xlu1 %v8648_v11 }
0x2e7d   : > { %8672 = vadd.xlane.f32.xlu0 %v8671_v17  ;;  %8681 = vadd.xlane.f32.xlu1 %v8680_v57  ;;  %v16448_v57 = vld [vmem:[#allocation11_spill] sm:$0xff] }
0x2e81   : > { %8646 = vadd.xlane.f32.xlu0 %v8645_v18 }
0x2e85   : > { %8678 = vadd.xlane.f32.xlu0 %v8677_v9 }
0x2ee1   : > { %v8629_v26 = vpop.xlane.xlu0 %8628 }
0x2ee3   : > { %v8661_v0 = vpop.xlane.xlu1 %8660 }
0x2ee4   : > { %v8684_v36 = vsel %vm704_vm2, %v8629_v26, %v8661_v0  ;;  %v16449_v26 = vld [vmem:[#allocation14_spill] sm:$0xff]  ;;  %v16450_v0 = vld [vmem:[#allocation12_spill] sm:$0xff] }
0x2ef2   : > { %v8664_v15 = vpop.xlane.xlu1 %8663 }
0x2ef6   : > { %v8638_v61 = vpop.xlane.xlu1 %8637 }
0x2efa   : > { %v8632_v48 = vpop.xlane.xlu0 %8631  ;;  %v8670_v40 = vpop.xlane.xlu1 %8669 }
0x2efb   : > { %v8685_v16 = vsel %vm704_vm2, %v8632_v48, %v8664_v15  ;;  %v8687_v60 = vsel %vm704_vm2, %v8638_v61, %v8670_v40  ;;  %v12640_v48 = vmov 3   ;;  %v16451_v15 = vld [vmem:[#allocation13_spill] sm:$0xff]  ;;  %v16456_v61 = vld [vmem:[#allocation18_spill] sm:$0xff] }
0x2efc   : > { %v11038_v12 = vpack.c.bf16 %v8685_v16, %v8684_v36  ;;  %v16452_v36 = vld [vmem:[#allocation16_spill] sm:$0xff]  ;;  %v16453_v16 = vmov 1  }
0x2efe   : > { %v8635_v30 = vpop.xlane.xlu0 %8634  ;;  %11039 = vmatprep.subr.bf16.mxu0 %v11038_v12  ;;  %v8644_v32 = vpop.xlane.xlu1 %8643 }
0x2eff   : > { %11041 = vmatpush3.bf16.msra.mxu0 %v11038_v12  ;;  %v16455_v12 = vld [vmem:[#allocation17_spill] sm:$0xff] }
0x2f02   : > { %v8667_v63 = vpop.xlane.xlu0 %8666  ;;  %v8676_v29 = vpop.xlane.xlu1 %8675 }
0x2f03   : > { %v8686_v55 = vsel %vm704_vm2, %v8635_v30, %v8667_v63  ;;  %v8689_v34 = vsel %vm704_vm2, %v8644_v32, %v8676_v29  ;;  %v16454_v30 = vld [vmem:[#allocation15_spill] sm:$0xff] }
0x2f04   : > { %v11042_v21 = vpack.c.bf16 %v8687_v60, %v8686_v55 }
0x2f06   : > { %v8641_v8 = vpop.xlane.xlu0 %8640  ;;  %11043 = vmatprep.subr.bf16.mxu0 %v11042_v21  ;;  %v8650_v51 = vpop.xlane.xlu1 %8649 }
0x2f07   : > { %11045 = vmatpush3.bf16.msra.mxu0 %v11042_v21 }
0x2f0a   : > { %v8673_v28 = vpop.xlane.xlu0 %8672  ;;  %v8682_v10 = vpop.xlane.xlu1 %8681 }
0x2f0b   : > { %v8688_v59 = vsel %vm704_vm2, %v8641_v8, %v8673_v28  ;;  %v8691_v13 = vsel %vm704_vm2, %v8650_v51, %v8682_v10 }
0x2f0c   : > { %v11046_v19 = vpack.c.bf16 %v8689_v34, %v8688_v59 }
0x2f0e   : > { %v8647_v20 = vpop.xlane.xlu0 %8646  ;;  %11047 = vmatprep.subr.bf16.mxu0 %v11046_v19 }
0x2f0f   : > { %11049 = vmatpush3.bf16.msra.mxu0 %v11046_v19 }
0x2f12   : > { %v8679_v50 = vpop.xlane.xlu0 %8678 }
0x2f13   : > { %v8690_v38 = vsel %vm704_vm2, %v8647_v20, %v8679_v50 }
0x2f14   : > { %v11050_v49 = vpack.c.bf16 %v8691_v13, %v8690_v38 }
0x2f16   : > { %11051 = vmatprep.subr.bf16.mxu0 %v11050_v49 }
0x2f17   : > { %11053 = vmatpush3.bf16.msra.mxu0 %v11050_v49 }
0x2f1a   : > { %10899 = vmatmul.mubr.msk.f32.vlgmr.msra.gmra.mrb[0].mxu0 %vm713_vm1, %v16441_v39 }
0x2f1b   : > { %10901 = vmatprep.mubr.msk.f32.mxu0 %vm713_vm1, %v16442_v44 }
0x2f1e   : > { %10902 = vmatmul.mubr.msk.f32.gmra.mrb[2].mxu0 %vm713_vm1, %v16443_v3 }
0x2f1f   : > { %10904 = vmatprep.mubr.msk.f32.mxu0 %vm713_vm1, %v16444_v24 }
0x2f22   : > { %10905 = vmatmul.mubr.msk.f32.gmra.mrb[4].mxu0 %vm713_vm1, %v16445_v52 }
0x2f23   : > { %10907 = vmatprep.mubr.msk.f32.mxu0 %vm713_vm1, %v16446_v43 }
0x2f26   : > { %10908 = vmatmul.mubr.msk.f32.gmra.mrb[6].mxu0 %vm713_vm1, %v16447_v25 }
0x2fed   : > { %v15988_v2 = vpop.f32.mrb[0].mxu0 }
0x2fee   : > { %v8823_v23 = vmul.f32 %v15988_v2, %v15988_v2  ;;  %v15992_v4 = vpop.f32.mrb[1].mxu0 }
0x2fef   : > { %v8822_v62 = vmul.f32 %v15992_v4, %v15992_v4 }
0x2ff0   : > { %8840 = vrot.lane.b32.xlu1 %v8823_v23, %s12639_s18 }
0x2ff1   : > { %8838 = vrot.lane.b32.xlu0 %v8822_v62, %s12639_s18  ;;  %v15996_v42 = vpop.f32.mrb[2].mxu0 }
0x2ff2   : > { %v8825_v22 = vmul.f32 %v15996_v42, %v15996_v42  ;;  %v16000_v1 = vpop.f32.mrb[3].mxu0 }
0x2ff3   : > { %v8824_v31 = vmul.f32 %v16000_v1, %v16000_v1 }
0x2ff4   : > { %8844 = vrot.lane.b32.xlu1 %v8825_v22, %s12639_s18 }
0x2ff5   : > { %v16002_v27 = vpop.f32.mrb[4].mxu0 }
0x2ff6   : > { %v16006_v17 = vpop.f32.mrb[5].mxu0  ;;  %v8827_v18 = vmul.f32 %v16002_v27, %v16002_v27 }
0x2ff7   : > { %v8826_v6 = vmul.f32 %v16006_v17, %v16006_v17 }
0x2ff8   : > { %8842 = vrot.lane.b32.xlu1 %v8824_v31, %s12639_s18 }
0x2ff9   : > { %8846 = vrot.lane.b32.xlu0 %v8826_v6, %s12639_s18  ;;  %v16012_v47 = vpop.f32.mrb[6].mxu0 }
0x2ffa   : > { %v16014_v11 = vpop.f32.mrb[7].mxu0  ;;  %v8829_v9 = vmul.f32 %v16012_v47, %v16012_v47 }
0x2ffb   : > { %v8828_v45 = vmul.f32 %v16014_v11, %v16014_v11 }
0x2ffc   : > { %8848 = vrot.lane.b32.xlu1 %v8827_v18, %s12639_s18 }
0x2ffd   : > { %8850 = vrot.lane.b32.xlu0 %v8828_v45, %s12639_s18 }
0x3000   : > { %8852 = vrot.lane.b32.xlu1 %v8829_v9, %s12639_s18 }
0x3001   : > { %8983 = vperm.xlu0 %12223, %v16448_v57  }
0x3004   : > { %8877 = vperm.xlu1 %12222, %v15988_v2  }
0x3005   : > { %8995 = vperm.xlu0 %12223, %v16449_v26  }
0x3008   : > { %8882 = vperm.xlu1 %12222, %v16000_v1  }
0x3009   : > { %12228 = vset.pattern.permute.xlu0 %v16440_v54 }
0x300a   : > { %8872 = vperm.xlu0 %12228, %v15992_v4  }
0x300c   : > { %8887 = vperm.xlu1 %12222, %v15996_v42  }
0x300e   : > { %8892 = vperm.xlu0 %12228, %v16006_v17  }
0x3010   : > { %12224 = vset.pattern.permute.xlu1 %v12638_v37 }
0x3011   : > { %8987 = vperm.xlu1 %12224, %v16450_v0  }
0x3012   : > { %8907 = vperm.xlu0 %12228, %v16012_v47  }
0x3015   : > { %12225 = vset.pattern.permute.xlu1 %v12640_v48 }
0x3016   : > { %9023 = vperm.xlu1 %12225, %v16448_v57   ;;  %12231 = vset.pattern.permute.xlu0 %v12640_v48 }
0x3017   : > { %9031 = vperm.xlu0 %12231, %v16451_v15  }
0x301a   : > { %9027 = vperm.xlu1 %12225, %v16450_v0  }
0x301b   : > { %9043 = vperm.xlu0 %12231, %v16452_v36  }
0x301e   : > { %12226 = vset.pattern.permute.xlu1 %v16440_v54 }
0x301f   : > { %8897 = vperm.xlu1 %12226, %v16002_v27   ;;  %12235 = vset.pattern.permute.xlu0 %v16453_v16 }
0x3023   : > { %12227 = vset.pattern.permute.xlu1 %v12638_v37 }
0x3024   : > { %8991 = vperm.xlu1 %12227, %v16451_v15  }
0x3028   : > { %12229 = vset.pattern.permute.xlu1 %v12640_v48 }
0x3029   : > { %9035 = vperm.xlu1 %12229, %v16449_v26  }
0x302d   : > { %12230 = vset.pattern.permute.xlu1 %v16440_v54 }
0x302e   : > { %8902 = vperm.xlu1 %12230, %v16014_v11  }
0x3032   : > { %12232 = vset.pattern.permute.xlu1 %v12638_v37 }
0x3033   : > { %8999 = vperm.xlu1 %12232, %v16454_v30  }
0x3037   : > { %9003 = vperm.xlu1 %12232, %v16452_v36  }
0x303b   : > { %12233 = vset.pattern.permute.xlu1 %v12640_v48 }
0x303c   : > { %9039 = vperm.xlu1 %12233, %v16454_v30  }
0x3040   : > { %12234 = vset.pattern.permute.xlu1 %v12638_v37 }
0x3041   : > { %9007 = vperm.xlu1 %12234, %v16455_v12  }
0x3045   : > { %9011 = vperm.xlu1 %12234, %v16456_v61  }
0x3049   : > { %12236 = vset.pattern.permute.xlu1 %v16453_v16 }
0x3062   : > { %v8841_v63 = vpop.permute.xlu1 %8840 }
0x3063   : > { %v8863_v40 = vsub.f32 %v15988_v2, %v8841_v63  ;;  %v8839_v55 = vpop.permute.xlu0 %8838 }
0x3064   : > { %v8862_v60 = vsub.f32 %v15992_v4, %v8839_v55 }
0x3065   : > { %v8919_v21 = vadd.f32 1e-05, %v8863_v40 }
0x3066   : > { %v8918_v8 = vadd.f32 1e-05, %v8862_v60  ;;  %v8845_v32 = vpop.permute.xlu1 %8844 }
0x3067   : > { %12327 = vrsqrt.f32 %v8919_v21  ;;  %v8865_v28 = vsub.f32 %v15996_v42, %v8845_v32 }
0x3068   : > { %12329 = vrsqrt.f32 %v8918_v8 }
0x3069   : > { %v8921_v29 = vadd.f32 1e-05, %v8865_v28 }
0x306a   : > { %v8843_v59 = vpop.permute.xlu1 %8842 }
0x306b   : > { %12331 = vrsqrt.f32 %v8921_v29  ;;  %v8864_v34 = vsub.f32 %v16000_v1, %v8843_v59  ;;  %v8847_v19 = vpop.permute.xlu0 %8846 }
0x306c   : > { %v8866_v50 = vsub.f32 %v16006_v17, %v8847_v19 }
0x306d   : > { %v8920_v20 = vadd.f32 1e-05, %v8864_v34 }
0x306e   : > { %v8849_v51 = vpop.permute.xlu1 %8848  ;;  %v8922_v52 = vadd.f32 1e-05, %v8866_v50 }
0x306f   : > { %12333 = vrsqrt.f32 %v8920_v20  ;;  %v8867_v10 = vsub.f32 %v16002_v27, %v8849_v51  ;;  %v8851_v38 = vpop.permute.xlu0 %8850 }
0x3070   : > { %v8868_v13 = vsub.f32 %v16014_v11, %v8851_v38 }
0x3071   : > { %v12328_v49 = vpop.eup %12327  ;;  %v8923_v39 = vadd.f32 1e-05, %v8867_v10 }
0x3072   : > { %v12330_v44 = vpop.eup %12329  ;;  %v8924_v3 = vadd.f32 1e-05, %v8868_v13  ;;  %v8853_v24 = vpop.permute.xlu1 %8852  ;;  %8941 = vperm.xlu0 %12235, %v12328_v49  }
0x3073   : > { %12335 = vrsqrt.f32 %v8923_v39  ;;  %v8869_v43 = vsub.f32 %v16012_v47, %v8853_v24  ;;  %8936 = vperm.xlu1 %12236, %v12330_v44  }
0x3074   : > { %12337 = vrsqrt.f32 %v8924_v3 }
0x3075   : > { %v12332_v25 = vpop.eup %12331  ;;  %12339 = vrsqrt.f32 %v8922_v52  ;;  %v8925_v37 = vadd.f32 1e-05, %v8869_v43 }
0x3076   : > { %8951 = vperm.xlu0 %12235, %v12332_v25  }
0x3077   : > { %12341 = vrsqrt.f32 %v8925_v37 }
0x3079   : > { %v12334_v2 = vpop.eup %12333 }
0x307a   : > { %8946 = vperm.xlu1 %12236, %v12334_v2  }
0x307d   : > { %v12336_v23 = vpop.eup %12335 }
0x307e   : > { %v12338_v4 = vpop.eup %12337  ;;  %8961 = vperm.xlu1 %12236, %v12336_v23  }
0x307f   : > { %8966 = vperm.xlu0 %12235, %v12338_v4   ;;  %v12340_v62 = vpop.eup %12339 }
0x3080   : > { %v8984_v11 = vpop.permute.xlu0 %8983 }
0x3081   : > { %v12342_v42 = vpop.eup %12341 }
0x3082   : > { %8956 = vperm.xlu1 %12236, %v12340_v62  }
0x3083   : > { %12237 = vset.pattern.permute.xlu0 %v12640_v48  ;;  %v8878_v22 = vpop.permute.xlu1 %8877 }
0x3084   : > { %9047 = vperm.xlu0 %12237, %v16455_v12   ;;  %v8996_v9 = vpop.permute.xlu0 %8995  ;;  %v8911_v40 = vsub.f32 %v16424_v56, %v8878_v22 }
0x3086   : > { %8971 = vperm.xlu1 %12236, %v12342_v42  }
0x3087   : > { %v8883_v1 = vpop.permute.xlu1 %8882 }
0x3088   : > { %12319 = vset.pattern.permute.xlu0 %v16440_v54  ;;  %v8912_v50 = vsub.f32 %v16425_v7, %v8883_v1 }
0x3089   : > { %v8873_v26 = vpop.permute.xlu0 %8872 }
0x308a   : > { %12238 = vset.pattern.permute.xlu1 %v12640_v48  ;;  %v8910_v55 = vsub.f32 %v16423_v41, %v8873_v26 }
0x308b   : > { %9051 = vperm.xlu1 %12238, %v16456_v61   ;;  %v8888_v27 = vpop.permute.xlu1 %8887 }
0x308c   : > { %v8913_v28 = vsub.f32 %v16426_v46, %v8888_v27 }
0x308d   : > { %v8893_v15 = vpop.permute.xlu0 %8892 }
0x308e   : > { %v8914_v37 = vsub.f32 %v16427_v53, %v8893_v15 }
0x308f   : > { %12320 = vset.pattern.permute.xlu1 %v16440_v54 }
0x3090   : > { %v8988_v31 = vpop.permute.xlu1 %8987 }
0x3091   : > { %v8908_v36 = vpop.permute.xlu0 %8907 }
0x3095   : > { %v9024_v17 = vpop.permute.xlu1 %9023 }
0x3096   : > { %v9032_v30 = vpop.permute.xlu0 %9031 }
0x3099   : > { %v9028_v6 = vpop.permute.xlu1 %9027 }
0x309a   : > { %v9044_v61 = vpop.permute.xlu0 %9043 }
0x309e   : > { %v8898_v18 = vpop.permute.xlu1 %8897 }
0x309f   : > { %v8915_v49 = vsub.f32 %v16428_v5, %v8898_v18 }
0x30a3   : > { %v8992_v47 = vpop.permute.xlu1 %8991 }
0x30a8   : > { %v9036_v45 = vpop.permute.xlu1 %9035 }
0x30ad   : > { %v8903_v57 = vpop.permute.xlu1 %8902 }
0x30ae   : > { %v8916_v3 = vsub.f32 %v16429_v33, %v8903_v57 }
0x30b2   : > { %v9000_v0 = vpop.permute.xlu1 %8999 }
0x30b6   : > { %v9004_v48 = vpop.permute.xlu1 %9003 }
0x30bb   : > { %v9040_v16 = vpop.permute.xlu1 %9039 }
0x30c0   : > { %v9008_v12 = vpop.permute.xlu1 %9007 }
0x30c4   : > { %v9012_v63 = vpop.permute.xlu1 %9011 }
0x30f1   : > { %v8942_v60 = vpop.permute.xlu0 %8941 }
0x30f2   : > { %v8975_v21 = vmul.f32 %v8942_v60, %v8911_v40  ;;  %v8937_v8 = vpop.permute.xlu1 %8936 }
0x30f3   : > { %v8974_v32 = vmul.f32 %v8937_v8, %v8910_v55 }
0x30f4   : > { %v9015_v29 = vmul.f32 %v8988_v31, %v8975_v21 }
0x30f5   : > { %v9014_v59 = vmul.f32 %v8984_v11, %v8974_v32  ;;  %v8952_v34 = vpop.permute.xlu0 %8951 }
0x30f6   : > { %v16068_v19 = vadd.f32 %v9028_v6, %v9015_v29  ;;  %v8977_v20 = vmul.f32 %v8952_v34, %v8913_v28  ;;  %v8917_v6 = vsub.f32 %v16430_v58, %v8908_v36 }
0x30f7   : > { %v16070_v51 = vadd.f32 %v9024_v17, %v9014_v59 }
0x30f8   : > { %v10002_v56 = vmul.f32 -1.442695, %v16068_v19  ;;  %v9017_v10 = vmul.f32 %v8996_v9, %v8977_v20 }
0x30f9   : > { %v10001_v41 = vmul.f32 -1.442695, %v16070_v51  ;;  %v8947_v38 = vpop.permute.xlu1 %8946 }
0x30fa   : > { %12343 = vpow2.f32 %v10002_v56  ;;  %v16075_v13 = vadd.f32 %v9036_v45, %v9017_v10  ;;  %v8976_v46 = vmul.f32 %v8947_v38, %v8912_v50 }
0x30fb   : > { %12345 = vpow2.f32 %v10001_v41 }
0x30fc   : > { %v10004_v39 = vmul.f32 -1.442695, %v16075_v13  ;;  %v9016_v44 = vmul.f32 %v8992_v47, %v8976_v46 }
0x30fd   : > { %v8962_v24 = vpop.permute.xlu1 %8961 }
0x30fe   : > { %12347 = vpow2.f32 %v10004_v39  ;;  %v9056_v7 = vadd.f32 %v9032_v30, %v9016_v44  ;;  %v8979_v52 = vmul.f32 %v8962_v24, %v8915_v49  ;;  %v8967_v43 = vpop.permute.xlu0 %8966 }
0x30ff   : > { %v8980_v25 = vmul.f32 %v8967_v43, %v8916_v3 }
0x3100   : > { %v10003_v2 = vmul.f32 -1.442695, %v9056_v7  ;;  %v9019_v23 = vmul.f32 %v9004_v48, %v8979_v52 }
0x3101   : > { %v8957_v4 = vpop.permute.xlu1 %8956  ;;  %v9020_v62 = vmul.f32 %v9008_v12, %v8980_v25 }
0x3102   : > { %12349 = vpow2.f32 %v10003_v2  ;;  %v9059_v42 = vadd.f32 %v9044_v61, %v9019_v23  ;;  %v8978_v5 = vmul.f32 %v8957_v4, %v8914_v37 }
0x3103   : > { %v9048_v22 = vpop.permute.xlu0 %9047 }
0x3104   : > { %v12344_v1 = vpop.eup %12343  ;;  %v10006_v27 = vmul.f32 -1.442695, %v9059_v42  ;;  %v9018_v31 = vmul.f32 %v9000_v0, %v8978_v5  ;;  %v9060_v33 = vadd.f32 %v9048_v22, %v9020_v62 }
0x3105   : > { %v12346_v17 = vpop.eup %12345  ;;  %v9087_v18 = vadd.f32 1.0, %v12344_v1  ;;  %v8972_v47 = vpop.permute.xlu1 %8971 }
0x3106   : > { %v9086_v11 = vadd.f32 1.0, %v12346_v17  ;;  %12351 = vpow2.f32 %v10006_v27  ;;  %v9058_v53 = vadd.f32 %v9040_v16, %v9018_v31  ;;  %v10007_v45 = vmul.f32 -1.442695, %v9060_v33 }
0x3107   : > { %12353 = vrcp.f32 %v9087_v18  ;;  %v8981_v9 = vmul.f32 %v8972_v47, %v8917_v6 }
0x3108   : > { %v12348_v57 = vpop.eup %12347  ;;  %12355 = vrcp.f32 %v9086_v11  ;;  %v10005_v26 = vmul.f32 -1.442695, %v9058_v53 }
0x3109   : > { %v9089_v15 = vadd.f32 1.0, %v12348_v57  ;;  %12357 = vpow2.f32 %v10007_v45  ;;  %v9021_v48 = vmul.f32 %v9012_v63, %v8981_v9 }
0x310a   : > { %12359 = vpow2.f32 %v10005_v26  ;;  %v9052_v0 = vpop.permute.xlu1 %9051 }
0x310b   : > { %v9061_v30 = vadd.f32 %v9052_v0, %v9021_v48  ;;  %12361 = vrcp.f32 %v9089_v15 }
0x310c   : > { %v12350_v12 = vpop.eup %12349 }
0x310d   : > { %v9088_v58 = vadd.f32 1.0, %v12350_v12  ;;  %v10008_v36 = vmul.f32 -1.442695, %v9061_v30 }
0x310f   : > { %12363 = vrcp.f32 %v9088_v58 }
0x3110   : > { %v12352_v61 = vpop.eup %12351  ;;  %12365 = vpow2.f32 %v10008_v36 }
0x3111   : > { %v12354_v16 = vpop.eup %12353  ;;  %v9091_v40 = vadd.f32 1.0, %v12352_v61 }
0x3112   : > { %v12356_v55 = vpop.eup %12355  ;;  %v16083_v60 = vmul.f32 %v12354_v16, %v16068_v19 }
0x3113   : > { %v12358_v21 = vpop.eup %12357  ;;  %v16086_v8 = vmul.f32 %v12356_v55, %v16070_v51  ;;  %12367 = vrcp.f32 %v9091_v40 }
0x3114   : > { %v12360_v63 = vpop.eup %12359  ;;  %v9092_v59 = vadd.f32 1.0, %v12358_v21 }
0x3115   : > { %v9090_v32 = vadd.f32 1.0, %v12360_v63  ;;  %v12239_v28 = vpack.i.bf16 %v16083_v60, %v16086_v8  ;;  %v12362_v29 = vpop.eup %12361 }
0x3116   : > { %v16092_v19 = vmul.f32 %v12362_v29, %v16075_v13 }
0x3117   : > { %12369 = vrcp.f32 %v9090_v32  ;;  %12240 = vrot.lane.b32.xlu0 %v12239_v28, %s12611_s0 }
0x3118   : > { %12371 = vrcp.f32 %v9092_v59 }
0x3119   : > { %v12364_v34 = vpop.eup %12363 }
0x311a   : > { %v12366_v20 = vpop.eup %12365  ;;  %v16094_v50 = vmul.f32 %v12364_v34, %v9056_v7 }
0x311b   : > { %v9093_v51 = vadd.f32 1.0, %v12366_v20 }
0x311c   : > { %v12244_v56 = vpack.i.bf16 %v16092_v19, %v16094_v50 }
0x311d   : > { %12373 = vrcp.f32 %v9093_v51  ;;  %v12368_v10 = vpop.eup %12367 }
0x311e   : > { %12245 = vrot.lane.b32.xlu1 %v12244_v56, %s12611_s0  ;;  %v16099_v38 = vmul.f32 %v12368_v10, %v9059_v42 }
0x3121   : > { %v12370_v41 = vpop.eup %12369 }
0x3122   : > { %v16101_v46 = vmul.f32 %v12370_v41, %v9058_v53  ;;  %v12372_v49 = vpop.eup %12371  ;;  %v12323_v41 = vld [vmem:[%s16242_s13 + $0x4] ss:$8 sps:$4 sm:$0xff]  }
0x3123   : > { %v16106_v44 = vmul.f32 %v12372_v49, %v9060_v33  ;;  %10053 = vmatprep.mubr.msk.bf16.mxu1 %vm713_vm1, %v12323_v41  ;;  %v9123_v49 = vld [vmem:[%s16457_s27 + $0x8] sm:$0xff] }
0x3124   : > { %v12249_v13 = vpack.i.bf16 %v16099_v38, %v16101_v46 }
0x3126   : > { %12250 = vrot.lane.b32.xlu0 %v12249_v13, %s12611_s0  ;;  %v9122_v13 = vld [vmem:[%s16457_s27] sm:$0xff] }
0x3127   : > { %v12374_v39 = vpop.eup %12373 }
0x3128   : > { %v16108_v3 = vmul.f32 %v12374_v39, %v9061_v30  ;;  %v9124_v39 = vld [vmem:[%s16457_s27 + $0x10] sm:$0xff] }
0x312a   : > { %v12254_v24 = vpack.i.bf16 %v16108_v3, %v16106_v44 }
0x312c   : > { %12255 = vrot.lane.b32.xlu1 %v12254_v24, %s12611_s0  ;;  %v9125_v24 = vld [vmem:[%s16457_s27 + $0x18] sm:$0xff] }
0x3189   : > { %v12241_v7 = vpop.permute.xlu0 %12240 }
0x318a   : > { %v12243_v52 = vunpack.i.h.bf16 %v12241_v7  ;;  %v12242_v43 = vunpack.i.l.bf16 %v12241_v7 }
0x318c   : > { %v9128_v25 = vsel %vm1874_vm3, %v12242_v43, %v16086_v8  ;;  %v9131_v37 = vsel %vm1874_vm3, %v12243_v52, %v16083_v60 }
0x318d   : > { %v12259_v2 = vpack.i.bf16 %v9131_v37, %v9128_v25 }
0x318f   : > { %12260 = vrot.lane.b32.xlu0 %v12259_v2, %s12611_s0 }
0x3190   : > { %v12246_v23 = vpop.permute.xlu1 %12245 }
0x3191   : > { %v12248_v4 = vunpack.i.h.bf16 %v12246_v23  ;;  %v12247_v62 = vunpack.i.l.bf16 %v12246_v23 }
0x3193   : > { %v9134_v42 = vsel %vm1874_vm3, %v12247_v62, %v16094_v50  ;;  %v9137_v5 = vsel %vm1874_vm3, %v12248_v4, %v16092_v19 }
0x3194   : > { %v12264_v22 = vpack.i.bf16 %v9137_v5, %v9134_v42 }
0x3196   : > { %12265 = vrot.lane.b32.xlu1 %v12264_v22, %s12611_s0 }
0x3198   : > { %v12251_v1 = vpop.permute.xlu0 %12250 }
0x3199   : > { %v12253_v27 = vunpack.i.h.bf16 %v12251_v1  ;;  %v12252_v31 = vunpack.i.l.bf16 %v12251_v1 }
0x319b   : > { %v9140_v33 = vsel %vm1874_vm3, %v12252_v31, %v16101_v46  ;;  %v9143_v17 = vsel %vm1874_vm3, %v12253_v27, %v16099_v38 }
0x319c   : > { %v12269_v6 = vpack.i.bf16 %v9143_v17, %v9140_v33  ;;  %v9250_v17 = vpack.c.bf16 %v16083_v60, %v16086_v8 }
0x319e   : > { %v12256_v18 = vpop.permute.xlu1 %12255  ;;  %12270 = vrot.lane.b32.xlu0 %v12269_v6, %s12611_s0  ;;  %v9251_v6 = vpack.c.bf16 %v16092_v19, %v16094_v50 }
0x319f   : > { %v12258_v47 = vunpack.i.h.bf16 %v12256_v18  ;;  %v12257_v11 = vunpack.i.l.bf16 %v12256_v18  ;;  %v9252_v18 = vpack.c.bf16 %v16099_v38, %v16101_v46 }
0x31a1   : > { %v9146_v53 = vsel %vm1874_vm3, %v12257_v11, %v16106_v44  ;;  %v9149_v45 = vsel %vm1874_vm3, %v12258_v47, %v16108_v3 }
0x31a2   : > { %v12274_v9 = vpack.i.bf16 %v9149_v45, %v9146_v53 }
0x31a4   : > { %12275 = vrot.lane.b32.xlu1 %v12274_v9, %s12611_s0 }
0x3201   : > { %v12261_v57 = vpop.permute.xlu0 %12260 }
0x3202   : > { %v12263_v26 = vunpack.i.h.bf16 %v12261_v57  ;;  %v12262_v15 = vunpack.i.l.bf16 %v12261_v57 }
0x3204   : > { %v9166_v48 = vsel %vm1874_vm3, %v12262_v15, %v16086_v8  ;;  %v9167_v0 = vsel %vm1874_vm3, %v12263_v26, %v16083_v60  ;;  %v9253_v60 = vpack.c.bf16 %v16108_v3, %v16106_v44 }
0x3205   : > { %v12279_v30 = vpack.i.bf16 %v9167_v0, %v9166_v48  ;;  %v12321_v48 = vld [vmem:[%s16242_s13] ss:$8 sps:$4 sm:$0xff]   ;;  %v12324_v0 = vld [vmem:[%s16242_s13 + $0x14] ss:$8 sps:$4 sm:$0xff]  }
0x3207   : > { %12280 = vrot.lane.b32.xlu0 %v12279_v30, %s12612_s20 }
0x3208   : > { %v12266_v12 = vpop.permute.xlu1 %12265 }
0x3209   : > { %v12268_v58 = vunpack.i.h.bf16 %v12266_v12  ;;  %v12267_v36 = vunpack.i.l.bf16 %v12266_v12 }
0x320b   : > { %v9168_v61 = vsel %vm1874_vm3, %v12267_v36, %v16094_v50  ;;  %v9169_v16 = vsel %vm1874_vm3, %v12268_v58, %v16092_v19 }
0x320c   : > { %v12284_v40 = vpack.i.bf16 %v9169_v16, %v9168_v61 }
0x320e   : > { %12285 = vrot.lane.b32.xlu1 %v12284_v40, %s12612_s20 }
0x3210   : > { %v12271_v55 = vpop.permute.xlu0 %12270 }
0x3211   : > { %v12273_v21 = vunpack.i.h.bf16 %v12271_v55  ;;  %v12272_v63 = vunpack.i.l.bf16 %v12271_v55 }
0x3213   : > { %v9170_v32 = vsel %vm1874_vm3, %v12272_v63, %v16101_v46  ;;  %v9171_v28 = vsel %vm1874_vm3, %v12273_v21, %v16099_v38 }
0x3214   : > { %v12289_v29 = vpack.i.bf16 %v9171_v28, %v9170_v32 }
0x3216   : > { %v12276_v59 = vpop.permute.xlu1 %12275  ;;  %12290 = vrot.lane.b32.xlu0 %v12289_v29, %s12612_s20 }
0x3217   : > { %v12278_v34 = vunpack.i.h.bf16 %v12276_v59  ;;  %v12277_v20 = vunpack.i.l.bf16 %v12276_v59 }
0x3219   : > { %v9172_v51 = vsel %vm1874_vm3, %v12277_v20, %v16106_v44  ;;  %v9173_v56 = vsel %vm1874_vm3, %v12278_v34, %v16108_v3 }
0x321a   : > { %12300 = vrot.lane.b32.xlu0 %v12279_v30, %s12613_s24  ;;  %v12294_v10 = vpack.i.bf16 %v9173_v56, %v9172_v51 }
0x321c   : > { %12295 = vrot.lane.b32.xlu1 %v12294_v10, %s12612_s20 }
0x321e   : > { %12310 = vrot.lane.b32.xlu0 %v12289_v29, %s12613_s24 }
0x3220   : > { %12305 = vrot.lane.b32.xlu1 %v12284_v40, %s12613_s24 }
0x3222   : > { %9260 = vperm.xlu0 %12319, %v9122_v13  }
0x3224   : > { %12315 = vrot.lane.b32.xlu1 %v12294_v10, %s12613_s24 }
0x3226   : > { %9275 = vperm.xlu0 %12319, %v9125_v24  }
0x3228   : > { %9265 = vperm.xlu1 %12320, %v9123_v49  }
0x322c   : > { %9270 = vperm.xlu1 %12320, %v9124_v39  }
0x3279   : > { %v12281_v7 = vpop.permute.xlu0 %12280 }
0x327a   : > { %v12283_v52 = vunpack.i.h.bf16 %v12281_v7  ;;  %v12282_v43 = vunpack.i.l.bf16 %v12281_v7 }
0x327c   : > { %v10016_v25 = vpack.c.bf16 %v12283_v52, %v12282_v43 }
0x327e   : > { %10017 = vmatpush1.bf16.msk.msra.mxu1 %vm13473_vm5, %v10016_v25 }
0x327f   : > { %9304 = vmatprep.subr.bf16.mxu1 %v16440_v54 }
0x3280   : > { %v12286_v37 = vpop.permute.xlu1 %12285 }
0x3281   : > { %v12288_v2 = vunpack.i.h.bf16 %v12286_v37  ;;  %v12287_v23 = vunpack.i.l.bf16 %v12286_v37 }
0x3283   : > { %v10021_v4 = vpack.c.bf16 %v12288_v2, %v12287_v23 }
0x3285   : > { %10022 = vmatpush1.bf16.msk.msra.mxu1 %vm13473_vm5, %v10021_v4 }
0x3286   : > { %9306 = vmatprep.subr.bf16.mxu1 %v16440_v54 }
0x3288   : > { %v12291_v62 = vpop.permute.xlu0 %12290 }
0x3289   : > { %v12293_v42 = vunpack.i.h.bf16 %v12291_v62  ;;  %v12292_v5 = vunpack.i.l.bf16 %v12291_v62 }
0x328b   : > { %v10026_v22 = vpack.c.bf16 %v12293_v42, %v12292_v5 }
0x328c   : > { %v12301_v47 = vpop.permute.xlu0 %12300 }
0x328d   : > { %10027 = vmatpush1.bf16.msk.msra.mxu1 %vm13473_vm5, %v10026_v22  ;;  %v12303_v35 = vunpack.i.h.bf16 %v12301_v47  ;;  %v12302_v11 = vunpack.i.l.bf16 %v12301_v47 }
0x328e   : > { %v12296_v1 = vpop.permute.xlu1 %12295  ;;  %9308 = vmatprep.subr.bf16.mxu1 %v16440_v54 }
0x328f   : > { %v12298_v27 = vunpack.i.h.bf16 %v12296_v1  ;;  %v12297_v31 = vunpack.i.l.bf16 %v12296_v1  ;;  %v10036_v19 = vpack.c.bf16 %v12303_v35, %v12302_v11 }
0x3290   : > { %v12311_v45 = vpop.permute.xlu0 %12310 }
0x3291   : > { %v10031_v33 = vpack.c.bf16 %v12298_v27, %v12297_v31  ;;  %v12313_v38 = vunpack.i.h.bf16 %v12311_v45  ;;  %v12312_v46 = vunpack.i.l.bf16 %v12311_v45 }
0x3292   : > { %v12306_v8 = vpop.permute.xlu1 %12305 }
0x3293   : > { %10032 = vmatpush1.bf16.msk.msra.mxu1 %vm13473_vm5, %v10031_v33  ;;  %v12308_v50 = vunpack.i.h.bf16 %v12306_v8  ;;  %v12307_v53 = vunpack.i.l.bf16 %v12306_v8  ;;  %v10046_v44 = vpack.c.bf16 %v12313_v38, %v12312_v46 }
0x3294   : > { %9310 = vmatprep.subr.bf16.mxu1 %v16440_v54 }
0x3295   : > { %v10041_v9 = vpack.c.bf16 %v12308_v50, %v12307_v53 }
0x3296   : > { %v12316_v57 = vpop.permute.xlu1 %12315 }
0x3297   : > { %9311 = vmatpush1.bf16.msra.mxu1 %v9250_v17  ;;  %v12318_v3 = vunpack.i.h.bf16 %v12316_v57  ;;  %v12317_v26 = vunpack.i.l.bf16 %v12316_v57 }
0x3298   : > { %9312 = vmatprep.subr.bf16.mxu1 %v16440_v54 }
0x3299   : > { %v10051_v15 = vpack.c.bf16 %v12318_v3, %v12317_v26 }
0x329b   : > { %9313 = vmatpush1.bf16.msra.mxu1 %v9251_v6 }
0x329c   : > { %9314 = vmatprep.subr.bf16.mxu1 %v16440_v54 }
0x329f   : > { %9315 = vmatpush1.bf16.msra.mxu1 %v9252_v18 }
0x32a0   : > { %9316 = vmatprep.subr.bf16.mxu1 %v16440_v54 }
0x32a1   : > { %v9261_v30 = vpop.permute.xlu0 %9260 }
0x32a3   : > { %9317 = vmatpush1.bf16.msra.mxu1 %v9253_v60 }
0x32a4   : > { %9318 = vmatprep.subr.bf16.mxu1 %v16440_v54 }
0x32a5   : > { %v9276_v28 = vpop.permute.xlu0 %9275 }
0x32a7   : > { %10037 = vmatpush1.bf16.msk.msra.mxu1 %vm13501_vm7, %v10036_v19  ;;  %v9266_v58 = vpop.permute.xlu1 %9265 }
0x32a8   : > { %9320 = vmatprep.subr.bf16.mxu1 %v16440_v54 }
0x32ab   : > { %10042 = vmatpush1.bf16.msk.msra.mxu1 %vm13501_vm7, %v10041_v9  ;;  %v9271_v55 = vpop.permute.xlu1 %9270 }
0x32ac   : > { %9322 = vmatprep.subr.bf16.mxu1 %v16440_v54 }
0x32af   : > { %10047 = vmatpush1.bf16.msk.msra.mxu1 %vm13501_vm7, %v10046_v44 }
0x32b0   : > { %9324 = vmatprep.subr.bf16.mxu1 %v16440_v54  ;;  %v12326_v54 = vld [vmem:[%s16242_s13 + $0x10] ss:$8 sps:$4 sm:$0xff]  }
0x32b3   : > { %10052 = vmatpush1.bf16.msk.msra.mxu1 %vm13501_vm7, %v10051_v15 }
0x32b6   : > { %9335 = vmatmul.mubr.bf16.vlgmr.msra.gmra.mrb[0].mxu1 %v12321_v48 }
0x32b7   : > { %10054 = vmatprep.mubr.msk.bf16.mxu1 %vm713_vm1, %v12324_v0 }
0x32be   : > { %9343 = vmatmul.mubr.bf16.gmra.mrb[4].mxu1 %v12326_v54 }
0x3389   : > { %v9336_v12 = vpop.f32.mrb[0].mxu1 }
0x338a   : > { %v9337_v36 = vadd.f32 %v9336_v12, %v9261_v30  ;;  %v9338_v14 = vpop.f32.mrb[1].mxu1 }
0x338b   : > { %v9339_v61 = vpop.f32.mrb[2].mxu1 }
0x338c   : > { %9351 = vst.msk [vmem:[%s12835_s16] sm:$0xff] %vm647_vm0, %v9337_v36  ;;  %v9340_v16 = vadd.f32 %v9339_v61, %v9266_v58  ;;  %v9341_v40 = vpop.f32.mrb[3].mxu1 }
0x338e   : > { %9352 = vst.msk [vmem:[%s12835_s16 + $0x8] sm:$0xff] %vm647_vm0, %v9340_v16 }
0x3391   : > { %v9344_v21 = vpop.f32.mrb[4].mxu1 }
0x3392   : > { %v9345_v63 = vadd.f32 %v9344_v21, %v9271_v55  ;;  %v9346_v32 = vpop.f32.mrb[5].mxu1 }
0x3393   : > { %v9347_v29 = vpop.f32.mrb[6].mxu1 }
0x3394   : > { %9353 = vst.msk [vmem:[%s12835_s16 + $0x10] sm:$0xff] %vm647_vm0, %v9345_v63  ;;  %v9348_v59 = vadd.f32 %v9347_v29, %v9276_v28  ;;  %v9349_v34 = vpop.f32.mrb[7].mxu1 }
0x3396   : > { %9354 = vst.msk [vmem:[%s12835_s16 + $0x18] sm:$0xff] %vm647_vm0, %v9348_v59 }
0x3397 PF: > { %s16458_s21 = sld [smem:[#allocation2_spill]] }
0x339d   : > { %s27_s24 = sadd.s32 1, %s16458_s21  }
0x339e   : > { %p24_p7 = scmp.ge.s32.totalorder %s27_s24, 4  }
0x33a0   :  { %26 = sbr.rel (!%p24_p7) target bundleno = 5 (0x5), region = 200 }

</bundles_post_ra>
